<compile_context>
chip_gen: v6e
topology: v6e:2x2x1
jax: 0.10.0
libtpu: 0.0.40
codegen_flags: <defaults>
</compile_context>

<pallas_src>
import functools
import math

import jax
import jax.numpy as jnp
from jax.experimental import pallas as pl
from jax.experimental.pallas import tpu as pltpu

_LANES = 128
_EPS = 1e-5
_VMEM_LIMIT = 48 * 1024 * 1024  # < 64 MiB physical on v7x, plenty of headroom elsewhere
_COMPILER_PARAMS = pltpu.CompilerParams(
    dimension_semantics=("parallel",),  # independent M tiles -> both TCs on v7x
    vmem_limit_bytes=_VMEM_LIMIT,
)


def _round_up(x, m):
    return ((x + m - 1) // m) * m


def _choose_tm(m, k_dim, c_pad, target=1024, budget=24 * 1024 * 1024):
    """Pick an M-tile: big enough to amortize per-step overhead, small enough
    that the double-buffered VMEM footprint stays under budget."""
    if m <= target:
        return m  # full-extent block (allowed even if not a multiple of 8)
    tm = target
    while tm > 64:
        # 2x (pipeline buffers) * [patches bf16 + weights bf16 + y bf16 + stats f32]
        fp = 2 * (tm * k_dim * 2 + k_dim * c_pad * 2 + tm * c_pad * 2 + 2 * c_pad * 4)
        if fp <= budget:
            break
        tm //= 2
    return tm


# ------------------------------------------------------------------ Pallas kernels

def _matmul_stats_kernel(p_ref, w_ref, y_ref, stats_ref, *, m_total):
    """Conv-as-matmul tile + per-tile partial BatchNorm statistics.

    p_ref:     (tm, K)      bf16 im2col patches tile
    w_ref:     (K,  Cp)     bf16 weights (Cout zero-padded to multiple of 128)
    y_ref:     (tm, Cp)     bf16 pre-BN conv output tile (stats taken from f32 acc)
    stats_ref: (1, 2, Cp)   f32  partials: row0 = sum(y), row1 = sum(y*y)
    """
    y = jnp.dot(p_ref[...], w_ref[...], preferred_element_type=jnp.float32)
    y_ref[...] = y.astype(y_ref.dtype)

    tm = y.shape[0]
    row = pl.program_id(0) * tm + jax.lax.broadcasted_iota(jnp.int32, (tm, 1), 0)
    valid = row < m_total                       # mask garbage rows of the edge tile
    ym = jnp.where(valid, y, 0.0)
    sums = jnp.sum(ym, axis=0, keepdims=True)          # (1, Cp)
    sqs = jnp.sum(ym * ym, axis=0, keepdims=True)       # (1, Cp)
    stats_ref[0, :, :] = jnp.concatenate([sums, sqs], axis=0)


def _bn_lrelu_kernel(y_ref, scale_ref, shift_ref, out_ref):
    """Folded BatchNorm (y*scale + shift) followed by LeakyReLU(0.2); bf16 out."""
    z = y_ref[...].astype(jnp.float32) * scale_ref[...] + shift_ref[...]
    out_ref[...] = jnp.where(z >= 0.0, z, 0.2 * z).astype(out_ref.dtype)


def _matmul_bias_kernel(p_ref, w_ref, b_ref, out_ref):
    """Final block: conv-as-matmul + bias (no BN, no activation); f32 out."""
    out_ref[...] = (
        jnp.dot(p_ref[...], w_ref[...], preferred_element_type=jnp.float32)
        + b_ref[...]
    )


# ------------------------------------------------------------------ JAX glue

def _im2col(x, k, s, p):
    """x: (N, H, W, C) -> (N*Ho*Wo, k*k*C) patches, feature order (kh, kw, C)."""
    n, h, w, c = x.shape
    xp = jnp.pad(x, ((0, 0), (p, p), (p, p), (0, 0)))
    ho = (h + 2 * p - k) // s + 1
    wo = (w + 2 * p - k) // s + 1
    cols = []
    for i in range(k):
        for j in range(k):
            cols.append(xp[:, i:i + s * ho:s, j:j + s * wo:s, :])
    patches = jnp.concatenate(cols, axis=-1)            # (N, Ho, Wo, k*k*C)
    return patches.reshape(n * ho * wo, k * k * c), (n, ho, wo)


def _conv_bn_lrelu(x, layer):
    k, s, p = layer["k"], layer["s"], layer["p"]
    c_out = layer["c_out"]
    w = layer["w"]                                      # (K, Cp) bf16
    c_pad = w.shape[1]
    x = x.astype(jnp.bfloat16)

    if k == 1 and s == 1 and p == 0:
        n, h, wd, c_in = x.shape                        # pointwise conv: pure matmul
        patches, (n, ho, wo) = x.reshape(n * h * wd, c_in), (n, h, wd)
    else:
        patches, (n, ho, wo) = _im2col(x, k, s, p)

    m, kdim = patches.shape
    tm = _choose_tm(m, kdim, c_pad)
    n_tiles = pl.cdiv(m, tm)

    # Sweep 1: tiled matmul + single-pass partial stats (bf16 intermediate out).
    y, part = pl.pallas_call(
        functools.partial(_matmul_stats_kernel, m_total=m),
        out_shape=(
            jax.ShapeDtypeStruct((m, c_pad), jnp.bfloat16),
            jax.ShapeDtypeStruct((n_tiles, 2, c_pad), jnp.float32),
        ),
        grid=(n_tiles,),
        in_specs=[
            pl.BlockSpec((tm, kdim), lambda i: (i, 0)),
            pl.BlockSpec((kdim, c_pad), lambda i: (0, 0)),
        ],
        out_specs=(
            pl.BlockSpec((tm, c_pad), lambda i: (i, 0)),
            pl.BlockSpec((1, 2, c_pad), lambda i: (i, 0, 0)),
        ),
        compiler_params=_COMPILER_PARAMS,
    )(patches, w)

    # Tiny per-channel reduction / BN fold in plain JAX (C values only).
    # Note: conv bias (omitted) would be exactly cancelled by the mean subtraction.
    sum_y = jnp.sum(part[:, 0, :], axis=0)
    sum_y2 = jnp.sum(part[:, 1, :], axis=0)
    mean = sum_y / m
    var = jnp.maximum(sum_y2 / m - mean * mean, 0.0)     # biased var (PyTorch training BN)
    inv_std = jax.lax.rsqrt(var + _EPS)
    scale = (layer["gamma"] * inv_std).reshape(1, c_pad).astype(jnp.float32)
    shift = (layer["beta"] - mean * layer["gamma"] * inv_std) \
        .reshape(1, c_pad).astype(jnp.float32)

    # Sweep 2: normalize + LeakyReLU, bf16 activations for the next layer.
    out = pl.pallas_call(
        _bn_lrelu_kernel,
        out_shape=jax.ShapeDtypeStruct((m, c_pad), jnp.bfloat16),
        grid=(n_tiles,),
        in_specs=[
            pl.BlockSpec((tm, c_pad), lambda i: (i, 0)),
            pl.BlockSpec((1, c_pad), lambda i: (0, 0)),
            pl.BlockSpec((1, c_pad), lambda i: (0, 0)),
        ],
        out_specs=pl.BlockSpec((tm, c_pad), lambda i: (i, 0)),
        compiler_params=_COMPILER_PARAMS,
    )(y, scale, shift)

    return out[:, :c_out].reshape(n, ho, wo, c_out)


def _conv_final(x, layer):
    k, s, p = layer["k"], layer["s"], layer["p"]
    c_out = layer["c_out"]
    w = layer["w"]                                      # (K, Cp) bf16
    c_pad = w.shape[1]
    x = x.astype(jnp.bfloat16)

    patches, (n, ho, wo) = _im2col(x, k, s, p)
    m, kdim = patches.shape
    tm = _choose_tm(m, kdim, c_pad)
    n_tiles = pl.cdiv(m, tm)

    out = pl.pallas_call(
        _matmul_bias_kernel,
        out_shape=jax.ShapeDtypeStruct((m, c_pad), jnp.float32),
        grid=(n_tiles,),
        in_specs=[
            pl.BlockSpec((tm, kdim), lambda i: (i, 0)),
            pl.BlockSpec((kdim, c_pad), lambda i: (0, 0)),
            pl.BlockSpec((1, c_pad), lambda i: (0, 0)),
        ],
        out_specs=pl.BlockSpec((tm, c_pad), lambda i: (i, 0)),
        compiler_params=_COMPILER_PARAMS,
    )(patches, w, layer["b"])
    return out[:, :c_out].reshape(n, ho, wo, c_out)


# ------------------------------------------------------------------ model

def init_critic_params(key, img_channels=3, hidden_dims=8):
    """Deterministic synthetic init mirroring the PyTorch Critic layer shapes.

    Weights are stored as (kh*kw*Cin, Cout_padded) bf16 with Cout zero-padded to
    a multiple of 128 lanes; gamma/beta/bias are padded the same way.
    """
    h = hidden_dims
    # (Cin, Cout, kernel, stride, pad, final_layer)
    cfg = [
        (img_channels, h,      4, 2, 1, False),
        (h,            h * 2,  4, 2, 1, False),
        (h * 2,        h * 4,  4, 2, 1, False),
        (h * 4,        h * 8,  4, 2, 1, False),
        (h * 8,        h * 16, 4, 2, 1, False),
        (h * 16,       h * 32, 1, 1, 0, False),
        (h * 32,       1,      4, 2, 1, True),
    ]
    params = []
    for (cin, cout, k, s, p, final) in cfg:
        key, kw, kb = jax.random.split(key, 3)
        fan_in = cin * k * k
        bound = 1.0 / math.sqrt(fan_in)
        c_pad = _round_up(cout, _LANES)
        w = jax.random.uniform(kw, (k, k, cin, cout), jnp.float32, -bound, bound)
        w = w.reshape(k * k * cin, cout)
        w = jnp.pad(w, ((0, 0), (0, c_pad - cout))).astype(jnp.bfloat16)
        layer = dict(w=w, k=k, s=s, p=p, c_out=cout, final=final)
        if final:
            b = jax.random.uniform(kb, (cout,), jnp.float32, -bound, bound)
            layer["b"] = jnp.pad(b, (0, c_pad - cout)).reshape(1, c_pad)
        else:
            # Conv bias is omitted for BN layers: a per-channel constant is
            # exactly cancelled by the BatchNorm mean subtraction (dead work).
            layer["gamma"] = jnp.pad(jnp.ones((cout,), jnp.float32), (0, c_pad - cout))
            layer["beta"] = jnp.zeros((c_pad,), jnp.float32)
        params.append(layer)
    return params


def critic_forward(img_nchw, params):
    # PyTorch input is NCHW; convert to NHWC for the kernel path.
    x = jnp.transpose(img_nchw, (0, 2, 3, 1))
    for layer in params:
        if layer["final"]:
            x = _conv_final(x, layer)
        else:
            x = _conv_bn_lrelu(x, layer)
    # PyTorch: img_.view(len(img_), -1) flattens NCHW -> (N, C*Ho*Wo)
    n, ho, wo, c = x.shape
    return jnp.transpose(x, (0, 3, 1, 2)).reshape(n, c * ho * wo)


if __name__ == "__main__":
    key = jax.random.PRNGKey(0)
    k_img, k_par = jax.random.split(key)
    # The architecture has six stride-2 k=4 convs, so spatial must be >= 64;
    # hidden_dims is shrunk to 8 to keep the example small.
    img = jax.random.normal(k_img, (2, 3, 64, 64), jnp.float32)   # NCHW like PyTorch
    params = init_critic_params(k_par, img_channels=3, hidden_dims=8)

    fwd = jax.jit(lambda im: critic_forward(im, params))
    out = jax.block_until_ready(fwd(img))
    assert out.shape == (2, 1), out.shape
    assert bool(jnp.all(jnp.isfinite(out)))
    print("KERNEL_OK")
</pallas_src>

<mosaic_0001>
module attributes {stable_mosaic.version = 11 : i64} {
  func.func @_matmul_stats_kernel(%arg0: i32, %arg1: memref<1024x48xbf16, #tpu.memory_space<vmem>>, %arg2: memref<48x128xbf16, #tpu.memory_space<vmem>>, %arg3: memref<1024x128xbf16, #tpu.memory_space<vmem>>, %arg4: memref<1x2x128xf32, #tpu.memory_space<vmem>>) attributes {dimension_semantics = [#tpu.dimension_semantics<parallel>], iteration_bounds = array<i64: 2>, scalar_prefetch = 0 : i64, scratch_operands = 0 : i64, tpu.core_type = #tpu.core_type<tc>, window_params = [{transform_indices = @transform_0, window_bounds = array<i64: 1024, 48>}, {pipeline_mode = #tpu.pipeline_mode<synchronous>, transform_indices = @transform_1, window_bounds = array<i64: 48, 128>}, {transform_indices = @transform_2, window_bounds = array<i64: 1024, 128>}, {transform_indices = @transform_3, window_bounds = array<i64: 1, 2, 128>}]} {
    %c0 = arith.constant 0 : index
    %c0_0 = arith.constant 0 : index
    %0 = vector.load %arg1[%c0, %c0_0] : memref<1024x48xbf16, #tpu.memory_space<vmem>>, vector<1024x48xbf16>
    %c0_1 = arith.constant 0 : index
    %c0_2 = arith.constant 0 : index
    %1 = vector.load %arg2[%c0_1, %c0_2] : memref<48x128xbf16, #tpu.memory_space<vmem>>, vector<48x128xbf16>
    %cst = arith.constant dense<0.000000e+00> : vector<1024x128xf32>
    %2 = tpu.matmul %0, %1, %cst {dimension_numbers = #tpu.dot_dimension_numbers<[1], [0], [0], [1], [0, 0, 1, 1], [], []>} : vector<1024x48xbf16>, vector<48x128xbf16>, vector<1024x128xf32> -> vector<1024x128xf32>
    %3 = arith.truncf %2 : vector<1024x128xf32> to vector<1024x128xbf16>
    %c0_3 = arith.constant 0 : index
    %c0_4 = arith.constant 0 : index
    %4 = vector.load %arg3[%c0_3, %c0_4] : memref<1024x128xbf16, #tpu.memory_space<vmem>>, vector<1024x128xbf16>
    tpu.vector_store %arg3[%c0_3, %c0_4], %3 {strides = array<i32>} : memref<1024x128xbf16, #tpu.memory_space<vmem>>, vector<1024x128xbf16>,
    %c1024_i32 = arith.constant 1024 : i32
    %5 = arith.muli %arg0, %c1024_i32 : i32
    %6 = tpu.iota {dimensions = array<i32: 0>} : vector<1024x1xi32>
    %7 = vector.broadcast %5 : i32 to vector<1024x1xi32>
    %8 = arith.addi %7, %6 : vector<1024x1xi32>
    %c2048_i32 = arith.constant 2048 : i32
    %9 = vector.broadcast %c2048_i32 : i32 to vector<1024x1xi32>
    %10 = arith.cmpi slt, %8, %9 : vector<1024x1xi32>
    %cst_5 = arith.constant 0.000000e+00 : f32
    %11 = vector.shape_cast %10 : vector<1024x1xi1> to vector<1024x1xi1>
    %12 = vector.broadcast %11 : vector<1024x1xi1> to vector<1024x128xi1>
    %13 = vector.broadcast %cst_5 : f32 to vector<1024x128xf32>
    %14 = arith.select %12, %2, %13 : vector<1024x128xi1>, vector<1024x128xf32>
    %cst_6 = arith.constant dense<0.000000e+00> : vector<128xf32>
    %15 = vector.multi_reduction <add>, %14, %cst_6 [0] : vector<1024x128xf32> to vector<128xf32>
    %16 = vector.shape_cast %15 : vector<128xf32> to vector<1x128xf32>
    %17 = arith.mulf %14, %14 : vector<1024x128xf32>
    %cst_7 = arith.constant dense<0.000000e+00> : vector<128xf32>
    %18 = vector.multi_reduction <add>, %17, %cst_7 [0] : vector<1024x128xf32> to vector<128xf32>
    %19 = vector.shape_cast %18 : vector<128xf32> to vector<1x128xf32>
    %20 = tpu.concatenate %16, %19 in 0 : vector<1x128xf32>, vector<1x128xf32> -> vector<2x128xf32>
    %c0_8 = arith.constant 0 : index
    %c0_9 = arith.constant 0 : index
    %c0_10 = arith.constant 0 : index
    %21 = vector.load %arg4[%c0_8, %c0_9, %c0_10] : memref<1x2x128xf32, #tpu.memory_space<vmem>>, vector<1x2x128xf32>
    %22 = vector.shape_cast %21 : vector<1x2x128xf32> to vector<2x128xf32>
    %23 = vector.shape_cast %20 : vector<2x128xf32> to vector<1x2x128xf32>
    tpu.vector_store %arg4[%c0_8, %c0_9, %c0_10], %23 {strides = array<i32>} : memref<1x2x128xf32, #tpu.memory_space<vmem>>, vector<1x2x128xf32>,
    return
  }
  func.func @transform_0(%arg0: i32) -> (i32, i32) {
    %c0_i32 = arith.constant 0 : i32
    %c0_i32_0 = arith.constant 0 : i32
    return %arg0, %c0_i32 : i32, i32
  }
  func.func @transform_1(%arg0: i32) -> (i32, i32) {
    %c0_i32 = arith.constant 0 : i32
    %c0_i32_0 = arith.constant 0 : i32
    %c0_i32_1 = arith.constant 0 : i32
    return %c0_i32, %c0_i32_0 : i32, i32
  }
  func.func @transform_2(%arg0: i32) -> (i32, i32) {
    %c0_i32 = arith.constant 0 : i32
    %c0_i32_0 = arith.constant 0 : i32
    return %arg0, %c0_i32 : i32, i32
  }
  func.func @transform_3(%arg0: i32) -> (i32, i32, i32) {
    %c0_i32 = arith.constant 0 : i32
    %c0_i32_0 = arith.constant 0 : i32
    %c0_i32_1 = arith.constant 0 : i32
    return %arg0, %c0_i32, %c0_i32_0 : i32, i32, i32
  }
}

module attributes {stable_mosaic.version = 11 : i64} {
  func.func @_bn_lrelu_kernel(%arg0: i32, %arg1: memref<1024x128xbf16, #tpu.memory_space<vmem>>, %arg2: memref<1x128xf32, #tpu.memory_space<vmem>>, %arg3: memref<1x128xf32, #tpu.memory_space<vmem>>, %arg4: memref<1024x128xbf16, #tpu.memory_space<vmem>>) attributes {dimension_semantics = [#tpu.dimension_semantics<parallel>], iteration_bounds = array<i64: 2>, scalar_prefetch = 0 : i64, scratch_operands = 0 : i64, tpu.core_type = #tpu.core_type<tc>, window_params = [{transform_indices = @transform_0, window_bounds = array<i64: 1024, 128>}, {pipeline_mode = #tpu.pipeline_mode<synchronous>, transform_indices = @transform_1, window_bounds = array<i64: 1, 128>}, {pipeline_mode = #tpu.pipeline_mode<synchronous>, transform_indices = @transform_2, window_bounds = array<i64: 1, 128>}, {transform_indices = @transform_3, window_bounds = array<i64: 1024, 128>}]} {
    %c0 = arith.constant 0 : index
    %c0_0 = arith.constant 0 : index
    %0 = vector.load %arg1[%c0, %c0_0] : memref<1024x128xbf16, #tpu.memory_space<vmem>>, vector<1024x128xbf16>
    %1 = arith.extf %0 : vector<1024x128xbf16> to vector<1024x128xf32>
    %c0_1 = arith.constant 0 : index
    %c0_2 = arith.constant 0 : index
    %2 = vector.load %arg2[%c0_1, %c0_2] : memref<1x128xf32, #tpu.memory_space<vmem>>, vector<1x128xf32>
    %3 = vector.broadcast %2 : vector<1x128xf32> to vector<1024x128xf32>
    %4 = arith.mulf %1, %3 : vector<1024x128xf32>
    %c0_3 = arith.constant 0 : index
    %c0_4 = arith.constant 0 : index
    %5 = vector.load %arg3[%c0_3, %c0_4] : memref<1x128xf32, #tpu.memory_space<vmem>>, vector<1x128xf32>
    %6 = vector.broadcast %5 : vector<1x128xf32> to vector<1024x128xf32>
    %7 = arith.addf %4, %6 : vector<1024x128xf32>
    %cst = arith.constant 0.000000e+00 : f32
    %8 = vector.broadcast %cst : f32 to vector<1024x128xf32>
    %9 = arith.cmpf oge, %7, %8 : vector<1024x128xf32>
    %cst_5 = arith.constant 2.000000e-01 : f32
    %10 = vector.broadcast %cst_5 : f32 to vector<1024x128xf32>
    %11 = arith.mulf %10, %7 : vector<1024x128xf32>
    %12 = arith.select %9, %7, %11 : vector<1024x128xi1>, vector<1024x128xf32>
    %13 = arith.truncf %12 : vector<1024x128xf32> to vector<1024x128xbf16>
    %c0_6 = arith.constant 0 : index
    %c0_7 = arith.constant 0 : index
    %14 = vector.load %arg4[%c0_6, %c0_7] : memref<1024x128xbf16, #tpu.memory_space<vmem>>, vector<1024x128xbf16>
    tpu.vector_store %arg4[%c0_6, %c0_7], %13 {strides = array<i32>} : memref<1024x128xbf16, #tpu.memory_space<vmem>>, vector<1024x128xbf16>,
    return
  }
  func.func @transform_0(%arg0: i32) -> (i32, i32) {
    %c0_i32 = arith.constant 0 : i32
    %c0_i32_0 = arith.constant 0 : i32
    return %arg0, %c0_i32 : i32, i32
  }
  func.func @transform_1(%arg0: i32) -> (i32, i32) {
    %c0_i32 = arith.constant 0 : i32
    %c0_i32_0 = arith.constant 0 : i32
    %c0_i32_1 = arith.constant 0 : i32
    return %c0_i32, %c0_i32_0 : i32, i32
  }
  func.func @transform_2(%arg0: i32) -> (i32, i32) {
    %c0_i32 = arith.constant 0 : i32
    %c0_i32_0 = arith.constant 0 : i32
    %c0_i32_1 = arith.constant 0 : i32
    return %c0_i32, %c0_i32_0 : i32, i32
  }
  func.func @transform_3(%arg0: i32) -> (i32, i32) {
    %c0_i32 = arith.constant 0 : i32
    %c0_i32_0 = arith.constant 0 : i32
    return %arg0, %c0_i32 : i32, i32
  }
}

module attributes {stable_mosaic.version = 11 : i64} {
  func.func @_matmul_stats_kernel(%arg0: i32, %arg1: memref<512x128xbf16, #tpu.memory_space<vmem>>, %arg2: memref<128x128xbf16, #tpu.memory_space<vmem>>, %arg3: memref<512x128xbf16, #tpu.memory_space<vmem>>, %arg4: memref<1x2x128xf32, #tpu.memory_space<vmem>>) attributes {dimension_semantics = [#tpu.dimension_semantics<parallel>], iteration_bounds = array<i64: 1>, scalar_prefetch = 0 : i64, scratch_operands = 0 : i64, tpu.core_type = #tpu.core_type<tc>, window_params = [{transform_indices = @transform_0, window_bounds = array<i64: 512, 128>}, {pipeline_mode = #tpu.pipeline_mode<synchronous>, transform_indices = @transform_1, window_bounds = array<i64: 128, 128>}, {transform_indices = @transform_2, window_bounds = array<i64: 512, 128>}, {transform_indices = @transform_3, window_bounds = array<i64: 1, 2, 128>}]} {
    %c0 = arith.constant 0 : index
    %c0_0 = arith.constant 0 : index
    %0 = vector.load %arg1[%c0, %c0_0] : memref<512x128xbf16, #tpu.memory_space<vmem>>, vector<512x128xbf16>
    %c0_1 = arith.constant 0 : index
    %c0_2 = arith.constant 0 : index
    %1 = vector.load %arg2[%c0_1, %c0_2] : memref<128x128xbf16, #tpu.memory_space<vmem>>, vector<128x128xbf16>
    %cst = arith.constant dense<0.000000e+00> : vector<512x128xf32>
    %2 = tpu.matmul %0, %1, %cst {dimension_numbers = #tpu.dot_dimension_numbers<[1], [0], [0], [1], [0, 0, 1, 1], [], []>} : vector<512x128xbf16>, vector<128x128xbf16>, vector<512x128xf32> -> vector<512x128xf32>
    %3 = arith.truncf %2 : vector<512x128xf32> to vector<512x128xbf16>
    %c0_3 = arith.constant 0 : index
    %c0_4 = arith.constant 0 : index
    %4 = vector.load %arg3[%c0_3, %c0_4] : memref<512x128xbf16, #tpu.memory_space<vmem>>, vector<512x128xbf16>
    tpu.vector_store %arg3[%c0_3, %c0_4], %3 {strides = array<i32>} : memref<512x128xbf16, #tpu.memory_space<vmem>>, vector<512x128xbf16>,
    %c512_i32 = arith.constant 512 : i32
    %5 = arith.muli %arg0, %c512_i32 : i32
    %6 = tpu.iota {dimensions = array<i32: 0>} : vector<512x1xi32>
    %7 = vector.broadcast %5 : i32 to vector<512x1xi32>
    %8 = arith.addi %7, %6 : vector<512x1xi32>
    %c512_i32_5 = arith.constant 512 : i32
    %9 = vector.broadcast %c512_i32_5 : i32 to vector<512x1xi32>
    %10 = arith.cmpi slt, %8, %9 : vector<512x1xi32>
    %cst_6 = arith.constant 0.000000e+00 : f32
    %11 = vector.shape_cast %10 : vector<512x1xi1> to vector<512x1xi1>
    %12 = vector.broadcast %11 : vector<512x1xi1> to vector<512x128xi1>
    %13 = vector.broadcast %cst_6 : f32 to vector<512x128xf32>
    %14 = arith.select %12, %2, %13 : vector<512x128xi1>, vector<512x128xf32>
    %cst_7 = arith.constant dense<0.000000e+00> : vector<128xf32>
    %15 = vector.multi_reduction <add>, %14, %cst_7 [0] : vector<512x128xf32> to vector<128xf32>
    %16 = vector.shape_cast %15 : vector<128xf32> to vector<1x128xf32>
    %17 = arith.mulf %14, %14 : vector<512x128xf32>
    %cst_8 = arith.constant dense<0.000000e+00> : vector<128xf32>
    %18 = vector.multi_reduction <add>, %17, %cst_8 [0] : vector<512x128xf32> to vector<128xf32>
    %19 = vector.shape_cast %18 : vector<128xf32> to vector<1x128xf32>
    %20 = tpu.concatenate %16, %19 in 0 : vector<1x128xf32>, vector<1x128xf32> -> vector<2x128xf32>
    %c0_9 = arith.constant 0 : index
    %c0_10 = arith.constant 0 : index
    %c0_11 = arith.constant 0 : index
    %21 = vector.load %arg4[%c0_9, %c0_10, %c0_11] : memref<1x2x128xf32, #tpu.memory_space<vmem>>, vector<1x2x128xf32>
    %22 = vector.shape_cast %21 : vector<1x2x128xf32> to vector<2x128xf32>
    %23 = vector.shape_cast %20 : vector<2x128xf32> to vector<1x2x128xf32>
    tpu.vector_store %arg4[%c0_9, %c0_10, %c0_11], %23 {strides = array<i32>} : memref<1x2x128xf32, #tpu.memory_space<vmem>>, vector<1x2x128xf32>,
    return
  }
  func.func @transform_0(%arg0: i32) -> (i32, i32) {
    %c0_i32 = arith.constant 0 : i32
    %c0_i32_0 = arith.constant 0 : i32
    return %arg0, %c0_i32 : i32, i32
  }
  func.func @transform_1(%arg0: i32) -> (i32, i32) {
    %c0_i32 = arith.constant 0 : i32
    %c0_i32_0 = arith.constant 0 : i32
    %c0_i32_1 = arith.constant 0 : i32
    return %c0_i32, %c0_i32_0 : i32, i32
  }
  func.func @transform_2(%arg0: i32) -> (i32, i32) {
    %c0_i32 = arith.constant 0 : i32
    %c0_i32_0 = arith.constant 0 : i32
    return %arg0, %c0_i32 : i32, i32
  }
  func.func @transform_3(%arg0: i32) -> (i32, i32, i32) {
    %c0_i32 = arith.constant 0 : i32
    %c0_i32_0 = arith.constant 0 : i32
    %c0_i32_1 = arith.constant 0 : i32
    return %arg0, %c0_i32, %c0_i32_0 : i32, i32, i32
  }
}

module attributes {stable_mosaic.version = 11 : i64} {
  func.func @_bn_lrelu_kernel(%arg0: i32, %arg1: memref<512x128xbf16, #tpu.memory_space<vmem>>, %arg2: memref<1x128xf32, #tpu.memory_space<vmem>>, %arg3: memref<1x128xf32, #tpu.memory_space<vmem>>, %arg4: memref<512x128xbf16, #tpu.memory_space<vmem>>) attributes {dimension_semantics = [#tpu.dimension_semantics<parallel>], iteration_bounds = array<i64: 1>, scalar_prefetch = 0 : i64, scratch_operands = 0 : i64, tpu.core_type = #tpu.core_type<tc>, window_params = [{transform_indices = @transform_0, window_bounds = array<i64: 512, 128>}, {pipeline_mode = #tpu.pipeline_mode<synchronous>, transform_indices = @transform_1, window_bounds = array<i64: 1, 128>}, {pipeline_mode = #tpu.pipeline_mode<synchronous>, transform_indices = @transform_2, window_bounds = array<i64: 1, 128>}, {transform_indices = @transform_3, window_bounds = array<i64: 512, 128>}]} {
    %c0 = arith.constant 0 : index
    %c0_0 = arith.constant 0 : index
    %0 = vector.load %arg1[%c0, %c0_0] : memref<512x128xbf16, #tpu.memory_space<vmem>>, vector<512x128xbf16>
    %1 = arith.extf %0 : vector<512x128xbf16> to vector<512x128xf32>
    %c0_1 = arith.constant 0 : index
    %c0_2 = arith.constant 0 : index
    %2 = vector.load %arg2[%c0_1, %c0_2] : memref<1x128xf32, #tpu.memory_space<vmem>>, vector<1x128xf32>
    %3 = vector.broadcast %2 : vector<1x128xf32> to vector<512x128xf32>
    %4 = arith.mulf %1, %3 : vector<512x128xf32>
    %c0_3 = arith.constant 0 : index
    %c0_4 = arith.constant 0 : index
    %5 = vector.load %arg3[%c0_3, %c0_4] : memref<1x128xf32, #tpu.memory_space<vmem>>, vector<1x128xf32>
    %6 = vector.broadcast %5 : vector<1x128xf32> to vector<512x128xf32>
    %7 = arith.addf %4, %6 : vector<512x128xf32>
    %cst = arith.constant 0.000000e+00 : f32
    %8 = vector.broadcast %cst : f32 to vector<512x128xf32>
    %9 = arith.cmpf oge, %7, %8 : vector<512x128xf32>
    %cst_5 = arith.constant 2.000000e-01 : f32
    %10 = vector.broadcast %cst_5 : f32 to vector<512x128xf32>
    %11 = arith.mulf %10, %7 : vector<512x128xf32>
    %12 = arith.select %9, %7, %11 : vector<512x128xi1>, vector<512x128xf32>
    %13 = arith.truncf %12 : vector<512x128xf32> to vector<512x128xbf16>
    %c0_6 = arith.constant 0 : index
    %c0_7 = arith.constant 0 : index
    %14 = vector.load %arg4[%c0_6, %c0_7] : memref<512x128xbf16, #tpu.memory_space<vmem>>, vector<512x128xbf16>
    tpu.vector_store %arg4[%c0_6, %c0_7], %13 {strides = array<i32>} : memref<512x128xbf16, #tpu.memory_space<vmem>>, vector<512x128xbf16>,
    return
  }
  func.func @transform_0(%arg0: i32) -> (i32, i32) {
    %c0_i32 = arith.constant 0 : i32
    %c0_i32_0 = arith.constant 0 : i32
    return %arg0, %c0_i32 : i32, i32
  }
  func.func @transform_1(%arg0: i32) -> (i32, i32) {
    %c0_i32 = arith.constant 0 : i32
    %c0_i32_0 = arith.constant 0 : i32
    %c0_i32_1 = arith.constant 0 : i32
    return %c0_i32, %c0_i32_0 : i32, i32
  }
  func.func @transform_2(%arg0: i32) -> (i32, i32) {
    %c0_i32 = arith.constant 0 : i32
    %c0_i32_0 = arith.constant 0 : i32
    %c0_i32_1 = arith.constant 0 : i32
    return %c0_i32, %c0_i32_0 : i32, i32
  }
  func.func @transform_3(%arg0: i32) -> (i32, i32) {
    %c0_i32 = arith.constant 0 : i32
    %c0_i32_0 = arith.constant 0 : i32
    return %arg0, %c0_i32 : i32, i32
  }
}

module attributes {stable_mosaic.version = 11 : i64} {
  func.func @_matmul_stats_kernel(%arg0: i32, %arg1: memref<128x256xbf16, #tpu.memory_space<vmem>>, %arg2: memref<256x128xbf16, #tpu.memory_space<vmem>>, %arg3: memref<128x128xbf16, #tpu.memory_space<vmem>>, %arg4: memref<1x2x128xf32, #tpu.memory_space<vmem>>) attributes {dimension_semantics = [#tpu.dimension_semantics<parallel>], iteration_bounds = array<i64: 1>, scalar_prefetch = 0 : i64, scratch_operands = 0 : i64, tpu.core_type = #tpu.core_type<tc>, window_params = [{transform_indices = @transform_0, window_bounds = array<i64: 128, 256>}, {pipeline_mode = #tpu.pipeline_mode<synchronous>, transform_indices = @transform_1, window_bounds = array<i64: 256, 128>}, {transform_indices = @transform_2, window_bounds = array<i64: 128, 128>}, {transform_indices = @transform_3, window_bounds = array<i64: 1, 2, 128>}]} {
    %c0 = arith.constant 0 : index
    %c0_0 = arith.constant 0 : index
    %0 = vector.load %arg1[%c0, %c0_0] : memref<128x256xbf16, #tpu.memory_space<vmem>>, vector<128x256xbf16>
    %c0_1 = arith.constant 0 : index
    %c0_2 = arith.constant 0 : index
    %1 = vector.load %arg2[%c0_1, %c0_2] : memref<256x128xbf16, #tpu.memory_space<vmem>>, vector<256x128xbf16>
    %cst = arith.constant dense<0.000000e+00> : vector<128x128xf32>
    %2 = tpu.matmul %0, %1, %cst {dimension_numbers = #tpu.dot_dimension_numbers<[1], [0], [0], [1], [0, 0, 1, 1], [], []>} : vector<128x256xbf16>, vector<256x128xbf16>, vector<128x128xf32> -> vector<128x128xf32>
    %3 = arith.truncf %2 : vector<128x128xf32> to vector<128x128xbf16>
    %c0_3 = arith.constant 0 : index
    %c0_4 = arith.constant 0 : index
    %4 = vector.load %arg3[%c0_3, %c0_4] : memref<128x128xbf16, #tpu.memory_space<vmem>>, vector<128x128xbf16>
    tpu.vector_store %arg3[%c0_3, %c0_4], %3 {strides = array<i32>} : memref<128x128xbf16, #tpu.memory_space<vmem>>, vector<128x128xbf16>,
    %c128_i32 = arith.constant 128 : i32
    %5 = arith.muli %arg0, %c128_i32 : i32
    %6 = tpu.iota {dimensions = array<i32: 0>} : vector<128x1xi32>
    %7 = vector.broadcast %5 : i32 to vector<128x1xi32>
    %8 = arith.addi %7, %6 : vector<128x1xi32>
    %c128_i32_5 = arith.constant 128 : i32
    %9 = vector.broadcast %c128_i32_5 : i32 to vector<128x1xi32>
    %10 = arith.cmpi slt, %8, %9 : vector<128x1xi32>
    %cst_6 = arith.constant 0.000000e+00 : f32
    %11 = vector.shape_cast %10 : vector<128x1xi1> to vector<128x1xi1>
    %12 = vector.broadcast %11 : vector<128x1xi1> to vector<128x128xi1>
    %13 = vector.broadcast %cst_6 : f32 to vector<128x128xf32>
    %14 = arith.select %12, %2, %13 : vector<128x128xi1>, vector<128x128xf32>
    %cst_7 = arith.constant dense<0.000000e+00> : vector<128xf32>
    %15 = vector.multi_reduction <add>, %14, %cst_7 [0] : vector<128x128xf32> to vector<128xf32>
    %16 = vector.shape_cast %15 : vector<128xf32> to vector<1x128xf32>
    %17 = arith.mulf %14, %14 : vector<128x128xf32>
    %cst_8 = arith.constant dense<0.000000e+00> : vector<128xf32>
    %18 = vector.multi_reduction <add>, %17, %cst_8 [0] : vector<128x128xf32> to vector<128xf32>
    %19 = vector.shape_cast %18 : vector<128xf32> to vector<1x128xf32>
    %20 = tpu.concatenate %16, %19 in 0 : vector<1x128xf32>, vector<1x128xf32> -> vector<2x128xf32>
    %c0_9 = arith.constant 0 : index
    %c0_10 = arith.constant 0 : index
    %c0_11 = arith.constant 0 : index
    %21 = vector.load %arg4[%c0_9, %c0_10, %c0_11] : memref<1x2x128xf32, #tpu.memory_space<vmem>>, vector<1x2x128xf32>
    %22 = vector.shape_cast %21 : vector<1x2x128xf32> to vector<2x128xf32>
    %23 = vector.shape_cast %20 : vector<2x128xf32> to vector<1x2x128xf32>
    tpu.vector_store %arg4[%c0_9, %c0_10, %c0_11], %23 {strides = array<i32>} : memref<1x2x128xf32, #tpu.memory_space<vmem>>, vector<1x2x128xf32>,
    return
  }
  func.func @transform_0(%arg0: i32) -> (i32, i32) {
    %c0_i32 = arith.constant 0 : i32
    %c0_i32_0 = arith.constant 0 : i32
    return %arg0, %c0_i32 : i32, i32
  }
  func.func @transform_1(%arg0: i32) -> (i32, i32) {
    %c0_i32 = arith.constant 0 : i32
    %c0_i32_0 = arith.constant 0 : i32
    %c0_i32_1 = arith.constant 0 : i32
    return %c0_i32, %c0_i32_0 : i32, i32
  }
  func.func @transform_2(%arg0: i32) -> (i32, i32) {
    %c0_i32 = arith.constant 0 : i32
    %c0_i32_0 = arith.constant 0 : i32
    return %arg0, %c0_i32 : i32, i32
  }
  func.func @transform_3(%arg0: i32) -> (i32, i32, i32) {
    %c0_i32 = arith.constant 0 : i32
    %c0_i32_0 = arith.constant 0 : i32
    %c0_i32_1 = arith.constant 0 : i32
    return %arg0, %c0_i32, %c0_i32_0 : i32, i32, i32
  }
}

module attributes {stable_mosaic.version = 11 : i64} {
  func.func @_bn_lrelu_kernel(%arg0: i32, %arg1: memref<128x128xbf16, #tpu.memory_space<vmem>>, %arg2: memref<1x128xf32, #tpu.memory_space<vmem>>, %arg3: memref<1x128xf32, #tpu.memory_space<vmem>>, %arg4: memref<128x128xbf16, #tpu.memory_space<vmem>>) attributes {dimension_semantics = [#tpu.dimension_semantics<parallel>], iteration_bounds = array<i64: 1>, scalar_prefetch = 0 : i64, scratch_operands = 0 : i64, tpu.core_type = #tpu.core_type<tc>, window_params = [{transform_indices = @transform_0, window_bounds = array<i64: 128, 128>}, {pipeline_mode = #tpu.pipeline_mode<synchronous>, transform_indices = @transform_1, window_bounds = array<i64: 1, 128>}, {pipeline_mode = #tpu.pipeline_mode<synchronous>, transform_indices = @transform_2, window_bounds = array<i64: 1, 128>}, {transform_indices = @transform_3, window_bounds = array<i64: 128, 128>}]} {
    %c0 = arith.constant 0 : index
    %c0_0 = arith.constant 0 : index
    %0 = vector.load %arg1[%c0, %c0_0] : memref<128x128xbf16, #tpu.memory_space<vmem>>, vector<128x128xbf16>
    %1 = arith.extf %0 : vector<128x128xbf16> to vector<128x128xf32>
    %c0_1 = arith.constant 0 : index
    %c0_2 = arith.constant 0 : index
    %2 = vector.load %arg2[%c0_1, %c0_2] : memref<1x128xf32, #tpu.memory_space<vmem>>, vector<1x128xf32>
    %3 = vector.broadcast %2 : vector<1x128xf32> to vector<128x128xf32>
    %4 = arith.mulf %1, %3 : vector<128x128xf32>
    %c0_3 = arith.constant 0 : index
    %c0_4 = arith.constant 0 : index
    %5 = vector.load %arg3[%c0_3, %c0_4] : memref<1x128xf32, #tpu.memory_space<vmem>>, vector<1x128xf32>
    %6 = vector.broadcast %5 : vector<1x128xf32> to vector<128x128xf32>
    %7 = arith.addf %4, %6 : vector<128x128xf32>
    %cst = arith.constant 0.000000e+00 : f32
    %8 = vector.broadcast %cst : f32 to vector<128x128xf32>
    %9 = arith.cmpf oge, %7, %8 : vector<128x128xf32>
    %cst_5 = arith.constant 2.000000e-01 : f32
    %10 = vector.broadcast %cst_5 : f32 to vector<128x128xf32>
    %11 = arith.mulf %10, %7 : vector<128x128xf32>
    %12 = arith.select %9, %7, %11 : vector<128x128xi1>, vector<128x128xf32>
    %13 = arith.truncf %12 : vector<128x128xf32> to vector<128x128xbf16>
    %c0_6 = arith.constant 0 : index
    %c0_7 = arith.constant 0 : index
    %14 = vector.load %arg4[%c0_6, %c0_7] : memref<128x128xbf16, #tpu.memory_space<vmem>>, vector<128x128xbf16>
    tpu.vector_store %arg4[%c0_6, %c0_7], %13 {strides = array<i32>} : memref<128x128xbf16, #tpu.memory_space<vmem>>, vector<128x128xbf16>,
    return
  }
  func.func @transform_0(%arg0: i32) -> (i32, i32) {
    %c0_i32 = arith.constant 0 : i32
    %c0_i32_0 = arith.constant 0 : i32
    return %arg0, %c0_i32 : i32, i32
  }
  func.func @transform_1(%arg0: i32) -> (i32, i32) {
    %c0_i32 = arith.constant 0 : i32
    %c0_i32_0 = arith.constant 0 : i32
    %c0_i32_1 = arith.constant 0 : i32
    return %c0_i32, %c0_i32_0 : i32, i32
  }
  func.func @transform_2(%arg0: i32) -> (i32, i32) {
    %c0_i32 = arith.constant 0 : i32
    %c0_i32_0 = arith.constant 0 : i32
    %c0_i32_1 = arith.constant 0 : i32
    return %c0_i32, %c0_i32_0 : i32, i32
  }
  func.func @transform_3(%arg0: i32) -> (i32, i32) {
    %c0_i32 = arith.constant 0 : i32
    %c0_i32_0 = arith.constant 0 : i32
    return %arg0, %c0_i32 : i32, i32
  }
}

module attributes {stable_mosaic.version = 11 : i64} {
  func.func @_matmul_stats_kernel(%arg0: i32, %arg1: memref<32x512xbf16, #tpu.memory_space<vmem>>, %arg2: memref<512x128xbf16, #tpu.memory_space<vmem>>, %arg3: memref<32x128xbf16, #tpu.memory_space<vmem>>, %arg4: memref<1x2x128xf32, #tpu.memory_space<vmem>>) attributes {dimension_semantics = [#tpu.dimension_semantics<parallel>], iteration_bounds = array<i64: 1>, scalar_prefetch = 0 : i64, scratch_operands = 0 : i64, tpu.core_type = #tpu.core_type<tc>, window_params = [{transform_indices = @transform_0, window_bounds = array<i64: 32, 512>}, {pipeline_mode = #tpu.pipeline_mode<synchronous>, transform_indices = @transform_1, window_bounds = array<i64: 512, 128>}, {transform_indices = @transform_2, window_bounds = array<i64: 32, 128>}, {transform_indices = @transform_3, window_bounds = array<i64: 1, 2, 128>}]} {
    %c0 = arith.constant 0 : index
    %c0_0 = arith.constant 0 : index
    %0 = vector.load %arg1[%c0, %c0_0] : memref<32x512xbf16, #tpu.memory_space<vmem>>, vector<32x512xbf16>
    %c0_1 = arith.constant 0 : index
    %c0_2 = arith.constant 0 : index
    %1 = vector.load %arg2[%c0_1, %c0_2] : memref<512x128xbf16, #tpu.memory_space<vmem>>, vector<512x128xbf16>
    %cst = arith.constant dense<0.000000e+00> : vector<32x128xf32>
    %2 = tpu.matmul %0, %1, %cst {dimension_numbers = #tpu.dot_dimension_numbers<[1], [0], [0], [1], [0, 0, 1, 1], [], []>} : vector<32x512xbf16>, vector<512x128xbf16>, vector<32x128xf32> -> vector<32x128xf32>
    %3 = arith.truncf %2 : vector<32x128xf32> to vector<32x128xbf16>
    %c0_3 = arith.constant 0 : index
    %c0_4 = arith.constant 0 : index
    %4 = vector.load %arg3[%c0_3, %c0_4] : memref<32x128xbf16, #tpu.memory_space<vmem>>, vector<32x128xbf16>
    tpu.vector_store %arg3[%c0_3, %c0_4], %3 {strides = array<i32>} : memref<32x128xbf16, #tpu.memory_space<vmem>>, vector<32x128xbf16>,
    %c32_i32 = arith.constant 32 : i32
    %5 = arith.muli %arg0, %c32_i32 : i32
    %6 = tpu.iota {dimensions = array<i32: 0>} : vector<32x1xi32>
    %7 = vector.broadcast %5 : i32 to vector<32x1xi32>
    %8 = arith.addi %7, %6 : vector<32x1xi32>
    %c32_i32_5 = arith.constant 32 : i32
    %9 = vector.broadcast %c32_i32_5 : i32 to vector<32x1xi32>
    %10 = arith.cmpi slt, %8, %9 : vector<32x1xi32>
    %cst_6 = arith.constant 0.000000e+00 : f32
    %11 = vector.shape_cast %10 : vector<32x1xi1> to vector<32x1xi1>
    %12 = vector.broadcast %11 : vector<32x1xi1> to vector<32x128xi1>
    %13 = vector.broadcast %cst_6 : f32 to vector<32x128xf32>
    %14 = arith.select %12, %2, %13 : vector<32x128xi1>, vector<32x128xf32>
    %cst_7 = arith.constant dense<0.000000e+00> : vector<128xf32>
    %15 = vector.multi_reduction <add>, %14, %cst_7 [0] : vector<32x128xf32> to vector<128xf32>
    %16 = vector.shape_cast %15 : vector<128xf32> to vector<1x128xf32>
    %17 = arith.mulf %14, %14 : vector<32x128xf32>
    %cst_8 = arith.constant dense<0.000000e+00> : vector<128xf32>
    %18 = vector.multi_reduction <add>, %17, %cst_8 [0] : vector<32x128xf32> to vector<128xf32>
    %19 = vector.shape_cast %18 : vector<128xf32> to vector<1x128xf32>
    %20 = tpu.concatenate %16, %19 in 0 : vector<1x128xf32>, vector<1x128xf32> -> vector<2x128xf32>
    %c0_9 = arith.constant 0 : index
    %c0_10 = arith.constant 0 : index
    %c0_11 = arith.constant 0 : index
    %21 = vector.load %arg4[%c0_9, %c0_10, %c0_11] : memref<1x2x128xf32, #tpu.memory_space<vmem>>, vector<1x2x128xf32>
    %22 = vector.shape_cast %21 : vector<1x2x128xf32> to vector<2x128xf32>
    %23 = vector.shape_cast %20 : vector<2x128xf32> to vector<1x2x128xf32>
    tpu.vector_store %arg4[%c0_9, %c0_10, %c0_11], %23 {strides = array<i32>} : memref<1x2x128xf32, #tpu.memory_space<vmem>>, vector<1x2x128xf32>,
    return
  }
  func.func @transform_0(%arg0: i32) -> (i32, i32) {
    %c0_i32 = arith.constant 0 : i32
    %c0_i32_0 = arith.constant 0 : i32
    return %arg0, %c0_i32 : i32, i32
  }
  func.func @transform_1(%arg0: i32) -> (i32, i32) {
    %c0_i32 = arith.constant 0 : i32
    %c0_i32_0 = arith.constant 0 : i32
    %c0_i32_1 = arith.constant 0 : i32
    return %c0_i32, %c0_i32_0 : i32, i32
  }
  func.func @transform_2(%arg0: i32) -> (i32, i32) {
    %c0_i32 = arith.constant 0 : i32
    %c0_i32_0 = arith.constant 0 : i32
    return %arg0, %c0_i32 : i32, i32
  }
  func.func @transform_3(%arg0: i32) -> (i32, i32, i32) {
    %c0_i32 = arith.constant 0 : i32
    %c0_i32_0 = arith.constant 0 : i32
    %c0_i32_1 = arith.constant 0 : i32
    return %arg0, %c0_i32, %c0_i32_0 : i32, i32, i32
  }
}

module attributes {stable_mosaic.version = 11 : i64} {
  func.func @_bn_lrelu_kernel(%arg0: i32, %arg1: memref<32x128xbf16, #tpu.memory_space<vmem>>, %arg2: memref<1x128xf32, #tpu.memory_space<vmem>>, %arg3: memref<1x128xf32, #tpu.memory_space<vmem>>, %arg4: memref<32x128xbf16, #tpu.memory_space<vmem>>) attributes {dimension_semantics = [#tpu.dimension_semantics<parallel>], iteration_bounds = array<i64: 1>, scalar_prefetch = 0 : i64, scratch_operands = 0 : i64, tpu.core_type = #tpu.core_type<tc>, window_params = [{transform_indices = @transform_0, window_bounds = array<i64: 32, 128>}, {pipeline_mode = #tpu.pipeline_mode<synchronous>, transform_indices = @transform_1, window_bounds = array<i64: 1, 128>}, {pipeline_mode = #tpu.pipeline_mode<synchronous>, transform_indices = @transform_2, window_bounds = array<i64: 1, 128>}, {transform_indices = @transform_3, window_bounds = array<i64: 32, 128>}]} {
    %c0 = arith.constant 0 : index
    %c0_0 = arith.constant 0 : index
    %0 = vector.load %arg1[%c0, %c0_0] : memref<32x128xbf16, #tpu.memory_space<vmem>>, vector<32x128xbf16>
    %1 = arith.extf %0 : vector<32x128xbf16> to vector<32x128xf32>
    %c0_1 = arith.constant 0 : index
    %c0_2 = arith.constant 0 : index
    %2 = vector.load %arg2[%c0_1, %c0_2] : memref<1x128xf32, #tpu.memory_space<vmem>>, vector<1x128xf32>
    %3 = vector.broadcast %2 : vector<1x128xf32> to vector<32x128xf32>
    %4 = arith.mulf %1, %3 : vector<32x128xf32>
    %c0_3 = arith.constant 0 : index
    %c0_4 = arith.constant 0 : index
    %5 = vector.load %arg3[%c0_3, %c0_4] : memref<1x128xf32, #tpu.memory_space<vmem>>, vector<1x128xf32>
    %6 = vector.broadcast %5 : vector<1x128xf32> to vector<32x128xf32>
    %7 = arith.addf %4, %6 : vector<32x128xf32>
    %cst = arith.constant 0.000000e+00 : f32
    %8 = vector.broadcast %cst : f32 to vector<32x128xf32>
    %9 = arith.cmpf oge, %7, %8 : vector<32x128xf32>
    %cst_5 = arith.constant 2.000000e-01 : f32
    %10 = vector.broadcast %cst_5 : f32 to vector<32x128xf32>
    %11 = arith.mulf %10, %7 : vector<32x128xf32>
    %12 = arith.select %9, %7, %11 : vector<32x128xi1>, vector<32x128xf32>
    %13 = arith.truncf %12 : vector<32x128xf32> to vector<32x128xbf16>
    %c0_6 = arith.constant 0 : index
    %c0_7 = arith.constant 0 : index
    %14 = vector.load %arg4[%c0_6, %c0_7] : memref<32x128xbf16, #tpu.memory_space<vmem>>, vector<32x128xbf16>
    tpu.vector_store %arg4[%c0_6, %c0_7], %13 {strides = array<i32>} : memref<32x128xbf16, #tpu.memory_space<vmem>>, vector<32x128xbf16>,
    return
  }
  func.func @transform_0(%arg0: i32) -> (i32, i32) {
    %c0_i32 = arith.constant 0 : i32
    %c0_i32_0 = arith.constant 0 : i32
    return %arg0, %c0_i32 : i32, i32
  }
  func.func @transform_1(%arg0: i32) -> (i32, i32) {
    %c0_i32 = arith.constant 0 : i32
    %c0_i32_0 = arith.constant 0 : i32
    %c0_i32_1 = arith.constant 0 : i32
    return %c0_i32, %c0_i32_0 : i32, i32
  }
  func.func @transform_2(%arg0: i32) -> (i32, i32) {
    %c0_i32 = arith.constant 0 : i32
    %c0_i32_0 = arith.constant 0 : i32
    %c0_i32_1 = arith.constant 0 : i32
    return %c0_i32, %c0_i32_0 : i32, i32
  }
  func.func @transform_3(%arg0: i32) -> (i32, i32) {
    %c0_i32 = arith.constant 0 : i32
    %c0_i32_0 = arith.constant 0 : i32
    return %arg0, %c0_i32 : i32, i32
  }
}

module attributes {stable_mosaic.version = 11 : i64} {
  func.func @_matmul_stats_kernel(%arg0: i32, %arg1: memref<8x1024xbf16, #tpu.memory_space<vmem>>, %arg2: memref<1024x128xbf16, #tpu.memory_space<vmem>>, %arg3: memref<8x128xbf16, #tpu.memory_space<vmem>>, %arg4: memref<1x2x128xf32, #tpu.memory_space<vmem>>) attributes {dimension_semantics = [#tpu.dimension_semantics<parallel>], iteration_bounds = array<i64: 1>, scalar_prefetch = 0 : i64, scratch_operands = 0 : i64, tpu.core_type = #tpu.core_type<tc>, window_params = [{transform_indices = @transform_0, window_bounds = array<i64: 8, 1024>}, {pipeline_mode = #tpu.pipeline_mode<synchronous>, transform_indices = @transform_1, window_bounds = array<i64: 1024, 128>}, {transform_indices = @transform_2, window_bounds = array<i64: 8, 128>}, {transform_indices = @transform_3, window_bounds = array<i64: 1, 2, 128>}]} {
    %c0 = arith.constant 0 : index
    %c0_0 = arith.constant 0 : index
    %0 = vector.load %arg1[%c0, %c0_0] : memref<8x1024xbf16, #tpu.memory_space<vmem>>, vector<8x1024xbf16>
    %c0_1 = arith.constant 0 : index
    %c0_2 = arith.constant 0 : index
    %1 = vector.load %arg2[%c0_1, %c0_2] : memref<1024x128xbf16, #tpu.memory_space<vmem>>, vector<1024x128xbf16>
    %cst = arith.constant dense<0.000000e+00> : vector<8x128xf32>
    %2 = tpu.matmul %0, %1, %cst {dimension_numbers = #tpu.dot_dimension_numbers<[1], [0], [0], [1], [0, 0, 1, 1], [], []>} : vector<8x1024xbf16>, vector<1024x128xbf16>, vector<8x128xf32> -> vector<8x128xf32>
    %3 = arith.truncf %2 : vector<8x128xf32> to vector<8x128xbf16>
    %c0_3 = arith.constant 0 : index
    %c0_4 = arith.constant 0 : index
    %4 = vector.load %arg3[%c0_3, %c0_4] : memref<8x128xbf16, #tpu.memory_space<vmem>>, vector<8x128xbf16>
    tpu.vector_store %arg3[%c0_3, %c0_4], %3 {strides = array<i32>} : memref<8x128xbf16, #tpu.memory_space<vmem>>, vector<8x128xbf16>,
    %c8_i32 = arith.constant 8 : i32
    %5 = arith.muli %arg0, %c8_i32 : i32
    %6 = tpu.iota {dimensions = array<i32: 0>} : vector<8x1xi32>
    %7 = vector.broadcast %5 : i32 to vector<8x1xi32>
    %8 = arith.addi %7, %6 : vector<8x1xi32>
    %c8_i32_5 = arith.constant 8 : i32
    %9 = vector.broadcast %c8_i32_5 : i32 to vector<8x1xi32>
    %10 = arith.cmpi slt, %8, %9 : vector<8x1xi32>
    %cst_6 = arith.constant 0.000000e+00 : f32
    %11 = vector.shape_cast %10 : vector<8x1xi1> to vector<8x1xi1>
    %12 = vector.broadcast %11 : vector<8x1xi1> to vector<8x128xi1>
    %13 = vector.broadcast %cst_6 : f32 to vector<8x128xf32>
    %14 = arith.select %12, %2, %13 : vector<8x128xi1>, vector<8x128xf32>
    %cst_7 = arith.constant dense<0.000000e+00> : vector<128xf32>
    %15 = vector.multi_reduction <add>, %14, %cst_7 [0] : vector<8x128xf32> to vector<128xf32>
    %16 = vector.shape_cast %15 : vector<128xf32> to vector<1x128xf32>
    %17 = arith.mulf %14, %14 : vector<8x128xf32>
    %cst_8 = arith.constant dense<0.000000e+00> : vector<128xf32>
    %18 = vector.multi_reduction <add>, %17, %cst_8 [0] : vector<8x128xf32> to vector<128xf32>
    %19 = vector.shape_cast %18 : vector<128xf32> to vector<1x128xf32>
    %20 = tpu.concatenate %16, %19 in 0 : vector<1x128xf32>, vector<1x128xf32> -> vector<2x128xf32>
    %c0_9 = arith.constant 0 : index
    %c0_10 = arith.constant 0 : index
    %c0_11 = arith.constant 0 : index
    %21 = vector.load %arg4[%c0_9, %c0_10, %c0_11] : memref<1x2x128xf32, #tpu.memory_space<vmem>>, vector<1x2x128xf32>
    %22 = vector.shape_cast %21 : vector<1x2x128xf32> to vector<2x128xf32>
    %23 = vector.shape_cast %20 : vector<2x128xf32> to vector<1x2x128xf32>
    tpu.vector_store %arg4[%c0_9, %c0_10, %c0_11], %23 {strides = array<i32>} : memref<1x2x128xf32, #tpu.memory_space<vmem>>, vector<1x2x128xf32>,
    return
  }
  func.func @transform_0(%arg0: i32) -> (i32, i32) {
    %c0_i32 = arith.constant 0 : i32
    %c0_i32_0 = arith.constant 0 : i32
    return %arg0, %c0_i32 : i32, i32
  }
  func.func @transform_1(%arg0: i32) -> (i32, i32) {
    %c0_i32 = arith.constant 0 : i32
    %c0_i32_0 = arith.constant 0 : i32
    %c0_i32_1 = arith.constant 0 : i32
    return %c0_i32, %c0_i32_0 : i32, i32
  }
  func.func @transform_2(%arg0: i32) -> (i32, i32) {
    %c0_i32 = arith.constant 0 : i32
    %c0_i32_0 = arith.constant 0 : i32
    return %arg0, %c0_i32 : i32, i32
  }
  func.func @transform_3(%arg0: i32) -> (i32, i32, i32) {
    %c0_i32 = arith.constant 0 : i32
    %c0_i32_0 = arith.constant 0 : i32
    %c0_i32_1 = arith.constant 0 : i32
    return %arg0, %c0_i32, %c0_i32_0 : i32, i32, i32
  }
}

module attributes {stable_mosaic.version = 11 : i64} {
  func.func @_bn_lrelu_kernel(%arg0: i32, %arg1: memref<8x128xbf16, #tpu.memory_space<vmem>>, %arg2: memref<1x128xf32, #tpu.memory_space<vmem>>, %arg3: memref<1x128xf32, #tpu.memory_space<vmem>>, %arg4: memref<8x128xbf16, #tpu.memory_space<vmem>>) attributes {dimension_semantics = [#tpu.dimension_semantics<parallel>], iteration_bounds = array<i64: 1>, scalar_prefetch = 0 : i64, scratch_operands = 0 : i64, tpu.core_type = #tpu.core_type<tc>, window_params = [{transform_indices = @transform_0, window_bounds = array<i64: 8, 128>}, {pipeline_mode = #tpu.pipeline_mode<synchronous>, transform_indices = @transform_1, window_bounds = array<i64: 1, 128>}, {pipeline_mode = #tpu.pipeline_mode<synchronous>, transform_indices = @transform_2, window_bounds = array<i64: 1, 128>}, {transform_indices = @transform_3, window_bounds = array<i64: 8, 128>}]} {
    %c0 = arith.constant 0 : index
    %c0_0 = arith.constant 0 : index
    %0 = vector.load %arg1[%c0, %c0_0] : memref<8x128xbf16, #tpu.memory_space<vmem>>, vector<8x128xbf16>
    %1 = arith.extf %0 : vector<8x128xbf16> to vector<8x128xf32>
    %c0_1 = arith.constant 0 : index
    %c0_2 = arith.constant 0 : index
    %2 = vector.load %arg2[%c0_1, %c0_2] : memref<1x128xf32, #tpu.memory_space<vmem>>, vector<1x128xf32>
    %3 = vector.broadcast %2 : vector<1x128xf32> to vector<8x128xf32>
    %4 = arith.mulf %1, %3 : vector<8x128xf32>
    %c0_3 = arith.constant 0 : index
    %c0_4 = arith.constant 0 : index
    %5 = vector.load %arg3[%c0_3, %c0_4] : memref<1x128xf32, #tpu.memory_space<vmem>>, vector<1x128xf32>
    %6 = vector.broadcast %5 : vector<1x128xf32> to vector<8x128xf32>
    %7 = arith.addf %4, %6 : vector<8x128xf32>
    %cst = arith.constant 0.000000e+00 : f32
    %8 = vector.broadcast %cst : f32 to vector<8x128xf32>
    %9 = arith.cmpf oge, %7, %8 : vector<8x128xf32>
    %cst_5 = arith.constant 2.000000e-01 : f32
    %10 = vector.broadcast %cst_5 : f32 to vector<8x128xf32>
    %11 = arith.mulf %10, %7 : vector<8x128xf32>
    %12 = arith.select %9, %7, %11 : vector<8x128xi1>, vector<8x128xf32>
    %13 = arith.truncf %12 : vector<8x128xf32> to vector<8x128xbf16>
    %c0_6 = arith.constant 0 : index
    %c0_7 = arith.constant 0 : index
    %14 = vector.load %arg4[%c0_6, %c0_7] : memref<8x128xbf16, #tpu.memory_space<vmem>>, vector<8x128xbf16>
    tpu.vector_store %arg4[%c0_6, %c0_7], %13 {strides = array<i32>} : memref<8x128xbf16, #tpu.memory_space<vmem>>, vector<8x128xbf16>,
    return
  }
  func.func @transform_0(%arg0: i32) -> (i32, i32) {
    %c0_i32 = arith.constant 0 : i32
    %c0_i32_0 = arith.constant 0 : i32
    return %arg0, %c0_i32 : i32, i32
  }
  func.func @transform_1(%arg0: i32) -> (i32, i32) {
    %c0_i32 = arith.constant 0 : i32
    %c0_i32_0 = arith.constant 0 : i32
    %c0_i32_1 = arith.constant 0 : i32
    return %c0_i32, %c0_i32_0 : i32, i32
  }
  func.func @transform_2(%arg0: i32) -> (i32, i32) {
    %c0_i32 = arith.constant 0 : i32
    %c0_i32_0 = arith.constant 0 : i32
    %c0_i32_1 = arith.constant 0 : i32
    return %c0_i32, %c0_i32_0 : i32, i32
  }
  func.func @transform_3(%arg0: i32) -> (i32, i32) {
    %c0_i32 = arith.constant 0 : i32
    %c0_i32_0 = arith.constant 0 : i32
    return %arg0, %c0_i32 : i32, i32
  }
}

module attributes {stable_mosaic.version = 11 : i64} {
  func.func @_matmul_stats_kernel(%arg0: i32, %arg1: memref<8x128xbf16, #tpu.memory_space<vmem>>, %arg2: memref<128x256xbf16, #tpu.memory_space<vmem>>, %arg3: memref<8x256xbf16, #tpu.memory_space<vmem>>, %arg4: memref<1x2x256xf32, #tpu.memory_space<vmem>>) attributes {dimension_semantics = [#tpu.dimension_semantics<parallel>], iteration_bounds = array<i64: 1>, scalar_prefetch = 0 : i64, scratch_operands = 0 : i64, tpu.core_type = #tpu.core_type<tc>, window_params = [{transform_indices = @transform_0, window_bounds = array<i64: 8, 128>}, {pipeline_mode = #tpu.pipeline_mode<synchronous>, transform_indices = @transform_1, window_bounds = array<i64: 128, 256>}, {transform_indices = @transform_2, window_bounds = array<i64: 8, 256>}, {transform_indices = @transform_3, window_bounds = array<i64: 1, 2, 256>}]} {
    %c0 = arith.constant 0 : index
    %c0_0 = arith.constant 0 : index
    %0 = vector.load %arg1[%c0, %c0_0] : memref<8x128xbf16, #tpu.memory_space<vmem>>, vector<8x128xbf16>
    %c0_1 = arith.constant 0 : index
    %c0_2 = arith.constant 0 : index
    %1 = vector.load %arg2[%c0_1, %c0_2] : memref<128x256xbf16, #tpu.memory_space<vmem>>, vector<128x256xbf16>
    %cst = arith.constant dense<0.000000e+00> : vector<8x256xf32>
    %2 = tpu.matmul %0, %1, %cst {dimension_numbers = #tpu.dot_dimension_numbers<[1], [0], [0], [1], [0, 0, 1, 1], [], []>} : vector<8x128xbf16>, vector<128x256xbf16>, vector<8x256xf32> -> vector<8x256xf32>
    %3 = arith.truncf %2 : vector<8x256xf32> to vector<8x256xbf16>
    %c0_3 = arith.constant 0 : index
    %c0_4 = arith.constant 0 : index
    %4 = vector.load %arg3[%c0_3, %c0_4] : memref<8x256xbf16, #tpu.memory_space<vmem>>, vector<8x256xbf16>
    tpu.vector_store %arg3[%c0_3, %c0_4], %3 {strides = array<i32>} : memref<8x256xbf16, #tpu.memory_space<vmem>>, vector<8x256xbf16>,
    %c8_i32 = arith.constant 8 : i32
    %5 = arith.muli %arg0, %c8_i32 : i32
    %6 = tpu.iota {dimensions = array<i32: 0>} : vector<8x1xi32>
    %7 = vector.broadcast %5 : i32 to vector<8x1xi32>
    %8 = arith.addi %7, %6 : vector<8x1xi32>
    %c8_i32_5 = arith.constant 8 : i32
    %9 = vector.broadcast %c8_i32_5 : i32 to vector<8x1xi32>
    %10 = arith.cmpi slt, %8, %9 : vector<8x1xi32>
    %cst_6 = arith.constant 0.000000e+00 : f32
    %11 = vector.shape_cast %10 : vector<8x1xi1> to vector<8x1xi1>
    %12 = vector.broadcast %11 : vector<8x1xi1> to vector<8x256xi1>
    %13 = vector.broadcast %cst_6 : f32 to vector<8x256xf32>
    %14 = arith.select %12, %2, %13 : vector<8x256xi1>, vector<8x256xf32>
    %cst_7 = arith.constant dense<0.000000e+00> : vector<256xf32>
    %15 = vector.multi_reduction <add>, %14, %cst_7 [0] : vector<8x256xf32> to vector<256xf32>
    %16 = vector.shape_cast %15 : vector<256xf32> to vector<1x256xf32>
    %17 = arith.mulf %14, %14 : vector<8x256xf32>
    %cst_8 = arith.constant dense<0.000000e+00> : vector<256xf32>
    %18 = vector.multi_reduction <add>, %17, %cst_8 [0] : vector<8x256xf32> to vector<256xf32>
    %19 = vector.shape_cast %18 : vector<256xf32> to vector<1x256xf32>
    %20 = tpu.concatenate %16, %19 in 0 : vector<1x256xf32>, vector<1x256xf32> -> vector<2x256xf32>
    %c0_9 = arith.constant 0 : index
    %c0_10 = arith.constant 0 : index
    %c0_11 = arith.constant 0 : index
    %21 = vector.load %arg4[%c0_9, %c0_10, %c0_11] : memref<1x2x256xf32, #tpu.memory_space<vmem>>, vector<1x2x256xf32>
    %22 = vector.shape_cast %21 : vector<1x2x256xf32> to vector<2x256xf32>
    %23 = vector.shape_cast %20 : vector<2x256xf32> to vector<1x2x256xf32>
    tpu.vector_store %arg4[%c0_9, %c0_10, %c0_11], %23 {strides = array<i32>} : memref<1x2x256xf32, #tpu.memory_space<vmem>>, vector<1x2x256xf32>,
    return
  }
  func.func @transform_0(%arg0: i32) -> (i32, i32) {
    %c0_i32 = arith.constant 0 : i32
    %c0_i32_0 = arith.constant 0 : i32
    return %arg0, %c0_i32 : i32, i32
  }
  func.func @transform_1(%arg0: i32) -> (i32, i32) {
    %c0_i32 = arith.constant 0 : i32
    %c0_i32_0 = arith.constant 0 : i32
    %c0_i32_1 = arith.constant 0 : i32
    return %c0_i32, %c0_i32_0 : i32, i32
  }
  func.func @transform_2(%arg0: i32) -> (i32, i32) {
    %c0_i32 = arith.constant 0 : i32
    %c0_i32_0 = arith.constant 0 : i32
    return %arg0, %c0_i32 : i32, i32
  }
  func.func @transform_3(%arg0: i32) -> (i32, i32, i32) {
    %c0_i32 = arith.constant 0 : i32
    %c0_i32_0 = arith.constant 0 : i32
    %c0_i32_1 = arith.constant 0 : i32
    return %arg0, %c0_i32, %c0_i32_0 : i32, i32, i32
  }
}

module attributes {stable_mosaic.version = 11 : i64} {
  func.func @_bn_lrelu_kernel(%arg0: i32, %arg1: memref<8x256xbf16, #tpu.memory_space<vmem>>, %arg2: memref<1x256xf32, #tpu.memory_space<vmem>>, %arg3: memref<1x256xf32, #tpu.memory_space<vmem>>, %arg4: memref<8x256xbf16, #tpu.memory_space<vmem>>) attributes {dimension_semantics = [#tpu.dimension_semantics<parallel>], iteration_bounds = array<i64: 1>, scalar_prefetch = 0 : i64, scratch_operands = 0 : i64, tpu.core_type = #tpu.core_type<tc>, window_params = [{transform_indices = @transform_0, window_bounds = array<i64: 8, 256>}, {pipeline_mode = #tpu.pipeline_mode<synchronous>, transform_indices = @transform_1, window_bounds = array<i64: 1, 256>}, {pipeline_mode = #tpu.pipeline_mode<synchronous>, transform_indices = @transform_2, window_bounds = array<i64: 1, 256>}, {transform_indices = @transform_3, window_bounds = array<i64: 8, 256>}]} {
    %c0 = arith.constant 0 : index
    %c0_0 = arith.constant 0 : index
    %0 = vector.load %arg1[%c0, %c0_0] : memref<8x256xbf16, #tpu.memory_space<vmem>>, vector<8x256xbf16>
    %1 = arith.extf %0 : vector<8x256xbf16> to vector<8x256xf32>
    %c0_1 = arith.constant 0 : index
    %c0_2 = arith.constant 0 : index
    %2 = vector.load %arg2[%c0_1, %c0_2] : memref<1x256xf32, #tpu.memory_space<vmem>>, vector<1x256xf32>
    %3 = vector.broadcast %2 : vector<1x256xf32> to vector<8x256xf32>
    %4 = arith.mulf %1, %3 : vector<8x256xf32>
    %c0_3 = arith.constant 0 : index
    %c0_4 = arith.constant 0 : index
    %5 = vector.load %arg3[%c0_3, %c0_4] : memref<1x256xf32, #tpu.memory_space<vmem>>, vector<1x256xf32>
    %6 = vector.broadcast %5 : vector<1x256xf32> to vector<8x256xf32>
    %7 = arith.addf %4, %6 : vector<8x256xf32>
    %cst = arith.constant 0.000000e+00 : f32
    %8 = vector.broadcast %cst : f32 to vector<8x256xf32>
    %9 = arith.cmpf oge, %7, %8 : vector<8x256xf32>
    %cst_5 = arith.constant 2.000000e-01 : f32
    %10 = vector.broadcast %cst_5 : f32 to vector<8x256xf32>
    %11 = arith.mulf %10, %7 : vector<8x256xf32>
    %12 = arith.select %9, %7, %11 : vector<8x256xi1>, vector<8x256xf32>
    %13 = arith.truncf %12 : vector<8x256xf32> to vector<8x256xbf16>
    %c0_6 = arith.constant 0 : index
    %c0_7 = arith.constant 0 : index
    %14 = vector.load %arg4[%c0_6, %c0_7] : memref<8x256xbf16, #tpu.memory_space<vmem>>, vector<8x256xbf16>
    tpu.vector_store %arg4[%c0_6, %c0_7], %13 {strides = array<i32>} : memref<8x256xbf16, #tpu.memory_space<vmem>>, vector<8x256xbf16>,
    return
  }
  func.func @transform_0(%arg0: i32) -> (i32, i32) {
    %c0_i32 = arith.constant 0 : i32
    %c0_i32_0 = arith.constant 0 : i32
    return %arg0, %c0_i32 : i32, i32
  }
  func.func @transform_1(%arg0: i32) -> (i32, i32) {
    %c0_i32 = arith.constant 0 : i32
    %c0_i32_0 = arith.constant 0 : i32
    %c0_i32_1 = arith.constant 0 : i32
    return %c0_i32, %c0_i32_0 : i32, i32
  }
  func.func @transform_2(%arg0: i32) -> (i32, i32) {
    %c0_i32 = arith.constant 0 : i32
    %c0_i32_0 = arith.constant 0 : i32
    %c0_i32_1 = arith.constant 0 : i32
    return %c0_i32, %c0_i32_0 : i32, i32
  }
  func.func @transform_3(%arg0: i32) -> (i32, i32) {
    %c0_i32 = arith.constant 0 : i32
    %c0_i32_0 = arith.constant 0 : i32
    return %arg0, %c0_i32 : i32, i32
  }
}

module attributes {stable_mosaic.version = 11 : i64} {
  func.func @_matmul_bias_kernel(%arg0: i32, %arg1: memref<2x4096xbf16, #tpu.memory_space<vmem>>, %arg2: memref<4096x128xbf16, #tpu.memory_space<vmem>>, %arg3: memref<1x128xf32, #tpu.memory_space<vmem>>, %arg4: memref<2x128xf32, #tpu.memory_space<vmem>>) attributes {dimension_semantics = [#tpu.dimension_semantics<parallel>], iteration_bounds = array<i64: 1>, scalar_prefetch = 0 : i64, scratch_operands = 0 : i64, tpu.core_type = #tpu.core_type<tc>, window_params = [{transform_indices = @transform_0, window_bounds = array<i64: 2, 4096>}, {pipeline_mode = #tpu.pipeline_mode<synchronous>, transform_indices = @transform_1, window_bounds = array<i64: 4096, 128>}, {pipeline_mode = #tpu.pipeline_mode<synchronous>, transform_indices = @transform_2, window_bounds = array<i64: 1, 128>}, {transform_indices = @transform_3, window_bounds = array<i64: 2, 128>}]} {
    %c0 = arith.constant 0 : index
    %c0_0 = arith.constant 0 : index
    %0 = vector.load %arg1[%c0, %c0_0] : memref<2x4096xbf16, #tpu.memory_space<vmem>>, vector<2x4096xbf16>
    %c0_1 = arith.constant 0 : index
    %c0_2 = arith.constant 0 : index
    %1 = vector.load %arg2[%c0_1, %c0_2] : memref<4096x128xbf16, #tpu.memory_space<vmem>>, vector<4096x128xbf16>
    %cst = arith.constant dense<0.000000e+00> : vector<2x128xf32>
    %2 = tpu.matmul %0, %1, %cst {dimension_numbers = #tpu.dot_dimension_numbers<[1], [0], [0], [1], [0, 0, 1, 1], [], []>} : vector<2x4096xbf16>, vector<4096x128xbf16>, vector<2x128xf32> -> vector<2x128xf32>
    %c0_3 = arith.constant 0 : index
    %c0_4 = arith.constant 0 : index
    %3 = vector.load %arg3[%c0_3, %c0_4] : memref<1x128xf32, #tpu.memory_space<vmem>>, vector<1x128xf32>
    %4 = vector.broadcast %3 : vector<1x128xf32> to vector<2x128xf32>
    %5 = arith.addf %2, %4 : vector<2x128xf32>
    %c0_5 = arith.constant 0 : index
    %c0_6 = arith.constant 0 : index
    %6 = vector.load %arg4[%c0_5, %c0_6] : memref<2x128xf32, #tpu.memory_space<vmem>>, vector<2x128xf32>
    tpu.vector_store %arg4[%c0_5, %c0_6], %5 {strides = array<i32>} : memref<2x128xf32, #tpu.memory_space<vmem>>, vector<2x128xf32>,
    return
  }
  func.func @transform_0(%arg0: i32) -> (i32, i32) {
    %c0_i32 = arith.constant 0 : i32
    %c0_i32_0 = arith.constant 0 : i32
    return %arg0, %c0_i32 : i32, i32
  }
  func.func @transform_1(%arg0: i32) -> (i32, i32) {
    %c0_i32 = arith.constant 0 : i32
    %c0_i32_0 = arith.constant 0 : i32
    %c0_i32_1 = arith.constant 0 : i32
    return %c0_i32, %c0_i32_0 : i32, i32
  }
  func.func @transform_2(%arg0: i32) -> (i32, i32) {
    %c0_i32 = arith.constant 0 : i32
    %c0_i32_0 = arith.constant 0 : i32
    %c0_i32_1 = arith.constant 0 : i32
    return %c0_i32, %c0_i32_0 : i32, i32
  }
  func.func @transform_3(%arg0: i32) -> (i32, i32) {
    %c0_i32 = arith.constant 0 : i32
    %c0_i32_0 = arith.constant 0 : i32
    return %arg0, %c0_i32 : i32, i32
  }
}

</mosaic_0001>

<bundles_post_ra>
// kernel: _lambda_.14
= control target key start
LH: loop header
LB: loop body
LE: loop exit
PB: predicated region body
PF: predicated region fallthrough
CT: control target
= control target key end

     0   :  { %s2789_s12 = smov 0   ;;  %s3222_s0 = inlined_call_operand.vmem [shape: bf16[2048,128], index: 0, kind: input, shape index: {}]   ;;  %s3223_s1 = inlined_call_operand.vmem [shape: f32[1,128], index: 1, kind: input, shape index: {}]   ;;  %s3224_s2 = inlined_call_operand.vmem [shape: f32[1,128], index: 2, kind: input, shape index: {}]   ;;  %s3225_s3 = inlined_call_operand.vmem [shape: bf16[2048,128], index: 3, kind: output, shape index: {}]  }
   0x1 LB: > { %s1780_s13 = sadd.s32 4294967295, %s2767_s12   ;;  %p1784_p0 = scmp.ge.s32.totalorder %s2767_s12, 1  ;;  %s2767_s12 = sphi %s2789_s12, %s13_s12  }
   0x2   : > { %p138_p1 = scmp.lt.s32.totalorder %s2767_s12, 3 }
   0x4   : > { %p139_p2 = pnand %p1784_p0, %p138_p1 }
   0x5   : > { %s1785_s14 = sshll.u32 (!%p139_p2), %s1780_s13, 7 }
   0x6   : > { %142 = sbr.rel (%p139_p2) target bundleno = 227 (0xe3), region = 32  ;;  %p163_p3 = scmp.lt.s32.totalorder (!%p139_p2), %s1785_s14, 255 }
   0xb   : > { %s3227_s14 = smov (!%p163_p3, %s1785_s14), 255  ;;  %v2810_v0 = vld [vmem:[%s3223_s1] ss:$0 sm:$0xff] }
   0xc   : > { %s1786_s15 = sshll.u32 %s3227_s14, 2  ;;  %v2819_v9 = vld [vmem:[%s3224_s2] ss:$0 sm:$0xff] }
   0xd   : > { %s2805_s18 = scalar_lea.vmem %s3222_s0, %s1786_s15  ;;  %s2842_s25 = scalar_lea.vmem %s3225_s3, %s1786_s15 }
   0xe   : > { %v2050_v1 = vld [vmem:[%s2805_s18] sm:$0xff]   ;;  %v2625_v2 = vld [vmem:[%s2805_s18 + $0x8] sm:$0xff]   ;;  %v2626_v3 = vld [vmem:[%s2805_s18 + $0x10] sm:$0xff]  }
   0xf   : > { %v2051_v4 = vunpack.c.l.bf16 %v2050_v1  ;;  %v2052_v5 = vunpack.c.h.bf16 %v2050_v1  ;;  %v2055_v6 = vunpack.c.l.bf16 %v2625_v2  ;;  %v2056_v7 = vunpack.c.h.bf16 %v2625_v2  ;;  %v2627_v8 = vld [vmem:[%s2805_s18 + $0x18] sm:$0xff]   ;;  %v2628_v36 = vld [vmem:[%s2805_s18 + $0x20] sm:$0xff]   ;;  %v2629_v41 = vld [vmem:[%s2805_s18 + $0x28] sm:$0xff]  }
  0x10   : > { %v2059_v10 = vunpack.c.l.bf16 %v2626_v3  ;;  %v2060_v11 = vunpack.c.h.bf16 %v2626_v3  ;;  %v2063_v12 = vunpack.c.l.bf16 %v2627_v8  ;;  %v2064_v13 = vunpack.c.h.bf16 %v2627_v8  ;;  %v2630_v52 = vld [vmem:[%s2805_s18 + $0x30] sm:$0xff]   ;;  %v2631_v53 = vld [vmem:[%s2805_s18 + $0x38] sm:$0xff]  }
  0x11   : > { %v437_v14 = vmul.f32 %v2051_v4, %v2810_v0  ;;  %v438_v15 = vmul.f32 %v2052_v5, %v2810_v0  ;;  %v439_v16 = vmul.f32 %v2055_v6, %v2810_v0  ;;  %v440_v17 = vmul.f32 %v2056_v7, %v2810_v0 }
  0x12   : > { %v441_v18 = vmul.f32 %v2059_v10, %v2810_v0  ;;  %v442_v19 = vmul.f32 %v2060_v11, %v2810_v0  ;;  %v443_v20 = vmul.f32 %v2063_v12, %v2810_v0  ;;  %v444_v21 = vmul.f32 %v2064_v13, %v2810_v0 }
  0x13   : > { %v572_v22 = vadd.f32 %v2819_v9, %v437_v14  ;;  %v573_v23 = vadd.f32 %v2819_v9, %v438_v15  ;;  %v574_v24 = vadd.f32 %v2819_v9, %v439_v16  ;;  %v575_v25 = vadd.f32 %v2819_v9, %v440_v17 }
  0x14   : > { %v576_v26 = vadd.f32 %v2819_v9, %v441_v18  ;;  %v577_v27 = vadd.f32 %v2819_v9, %v442_v19  ;;  %v578_v28 = vadd.f32 %v2819_v9, %v443_v20  ;;  %v579_v29 = vadd.f32 %v2819_v9, %v444_v21  ;;  %v2632_v20 = vld [vmem:[%s2805_s18 + $0x40] sm:$0xff]  }
  0x15   : > { %vm700_vm0 = vcmp.ge.f32.partialorder %v572_v22, 0.0  ;;  %vm701_vm1 = vcmp.ge.f32.partialorder %v573_v23, 0.0  ;;  %v828_v30 = vmul.f32 0.2, %v572_v22  ;;  %v829_v31 = vmul.f32 0.2, %v573_v23 }
  0x16   : > { %vm702_vm2 = vcmp.ge.f32.partialorder %v574_v24, 0.0  ;;  %vm703_vm3 = vcmp.ge.f32.partialorder %v575_v25, 0.0  ;;  %v830_v32 = vmul.f32 0.2, %v574_v24  ;;  %v831_v33 = vmul.f32 0.2, %v575_v25 }
  0x17   : > { %v956_v34 = vsel %vm700_vm0, %v572_v22, %v828_v30  ;;  %v957_v35 = vsel %vm701_vm1, %v573_v23, %v829_v31  ;;  %vm704_vm4 = vcmp.ge.f32.partialorder %v576_v26, 0.0  ;;  %vm705_vm5 = vcmp.ge.f32.partialorder %v577_v27, 0.0 }
  0x18   : > { %v2308_v37 = vpack.c.bf16 %v957_v35, %v956_v34  ;;  %v958_v38 = vsel %vm702_vm2, %v574_v24, %v830_v32  ;;  %v959_v39 = vsel %vm703_vm3, %v575_v25, %v831_v33  ;;  %v832_v40 = vmul.f32 0.2, %v576_v26  ;;  %v2633_v24 = vld [vmem:[%s2805_s18 + $0x48] sm:$0xff]  }
  0x19   : > { %v2313_v42 = vpack.c.bf16 %v959_v39, %v958_v38  ;;  %v833_v43 = vmul.f32 0.2, %v577_v27  ;;  %vm706_vm6 = vcmp.ge.f32.partialorder %v578_v28, 0.0  ;;  %vm707_vm7 = vcmp.ge.f32.partialorder %v579_v29, 0.0 }
  0x1a   : > { %2309 = vst [vmem:[%s2842_s25] sm:$0xff] %v2308_v37   ;;  %v960_v44 = vsel %vm704_vm4, %v576_v26, %v832_v40  ;;  %v834_v45 = vmul.f32 0.2, %v578_v28  ;;  %v835_v46 = vmul.f32 0.2, %v579_v29  ;;  %v2067_v47 = vunpack.c.l.bf16 %v2628_v36 }
  0x1b   : > { %2688 = vst [vmem:[%s2842_s25 + $0x8] sm:$0xff] %v2313_v42   ;;  %v961_v48 = vsel %vm705_vm5, %v577_v27, %v833_v43  ;;  %v2068_v49 = vunpack.c.h.bf16 %v2628_v36  ;;  %v2071_v50 = vunpack.c.l.bf16 %v2629_v41  ;;  %v2072_v51 = vunpack.c.h.bf16 %v2629_v41  ;;  %v2634_v36 = vld [vmem:[%s2805_s18 + $0x50] sm:$0xff]  }
  0x1c   : > { %v2318_v54 = vpack.c.bf16 %v961_v48, %v960_v44  ;;  %v962_v55 = vsel %vm706_vm6, %v578_v28, %v834_v45  ;;  %v963_v56 = vsel %vm707_vm7, %v579_v29, %v835_v46  ;;  %v445_v57 = vmul.f32 %v2067_v47, %v2810_v0 }
  0x1d   : > { %v2323_v58 = vpack.c.bf16 %v963_v56, %v962_v55  ;;  %v446_v59 = vmul.f32 %v2068_v49, %v2810_v0  ;;  %v447_v60 = vmul.f32 %v2071_v50, %v2810_v0  ;;  %v448_v61 = vmul.f32 %v2072_v51, %v2810_v0  ;;  %v2635_v55 = vld [vmem:[%s2805_s18 + $0x58] sm:$0xff]  }
  0x1e   : > { %2689 = vst [vmem:[%s2842_s25 + $0x10] sm:$0xff] %v2318_v54   ;;  %v580_v62 = vadd.f32 %v2819_v9, %v445_v57  ;;  %v2075_v63 = vunpack.c.l.bf16 %v2630_v52  ;;  %v2076_v1 = vunpack.c.h.bf16 %v2630_v52  ;;  %v2079_v2 = vunpack.c.l.bf16 %v2631_v53 }
  0x1f   : > { %2690 = vst [vmem:[%s2842_s25 + $0x18] sm:$0xff] %v2323_v58   ;;  %v581_v3 = vadd.f32 %v2819_v9, %v446_v59  ;;  %v582_v4 = vadd.f32 %v2819_v9, %v447_v60  ;;  %v583_v5 = vadd.f32 %v2819_v9, %v448_v61  ;;  %v2080_v6 = vunpack.c.h.bf16 %v2631_v53 }
  0x20   : > { %vm708_vm8 = vcmp.ge.f32.partialorder %v580_v62, 0.0  ;;  %v836_v7 = vmul.f32 0.2, %v580_v62  ;;  %v449_v8 = vmul.f32 %v2075_v63, %v2810_v0  ;;  %v450_v10 = vmul.f32 %v2076_v1, %v2810_v0  ;;  %v2636_v1 = vld [vmem:[%s2805_s18 + $0x60] sm:$0xff]  }
  0x21   : > { %vm709_vm9 = vcmp.ge.f32.partialorder %v581_v3, 0.0  ;;  %v837_v11 = vmul.f32 0.2, %v581_v3  ;;  %vm710_vm10 = vcmp.ge.f32.partialorder %v582_v4, 0.0  ;;  %vm711_vm11 = vcmp.ge.f32.partialorder %v583_v5, 0.0 }
  0x22   : > { %v964_v12 = vsel %vm708_vm8, %v580_v62, %v836_v7  ;;  %v838_v13 = vmul.f32 0.2, %v582_v4  ;;  %v839_v14 = vmul.f32 0.2, %v583_v5  ;;  %v584_v15 = vadd.f32 %v2819_v9, %v449_v8 }
  0x23   : > { %v965_v16 = vsel %vm709_vm9, %v581_v3, %v837_v11  ;;  %v585_v17 = vadd.f32 %v2819_v9, %v450_v10  ;;  %v451_v18 = vmul.f32 %v2079_v2, %v2810_v0  ;;  %v452_v19 = vmul.f32 %v2080_v6, %v2810_v0  ;;  %v2637_v6 = vld [vmem:[%s2805_s18 + $0x68] sm:$0xff]  }
  0x24   : > { %v2328_v21 = vpack.c.bf16 %v965_v16, %v964_v12  ;;  %v966_v22 = vsel %vm710_vm10, %v582_v4, %v838_v13  ;;  %v967_v23 = vsel %vm711_vm11, %v583_v5, %v839_v14  ;;  %vm712_vm12 = vcmp.ge.f32.partialorder %v584_v15, 0.0 }
  0x25   : > { %v2333_v25 = vpack.c.bf16 %v967_v23, %v966_v22  ;;  %vm713_vm13 = vcmp.ge.f32.partialorder %v585_v17, 0.0  ;;  %v840_v26 = vmul.f32 0.2, %v584_v15  ;;  %v841_v27 = vmul.f32 0.2, %v585_v17  ;;  %v2638_v22 = vld [vmem:[%s2805_s18 + $0x70] sm:$0xff]  }
  0x26   : > { %2691 = vst [vmem:[%s2842_s25 + $0x20] sm:$0xff] %v2328_v21   ;;  %v586_v28 = vadd.f32 %v2819_v9, %v451_v18  ;;  %v587_v29 = vadd.f32 %v2819_v9, %v452_v19  ;;  %v2083_v30 = vunpack.c.l.bf16 %v2632_v20  ;;  %v2084_v31 = vunpack.c.h.bf16 %v2632_v20 }
  0x27   : > { %2692 = vst [vmem:[%s2842_s25 + $0x28] sm:$0xff] %v2333_v25   ;;  %v968_v32 = vsel %vm712_vm12, %v584_v15, %v840_v26  ;;  %v969_v33 = vsel %vm713_vm13, %v585_v17, %v841_v27  ;;  %v2087_v34 = vunpack.c.l.bf16 %v2633_v24  ;;  %v2088_v35 = vunpack.c.h.bf16 %v2633_v24 }
  0x28   : > { %v2338_v37 = vpack.c.bf16 %v969_v33, %v968_v32  ;;  %vm714_vm14 = vcmp.ge.f32.partialorder %v586_v28, 0.0  ;;  %vm715_vm15 = vcmp.ge.f32.partialorder %v587_v29, 0.0  ;;  %v842_v38 = vmul.f32 0.2, %v586_v28 }
  0x29   : > { %v843_v39 = vmul.f32 0.2, %v587_v29  ;;  %v453_v40 = vmul.f32 %v2083_v30, %v2810_v0  ;;  %v454_v41 = vmul.f32 %v2084_v31, %v2810_v0  ;;  %v455_v42 = vmul.f32 %v2087_v34, %v2810_v0 }
  0x2a   : > { %2693 = vst [vmem:[%s2842_s25 + $0x30] sm:$0xff] %v2338_v37   ;;  %v970_v43 = vsel %vm714_vm14, %v586_v28, %v842_v38  ;;  %v456_v44 = vmul.f32 %v2088_v35, %v2810_v0  ;;  %v2091_v45 = vunpack.c.l.bf16 %v2634_v36  ;;  %v2092_v46 = vunpack.c.h.bf16 %v2634_v36 }
  0x2b   : > { %v971_v47 = vsel %vm715_vm15, %v587_v29, %v843_v39  ;;  %v588_v48 = vadd.f32 %v2819_v9, %v453_v40  ;;  %v589_v49 = vadd.f32 %v2819_v9, %v454_v41  ;;  %v590_v50 = vadd.f32 %v2819_v9, %v455_v42  ;;  %v2639_v41 = vld [vmem:[%s2805_s18 + $0x78] sm:$0xff]  }
  0x2c   : > { %v2343_v51 = vpack.c.bf16 %v971_v47, %v970_v43  ;;  %v591_v52 = vadd.f32 %v2819_v9, %v456_v44  ;;  %v457_v53 = vmul.f32 %v2091_v45, %v2810_v0  ;;  %v458_v54 = vmul.f32 %v2092_v46, %v2810_v0  ;;  %v2640_v46 = vld [vmem:[%s2805_s18 + $0x80] sm:$0xff]   ;;  %v2641_v47 = vld [vmem:[%s2805_s18 + $0x88] sm:$0xff]  }
  0x2d   : > { %vm716_vm0 = vcmp.ge.f32.partialorder %v588_v48, 0.0  ;;  %vm717_vm1 = vcmp.ge.f32.partialorder %v589_v49, 0.0  ;;  %v844_v56 = vmul.f32 0.2, %v588_v48  ;;  %v845_v57 = vmul.f32 0.2, %v589_v49 }
  0x2e   : > { %2694 = vst [vmem:[%s2842_s25 + $0x38] sm:$0xff] %v2343_v51   ;;  %vm718_vm2 = vcmp.ge.f32.partialorder %v590_v50, 0.0  ;;  %vm719_vm3 = vcmp.ge.f32.partialorder %v591_v52, 0.0  ;;  %v846_v58 = vmul.f32 0.2, %v590_v50  ;;  %v592_v62 = vadd.f32 %v2819_v9, %v457_v53 }
  0x2f   : > { %v847_v59 = vmul.f32 0.2, %v591_v52  ;;  %v972_v60 = vsel %vm716_vm0, %v588_v48, %v844_v56  ;;  %v973_v61 = vsel %vm717_vm1, %v589_v49, %v845_v57  ;;  %v593_v63 = vadd.f32 %v2819_v9, %v458_v54 }
  0x30   : > { %v2348_v2 = vpack.c.bf16 %v973_v61, %v972_v60  ;;  %v974_v3 = vsel %vm718_vm2, %v590_v50, %v846_v58  ;;  %v2095_v5 = vunpack.c.l.bf16 %v2635_v55  ;;  %vm720_vm4 = vcmp.ge.f32.partialorder %v592_v62, 0.0 }
  0x31   : > { %v975_v4 = vsel %vm719_vm3, %v591_v52, %v847_v59  ;;  %vm721_vm5 = vcmp.ge.f32.partialorder %v593_v63, 0.0  ;;  %v848_v8 = vmul.f32 0.2, %v592_v62  ;;  %v849_v10 = vmul.f32 0.2, %v593_v63 }
  0x32   : > { %v2353_v7 = vpack.c.bf16 %v975_v4, %v974_v3  ;;  %2695 = vst [vmem:[%s2842_s25 + $0x40] sm:$0xff] %v2348_v2   ;;  %v2096_v11 = vunpack.c.h.bf16 %v2635_v55  ;;  %v459_v12 = vmul.f32 %v2095_v5, %v2810_v0  ;;  %v2099_v13 = vunpack.c.l.bf16 %v2636_v1 }
  0x33   : > { %v976_v14 = vsel %vm720_vm4, %v592_v62, %v848_v8  ;;  %v2100_v15 = vunpack.c.h.bf16 %v2636_v1  ;;  %v2103_v16 = vunpack.c.l.bf16 %v2637_v6  ;;  %v2104_v17 = vunpack.c.h.bf16 %v2637_v6 }
  0x34   : > { %2696 = vst [vmem:[%s2842_s25 + $0x48] sm:$0xff] %v2353_v7   ;;  %v977_v18 = vsel %vm721_vm5, %v593_v63, %v849_v10  ;;  %v460_v19 = vmul.f32 %v2096_v11, %v2810_v0  ;;  %v594_v20 = vadd.f32 %v2819_v9, %v459_v12  ;;  %v461_v21 = vmul.f32 %v2099_v13, %v2810_v0 }
  0x35   : > { %v2358_v23 = vpack.c.bf16 %v977_v18, %v976_v14  ;;  %v462_v24 = vmul.f32 %v2100_v15, %v2810_v0  ;;  %v463_v25 = vmul.f32 %v2103_v16, %v2810_v0  ;;  %v464_v26 = vmul.f32 %v2104_v17, %v2810_v0  ;;  %v2642_v14 = vld [vmem:[%s2805_s18 + $0x90] sm:$0xff]  }
  0x36   : > { %v595_v27 = vadd.f32 %v2819_v9, %v460_v19  ;;  %vm722_vm6 = vcmp.ge.f32.partialorder %v594_v20, 0.0  ;;  %v850_v28 = vmul.f32 0.2, %v594_v20  ;;  %v596_v29 = vadd.f32 %v2819_v9, %v461_v21 }
  0x37   : > { %2697 = vst [vmem:[%s2842_s25 + $0x50] sm:$0xff] %v2358_v23   ;;  %v597_v30 = vadd.f32 %v2819_v9, %v462_v24  ;;  %v598_v31 = vadd.f32 %v2819_v9, %v463_v25  ;;  %v599_v32 = vadd.f32 %v2819_v9, %v464_v26  ;;  %v2107_v33 = vunpack.c.l.bf16 %v2638_v22  ;;  %v2643_v25 = vld [vmem:[%s2805_s18 + $0x98] sm:$0xff]  }
  0x38   : > { %vm723_vm7 = vcmp.ge.f32.partialorder %v595_v27, 0.0  ;;  %v851_v34 = vmul.f32 0.2, %v595_v27  ;;  %v978_v35 = vsel %vm722_vm6, %v594_v20, %v850_v28  ;;  %vm724_vm8 = vcmp.ge.f32.partialorder %v596_v29, 0.0 }
  0x39   : > { %vm725_vm9 = vcmp.ge.f32.partialorder %v597_v30, 0.0  ;;  %v852_v36 = vmul.f32 0.2, %v596_v29  ;;  %v853_v37 = vmul.f32 0.2, %v597_v30  ;;  %vm726_vm10 = vcmp.ge.f32.partialorder %v598_v31, 0.0 }
  0x3a   : > { %v979_v38 = vsel %vm723_vm7, %v595_v27, %v851_v34  ;;  %vm727_vm11 = vcmp.ge.f32.partialorder %v599_v32, 0.0  ;;  %v854_v39 = vmul.f32 0.2, %v598_v31  ;;  %v855_v40 = vmul.f32 0.2, %v599_v32 }
  0x3b   : > { %v2363_v42 = vpack.c.bf16 %v979_v38, %v978_v35  ;;  %v980_v43 = vsel %vm724_vm8, %v596_v29, %v852_v36  ;;  %v981_v44 = vsel %vm725_vm9, %v597_v30, %v853_v37  ;;  %v2108_v45 = vunpack.c.h.bf16 %v2638_v22  ;;  %v2644_v30 = vld [vmem:[%s2805_s18 + $0xa0] sm:$0xff]  }
  0x3c   : > { %v2368_v48 = vpack.c.bf16 %v981_v44, %v980_v43  ;;  %v982_v49 = vsel %vm726_vm10, %v598_v31, %v854_v39  ;;  %v983_v50 = vsel %vm727_vm11, %v599_v32, %v855_v40  ;;  %v465_v51 = vmul.f32 %v2107_v33, %v2810_v0 }
  0x3d   : > { %2698 = vst [vmem:[%s2842_s25 + $0x58] sm:$0xff] %v2363_v42   ;;  %v2373_v52 = vpack.c.bf16 %v983_v50, %v982_v49  ;;  %v466_v53 = vmul.f32 %v2108_v45, %v2810_v0  ;;  %v2111_v54 = vunpack.c.l.bf16 %v2639_v41  ;;  %v2112_v55 = vunpack.c.h.bf16 %v2639_v41  ;;  %v2645_v45 = vld [vmem:[%s2805_s18 + $0xa8] sm:$0xff]  }
  0x3e   : > { %2699 = vst [vmem:[%s2842_s25 + $0x60] sm:$0xff] %v2368_v48   ;;  %v600_v56 = vadd.f32 %v2819_v9, %v465_v51  ;;  %v2115_v57 = vunpack.c.l.bf16 %v2640_v46  ;;  %v2116_v58 = vunpack.c.h.bf16 %v2640_v46  ;;  %v2119_v59 = vunpack.c.l.bf16 %v2641_v47 }
  0x3f   : > { %2700 = vst [vmem:[%s2842_s25 + $0x68] sm:$0xff] %v2373_v52   ;;  %v601_v60 = vadd.f32 %v2819_v9, %v466_v53  ;;  %v467_v61 = vmul.f32 %v2111_v54, %v2810_v0  ;;  %v468_v62 = vmul.f32 %v2112_v55, %v2810_v0  ;;  %v2120_v63 = vunpack.c.h.bf16 %v2641_v47 }
  0x40   : > { %vm728_vm12 = vcmp.ge.f32.partialorder %v600_v56, 0.0  ;;  %v856_v1 = vmul.f32 0.2, %v600_v56  ;;  %v469_v2 = vmul.f32 %v2115_v57, %v2810_v0  ;;  %v470_v3 = vmul.f32 %v2116_v58, %v2810_v0 }
  0x41   : > { %vm729_vm13 = vcmp.ge.f32.partialorder %v601_v60, 0.0  ;;  %v857_v4 = vmul.f32 0.2, %v601_v60  ;;  %v602_v5 = vadd.f32 %v2819_v9, %v467_v61  ;;  %v603_v6 = vadd.f32 %v2819_v9, %v468_v62  ;;  %v2646_v62 = vld [vmem:[%s2805_s18 + $0xb0] sm:$0xff]  }
  0x42   : > { %v984_v7 = vsel %vm728_vm12, %v600_v56, %v856_v1  ;;  %v604_v8 = vadd.f32 %v2819_v9, %v469_v2  ;;  %v605_v10 = vadd.f32 %v2819_v9, %v470_v3  ;;  %v471_v11 = vmul.f32 %v2119_v59, %v2810_v0  ;;  %v2647_v3 = vld [vmem:[%s2805_s18 + $0xb8] sm:$0xff]  }
  0x43   : > { %v985_v12 = vsel %vm729_vm13, %v601_v60, %v857_v4  ;;  %vm730_vm14 = vcmp.ge.f32.partialorder %v602_v5, 0.0  ;;  %vm731_vm15 = vcmp.ge.f32.partialorder %v603_v6, 0.0  ;;  %v858_v13 = vmul.f32 0.2, %v602_v5 }
  0x44   : > { %v2378_v15 = vpack.c.bf16 %v985_v12, %v984_v7  ;;  %v859_v16 = vmul.f32 0.2, %v603_v6  ;;  %vm732_vm0 = vcmp.ge.f32.partialorder %v604_v8, 0.0  ;;  %vm733_vm1 = vcmp.ge.f32.partialorder %v605_v10, 0.0 }
  0x45   : > { %v986_v17 = vsel %vm730_vm14, %v602_v5, %v858_v13  ;;  %v860_v18 = vmul.f32 0.2, %v604_v8  ;;  %v861_v19 = vmul.f32 0.2, %v605_v10  ;;  %v472_v20 = vmul.f32 %v2120_v63, %v2810_v0 }
  0x46   : > { %2701 = vst [vmem:[%s2842_s25 + $0x70] sm:$0xff] %v2378_v15   ;;  %v987_v21 = vsel %vm731_vm15, %v603_v6, %v859_v16  ;;  %v606_v22 = vadd.f32 %v2819_v9, %v471_v11  ;;  %v2123_v23 = vunpack.c.l.bf16 %v2642_v14  ;;  %v2124_v24 = vunpack.c.h.bf16 %v2642_v14 }
  0x47   : > { %v2383_v26 = vpack.c.bf16 %v987_v21, %v986_v17  ;;  %v988_v27 = vsel %vm732_vm0, %v604_v8, %v860_v18  ;;  %v989_v28 = vsel %vm733_vm1, %v605_v10, %v861_v19  ;;  %v607_v29 = vadd.f32 %v2819_v9, %v472_v20  ;;  %v2648_v20 = vld [vmem:[%s2805_s18 + $0xc0] sm:$0xff]  }
  0x48   : > { %v2388_v31 = vpack.c.bf16 %v989_v28, %v988_v27  ;;  %vm734_vm2 = vcmp.ge.f32.partialorder %v606_v22, 0.0  ;;  %v862_v32 = vmul.f32 0.2, %v606_v22  ;;  %v473_v33 = vmul.f32 %v2123_v23, %v2810_v0 }
  0x49   : > { %2702 = vst [vmem:[%s2842_s25 + $0x78] sm:$0xff] %v2383_v26   ;;  %vm735_vm3 = vcmp.ge.f32.partialorder %v607_v29, 0.0  ;;  %v863_v34 = vmul.f32 0.2, %v607_v29  ;;  %v474_v35 = vmul.f32 %v2124_v24, %v2810_v0  ;;  %v2127_v36 = vunpack.c.l.bf16 %v2643_v25 }
  0x4a   : > { %2703 = vst [vmem:[%s2842_s25 + $0x80] sm:$0xff] %v2388_v31   ;;  %v990_v37 = vsel %vm734_vm2, %v606_v22, %v862_v32  ;;  %v608_v38 = vadd.f32 %v2819_v9, %v473_v33  ;;  %v2128_v39 = vunpack.c.h.bf16 %v2643_v25  ;;  %v2131_v40 = vunpack.c.l.bf16 %v2644_v30 }
  0x4b   : > { %v991_v41 = vsel %vm735_vm3, %v607_v29, %v863_v34  ;;  %v609_v42 = vadd.f32 %v2819_v9, %v474_v35  ;;  %v475_v43 = vmul.f32 %v2127_v36, %v2810_v0  ;;  %v2132_v44 = vunpack.c.h.bf16 %v2644_v30  ;;  %v2649_v34 = vld [vmem:[%s2805_s18 + $0xc8] sm:$0xff]  }
  0x4c   : > { %v2393_v46 = vpack.c.bf16 %v991_v41, %v990_v37  ;;  %vm736_vm4 = vcmp.ge.f32.partialorder %v608_v38, 0.0  ;;  %v864_v47 = vmul.f32 0.2, %v608_v38  ;;  %v476_v48 = vmul.f32 %v2128_v39, %v2810_v0 }
  0x4d   : > { %vm737_vm5 = vcmp.ge.f32.partialorder %v609_v42, 0.0  ;;  %v865_v49 = vmul.f32 0.2, %v609_v42  ;;  %v610_v50 = vadd.f32 %v2819_v9, %v475_v43  ;;  %v477_v51 = vmul.f32 %v2131_v40, %v2810_v0 }
  0x4e   : > { %2704 = vst [vmem:[%s2842_s25 + $0x88] sm:$0xff] %v2393_v46   ;;  %v992_v52 = vsel %vm736_vm4, %v608_v38, %v864_v47  ;;  %v611_v53 = vadd.f32 %v2819_v9, %v476_v48  ;;  %v478_v54 = vmul.f32 %v2132_v44, %v2810_v0  ;;  %v2135_v55 = vunpack.c.l.bf16 %v2645_v45  ;;  %v2650_v44 = vld [vmem:[%s2805_s18 + $0xd0] sm:$0xff]  }
  0x4f   : > { %v993_v56 = vsel %vm737_vm5, %v609_v42, %v865_v49  ;;  %vm738_vm6 = vcmp.ge.f32.partialorder %v610_v50, 0.0  ;;  %v866_v57 = vmul.f32 0.2, %v610_v50  ;;  %v612_v58 = vadd.f32 %v2819_v9, %v477_v51 }
  0x50   : > { %v2398_v59 = vpack.c.bf16 %v993_v56, %v992_v52  ;;  %vm739_vm7 = vcmp.ge.f32.partialorder %v611_v53, 0.0  ;;  %v867_v60 = vmul.f32 0.2, %v611_v53  ;;  %v613_v61 = vadd.f32 %v2819_v9, %v478_v54 }
  0x51   : > { %v994_v63 = vsel %vm738_vm6, %v610_v50, %v866_v57  ;;  %vm740_vm8 = vcmp.ge.f32.partialorder %v612_v58, 0.0  ;;  %v868_v1 = vmul.f32 0.2, %v612_v58  ;;  %v2136_v2 = vunpack.c.h.bf16 %v2645_v45  ;;  %v2651_v45 = vld [vmem:[%s2805_s18 + $0xd8] sm:$0xff]  }
  0x52   : > { %2705 = vst [vmem:[%s2842_s25 + $0x90] sm:$0xff] %v2398_v59   ;;  %v995_v4 = vsel %vm739_vm7, %v611_v53, %v867_v60  ;;  %vm741_vm9 = vcmp.ge.f32.partialorder %v613_v61, 0.0  ;;  %v869_v5 = vmul.f32 0.2, %v613_v61  ;;  %v479_v6 = vmul.f32 %v2135_v55, %v2810_v0 }
  0x53   : > { %v2403_v7 = vpack.c.bf16 %v995_v4, %v994_v63  ;;  %v996_v8 = vsel %vm740_vm8, %v612_v58, %v868_v1  ;;  %v480_v10 = vmul.f32 %v2136_v2, %v2810_v0  ;;  %v2139_v11 = vunpack.c.l.bf16 %v2646_v62 }
  0x54   : > { %v997_v12 = vsel %vm741_vm9, %v613_v61, %v869_v5  ;;  %v614_v13 = vadd.f32 %v2819_v9, %v479_v6  ;;  %v2140_v14 = vunpack.c.h.bf16 %v2646_v62  ;;  %v2143_v15 = vunpack.c.l.bf16 %v2647_v3 }
  0x55   : > { %2706 = vst [vmem:[%s2842_s25 + $0x98] sm:$0xff] %v2403_v7   ;;  %v2408_v16 = vpack.c.bf16 %v997_v12, %v996_v8  ;;  %v615_v17 = vadd.f32 %v2819_v9, %v480_v10  ;;  %v481_v18 = vmul.f32 %v2139_v11, %v2810_v0  ;;  %v2144_v19 = vunpack.c.h.bf16 %v2647_v3  ;;  %v2652_v12 = vld [vmem:[%s2805_s18 + $0xe0] sm:$0xff]  }
  0x56   : > { %vm742_vm10 = vcmp.ge.f32.partialorder %v614_v13, 0.0  ;;  %v870_v21 = vmul.f32 0.2, %v614_v13  ;;  %v482_v22 = vmul.f32 %v2140_v14, %v2810_v0  ;;  %v483_v23 = vmul.f32 %v2143_v15, %v2810_v0 }
  0x57   : > { %2707 = vst [vmem:[%s2842_s25 + $0xa0] sm:$0xff] %v2408_v16   ;;  %vm743_vm11 = vcmp.ge.f32.partialorder %v615_v17, 0.0  ;;  %v871_v24 = vmul.f32 0.2, %v615_v17  ;;  %v616_v25 = vadd.f32 %v2819_v9, %v481_v18  ;;  %v484_v26 = vmul.f32 %v2144_v19, %v2810_v0  ;;  %v2653_v16 = vld [vmem:[%s2805_s18 + $0xe8] sm:$0xff]  }
  0x58   : > { %v998_v27 = vsel %vm742_vm10, %v614_v13, %v870_v21  ;;  %v617_v28 = vadd.f32 %v2819_v9, %v482_v22  ;;  %v618_v29 = vadd.f32 %v2819_v9, %v483_v23  ;;  %v2147_v30 = vunpack.c.l.bf16 %v2648_v20 }
  0x59   : > { %v999_v31 = vsel %vm743_vm11, %v615_v17, %v871_v24  ;;  %vm744_vm12 = vcmp.ge.f32.partialorder %v616_v25, 0.0  ;;  %v872_v32 = vmul.f32 0.2, %v616_v25  ;;  %v619_v33 = vadd.f32 %v2819_v9, %v484_v26 }
  0x5a   : > { %v2413_v35 = vpack.c.bf16 %v999_v31, %v998_v27  ;;  %vm745_vm13 = vcmp.ge.f32.partialorder %v617_v28, 0.0  ;;  %v873_v36 = vmul.f32 0.2, %v617_v28  ;;  %vm746_vm14 = vcmp.ge.f32.partialorder %v618_v29, 0.0 }
  0x5b   : > { %v1000_v37 = vsel %vm744_vm12, %v616_v25, %v872_v32  ;;  %vm747_vm15 = vcmp.ge.f32.partialorder %v619_v33, 0.0  ;;  %v874_v38 = vmul.f32 0.2, %v618_v29  ;;  %v875_v39 = vmul.f32 0.2, %v619_v33 }
  0x5c   : > { %2708 = vst [vmem:[%s2842_s25 + $0xa8] sm:$0xff] %v2413_v35   ;;  %v1001_v40 = vsel %vm745_vm13, %v617_v28, %v873_v36  ;;  %v2148_v41 = vunpack.c.h.bf16 %v2648_v20  ;;  %v485_v42 = vmul.f32 %v2147_v30, %v2810_v0  ;;  %v2151_v43 = vunpack.c.l.bf16 %v2649_v34  ;;  %v2654_v28 = vld [vmem:[%s2805_s18 + $0xf0] sm:$0xff]  }
  0x5d   : > { %v2418_v46 = vpack.c.bf16 %v1001_v40, %v1000_v37  ;;  %v1002_v47 = vsel %vm746_vm14, %v618_v29, %v874_v38  ;;  %v1003_v48 = vsel %vm747_vm15, %v619_v33, %v875_v39  ;;  %v2152_v49 = vunpack.c.h.bf16 %v2649_v34 }
  0x5e   : > { %v2423_v50 = vpack.c.bf16 %v1003_v48, %v1002_v47  ;;  %v486_v51 = vmul.f32 %v2148_v41, %v2810_v0  ;;  %v620_v52 = vadd.f32 %v2819_v9, %v485_v42  ;;  %v487_v53 = vmul.f32 %v2151_v43, %v2810_v0  ;;  %v2655_v47 = vld [vmem:[%s2805_s18 + $0xf8] sm:$0xff]  }
  0x5f   : > { %2709 = vst [vmem:[%s2842_s25 + $0xb0] sm:$0xff] %v2418_v46   ;;  %v488_v54 = vmul.f32 %v2152_v49, %v2810_v0  ;;  %v2155_v55 = vunpack.c.l.bf16 %v2650_v44  ;;  %v2156_v56 = vunpack.c.h.bf16 %v2650_v44  ;;  %v2159_v57 = vunpack.c.l.bf16 %v2651_v45 }
  0x60   : > { %2710 = vst [vmem:[%s2842_s25 + $0xb8] sm:$0xff] %v2423_v50   ;;  %v621_v58 = vadd.f32 %v2819_v9, %v486_v51  ;;  %vm748_vm0 = vcmp.ge.f32.partialorder %v620_v52, 0.0  ;;  %v876_v59 = vmul.f32 0.2, %v620_v52  ;;  %v622_v60 = vadd.f32 %v2819_v9, %v487_v53 }
  0x61   : > { %v623_v61 = vadd.f32 %v2819_v9, %v488_v54  ;;  %v489_v62 = vmul.f32 %v2155_v55, %v2810_v0  ;;  %v490_v63 = vmul.f32 %v2156_v56, %v2810_v0  ;;  %v2160_v1 = vunpack.c.h.bf16 %v2651_v45  ;;  %v2656_v56 = vld [vmem:[%s2805_s18 + $0x100] sm:$0xff]  }
  0x62   : > { %vm749_vm1 = vcmp.ge.f32.partialorder %v621_v58, 0.0  ;;  %v877_v2 = vmul.f32 0.2, %v621_v58  ;;  %v1004_v3 = vsel %vm748_vm0, %v620_v52, %v876_v59  ;;  %vm750_vm2 = vcmp.ge.f32.partialorder %v622_v60, 0.0 }
  0x63   : > { %vm751_vm3 = vcmp.ge.f32.partialorder %v623_v61, 0.0  ;;  %v878_v4 = vmul.f32 0.2, %v622_v60  ;;  %v879_v5 = vmul.f32 0.2, %v623_v61  ;;  %v624_v6 = vadd.f32 %v2819_v9, %v489_v62 }
  0x64   : > { %v1005_v7 = vsel %vm749_vm1, %v621_v58, %v877_v2  ;;  %v625_v8 = vadd.f32 %v2819_v9, %v490_v63  ;;  %v491_v10 = vmul.f32 %v2159_v57, %v2810_v0  ;;  %v492_v11 = vmul.f32 %v2160_v1, %v2810_v0 }
  0x65   : > { %v2428_v13 = vpack.c.bf16 %v1005_v7, %v1004_v3  ;;  %v1006_v14 = vsel %vm750_vm2, %v622_v60, %v878_v4  ;;  %v1007_v15 = vsel %vm751_vm3, %v623_v61, %v879_v5  ;;  %vm752_vm4 = vcmp.ge.f32.partialorder %v624_v6, 0.0  ;;  %v2657_v61 = vld [vmem:[%s2805_s18 + $0x108] sm:$0xff]  }
  0x66   : > { %v2433_v17 = vpack.c.bf16 %v1007_v15, %v1006_v14  ;;  %vm753_vm5 = vcmp.ge.f32.partialorder %v625_v8, 0.0  ;;  %v880_v18 = vmul.f32 0.2, %v624_v6  ;;  %v881_v19 = vmul.f32 0.2, %v625_v8  ;;  %v2658_v14 = vld [vmem:[%s2805_s18 + $0x110] sm:$0xff]  }
  0x67   : > { %2711 = vst [vmem:[%s2842_s25 + $0xc0] sm:$0xff] %v2428_v13   ;;  %v626_v20 = vadd.f32 %v2819_v9, %v491_v10  ;;  %v627_v21 = vadd.f32 %v2819_v9, %v492_v11  ;;  %v2163_v22 = vunpack.c.l.bf16 %v2652_v12  ;;  %v2164_v23 = vunpack.c.h.bf16 %v2652_v12 }
  0x68   : > { %2712 = vst [vmem:[%s2842_s25 + $0xc8] sm:$0xff] %v2433_v17   ;;  %v1008_v24 = vsel %vm752_vm4, %v624_v6, %v880_v18  ;;  %v1009_v25 = vsel %vm753_vm5, %v625_v8, %v881_v19  ;;  %v2167_v26 = vunpack.c.l.bf16 %v2653_v16  ;;  %v2168_v27 = vunpack.c.h.bf16 %v2653_v16 }
  0x69   : > { %v2438_v29 = vpack.c.bf16 %v1009_v25, %v1008_v24  ;;  %vm754_vm6 = vcmp.ge.f32.partialorder %v626_v20, 0.0  ;;  %vm755_vm7 = vcmp.ge.f32.partialorder %v627_v21, 0.0  ;;  %v882_v30 = vmul.f32 0.2, %v626_v20 }
  0x6a   : > { %v883_v31 = vmul.f32 0.2, %v627_v21  ;;  %v493_v32 = vmul.f32 %v2163_v22, %v2810_v0  ;;  %v494_v33 = vmul.f32 %v2164_v23, %v2810_v0  ;;  %v495_v34 = vmul.f32 %v2167_v26, %v2810_v0 }
  0x6b   : > { %2713 = vst [vmem:[%s2842_s25 + $0xd0] sm:$0xff] %v2438_v29   ;;  %v1010_v35 = vsel %vm754_vm6, %v626_v20, %v882_v30  ;;  %v496_v36 = vmul.f32 %v2168_v27, %v2810_v0  ;;  %v2171_v37 = vunpack.c.l.bf16 %v2654_v28  ;;  %v2172_v38 = vunpack.c.h.bf16 %v2654_v28 }
  0x6c   : > { %v1011_v39 = vsel %vm755_vm7, %v627_v21, %v883_v31  ;;  %v628_v40 = vadd.f32 %v2819_v9, %v493_v32  ;;  %v629_v41 = vadd.f32 %v2819_v9, %v494_v33  ;;  %v630_v42 = vadd.f32 %v2819_v9, %v495_v34  ;;  %v2659_v32 = vld [vmem:[%s2805_s18 + $0x118] sm:$0xff]  }
  0x6d   : > { %v2443_v43 = vpack.c.bf16 %v1011_v39, %v1010_v35  ;;  %v631_v44 = vadd.f32 %v2819_v9, %v496_v36  ;;  %v497_v45 = vmul.f32 %v2171_v37, %v2810_v0  ;;  %v498_v46 = vmul.f32 %v2172_v38, %v2810_v0  ;;  %v2660_v36 = vld [vmem:[%s2805_s18 + $0x120] sm:$0xff]   ;;  %v2661_v37 = vld [vmem:[%s2805_s18 + $0x128] sm:$0xff]  }
  0x6e   : > { %vm756_vm8 = vcmp.ge.f32.partialorder %v628_v40, 0.0  ;;  %vm757_vm9 = vcmp.ge.f32.partialorder %v629_v41, 0.0  ;;  %v884_v48 = vmul.f32 0.2, %v628_v40  ;;  %v885_v49 = vmul.f32 0.2, %v629_v41 }
  0x6f   : > { %2714 = vst [vmem:[%s2842_s25 + $0xd8] sm:$0xff] %v2443_v43   ;;  %vm758_vm10 = vcmp.ge.f32.partialorder %v630_v42, 0.0  ;;  %vm759_vm11 = vcmp.ge.f32.partialorder %v631_v44, 0.0  ;;  %v886_v50 = vmul.f32 0.2, %v630_v42  ;;  %v632_v54 = vadd.f32 %v2819_v9, %v497_v45 }
  0x70   : > { %v887_v51 = vmul.f32 0.2, %v631_v44  ;;  %v1012_v52 = vsel %vm756_vm8, %v628_v40, %v884_v48  ;;  %v1013_v53 = vsel %vm757_vm9, %v629_v41, %v885_v49  ;;  %v633_v55 = vadd.f32 %v2819_v9, %v498_v46  ;;  %v3033_v41 = vld [vmem:[%s3223_s1] ss:$0 sm:$0xff] }
  0x71   : > { %v2448_v57 = vpack.c.bf16 %v1013_v53, %v1012_v52  ;;  %v1014_v58 = vsel %vm758_vm10, %v630_v42, %v886_v50  ;;  %v2175_v60 = vunpack.c.l.bf16 %v2655_v47  ;;  %vm760_vm12 = vcmp.ge.f32.partialorder %v632_v54, 0.0 }
  0x72   : > { %v1015_v59 = vsel %vm759_vm11, %v631_v44, %v887_v51  ;;  %vm761_vm13 = vcmp.ge.f32.partialorder %v633_v55, 0.0  ;;  %v888_v63 = vmul.f32 0.2, %v632_v54  ;;  %v889_v1 = vmul.f32 0.2, %v633_v55 }
  0x73   : > { %v2453_v62 = vpack.c.bf16 %v1015_v59, %v1014_v58  ;;  %2715 = vst [vmem:[%s2842_s25 + $0xe0] sm:$0xff] %v2448_v57   ;;  %v2176_v2 = vunpack.c.h.bf16 %v2655_v47  ;;  %v499_v3 = vmul.f32 %v2175_v60, %v2810_v0  ;;  %v2179_v4 = vunpack.c.l.bf16 %v2656_v56  ;;  %v3042_v47 = vld [vmem:[%s3224_s2] ss:$0 sm:$0xff] }
  0x74   : > { %v1016_v5 = vsel %vm760_vm12, %v632_v54, %v888_v63  ;;  %v2180_v6 = vunpack.c.h.bf16 %v2656_v56  ;;  %v2183_v7 = vunpack.c.l.bf16 %v2657_v61  ;;  %v2184_v8 = vunpack.c.h.bf16 %v2657_v61 }
  0x75   : > { %2716 = vst [vmem:[%s2842_s25 + $0xe8] sm:$0xff] %v2453_v62   ;;  %v1017_v10 = vsel %vm761_vm13, %v633_v55, %v889_v1  ;;  %v500_v11 = vmul.f32 %v2176_v2, %v2810_v0  ;;  %v634_v12 = vadd.f32 %v2819_v9, %v499_v3  ;;  %v501_v13 = vmul.f32 %v2179_v4, %v2810_v0 }
  0x76   : > { %v2458_v15 = vpack.c.bf16 %v1017_v10, %v1016_v5  ;;  %v502_v16 = vmul.f32 %v2180_v6, %v2810_v0  ;;  %v503_v17 = vmul.f32 %v2183_v7, %v2810_v0  ;;  %v504_v18 = vmul.f32 %v2184_v8, %v2810_v0  ;;  %v2662_v5 = vld [vmem:[%s2805_s18 + $0x130] sm:$0xff]  }
  0x77   : > { %v635_v19 = vadd.f32 %v2819_v9, %v500_v11  ;;  %vm762_vm14 = vcmp.ge.f32.partialorder %v634_v12, 0.0  ;;  %v890_v20 = vmul.f32 0.2, %v634_v12  ;;  %v636_v21 = vadd.f32 %v2819_v9, %v501_v13 }
  0x78   : > { %2717 = vst [vmem:[%s2842_s25 + $0xf0] sm:$0xff] %v2458_v15   ;;  %v637_v22 = vadd.f32 %v2819_v9, %v502_v16  ;;  %v638_v23 = vadd.f32 %v2819_v9, %v503_v17  ;;  %v639_v24 = vadd.f32 %v2819_v9, %v504_v18  ;;  %v2187_v25 = vunpack.c.l.bf16 %v2658_v14  ;;  %v2663_v17 = vld [vmem:[%s2805_s18 + $0x138] sm:$0xff]  }
  0x79   : > { %vm763_vm15 = vcmp.ge.f32.partialorder %v635_v19, 0.0  ;;  %v891_v26 = vmul.f32 0.2, %v635_v19  ;;  %v1018_v27 = vsel %vm762_vm14, %v634_v12, %v890_v20  ;;  %vm764_vm0 = vcmp.ge.f32.partialorder %v636_v21, 0.0 }
  0x7a   : > { %vm765_vm1 = vcmp.ge.f32.partialorder %v637_v22, 0.0  ;;  %v892_v0 = vmul.f32 0.2, %v636_v21  ;;  %v893_v28 = vmul.f32 0.2, %v637_v22  ;;  %vm766_vm2 = vcmp.ge.f32.partialorder %v638_v23, 0.0 }
  0x7b   : > { %v1019_v29 = vsel %vm763_vm15, %v635_v19, %v891_v26  ;;  %vm767_vm3 = vcmp.ge.f32.partialorder %v639_v24, 0.0  ;;  %v894_v30 = vmul.f32 0.2, %v638_v23  ;;  %v895_v31 = vmul.f32 0.2, %v639_v24 }
  0x7c   : > { %v2463_v33 = vpack.c.bf16 %v1019_v29, %v1018_v27  ;;  %v1020_v9 = vsel %vm764_vm0, %v636_v21, %v892_v0  ;;  %v1021_v34 = vsel %vm765_vm1, %v637_v22, %v893_v28  ;;  %v2188_v35 = vunpack.c.h.bf16 %v2658_v14  ;;  %v2664_v22 = vld [vmem:[%s2805_s18 + $0x140] sm:$0xff]  }
  0x7d   : > { %v2468_v38 = vpack.c.bf16 %v1021_v34, %v1020_v9  ;;  %v1022_v39 = vsel %vm766_vm2, %v638_v23, %v894_v30  ;;  %v1023_v40 = vsel %vm767_vm3, %v639_v24, %v895_v31  ;;  %v505_v42 = vmul.f32 %v3033_v41, %v2187_v25 }
  0x7e   : > { %2718 = vst [vmem:[%s2842_s25 + $0xf8] sm:$0xff] %v2463_v33   ;;  %v2473_v43 = vpack.c.bf16 %v1023_v40, %v1022_v39  ;;  %v506_v44 = vmul.f32 %v3033_v41, %v2188_v35  ;;  %v2191_v45 = vunpack.c.l.bf16 %v2659_v32  ;;  %v2192_v46 = vunpack.c.h.bf16 %v2659_v32  ;;  %v2665_v35 = vld [vmem:[%s2805_s18 + $0x148] sm:$0xff]  }
  0x7f   : > { %2719 = vst [vmem:[%s2842_s25 + $0x100] sm:$0xff] %v2468_v38   ;;  %v640_v48 = vadd.f32 %v3042_v47, %v505_v42  ;;  %v2195_v49 = vunpack.c.l.bf16 %v2660_v36  ;;  %v2196_v50 = vunpack.c.h.bf16 %v2660_v36  ;;  %v2199_v51 = vunpack.c.l.bf16 %v2661_v37 }
  0x80   : > { %2720 = vst [vmem:[%s2842_s25 + $0x108] sm:$0xff] %v2473_v43   ;;  %v641_v52 = vadd.f32 %v3042_v47, %v506_v44  ;;  %v507_v53 = vmul.f32 %v3033_v41, %v2191_v45  ;;  %v508_v54 = vmul.f32 %v3033_v41, %v2192_v46  ;;  %v2200_v55 = vunpack.c.h.bf16 %v2661_v37 }
  0x81   : > { %vm768_vm4 = vcmp.ge.f32.partialorder %v640_v48, 0.0  ;;  %v896_v56 = vmul.f32 0.2, %v640_v48  ;;  %v509_v57 = vmul.f32 %v3033_v41, %v2195_v49  ;;  %v510_v58 = vmul.f32 %v3033_v41, %v2196_v50 }
  0x82   : > { %vm769_vm5 = vcmp.ge.f32.partialorder %v641_v52, 0.0  ;;  %v897_v59 = vmul.f32 0.2, %v641_v52  ;;  %v642_v60 = vadd.f32 %v3042_v47, %v507_v53  ;;  %v643_v61 = vadd.f32 %v3042_v47, %v508_v54  ;;  %v2666_v54 = vld [vmem:[%s2805_s18 + $0x150] sm:$0xff]  }
  0x83   : > { %v1024_v62 = vsel %vm768_vm4, %v640_v48, %v896_v56  ;;  %v644_v63 = vadd.f32 %v3042_v47, %v509_v57  ;;  %v645_v1 = vadd.f32 %v3042_v47, %v510_v58  ;;  %v511_v2 = vmul.f32 %v3033_v41, %v2199_v51  ;;  %v2667_v58 = vld [vmem:[%s2805_s18 + $0x158] sm:$0xff]  }
  0x84   : > { %v1025_v3 = vsel %vm769_vm5, %v641_v52, %v897_v59  ;;  %vm770_vm6 = vcmp.ge.f32.partialorder %v642_v60, 0.0  ;;  %vm771_vm7 = vcmp.ge.f32.partialorder %v643_v61, 0.0  ;;  %v898_v4 = vmul.f32 0.2, %v642_v60 }
  0x85   : > { %v2478_v6 = vpack.c.bf16 %v1025_v3, %v1024_v62  ;;  %v899_v7 = vmul.f32 0.2, %v643_v61  ;;  %vm772_vm8 = vcmp.ge.f32.partialorder %v644_v63, 0.0  ;;  %vm773_vm9 = vcmp.ge.f32.partialorder %v645_v1, 0.0 }
  0x86   : > { %v1026_v8 = vsel %vm770_vm6, %v642_v60, %v898_v4  ;;  %v900_v10 = vmul.f32 0.2, %v644_v63  ;;  %v901_v11 = vmul.f32 0.2, %v645_v1  ;;  %v512_v12 = vmul.f32 %v3033_v41, %v2200_v55 }
  0x87   : > { %2721 = vst [vmem:[%s2842_s25 + $0x110] sm:$0xff] %v2478_v6   ;;  %v1027_v13 = vsel %vm771_vm7, %v643_v61, %v899_v7  ;;  %v646_v14 = vadd.f32 %v3042_v47, %v511_v2  ;;  %v2203_v15 = vunpack.c.l.bf16 %v2662_v5  ;;  %v2204_v16 = vunpack.c.h.bf16 %v2662_v5 }
  0x88   : > { %v2483_v18 = vpack.c.bf16 %v1027_v13, %v1026_v8  ;;  %v1028_v19 = vsel %vm772_vm8, %v644_v63, %v900_v10  ;;  %v1029_v20 = vsel %vm773_vm9, %v645_v1, %v901_v11  ;;  %v647_v21 = vadd.f32 %v3042_v47, %v512_v12  ;;  %v2668_v12 = vld [vmem:[%s2805_s18 + $0x160] sm:$0xff]  }
  0x89   : > { %v2488_v23 = vpack.c.bf16 %v1029_v20, %v1028_v19  ;;  %vm774_vm10 = vcmp.ge.f32.partialorder %v646_v14, 0.0  ;;  %v902_v24 = vmul.f32 0.2, %v646_v14  ;;  %v513_v25 = vmul.f32 %v3033_v41, %v2203_v15 }
  0x8a   : > { %2722 = vst [vmem:[%s2842_s25 + $0x118] sm:$0xff] %v2483_v18   ;;  %vm775_vm11 = vcmp.ge.f32.partialorder %v647_v21, 0.0  ;;  %v903_v26 = vmul.f32 0.2, %v647_v21  ;;  %v514_v27 = vmul.f32 %v3033_v41, %v2204_v16  ;;  %v2207_v0 = vunpack.c.l.bf16 %v2663_v17 }
  0x8b   : > { %2723 = vst [vmem:[%s2842_s25 + $0x120] sm:$0xff] %v2488_v23   ;;  %v1030_v28 = vsel %vm774_vm10, %v646_v14, %v902_v24  ;;  %v648_v29 = vadd.f32 %v3042_v47, %v513_v25  ;;  %v2208_v30 = vunpack.c.h.bf16 %v2663_v17  ;;  %v2211_v31 = vunpack.c.l.bf16 %v2664_v22 }
  0x8c   : > { %v1031_v32 = vsel %vm775_vm11, %v647_v21, %v903_v26  ;;  %v649_v33 = vadd.f32 %v3042_v47, %v514_v27  ;;  %v515_v9 = vmul.f32 %v3033_v41, %v2207_v0  ;;  %v2212_v34 = vunpack.c.h.bf16 %v2664_v22  ;;  %v2669_v26 = vld [vmem:[%s2805_s18 + $0x168] sm:$0xff]  }
  0x8d   : > { %v2493_v36 = vpack.c.bf16 %v1031_v32, %v1030_v28  ;;  %vm776_vm12 = vcmp.ge.f32.partialorder %v648_v29, 0.0  ;;  %v904_v37 = vmul.f32 0.2, %v648_v29  ;;  %v516_v38 = vmul.f32 %v3033_v41, %v2208_v30 }
  0x8e   : > { %vm777_vm13 = vcmp.ge.f32.partialorder %v649_v33, 0.0  ;;  %v905_v39 = vmul.f32 0.2, %v649_v33  ;;  %v650_v40 = vadd.f32 %v3042_v47, %v515_v9  ;;  %v517_v42 = vmul.f32 %v3033_v41, %v2211_v31 }
  0x8f   : > { %2724 = vst [vmem:[%s2842_s25 + $0x128] sm:$0xff] %v2493_v36   ;;  %v1032_v43 = vsel %vm776_vm12, %v648_v29, %v904_v37  ;;  %v651_v44 = vadd.f32 %v3042_v47, %v516_v38  ;;  %v518_v45 = vmul.f32 %v3033_v41, %v2212_v34  ;;  %v2215_v46 = vunpack.c.l.bf16 %v2665_v35  ;;  %v2670_v34 = vld [vmem:[%s2805_s18 + $0x170] sm:$0xff]  }
  0x90   : > { %v1033_v48 = vsel %vm777_vm13, %v649_v33, %v905_v39  ;;  %vm778_vm14 = vcmp.ge.f32.partialorder %v650_v40, 0.0  ;;  %v906_v49 = vmul.f32 0.2, %v650_v40  ;;  %v652_v50 = vadd.f32 %v3042_v47, %v517_v42 }
  0x91   : > { %v2498_v51 = vpack.c.bf16 %v1033_v48, %v1032_v43  ;;  %vm779_vm15 = vcmp.ge.f32.partialorder %v651_v44, 0.0  ;;  %v907_v52 = vmul.f32 0.2, %v651_v44  ;;  %v653_v53 = vadd.f32 %v3042_v47, %v518_v45 }
  0x92   : > { %v1034_v55 = vsel %vm778_vm14, %v650_v40, %v906_v49  ;;  %vm780_vm0 = vcmp.ge.f32.partialorder %v652_v50, 0.0  ;;  %v908_v56 = vmul.f32 0.2, %v652_v50  ;;  %v2216_v57 = vunpack.c.h.bf16 %v2665_v35  ;;  %v2671_v35 = vld [vmem:[%s2805_s18 + $0x178] sm:$0xff]  }
  0x93   : > { %2725 = vst [vmem:[%s2842_s25 + $0x130] sm:$0xff] %v2498_v51   ;;  %v1035_v59 = vsel %vm779_vm15, %v651_v44, %v907_v52  ;;  %vm781_vm1 = vcmp.ge.f32.partialorder %v653_v53, 0.0  ;;  %v909_v60 = vmul.f32 0.2, %v653_v53  ;;  %v519_v61 = vmul.f32 %v3033_v41, %v2215_v46 }
  0x94   : > { %v2503_v62 = vpack.c.bf16 %v1035_v59, %v1034_v55  ;;  %v1036_v63 = vsel %vm780_vm0, %v652_v50, %v908_v56  ;;  %v520_v1 = vmul.f32 %v3033_v41, %v2216_v57  ;;  %v2219_v2 = vunpack.c.l.bf16 %v2666_v54 }
  0x95   : > { %v1037_v3 = vsel %vm781_vm1, %v653_v53, %v909_v60  ;;  %v654_v4 = vadd.f32 %v3042_v47, %v519_v61  ;;  %v2220_v5 = vunpack.c.h.bf16 %v2666_v54  ;;  %v2223_v6 = vunpack.c.l.bf16 %v2667_v58 }
  0x96   : > { %2726 = vst [vmem:[%s2842_s25 + $0x138] sm:$0xff] %v2503_v62   ;;  %v2508_v7 = vpack.c.bf16 %v1037_v3, %v1036_v63  ;;  %v655_v8 = vadd.f32 %v3042_v47, %v520_v1  ;;  %v521_v10 = vmul.f32 %v3033_v41, %v2219_v2  ;;  %v2224_v11 = vunpack.c.h.bf16 %v2667_v58  ;;  %v2672_v3 = vld [vmem:[%s2805_s18 + $0x180] sm:$0xff]  }
  0x97   : > { %vm782_vm2 = vcmp.ge.f32.partialorder %v654_v4, 0.0  ;;  %v910_v13 = vmul.f32 0.2, %v654_v4  ;;  %v522_v14 = vmul.f32 %v3033_v41, %v2220_v5  ;;  %v523_v15 = vmul.f32 %v3033_v41, %v2223_v6 }
  0x98   : > { %2727 = vst [vmem:[%s2842_s25 + $0x140] sm:$0xff] %v2508_v7   ;;  %vm783_vm3 = vcmp.ge.f32.partialorder %v655_v8, 0.0  ;;  %v911_v16 = vmul.f32 0.2, %v655_v8  ;;  %v656_v17 = vadd.f32 %v3042_v47, %v521_v10  ;;  %v524_v18 = vmul.f32 %v3033_v41, %v2224_v11  ;;  %v2673_v7 = vld [vmem:[%s2805_s18 + $0x188] sm:$0xff]  }
  0x99   : > { %v1038_v19 = vsel %vm782_vm2, %v654_v4, %v910_v13  ;;  %v657_v20 = vadd.f32 %v3042_v47, %v522_v14  ;;  %v658_v21 = vadd.f32 %v3042_v47, %v523_v15  ;;  %v2227_v22 = vunpack.c.l.bf16 %v2668_v12 }
  0x9a   : > { %v1039_v23 = vsel %vm783_vm3, %v655_v8, %v911_v16  ;;  %vm784_vm4 = vcmp.ge.f32.partialorder %v656_v17, 0.0  ;;  %v912_v24 = vmul.f32 0.2, %v656_v17  ;;  %v659_v25 = vadd.f32 %v3042_v47, %v524_v18 }
  0x9b   : > { %v2513_v27 = vpack.c.bf16 %v1039_v23, %v1038_v19  ;;  %vm785_vm5 = vcmp.ge.f32.partialorder %v657_v20, 0.0  ;;  %v913_v0 = vmul.f32 0.2, %v657_v20  ;;  %vm786_vm6 = vcmp.ge.f32.partialorder %v658_v21, 0.0 }
  0x9c   : > { %v1040_v28 = vsel %vm784_vm4, %v656_v17, %v912_v24  ;;  %vm787_vm7 = vcmp.ge.f32.partialorder %v659_v25, 0.0  ;;  %v914_v29 = vmul.f32 0.2, %v658_v21  ;;  %v915_v30 = vmul.f32 0.2, %v659_v25 }
  0x9d   : > { %2728 = vst [vmem:[%s2842_s25 + $0x148] sm:$0xff] %v2513_v27   ;;  %v1041_v31 = vsel %vm785_vm5, %v657_v20, %v913_v0  ;;  %v2228_v32 = vunpack.c.h.bf16 %v2668_v12  ;;  %v525_v33 = vmul.f32 %v3033_v41, %v2227_v22  ;;  %v2231_v9 = vunpack.c.l.bf16 %v2669_v26  ;;  %v2674_v20 = vld [vmem:[%s2805_s18 + $0x190] sm:$0xff]  }
  0x9e   : > { %v2518_v36 = vpack.c.bf16 %v1041_v31, %v1040_v28  ;;  %v1042_v37 = vsel %vm786_vm6, %v658_v21, %v914_v29  ;;  %v1043_v38 = vsel %vm787_vm7, %v659_v25, %v915_v30  ;;  %v2232_v39 = vunpack.c.h.bf16 %v2669_v26 }
  0x9f   : > { %v2523_v40 = vpack.c.bf16 %v1043_v38, %v1042_v37  ;;  %v526_v42 = vmul.f32 %v3033_v41, %v2228_v32  ;;  %v660_v43 = vadd.f32 %v3042_v47, %v525_v33  ;;  %v527_v44 = vmul.f32 %v3033_v41, %v2231_v9  ;;  %v2675_v37 = vld [vmem:[%s2805_s18 + $0x198] sm:$0xff]  }
  0xa0   : > { %2729 = vst [vmem:[%s2842_s25 + $0x150] sm:$0xff] %v2518_v36   ;;  %v528_v45 = vmul.f32 %v3033_v41, %v2232_v39  ;;  %v2235_v46 = vunpack.c.l.bf16 %v2670_v34  ;;  %v2236_v48 = vunpack.c.h.bf16 %v2670_v34  ;;  %v2239_v49 = vunpack.c.l.bf16 %v2671_v35 }
  0xa1   : > { %2730 = vst [vmem:[%s2842_s25 + $0x158] sm:$0xff] %v2523_v40   ;;  %v661_v50 = vadd.f32 %v3042_v47, %v526_v42  ;;  %vm788_vm8 = vcmp.ge.f32.partialorder %v660_v43, 0.0  ;;  %v916_v51 = vmul.f32 0.2, %v660_v43  ;;  %v662_v52 = vadd.f32 %v3042_v47, %v527_v44 }
  0xa2   : > { %v663_v53 = vadd.f32 %v3042_v47, %v528_v45  ;;  %v529_v54 = vmul.f32 %v3033_v41, %v2235_v46  ;;  %v530_v55 = vmul.f32 %v3033_v41, %v2236_v48  ;;  %v2240_v56 = vunpack.c.h.bf16 %v2671_v35  ;;  %v2676_v48 = vld [vmem:[%s2805_s18 + $0x1a0] sm:$0xff]  }
  0xa3   : > { %vm789_vm9 = vcmp.ge.f32.partialorder %v661_v50, 0.0  ;;  %v917_v57 = vmul.f32 0.2, %v661_v50  ;;  %v1044_v58 = vsel %vm788_vm8, %v660_v43, %v916_v51  ;;  %vm790_vm10 = vcmp.ge.f32.partialorder %v662_v52, 0.0 }
  0xa4   : > { %vm791_vm11 = vcmp.ge.f32.partialorder %v663_v53, 0.0  ;;  %v918_v59 = vmul.f32 0.2, %v662_v52  ;;  %v919_v60 = vmul.f32 0.2, %v663_v53  ;;  %v664_v61 = vadd.f32 %v3042_v47, %v529_v54 }
  0xa5   : > { %v1045_v62 = vsel %vm789_vm9, %v661_v50, %v917_v57  ;;  %v665_v63 = vadd.f32 %v3042_v47, %v530_v55  ;;  %v531_v1 = vmul.f32 %v3033_v41, %v2239_v49  ;;  %v532_v2 = vmul.f32 %v3033_v41, %v2240_v56 }
  0xa6   : > { %v2528_v4 = vpack.c.bf16 %v1045_v62, %v1044_v58  ;;  %v1046_v5 = vsel %vm790_vm10, %v662_v52, %v918_v59  ;;  %v1047_v6 = vsel %vm791_vm11, %v663_v53, %v919_v60  ;;  %vm792_vm12 = vcmp.ge.f32.partialorder %v664_v61, 0.0  ;;  %v2677_v53 = vld [vmem:[%s2805_s18 + $0x1a8] sm:$0xff]  }
  0xa7   : > { %v2533_v8 = vpack.c.bf16 %v1047_v6, %v1046_v5  ;;  %vm793_vm13 = vcmp.ge.f32.partialorder %v665_v63, 0.0  ;;  %v920_v10 = vmul.f32 0.2, %v664_v61  ;;  %v921_v11 = vmul.f32 0.2, %v665_v63  ;;  %v2678_v5 = vld [vmem:[%s2805_s18 + $0x1b0] sm:$0xff]  }
  0xa8   : > { %2731 = vst [vmem:[%s2842_s25 + $0x160] sm:$0xff] %v2528_v4   ;;  %v666_v12 = vadd.f32 %v3042_v47, %v531_v1  ;;  %v667_v13 = vadd.f32 %v3042_v47, %v532_v2  ;;  %v2243_v14 = vunpack.c.l.bf16 %v2672_v3  ;;  %v2244_v15 = vunpack.c.h.bf16 %v2672_v3 }
  0xa9   : > { %2732 = vst [vmem:[%s2842_s25 + $0x168] sm:$0xff] %v2533_v8   ;;  %v1048_v16 = vsel %vm792_vm12, %v664_v61, %v920_v10  ;;  %v1049_v17 = vsel %vm793_vm13, %v665_v63, %v921_v11  ;;  %v2247_v18 = vunpack.c.l.bf16 %v2673_v7  ;;  %v2248_v19 = vunpack.c.h.bf16 %v2673_v7 }
  0xaa   : > { %v2538_v21 = vpack.c.bf16 %v1049_v17, %v1048_v16  ;;  %vm794_vm14 = vcmp.ge.f32.partialorder %v666_v12, 0.0  ;;  %vm795_vm15 = vcmp.ge.f32.partialorder %v667_v13, 0.0  ;;  %v922_v22 = vmul.f32 0.2, %v666_v12 }
  0xab   : > { %v923_v23 = vmul.f32 0.2, %v667_v13  ;;  %v533_v24 = vmul.f32 %v3033_v41, %v2243_v14  ;;  %v534_v25 = vmul.f32 %v3033_v41, %v2244_v15  ;;  %v535_v26 = vmul.f32 %v3033_v41, %v2247_v18 }
  0xac   : > { %2733 = vst [vmem:[%s2842_s25 + $0x170] sm:$0xff] %v2538_v21   ;;  %v1050_v27 = vsel %vm794_vm14, %v666_v12, %v922_v22  ;;  %v536_v0 = vmul.f32 %v3033_v41, %v2248_v19  ;;  %v2251_v28 = vunpack.c.l.bf16 %v2674_v20  ;;  %v2252_v29 = vunpack.c.h.bf16 %v2674_v20 }
  0xad   : > { %v1051_v30 = vsel %vm795_vm15, %v667_v13, %v923_v23  ;;  %v668_v31 = vadd.f32 %v3042_v47, %v533_v24  ;;  %v669_v32 = vadd.f32 %v3042_v47, %v534_v25  ;;  %v670_v33 = vadd.f32 %v3042_v47, %v535_v26  ;;  %v2679_v25 = vld [vmem:[%s2805_s18 + $0x1b8] sm:$0xff]  }
  0xae   : > { %v2543_v9 = vpack.c.bf16 %v1051_v30, %v1050_v27  ;;  %v671_v34 = vadd.f32 %v3042_v47, %v536_v0  ;;  %v537_v35 = vmul.f32 %v3033_v41, %v2251_v28  ;;  %v538_v36 = vmul.f32 %v3033_v41, %v2252_v29  ;;  %v2680_v29 = vld [vmem:[%s2805_s18 + $0x1c0] sm:$0xff]   ;;  %v2681_v30 = vld [vmem:[%s2805_s18 + $0x1c8] sm:$0xff]  }
  0xaf   : > { %vm796_vm0 = vcmp.ge.f32.partialorder %v668_v31, 0.0  ;;  %vm797_vm1 = vcmp.ge.f32.partialorder %v669_v32, 0.0  ;;  %v924_v38 = vmul.f32 0.2, %v668_v31  ;;  %v925_v39 = vmul.f32 0.2, %v669_v32 }
  0xb0   : > { %2734 = vst [vmem:[%s2842_s25 + $0x178] sm:$0xff] %v2543_v9   ;;  %vm798_vm2 = vcmp.ge.f32.partialorder %v670_v33, 0.0  ;;  %vm799_vm3 = vcmp.ge.f32.partialorder %v671_v34, 0.0  ;;  %v926_v40 = vmul.f32 0.2, %v670_v33  ;;  %v672_v45 = vadd.f32 %v3042_v47, %v537_v35 }
  0xb1   : > { %v927_v42 = vmul.f32 0.2, %v671_v34  ;;  %v1052_v43 = vsel %vm796_vm0, %v668_v31, %v924_v38  ;;  %v1053_v44 = vsel %vm797_vm1, %v669_v32, %v925_v39  ;;  %v673_v46 = vadd.f32 %v3042_v47, %v538_v36 }
  0xb2   : > { %v2548_v49 = vpack.c.bf16 %v1053_v44, %v1052_v43  ;;  %v1054_v50 = vsel %vm798_vm2, %v670_v33, %v926_v40  ;;  %v2255_v52 = vunpack.c.l.bf16 %v2675_v37  ;;  %vm800_vm4 = vcmp.ge.f32.partialorder %v672_v45, 0.0 }
  0xb3   : > { %v1055_v51 = vsel %vm799_vm3, %v671_v34, %v927_v42  ;;  %vm801_vm5 = vcmp.ge.f32.partialorder %v673_v46, 0.0  ;;  %v928_v55 = vmul.f32 0.2, %v672_v45  ;;  %v929_v56 = vmul.f32 0.2, %v673_v46 }
  0xb4   : > { %v2553_v54 = vpack.c.bf16 %v1055_v51, %v1054_v50  ;;  %2735 = vst [vmem:[%s2842_s25 + $0x180] sm:$0xff] %v2548_v49   ;;  %v2256_v57 = vunpack.c.h.bf16 %v2675_v37  ;;  %v539_v58 = vmul.f32 %v3033_v41, %v2255_v52  ;;  %v2259_v59 = vunpack.c.l.bf16 %v2676_v48 }
  0xb5   : > { %v1056_v60 = vsel %vm800_vm4, %v672_v45, %v928_v55  ;;  %v2260_v61 = vunpack.c.h.bf16 %v2676_v48  ;;  %v2263_v62 = vunpack.c.l.bf16 %v2677_v53  ;;  %v2264_v63 = vunpack.c.h.bf16 %v2677_v53 }
  0xb6   : > { %2736 = vst [vmem:[%s2842_s25 + $0x188] sm:$0xff] %v2553_v54   ;;  %v1057_v1 = vsel %vm801_vm5, %v673_v46, %v929_v56  ;;  %v540_v2 = vmul.f32 %v3033_v41, %v2256_v57  ;;  %v674_v3 = vadd.f32 %v3042_v47, %v539_v58  ;;  %v541_v4 = vmul.f32 %v3033_v41, %v2259_v59 }
  0xb7   : > { %v2558_v6 = vpack.c.bf16 %v1057_v1, %v1056_v60  ;;  %v542_v7 = vmul.f32 %v3033_v41, %v2260_v61  ;;  %v543_v8 = vmul.f32 %v3033_v41, %v2263_v62  ;;  %v544_v10 = vmul.f32 %v3033_v41, %v2264_v63  ;;  %v2682_v60 = vld [vmem:[%s2805_s18 + $0x1d0] sm:$0xff]  }
  0xb8   : > { %v675_v11 = vadd.f32 %v3042_v47, %v540_v2  ;;  %vm802_vm6 = vcmp.ge.f32.partialorder %v674_v3, 0.0  ;;  %v930_v12 = vmul.f32 0.2, %v674_v3  ;;  %v676_v13 = vadd.f32 %v3042_v47, %v541_v4 }
  0xb9   : > { %2737 = vst [vmem:[%s2842_s25 + $0x190] sm:$0xff] %v2558_v6   ;;  %v677_v14 = vadd.f32 %v3042_v47, %v542_v7  ;;  %v678_v15 = vadd.f32 %v3042_v47, %v543_v8  ;;  %v679_v16 = vadd.f32 %v3042_v47, %v544_v10  ;;  %v2267_v17 = vunpack.c.l.bf16 %v2678_v5  ;;  %v2683_v8 = vld [vmem:[%s2805_s18 + $0x1d8] sm:$0xff]  }
  0xba   : > { %vm803_vm7 = vcmp.ge.f32.partialorder %v675_v11, 0.0  ;;  %v931_v18 = vmul.f32 0.2, %v675_v11  ;;  %v1058_v19 = vsel %vm802_vm6, %v674_v3, %v930_v12  ;;  %vm804_vm8 = vcmp.ge.f32.partialorder %v676_v13, 0.0 }
  0xbb   : > { %vm805_vm9 = vcmp.ge.f32.partialorder %v677_v14, 0.0  ;;  %v932_v20 = vmul.f32 0.2, %v676_v13  ;;  %v933_v21 = vmul.f32 0.2, %v677_v14  ;;  %vm806_vm10 = vcmp.ge.f32.partialorder %v678_v15, 0.0 }
  0xbc   : > { %v1059_v22 = vsel %vm803_vm7, %v675_v11, %v931_v18  ;;  %vm807_vm11 = vcmp.ge.f32.partialorder %v679_v16, 0.0  ;;  %v934_v23 = vmul.f32 0.2, %v678_v15  ;;  %v935_v24 = vmul.f32 0.2, %v679_v16 }
  0xbd   : > { %v2563_v26 = vpack.c.bf16 %v1059_v22, %v1058_v19  ;;  %v1060_v27 = vsel %vm804_vm8, %v676_v13, %v932_v20  ;;  %v1061_v0 = vsel %vm805_vm9, %v677_v14, %v933_v21  ;;  %v2268_v28 = vunpack.c.h.bf16 %v2678_v5  ;;  %v2684_v14 = vld [vmem:[%s2805_s18 + $0x1e0] sm:$0xff]  }
  0xbe   : > { %v2568_v31 = vpack.c.bf16 %v1061_v0, %v1060_v27  ;;  %v1062_v32 = vsel %vm806_vm10, %v678_v15, %v934_v23  ;;  %v1063_v33 = vsel %vm807_vm11, %v679_v16, %v935_v24  ;;  %v545_v9 = vmul.f32 %v3033_v41, %v2267_v17 }
  0xbf   : > { %2738 = vst [vmem:[%s2842_s25 + $0x198] sm:$0xff] %v2563_v26   ;;  %v2573_v34 = vpack.c.bf16 %v1063_v33, %v1062_v32  ;;  %v546_v35 = vmul.f32 %v3033_v41, %v2268_v28  ;;  %v2271_v36 = vunpack.c.l.bf16 %v2679_v25  ;;  %v2272_v37 = vunpack.c.h.bf16 %v2679_v25  ;;  %v2685_v28 = vld [vmem:[%s2805_s18 + $0x1e8] sm:$0xff]  }
  0xc0   : > { %2739 = vst [vmem:[%s2842_s25 + $0x1a0] sm:$0xff] %v2568_v31   ;;  %v680_v38 = vadd.f32 %v3042_v47, %v545_v9  ;;  %v2275_v39 = vunpack.c.l.bf16 %v2680_v29  ;;  %v2276_v40 = vunpack.c.h.bf16 %v2680_v29  ;;  %v2279_v42 = vunpack.c.l.bf16 %v2681_v30 }
  0xc1   : > { %2740 = vst [vmem:[%s2842_s25 + $0x1a8] sm:$0xff] %v2573_v34   ;;  %v681_v43 = vadd.f32 %v3042_v47, %v546_v35  ;;  %v547_v44 = vmul.f32 %v3033_v41, %v2271_v36  ;;  %v548_v45 = vmul.f32 %v3033_v41, %v2272_v37  ;;  %v2280_v46 = vunpack.c.h.bf16 %v2681_v30 }
  0xc2   : > { %vm808_vm12 = vcmp.ge.f32.partialorder %v680_v38, 0.0  ;;  %v936_v48 = vmul.f32 0.2, %v680_v38  ;;  %v549_v49 = vmul.f32 %v3033_v41, %v2275_v39  ;;  %v550_v50 = vmul.f32 %v3033_v41, %v2276_v40 }
  0xc3   : > { %vm809_vm13 = vcmp.ge.f32.partialorder %v681_v43, 0.0  ;;  %v937_v51 = vmul.f32 0.2, %v681_v43  ;;  %v682_v52 = vadd.f32 %v3042_v47, %v547_v44  ;;  %v683_v53 = vadd.f32 %v3042_v47, %v548_v45  ;;  %v2686_v45 = vld [vmem:[%s2805_s18 + $0x1f0] sm:$0xff]  }
  0xc4   : > { %v1064_v54 = vsel %vm808_vm12, %v680_v38, %v936_v48  ;;  %v684_v55 = vadd.f32 %v3042_v47, %v549_v49  ;;  %v685_v56 = vadd.f32 %v3042_v47, %v550_v50  ;;  %v551_v57 = vmul.f32 %v3033_v41, %v2279_v42  ;;  %v2687_v50 = vld [vmem:[%s2805_s18 + $0x1f8] sm:$0xff]  }
  0xc5   : > { %v1065_v58 = vsel %vm809_vm13, %v681_v43, %v937_v51  ;;  %vm810_vm14 = vcmp.ge.f32.partialorder %v682_v52, 0.0  ;;  %vm811_vm15 = vcmp.ge.f32.partialorder %v683_v53, 0.0  ;;  %v938_v59 = vmul.f32 0.2, %v682_v52 }
  0xc6   : > { %v2578_v61 = vpack.c.bf16 %v1065_v58, %v1064_v54  ;;  %v939_v62 = vmul.f32 0.2, %v683_v53  ;;  %vm812_vm0 = vcmp.ge.f32.partialorder %v684_v55, 0.0  ;;  %vm813_vm1 = vcmp.ge.f32.partialorder %v685_v56, 0.0 }
  0xc7   : > { %v1066_v63 = vsel %vm810_vm14, %v682_v52, %v938_v59  ;;  %v940_v1 = vmul.f32 0.2, %v684_v55  ;;  %v941_v2 = vmul.f32 0.2, %v685_v56  ;;  %v552_v3 = vmul.f32 %v3033_v41, %v2280_v46 }
  0xc8   : > { %2741 = vst [vmem:[%s2842_s25 + $0x1b0] sm:$0xff] %v2578_v61   ;;  %v1067_v4 = vsel %vm811_vm15, %v683_v53, %v939_v62  ;;  %v686_v5 = vadd.f32 %v3042_v47, %v551_v57  ;;  %v2283_v6 = vunpack.c.l.bf16 %v2682_v60  ;;  %v2284_v7 = vunpack.c.h.bf16 %v2682_v60 }
  0xc9   : > { %v2583_v10 = vpack.c.bf16 %v1067_v4, %v1066_v63  ;;  %v1068_v11 = vsel %vm812_vm0, %v684_v55, %v940_v1  ;;  %v1069_v12 = vsel %vm813_vm1, %v685_v56, %v941_v2  ;;  %v687_v13 = vadd.f32 %v3042_v47, %v552_v3 }
  0xca   : > { %v2588_v15 = vpack.c.bf16 %v1069_v12, %v1068_v11  ;;  %vm814_vm2 = vcmp.ge.f32.partialorder %v686_v5, 0.0  ;;  %v942_v16 = vmul.f32 0.2, %v686_v5  ;;  %v553_v17 = vmul.f32 %v3033_v41, %v2283_v6 }
  0xcb   : > { %2742 = vst [vmem:[%s2842_s25 + $0x1b8] sm:$0xff] %v2583_v10   ;;  %vm815_vm3 = vcmp.ge.f32.partialorder %v687_v13, 0.0  ;;  %v943_v18 = vmul.f32 0.2, %v687_v13  ;;  %v554_v19 = vmul.f32 %v3033_v41, %v2284_v7  ;;  %v2287_v20 = vunpack.c.l.bf16 %v2683_v8 }
  0xcc   : > { %2743 = vst [vmem:[%s2842_s25 + $0x1c0] sm:$0xff] %v2588_v15   ;;  %v1070_v21 = vsel %vm814_vm2, %v686_v5, %v942_v16  ;;  %v688_v22 = vadd.f32 %v3042_v47, %v553_v17  ;;  %v2288_v23 = vunpack.c.h.bf16 %v2683_v8  ;;  %v2291_v24 = vunpack.c.l.bf16 %v2684_v14 }
  0xcd   : > { %v1071_v25 = vsel %vm815_vm3, %v687_v13, %v943_v18  ;;  %v689_v26 = vadd.f32 %v3042_v47, %v554_v19  ;;  %v555_v27 = vmul.f32 %v3033_v41, %v2287_v20  ;;  %v2292_v0 = vunpack.c.h.bf16 %v2684_v14 }
  0xce   : > { %v2593_v29 = vpack.c.bf16 %v1071_v25, %v1070_v21  ;;  %vm816_vm4 = vcmp.ge.f32.partialorder %v688_v22, 0.0  ;;  %v944_v30 = vmul.f32 0.2, %v688_v22  ;;  %v556_v31 = vmul.f32 %v3033_v41, %v2288_v23 }
  0xcf   : > { %vm817_vm5 = vcmp.ge.f32.partialorder %v689_v26, 0.0  ;;  %v945_v32 = vmul.f32 0.2, %v689_v26  ;;  %v690_v33 = vadd.f32 %v3042_v47, %v555_v27  ;;  %v557_v9 = vmul.f32 %v3033_v41, %v2291_v24 }
  0xd0   : > { %2744 = vst [vmem:[%s2842_s25 + $0x1c8] sm:$0xff] %v2593_v29   ;;  %v1072_v34 = vsel %vm816_vm4, %v688_v22, %v944_v30  ;;  %v691_v35 = vadd.f32 %v3042_v47, %v556_v31  ;;  %v558_v36 = vmul.f32 %v3033_v41, %v2292_v0  ;;  %v2295_v37 = vunpack.c.l.bf16 %v2685_v28 }
  0xd1   : > { %v1073_v38 = vsel %vm817_vm5, %v689_v26, %v945_v32  ;;  %vm818_vm6 = vcmp.ge.f32.partialorder %v690_v33, 0.0  ;;  %v946_v39 = vmul.f32 0.2, %v690_v33  ;;  %v692_v40 = vadd.f32 %v3042_v47, %v557_v9 }
  0xd2   : > { %v2598_v42 = vpack.c.bf16 %v1073_v38, %v1072_v34  ;;  %vm819_vm7 = vcmp.ge.f32.partialorder %v691_v35, 0.0  ;;  %v947_v43 = vmul.f32 0.2, %v691_v35  ;;  %v693_v44 = vadd.f32 %v3042_v47, %v558_v36 }
  0xd3   : > { %v1074_v46 = vsel %vm818_vm6, %v690_v33, %v946_v39  ;;  %vm820_vm8 = vcmp.ge.f32.partialorder %v692_v40, 0.0  ;;  %v948_v48 = vmul.f32 0.2, %v692_v40  ;;  %v2296_v49 = vunpack.c.h.bf16 %v2685_v28 }
  0xd4   : > { %2745 = vst [vmem:[%s2842_s25 + $0x1d0] sm:$0xff] %v2598_v42   ;;  %v1075_v51 = vsel %vm819_vm7, %v691_v35, %v947_v43  ;;  %vm821_vm9 = vcmp.ge.f32.partialorder %v693_v44, 0.0  ;;  %v949_v52 = vmul.f32 0.2, %v693_v44  ;;  %v559_v53 = vmul.f32 %v3033_v41, %v2295_v37 }
  0xd5   : > { %v2603_v54 = vpack.c.bf16 %v1075_v51, %v1074_v46  ;;  %v1076_v55 = vsel %vm820_vm8, %v692_v40, %v948_v48  ;;  %v560_v56 = vmul.f32 %v3033_v41, %v2296_v49  ;;  %v2299_v57 = vunpack.c.l.bf16 %v2686_v45 }
  0xd6   : > { %v1077_v58 = vsel %vm821_vm9, %v693_v44, %v949_v52  ;;  %v694_v59 = vadd.f32 %v3042_v47, %v559_v53  ;;  %v2300_v60 = vunpack.c.h.bf16 %v2686_v45  ;;  %v2303_v61 = vunpack.c.l.bf16 %v2687_v50 }
  0xd7   : > { %2746 = vst [vmem:[%s2842_s25 + $0x1d8] sm:$0xff] %v2603_v54   ;;  %v2608_v62 = vpack.c.bf16 %v1077_v58, %v1076_v55  ;;  %v695_v63 = vadd.f32 %v3042_v47, %v560_v56  ;;  %v561_v1 = vmul.f32 %v3033_v41, %v2299_v57  ;;  %v2304_v2 = vunpack.c.h.bf16 %v2687_v50 }
  0xd8   : > { %vm822_vm10 = vcmp.ge.f32.partialorder %v694_v59, 0.0  ;;  %v950_v3 = vmul.f32 0.2, %v694_v59  ;;  %v562_v4 = vmul.f32 %v3033_v41, %v2300_v60  ;;  %v563_v5 = vmul.f32 %v3033_v41, %v2303_v61 }
  0xd9   : > { %2747 = vst [vmem:[%s2842_s25 + $0x1e0] sm:$0xff] %v2608_v62   ;;  %vm823_vm11 = vcmp.ge.f32.partialorder %v695_v63, 0.0  ;;  %v951_v6 = vmul.f32 0.2, %v695_v63  ;;  %v696_v7 = vadd.f32 %v3042_v47, %v561_v1  ;;  %v564_v8 = vmul.f32 %v3033_v41, %v2304_v2 }
  0xda   : > { %v1078_v10 = vsel %vm822_vm10, %v694_v59, %v950_v3  ;;  %v697_v11 = vadd.f32 %v3042_v47, %v562_v4  ;;  %v698_v12 = vadd.f32 %v3042_v47, %v563_v5 }
  0xdb   : > { %v1079_v13 = vsel %vm823_vm11, %v695_v63, %v951_v6  ;;  %vm824_vm12 = vcmp.ge.f32.partialorder %v696_v7, 0.0  ;;  %v952_v14 = vmul.f32 0.2, %v696_v7  ;;  %v699_v15 = vadd.f32 %v3042_v47, %v564_v8 }
  0xdc   : > { %v2613_v16 = vpack.c.bf16 %v1079_v13, %v1078_v10  ;;  %vm825_vm13 = vcmp.ge.f32.partialorder %v697_v11, 0.0  ;;  %v953_v17 = vmul.f32 0.2, %v697_v11  ;;  %vm826_vm14 = vcmp.ge.f32.partialorder %v698_v12, 0.0 }
  0xdd   : > { %v1080_v18 = vsel %vm824_vm12, %v696_v7, %v952_v14  ;;  %vm827_vm15 = vcmp.ge.f32.partialorder %v699_v15, 0.0  ;;  %v954_v41 = vmul.f32 0.2, %v698_v12  ;;  %v955_v19 = vmul.f32 0.2, %v699_v15 }
  0xde   : > { %2748 = vst [vmem:[%s2842_s25 + $0x1e8] sm:$0xff] %v2613_v16   ;;  %v1081_v20 = vsel %vm825_vm13, %v697_v11, %v953_v17 }
  0xdf   : > { %v2618_v21 = vpack.c.bf16 %v1081_v20, %v1080_v18  ;;  %v1082_v22 = vsel %vm826_vm14, %v698_v12, %v954_v41  ;;  %v1083_v23 = vsel %vm827_vm15, %v699_v15, %v955_v19 }
  0xe0   : > { %v2623_v24 = vpack.c.bf16 %v1083_v23, %v1082_v22 }
  0xe1   : > { %2749 = vst [vmem:[%s2842_s25 + $0x1f0] sm:$0xff] %v2618_v21  }
  0xe2   : > { %2750 = vst [vmem:[%s2842_s25 + $0x1f8] sm:$0xff] %v2623_v24  }
  0xe3 PF: > { %s13_s12 = sadd.s32 1, %s2767_s12  }
  0xe4   : > { %p10_p4 = scmp.ge.s32.totalorder %s13_s12, 4  }
  0xe6   :  { %12 = sbr.rel (!%p10_p4) target bundleno = 1 (0x1), region = 62 }

// kernel: _lambda_.13
= control target key start
LH: loop header
LB: loop body
LE: loop exit
PB: predicated region body
PF: predicated region fallthrough
CT: control target
= control target key end

     0   :  { %s4384_s12 = smov 0   ;;  %s5207_s0 = inlined_call_operand.vmem [shape: bf16[2048,48], index: 0, kind: input, shape index: {}]   ;;  %s5208_s1 = inlined_call_operand.vmem [shape: bf16[48,128], index: 1, kind: input, shape index: {}]   ;;  %s5209_s2 = inlined_call_operand.vmem [shape: bf16[2048,128], index: 2, kind: output, shape index: {0}]   ;;  %s5210_s3 = inlined_call_operand.vmem [shape: f32[2,2,128], index: 3, kind: output, shape index: {1}]  }
   0x1 LB: > { %s4390_s13 = sadd.s32 4294967295, %s4362_s12   ;;  %p3295_p0 = scmp.ge.s32.totalorder %s4362_s12, 1  ;;  %s4362_s12 = sphi %s4384_s12, %s14_s12  }
   0x2   : > { %p141_p1 = scmp.lt.s32.totalorder %s4362_s12, 3 }
   0x4   : > { %p142_p2 = pnand %p3295_p0, %p141_p1 }
   0x6   : > { %145 = sbr.rel (%p142_p2) target bundleno = 494 (0x1ee), region = 28 }
   0xb   : > { %v4289_v0 = vld [vmem:[%s5208_s1 + $0x10] sm:$0xff]   ;;  %s3296_s16 = sshll.u32 %s4390_s13, 7  ;;  %v4290_v1 = vld [vmem:[%s5208_s1 + $0x8] sm:$0xff]   ;;  %v4291_v2 = vld [vmem:[%s5208_s1] sm:$0xff]   ;;  %vm658_vm0 = vcmask 392192   ;;  %s3560_s25 = sshll.u32 %s4390_s13, 10 }
   0xc   : > { %p170_p3 = scmp.lt.s32.totalorder %s3296_s16, 255  ;;  %4141 = vmatprep.subr.bf16.mxu0 %v4289_v0  ;;  %4275 = vmatprep.subr.bf16.mxu1 %v4289_v0  ;;  %p181_p4 = scmp.lt.s32.totalorder %s4390_s13, 1 }
   0xd   : > { %4142 = vmatpush3.bf16.msra.mxu0 %v4289_v0  ;;  %4278 = vmatpush3.bf16.msra.mxu1 %v4289_v0 }
   0xe   : > { %s5254_s16 = smov (!%p170_p3, %s3296_s16), 255  ;;  %4143 = vmatprep.subr.bf16.mxu0 %v4290_v1  ;;  %4276 = vmatprep.subr.bf16.mxu1 %v4290_v1  ;;  %s5256_s13 = smov (!%p181_p4, %s4390_s13), 1 }
   0xf   : > { %s3297_s21 = sshll.u32 %s5254_s16, 2  ;;  %s3300_s29 = sshll.u32 %s5256_s13, 1 }
  0x10   : > { %s4412_s24 = scalar_lea.vmem %s5207_s0, %s3297_s21  ;;  %s4564_s28 = scalar_lea.vmem %s5209_s2, %s3297_s21 }
  0x11   : > { %4144 = vmatpush3.bf16.msra.mxu0 %v4290_v1  ;;  %v4292_v3 = vld [vmem:[%s4412_s24] sm:$0xff]   ;;  %4279 = vmatpush3.bf16.msra.mxu1 %v4290_v1  ;;  %v4293_v4 = vld [vmem:[%s4412_s24 + $0x8] sm:$0xff]   ;;  %v4294_v5 = vld [vmem:[%s4412_s24 + $0x10] sm:$0xff]   ;;  %s184_s5 = scalar_lea.vmem %s5210_s3, %s3300_s29 }
  0x12   : > { %4145 = vmatprep.subr.bf16.mxu0 %v4291_v2  ;;  %4277 = vmatprep.subr.bf16.mxu1 %v4291_v2  ;;  %v4295_v6 = vld [vmem:[%s4412_s24 + $0x18] sm:$0xff]   ;;  %v4296_v7 = vld [vmem:[%s4412_s24 + $0x20] sm:$0xff]   ;;  %v4297_v8 = vld [vmem:[%s4412_s24 + $0x28] sm:$0xff]  }
  0x13   : > { %4147 = vmatprep.mubr.msk.bf16.mxu0 %vm658_vm0, %v4292_v3  ;;  %v4298_v9 = vld [vmem:[%s4412_s24 + $0x30] sm:$0xff]   ;;  %v4299_v10 = vld [vmem:[%s4412_s24 + $0x38] sm:$0xff]   ;;  %v4300_v11 = vld [vmem:[%s4412_s24 + $0x40] sm:$0xff]   ;;  %v2037_v3 = vlaneseq }
  0x14   : > { %v4324_v12 = vld [vmem:[%s4412_s24 + $0x100] sm:$0xff]   ;;  %v4325_v13 = vld [vmem:[%s4412_s24 + $0x108] sm:$0xff]   ;;  %v4326_v14 = vld [vmem:[%s4412_s24 + $0x110] sm:$0xff]  }
  0x15   : > { %4146 = vmatpush3.bf16.msra.mxu0 %v4291_v2  ;;  %4280 = vmatpush3.bf16.msra.mxu1 %v4291_v2  ;;  %v4301_v15 = vld [vmem:[%s4412_s24 + $0x48] sm:$0xff]   ;;  %v4302_v16 = vld [vmem:[%s4412_s24 + $0x50] sm:$0xff]   ;;  %v4327_v17 = vld [vmem:[%s4412_s24 + $0x118] sm:$0xff]  }
  0x16   : > { %4211 = vmatprep.mubr.msk.bf16.mxu1 %vm658_vm0, %v4324_v12  ;;  %v4328_v18 = vld [vmem:[%s4412_s24 + $0x120] sm:$0xff]   ;;  %v4303_v19 = vld [vmem:[%s4412_s24 + $0x58] sm:$0xff]   ;;  %v4329_v21 = vld [vmem:[%s4412_s24 + $0x128] sm:$0xff]  }
  0x17   : > { %v4304_v20 = vld [vmem:[%s4412_s24 + $0x60] sm:$0xff]   ;;  %v4330_v22 = vld [vmem:[%s4412_s24 + $0x130] sm:$0xff]   ;;  %v4305_v23 = vld [vmem:[%s4412_s24 + $0x68] sm:$0xff]  }
  0x18   : > { %4148 = vmatmul.mubr.msk.bf16.vlgmr.msra.gmra.mxu0 %vm658_vm0, %v4293_v4  ;;  %4212 = vmatmul.mubr.msk.bf16.vlgmr.msra.gmra.mxu1 %vm658_vm0, %v4325_v13  ;;  %v4306_v24 = vld [vmem:[%s4412_s24 + $0x70] sm:$0xff]   ;;  %v4331_v25 = vld [vmem:[%s4412_s24 + $0x138] sm:$0xff]   ;;  %v4332_v26 = vld [vmem:[%s4412_s24 + $0x140] sm:$0xff]   ;;  %v4542_v4 = vshrl.u32 %v2037_v3, 7 }
  0x19   : > { %4151 = vmatprep.mubr.msk.bf16.mxu0 %vm658_vm0, %v4294_v5  ;;  %4215 = vmatprep.mubr.msk.bf16.mxu1 %vm658_vm0, %v4326_v14  ;;  %v4307_v27 = vld [vmem:[%s4412_s24 + $0x78] sm:$0xff]   ;;  %v4308_v28 = vld [vmem:[%s4412_s24 + $0x80] sm:$0xff]   ;;  %v4333_v29 = vld [vmem:[%s4412_s24 + $0x148] sm:$0xff]  }
  0x1a   : > { %v4334_v30 = vld [vmem:[%s4412_s24 + $0x150] sm:$0xff]   ;;  %v4309_v31 = vld [vmem:[%s4412_s24 + $0x88] sm:$0xff]   ;;  %v4335_v33 = vld [vmem:[%s4412_s24 + $0x158] sm:$0xff]   ;;  %v2040_v5 = vadd.s32 16, %v4542_v4 }
  0x1b   : > { %v4310_v32 = vld [vmem:[%s4412_s24 + $0x90] sm:$0xff]   ;;  %v4336_v34 = vld [vmem:[%s4412_s24 + $0x160] sm:$0xff]   ;;  %v4311_v35 = vld [vmem:[%s4412_s24 + $0x98] sm:$0xff]  }
  0x1c   : > { %v4312_v36 = vld [vmem:[%s4412_s24 + $0xa0] sm:$0xff]   ;;  %v4337_v37 = vld [vmem:[%s4412_s24 + $0x168] sm:$0xff]   ;;  %v4338_v38 = vld [vmem:[%s4412_s24 + $0x170] sm:$0xff]  }
  0x1d   : > { %v4313_v39 = vld [vmem:[%s4412_s24 + $0xa8] sm:$0xff]   ;;  %v4314_v40 = vld [vmem:[%s4412_s24 + $0xb0] sm:$0xff]   ;;  %v4339_v41 = vld [vmem:[%s4412_s24 + $0x178] sm:$0xff]  }
  0x1e   : > { %v4340_v42 = vld [vmem:[%s4412_s24 + $0x180] sm:$0xff]   ;;  %v4315_v43 = vld [vmem:[%s4412_s24 + $0xb8] sm:$0xff]   ;;  %v4341_v45 = vld [vmem:[%s4412_s24 + $0x188] sm:$0xff]  }
  0x1f   : > { %v4316_v44 = vld [vmem:[%s4412_s24 + $0xc0] sm:$0xff]   ;;  %v4342_v46 = vld [vmem:[%s4412_s24 + $0x190] sm:$0xff]   ;;  %v4317_v47 = vld [vmem:[%s4412_s24 + $0xc8] sm:$0xff]  }
  0x20   : > { %4152 = vmatmul.mubr.msk.bf16.gmra.mxu0 %vm658_vm0, %v4295_v6  ;;  %4216 = vmatmul.mubr.msk.bf16.gmra.mxu1 %vm658_vm0, %v4327_v17  ;;  %v4318_v48 = vld [vmem:[%s4412_s24 + $0xd0] sm:$0xff]   ;;  %v4343_v49 = vld [vmem:[%s4412_s24 + $0x198] sm:$0xff]   ;;  %v4344_v50 = vld [vmem:[%s4412_s24 + $0x1a0] sm:$0xff]   ;;  %v2039_v6 = vadd.s32 8, %v4542_v4 }
  0x21   : > { %4155 = vmatprep.mubr.msk.bf16.mxu0 %vm658_vm0, %v4296_v7  ;;  %4219 = vmatprep.mubr.msk.bf16.mxu1 %vm658_vm0, %v4328_v18  ;;  %v4319_v51 = vld [vmem:[%s4412_s24 + $0xd8] sm:$0xff]   ;;  %v4320_v52 = vld [vmem:[%s4412_s24 + $0xe0] sm:$0xff]   ;;  %v4345_v53 = vld [vmem:[%s4412_s24 + $0x1a8] sm:$0xff]   ;;  %v4547_v7 = vstv %s3560_s25  ;;  %v2043_v18 = vadd.s32 40, %v4542_v4 }
  0x22   : > { %v4346_v54 = vld [vmem:[%s4412_s24 + $0x1b0] sm:$0xff]   ;;  %v4321_v55 = vld [vmem:[%s4412_s24 + $0xe8] sm:$0xff]   ;;  %v4347_v57 = vld [vmem:[%s4412_s24 + $0x1b8] sm:$0xff]   ;;  %v2169_v12 = vadd.s32 %v4547_v7, %v2040_v5  ;;  %v2168_v13 = vadd.s32 %v4547_v7, %v2039_v6 }
  0x23   : > { %v4322_v56 = vld [vmem:[%s4412_s24 + $0xf0] sm:$0xff]   ;;  %v4348_v58 = vld [vmem:[%s4412_s24 + $0x1c0] sm:$0xff]   ;;  %v4323_v59 = vld [vmem:[%s4412_s24 + $0xf8] sm:$0xff]  }
  0x24   : > { %v4349_v60 = vld [vmem:[%s4412_s24 + $0x1c8] sm:$0xff]   ;;  %v4350_v61 = vld [vmem:[%s4412_s24 + $0x1d0] sm:$0xff]   ;;  %v4351_v62 = vld [vmem:[%s4412_s24 + $0x1d8] sm:$0xff]   ;;  %vm2297_vm2 = vcmp.lt.s32.totalorder %v2169_v12, 2048  ;;  %vm2296_vm3 = vcmp.lt.s32.totalorder %v2168_v13, 2048 }
  0x25   : > { %v4352_v63 = vld [vmem:[%s4412_s24 + $0x1e0] sm:$0xff]   ;;  %v4353_v0 = vld [vmem:[%s4412_s24 + $0x1e8] sm:$0xff]   ;;  %v4354_v1 = vld [vmem:[%s4412_s24 + $0x1f0] sm:$0xff]  }
  0x26   : > { %v4355_v2 = vld [vmem:[%s4412_s24 + $0x1f8] sm:$0xff]  }
  0x28   : > { %4156 = vmatmul.mubr.msk.bf16.gmra.mxu0 %vm658_vm0, %v4297_v8  ;;  %4220 = vmatmul.mubr.msk.bf16.gmra.mxu1 %vm658_vm0, %v4329_v21  ;;  %v2167_v8 = vadd.s32 %v4547_v7, %v4542_v4 }
  0x29   : > { %4159 = vmatprep.mubr.msk.bf16.mxu0 %vm658_vm0, %v4298_v9  ;;  %4223 = vmatprep.mubr.msk.bf16.mxu1 %vm658_vm0, %v4330_v22  ;;  %v2041_v9 = vadd.s32 24, %v4542_v4  ;;  %v2045_v22 = vadd.s32 56, %v4542_v4 }
  0x2a   : > { %vm2295_vm1 = vcmp.lt.s32.totalorder %v2167_v8, 2048 }
  0x30   : > { %4160 = vmatmul.mubr.msk.bf16.gmra.mxu0 %vm658_vm0, %v4299_v10  ;;  %4224 = vmatmul.mubr.msk.bf16.gmra.mxu1 %vm658_vm0, %v4331_v25  ;;  %v2042_v10 = vadd.s32 32, %v4542_v4 }
  0x31   : > { %4163 = vmatprep.mubr.msk.bf16.mxu0 %vm658_vm0, %v4300_v11  ;;  %4227 = vmatprep.mubr.msk.bf16.mxu1 %vm658_vm0, %v4332_v26 }
  0x32   : > { %v2171_v17 = vadd.s32 %v4547_v7, %v2042_v10 }
  0x34   : > { %vm2299_vm5 = vcmp.lt.s32.totalorder %v2171_v17, 2048 }
  0x38   : > { %4164 = vmatmul.mubr.msk.bf16.gmra.mxu0 %vm658_vm0, %v4301_v15  ;;  %4228 = vmatmul.mubr.msk.bf16.gmra.mxu1 %vm658_vm0, %v4333_v29  ;;  %v2170_v15 = vadd.s32 %v4547_v7, %v2041_v9 }
  0x39   : > { %4167 = vmatprep.mubr.msk.bf16.mxu0 %vm658_vm0, %v4302_v16  ;;  %4231 = vmatprep.mubr.msk.bf16.mxu1 %vm658_vm0, %v4334_v30  ;;  %v2044_v16 = vadd.s32 48, %v4542_v4 }
  0x3a   : > { %vm2298_vm4 = vcmp.lt.s32.totalorder %v2170_v15, 2048  ;;  %v2051_v15 = vadd.s32 104, %v4542_v4 }
  0x40   : > { %4168 = vmatmul.mubr.msk.bf16.gmra.mxu0 %vm658_vm0, %v4303_v19  ;;  %4232 = vmatmul.mubr.msk.bf16.gmra.mxu1 %vm658_vm0, %v4335_v33  ;;  %v2046_v33 = vadd.s32 64, %v4542_v4 }
  0x41   : > { %4171 = vmatprep.mubr.msk.bf16.mxu0 %vm658_vm0, %v4304_v20  ;;  %4235 = vmatprep.mubr.msk.bf16.mxu1 %vm658_vm0, %v4336_v34 }
  0x48   : > { %4172 = vmatmul.mubr.msk.bf16.gmra.mxu0 %vm658_vm0, %v4305_v23  ;;  %4236 = vmatmul.mubr.msk.bf16.gmra.mxu1 %vm658_vm0, %v4337_v37 }
  0x49   : > { %4175 = vmatprep.mubr.msk.bf16.mxu0 %vm658_vm0, %v4306_v24  ;;  %4239 = vmatprep.mubr.msk.bf16.mxu1 %vm658_vm0, %v4338_v38  ;;  %v2173_v24 = vadd.s32 %v4547_v7, %v2044_v16 }
  0x4b   : > { %vm2301_vm6 = vcmp.lt.s32.totalorder %v2173_v24, 2048 }
  0x50   : > { %4176 = vmatmul.mubr.msk.bf16.gmra.mxu0 %vm658_vm0, %v4307_v27  ;;  %4240 = vmatmul.mubr.msk.bf16.gmra.mxu1 %vm658_vm0, %v4339_v41  ;;  %v2047_v41 = vadd.s32 72, %v4542_v4 }
  0x51   : > { %4179 = vmatprep.mubr.msk.bf16.mxu0 %vm658_vm0, %v4308_v28  ;;  %4243 = vmatprep.mubr.msk.bf16.mxu1 %vm658_vm0, %v4340_v42  ;;  %v2172_v28 = vadd.s32 %v4547_v7, %v2043_v18  ;;  %v2053_v18 = vadd.s32 120, %v4542_v4 }
  0x53   : > { %vm2300_vm7 = vcmp.lt.s32.totalorder %v2172_v28, 2048 }
  0x58   : > { %4180 = vmatmul.mubr.msk.bf16.gmra.mxu0 %vm658_vm0, %v4309_v31  ;;  %4244 = vmatmul.mubr.msk.bf16.gmra.mxu1 %vm658_vm0, %v4341_v45 }
  0x59   : > { %4183 = vmatprep.mubr.msk.bf16.mxu0 %vm658_vm0, %v4310_v32  ;;  %4247 = vmatprep.mubr.msk.bf16.mxu1 %vm658_vm0, %v4342_v46 }
  0x60   : > { %4184 = vmatmul.mubr.msk.bf16.gmra.mxu0 %vm658_vm0, %v4311_v35  ;;  %4248 = vmatmul.mubr.msk.bf16.gmra.mxu1 %vm658_vm0, %v4343_v49  ;;  %v2174_v35 = vadd.s32 %v4547_v7, %v2045_v22 }
  0x61   : > { %4187 = vmatprep.mubr.msk.bf16.mxu0 %vm658_vm0, %v4312_v36  ;;  %4251 = vmatprep.mubr.msk.bf16.mxu1 %vm658_vm0, %v4344_v50  ;;  %v2048_v36 = vadd.s32 80, %v4542_v4  ;;  %v2049_v50 = vadd.s32 88, %v4542_v4 }
  0x62   : > { %vm2302_vm8 = vcmp.lt.s32.totalorder %v2174_v35, 2048 }
  0x63   : > { %v2177_v49 = vadd.s32 %v4547_v7, %v2048_v36 }
  0x65   : > { %vm2305_vm10 = vcmp.lt.s32.totalorder %v2177_v49, 2048  ;;  %v2057_v49 = vadd.s32 152, %v4542_v4 }
  0x68   : > { %4188 = vmatmul.mubr.msk.bf16.gmra.mxu0 %vm658_vm0, %v4313_v39  ;;  %4252 = vmatmul.mubr.msk.bf16.gmra.mxu1 %vm658_vm0, %v4345_v53 }
  0x69   : > { %4191 = vmatprep.mubr.msk.bf16.mxu0 %vm658_vm0, %v4314_v40  ;;  %4255 = vmatprep.mubr.msk.bf16.mxu1 %vm658_vm0, %v4346_v54 }
  0x70   : > { %4192 = vmatmul.mubr.msk.bf16.gmra.mxu0 %vm658_vm0, %v4315_v43  ;;  %4256 = vmatmul.mubr.msk.bf16.gmra.mxu1 %vm658_vm0, %v4347_v57 }
  0x71   : > { %4195 = vmatprep.mubr.msk.bf16.mxu0 %vm658_vm0, %v4316_v44  ;;  %4259 = vmatprep.mubr.msk.bf16.mxu1 %vm658_vm0, %v4348_v58 }
  0x78   : > { %4196 = vmatmul.mubr.msk.bf16.gmra.mxu0 %vm658_vm0, %v4317_v47  ;;  %4260 = vmatmul.mubr.msk.bf16.gmra.mxu1 %vm658_vm0, %v4349_v60  ;;  %v2175_v47 = vadd.s32 %v4547_v7, %v2046_v33  ;;  %v2182_v33 = vadd.s32 %v4547_v7, %v2053_v18 }
  0x79   : > { %4199 = vmatprep.mubr.msk.bf16.mxu0 %vm658_vm0, %v4318_v48  ;;  %4263 = vmatprep.mubr.msk.bf16.mxu1 %vm658_vm0, %v4350_v61 }
  0x7a   : > { %vm2303_vm9 = vcmp.lt.s32.totalorder %v2175_v47, 2048 }
  0x80   : > { %4200 = vmatmul.mubr.msk.bf16.gmra.mxu0 %vm658_vm0, %v4319_v51  ;;  %4264 = vmatmul.mubr.msk.bf16.gmra.mxu1 %vm658_vm0, %v4351_v62 }
  0x81   : > { %4203 = vmatprep.mubr.msk.bf16.mxu0 %vm658_vm0, %v4320_v52  ;;  %4267 = vmatprep.mubr.msk.bf16.mxu1 %vm658_vm0, %v4352_v63 }
  0x88   : > { %4204 = vmatmul.mubr.msk.bf16.gmra.mxu0 %vm658_vm0, %v4321_v55  ;;  %4268 = vmatmul.mubr.msk.bf16.gmra.mxu1 %vm658_vm0, %v4353_v0  ;;  %v2176_v55 = vadd.s32 %v4547_v7, %v2047_v41  ;;  %v2055_v41 = vadd.s32 136, %v4542_v4 }
  0x89   : > { %4207 = vmatprep.mubr.msk.bf16.mxu0 %vm658_vm0, %v4322_v56  ;;  %4271 = vmatprep.mubr.msk.bf16.mxu1 %vm658_vm0, %v4354_v1  ;;  %v2178_v1 = vadd.s32 %v4547_v7, %v2049_v50 }
  0x8a   : > { %vm2304_vm11 = vcmp.lt.s32.totalorder %v2176_v55, 2048 }
  0x8b   : > { %vm2306_vm12 = vcmp.lt.s32.totalorder %v2178_v1, 2048 }
  0x90   : > { %4208 = vmatmul.mubr.msk.bf16.gmra.mxu0 %vm658_vm0, %v4323_v59  ;;  %4272 = vmatmul.mubr.msk.bf16.gmra.mxu1 %vm658_vm0, %v4355_v2  ;;  %v2050_v59 = vadd.s32 96, %v4542_v4  ;;  %v2052_v2 = vadd.s32 112, %v4542_v4  ;;  %vm2310_vm0 = vcmp.lt.s32.totalorder %v2182_v33, 2048  ;;  %v2062_v33 = vadd.s32 192, %v4542_v4 }
  0x92   : > { %v2179_v10 = vadd.s32 %v4547_v7, %v2050_v59  ;;  %v2181_v17 = vadd.s32 %v4547_v7, %v2052_v2  ;;  %v2186_v2 = vadd.s32 %v4547_v7, %v2057_v49 }
  0x94   : > { %vm2307_vm13 = vcmp.lt.s32.totalorder %v2179_v10, 2048  ;;  %vm2309_vm14 = vcmp.lt.s32.totalorder %v2181_v17, 2048 }
  0xd8   : > { %v4149_v11 = vpop.f32.mrf.mxu0 }
  0xd9   : > { %v2681_v25 = vsel %vm2297_vm2, %v4149_v11, 0.0 }
  0xda   : > { %v885_v14 = vpop.f32.mrf.mxu0  ;;  %v2942_v37 = vmul.f32 %v2681_v25, %v2681_v25 }
  0xdb   : > { %v2679_v20 = vsel %vm2295_vm1, %v885_v14, 0.0 }
  0xdc   : > { %v4150_v19 = vpop.f32.mrf.mxu0  ;;  %v2940_v29 = vmul.f32 %v2679_v20, %v2679_v20 }
  0xdd   : > { %v3699_v21 = vpack.c.bf16 %v4150_v19, %v4149_v11  ;;  %v2682_v34 = vsel %vm2298_vm4, %v4150_v19, 0.0  ;;  %vm2314_vm4 = vcmp.lt.s32.totalorder %v2186_v2, 2048 }
  0xde   : > { %v888_v23 = vpop.f32.mrf.mxu0  ;;  %v2943_v43 = vmul.f32 %v2682_v34, %v2682_v34 }
  0xdf   : > { %4011 = vst [vmem:[%s4564_s28 + $0x8] sm:$0xff] %v3699_v21   ;;  %v3694_v26 = vpack.c.bf16 %v888_v23, %v885_v14  ;;  %v2680_v27 = vsel %vm2296_vm3, %v888_v23, 0.0  ;;  %v2054_v23 = vadd.s32 128, %v4542_v4 }
  0xe0   : > { %v2807_v30 = vadd.f32 %v2680_v27, %v2679_v20  ;;  %v2941_v31 = vmul.f32 %v2680_v27, %v2680_v27  ;;  %v4153_v32 = vpop.f32.mrf.mxu0 }
  0xe1   : > { %3695 = vst [vmem:[%s4564_s28] sm:$0xff] %v3694_v26   ;;  %v2685_v56 = vsel %vm2301_vm6, %v4153_v32, 0.0 }
  0xe2   : > { %v2808_v38 = vadd.f32 %v2807_v30, %v2681_v25  ;;  %v3068_v39 = vadd.f32 %v2941_v31, %v2940_v29  ;;  %v901_v40 = vpop.f32.mrf.mxu0  ;;  %v2946_v3 = vmul.f32 %v2685_v56, %v2685_v56  ;;  %v2180_v31 = vadd.s32 %v4547_v7, %v2051_v15 }
  0xe3   : > { %v2683_v42 = vsel %vm2299_vm5, %v901_v40, 0.0 }
  0xe4   : > { %v3069_v44 = vadd.f32 %v3068_v39, %v2942_v37  ;;  %v2809_v45 = vadd.f32 %v2808_v38, %v2682_v34  ;;  %v4154_v46 = vpop.f32.mrf.mxu0  ;;  %v2944_v52 = vmul.f32 %v2683_v42, %v2683_v42  ;;  %v2056_v34 = vadd.s32 144, %v4542_v4 }
  0xe5   : > { %v3709_v48 = vpack.c.bf16 %v4154_v46, %v4153_v32  ;;  %v2686_v0 = vsel %vm2302_vm8, %v4154_v46, 0.0  ;;  %v2183_v39 = vadd.s32 %v4547_v7, %v2054_v23  ;;  %vm2308_vm15 = vcmp.lt.s32.totalorder %v2180_v31, 2048  ;;  %v4604_v46 = vpop.f32.mrf.mxu1 }
  0xe6   : > { %v2810_v51 = vadd.f32 %v2809_v45, %v2683_v42  ;;  %v3070_v53 = vadd.f32 %v3069_v44, %v2943_v43  ;;  %v904_v54 = vpop.f32.mrf.mxu0  ;;  %v2947_v11 = vmul.f32 %v2686_v0, %v2686_v0  ;;  %v2061_v23 = vadd.s32 184, %v4542_v4 }
  0xe7   : > { %4013 = vst [vmem:[%s4564_s28 + $0x18] sm:$0xff] %v3709_v48   ;;  %v3704_v57 = vpack.c.bf16 %v904_v54, %v901_v40  ;;  %v2684_v58 = vsel %vm2300_vm7, %v904_v54, 0.0  ;;  %v2185_v48 = vadd.s32 %v4547_v7, %v2056_v34  ;;  %vm2311_vm1 = vcmp.lt.s32.totalorder %v2183_v39, 2048  ;;  %v4608_v54 = vpop.f32.mrf.mxu1 }
  0xe8   : > { %v3071_v60 = vadd.f32 %v3070_v53, %v2944_v52  ;;  %v2811_v61 = vadd.f32 %v2810_v51, %v2684_v58  ;;  %v2945_v62 = vmul.f32 %v2684_v58, %v2684_v58  ;;  %v4157_v63 = vpop.f32.mrf.mxu0  ;;  %v2184_v58 = vadd.s32 %v4547_v7, %v2055_v41 }
  0xe9   : > { %4012 = vst [vmem:[%s4564_s28 + $0x10] sm:$0xff] %v3704_v57   ;;  %v2689_v24 = vsel %vm2305_vm10, %v4157_v63, 0.0  ;;  %vm2313_vm2 = vcmp.lt.s32.totalorder %v2185_v48, 2048  ;;  %v2064_v41 = vadd.s32 208, %v4542_v4 }
  0xea   : > { %v2812_v5 = vadd.f32 %v2811_v61, %v2685_v56  ;;  %v3072_v6 = vadd.f32 %v3071_v60, %v2945_v62  ;;  %v917_v8 = vpop.f32.mrf.mxu0  ;;  %v2950_v35 = vmul.f32 %v2689_v24, %v2689_v24  ;;  %vm2312_vm3 = vcmp.lt.s32.totalorder %v2184_v58, 2048 }
  0xeb   : > { %v2687_v9 = vsel %vm2303_vm9, %v917_v8, 0.0 }
  0xec   : > { %v3073_v12 = vadd.f32 %v3072_v6, %v2946_v3  ;;  %v2813_v13 = vadd.f32 %v2812_v5, %v2686_v0  ;;  %v4158_v14 = vpop.f32.mrf.mxu0  ;;  %v2948_v20 = vmul.f32 %v2687_v9, %v2687_v9  ;;  %v4614_v0 = vpop.f32.mrf.mxu1  ;;  %v2060_v3 = vadd.s32 176, %v4542_v4 }
  0xed   : > { %v3719_v16 = vpack.c.bf16 %v4158_v14, %v4157_v63  ;;  %v2690_v32 = vsel %vm2306_vm12, %v4158_v14, 0.0  ;;  %v2058_v63 = vadd.s32 160, %v4542_v4  ;;  %v3859_v5 = vpack.c.bf16 %v4614_v0, %v4604_v46 }
  0xee   : > { %v2814_v19 = vadd.f32 %v2813_v13, %v2687_v9  ;;  %v3074_v21 = vadd.f32 %v3073_v12, %v2947_v11  ;;  %v920_v22 = vpop.f32.mrf.mxu0  ;;  %v2951_v42 = vmul.f32 %v2690_v32, %v2690_v32  ;;  %v2059_v11 = vadd.s32 168, %v4542_v4  ;;  %v4623_v12 = vpop.f32.mrf.mxu1 }
  0xef   : > { %4015 = vst [vmem:[%s4564_s28 + $0x28] sm:$0xff] %v3719_v16   ;;  %v3714_v25 = vpack.c.bf16 %v920_v22, %v917_v8  ;;  %v2688_v26 = vsel %vm2304_vm11, %v920_v22, 0.0  ;;  %4043 = vst [vmem:[%s4564_s28 + $0x108] sm:$0xff] %v3859_v5   ;;  %v3854_v14 = vpack.c.bf16 %v4623_v12, %v4608_v54  ;;  %v2189_v22 = vadd.s32 %v4547_v7, %v2060_v3 }
  0xf0   : > { %v3075_v27 = vadd.f32 %v3074_v21, %v2948_v20  ;;  %v2815_v28 = vadd.f32 %v2814_v19, %v2688_v26  ;;  %v2949_v29 = vmul.f32 %v2688_v26, %v2688_v26  ;;  %v4161_v30 = vpop.f32.mrf.mxu0  ;;  %v2187_v19 = vadd.s32 %v4547_v7, %v2058_v63  ;;  %v4630_v20 = vpop.f32.mrf.mxu1 }
  0xf1   : > { %4014 = vst [vmem:[%s4564_s28 + $0x20] sm:$0xff] %v3714_v25   ;;  %v2693_v55 = vsel %vm2309_vm14, %v4161_v30, 0.0  ;;  %4042 = vst [vmem:[%s4564_s28 + $0x100] sm:$0xff] %v3854_v14   ;;  %vm2317_vm6 = vcmp.lt.s32.totalorder %v2189_v22, 2048  ;;  %v2066_v3 = vadd.s32 224, %v4542_v4 }
  0xf2   : > { %v2816_v36 = vadd.f32 %v2815_v28, %v2689_v24  ;;  %v3076_v37 = vadd.f32 %v3075_v27, %v2949_v29  ;;  %v933_v38 = vpop.f32.mrf.mxu0  ;;  %v2954_v6 = vmul.f32 %v2693_v55, %v2693_v55  ;;  %v2188_v28 = vadd.s32 %v4547_v7, %v2059_v11  ;;  %v4636_v29 = vpop.f32.mrf.mxu1 }
  0xf3   : > { %v2691_v40 = vsel %vm2307_vm13, %v933_v38, 0.0  ;;  %vm2315_vm5 = vcmp.lt.s32.totalorder %v2187_v19, 2048  ;;  %v2068_v19 = vadd.s32 240, %v4542_v4 }
  0xf4   : > { %v3077_v43 = vadd.f32 %v3076_v37, %v2950_v35  ;;  %v2817_v44 = vadd.f32 %v2816_v36, %v2690_v32  ;;  %v4162_v45 = vpop.f32.mrf.mxu0  ;;  %v2952_v51 = vmul.f32 %v2691_v40, %v2691_v40  ;;  %vm2316_vm7 = vcmp.lt.s32.totalorder %v2188_v28, 2048 }
  0xf5   : > { %v3729_v47 = vpack.c.bf16 %v4162_v45, %v4161_v30  ;;  %v2694_v1 = vsel %vm2310_vm0, %v4162_v45, 0.0 }
  0xf6   : > { %v2818_v50 = vadd.f32 %v2817_v44, %v2691_v40  ;;  %v3078_v52 = vadd.f32 %v3077_v43, %v2951_v42  ;;  %v936_v53 = vpop.f32.mrf.mxu0  ;;  %v2955_v15 = vmul.f32 %v2694_v1, %v2694_v1  ;;  %v2190_v40 = vadd.s32 %v4547_v7, %v2061_v23 }
  0xf7   : > { %4017 = vst [vmem:[%s4564_s28 + $0x38] sm:$0xff] %v3729_v47   ;;  %v3724_v56 = vpack.c.bf16 %v936_v53, %v933_v38  ;;  %v2692_v57 = vsel %vm2308_vm15, %v936_v53, 0.0  ;;  %v4642_v38 = vpop.f32.mrf.mxu1 }
  0xf8   : > { %v3079_v59 = vadd.f32 %v3078_v52, %v2952_v51  ;;  %v2819_v60 = vadd.f32 %v2818_v50, %v2692_v57  ;;  %v2953_v61 = vmul.f32 %v2692_v57, %v2692_v57  ;;  %v4165_v62 = vpop.f32.mrf.mxu0  ;;  %v3869_v42 = vpack.c.bf16 %v4642_v38, %v4630_v20 }
  0xf9   : > { %4016 = vst [vmem:[%s4564_s28 + $0x30] sm:$0xff] %v3724_v56   ;;  %v2697_v30 = vsel %vm2313_vm2, %v4165_v62, 0.0  ;;  %v4650_v48 = vpop.f32.mrf.mxu1  ;;  %v2191_v50 = vadd.s32 %v4547_v7, %v2062_v33  ;;  %v2063_v57 = vadd.s32 200, %v4542_v4  ;;  %vm2318_vm8 = vcmp.lt.s32.totalorder %v2190_v40, 2048 }
  0xfa   : > { %v2820_v8 = vadd.f32 %v2819_v60, %v2693_v55  ;;  %v3080_v9 = vadd.f32 %v3079_v59, %v2953_v61  ;;  %v949_v10 = vpop.f32.mrf.mxu0  ;;  %v2958_v43 = vmul.f32 %v2697_v30, %v2697_v30  ;;  %4045 = vst [vmem:[%s4564_s28 + $0x118] sm:$0xff] %v3869_v42   ;;  %v3864_v51 = vpack.c.bf16 %v4650_v48, %v4636_v29 }
  0xfb   : > { %v2695_v13 = vsel %vm2311_vm1, %v949_v10, 0.0  ;;  %v4657_v58 = vpop.f32.mrf.mxu1  ;;  %v2193_v60 = vadd.s32 %v4547_v7, %v2064_v41  ;;  %v2065_v61 = vadd.s32 216, %v4542_v4  ;;  %vm2319_vm9 = vcmp.lt.s32.totalorder %v2191_v50, 2048 }
  0xfc   : > { %v3081_v16 = vadd.f32 %v3080_v9, %v2954_v6  ;;  %v2821_v17 = vadd.f32 %v2820_v8, %v2694_v1  ;;  %v4166_v18 = vpop.f32.mrf.mxu0  ;;  %v2956_v25 = vmul.f32 %v2695_v13, %v2695_v13  ;;  %4044 = vst [vmem:[%s4564_s28 + $0x110] sm:$0xff] %v3864_v51   ;;  %v2069_v40 = vadd.s32 248, %v4542_v4 }
  0xfd   : > { %v3739_v21 = vpack.c.bf16 %v4166_v18, %v4165_v62  ;;  %v2698_v39 = vsel %vm2314_vm4, %v4166_v18, 0.0  ;;  %v4663_v5 = vpop.f32.mrf.mxu1  ;;  %v2194_v18 = vadd.s32 %v4547_v7, %v2065_v61  ;;  %vm2321_vm10 = vcmp.lt.s32.totalorder %v2193_v60, 2048 }
  0xfe   : > { %v2822_v24 = vadd.f32 %v2821_v17, %v2695_v13  ;;  %v3082_v26 = vadd.f32 %v3081_v16, %v2955_v15  ;;  %v952_v27 = vpop.f32.mrf.mxu0  ;;  %v2959_v52 = vmul.f32 %v2698_v39, %v2698_v39  ;;  %v2192_v15 = vadd.s32 %v4547_v7, %v2063_v57 }
  0xff   : > { %4019 = vst [vmem:[%s4564_s28 + $0x48] sm:$0xff] %v3739_v21   ;;  %v3734_v31 = vpack.c.bf16 %v952_v27, %v949_v10  ;;  %v2696_v32 = vsel %vm2312_vm3, %v952_v27, 0.0  ;;  %v4669_v16 = vpop.f32.mrf.mxu1  ;;  %vm2322_vm12 = vcmp.lt.s32.totalorder %v2194_v18, 2048  ;;  %v2070_v57 = vadd.s32 256, %v4542_v4 }
 0x100   : > { %v3083_v34 = vadd.f32 %v3082_v26, %v2956_v25  ;;  %v2823_v35 = vadd.f32 %v2822_v24, %v2696_v32  ;;  %v2957_v36 = vmul.f32 %v2696_v32, %v2696_v32  ;;  %v4169_v37 = vpop.f32.mrf.mxu0  ;;  %v3879_v21 = vpack.c.bf16 %v4669_v16, %v4657_v58 }
 0x101   : > { %4018 = vst [vmem:[%s4564_s28 + $0x40] sm:$0xff] %v3734_v31   ;;  %v2701_v6 = vsel %vm2317_vm6, %v4169_v37, 0.0  ;;  %v2195_v26 = vadd.s32 %v4547_v7, %v2066_v3  ;;  %v4678_v27 = vpop.f32.mrf.mxu1  ;;  %vm2320_vm11 = vcmp.lt.s32.totalorder %v2192_v15, 2048  ;;  %v2198_v60 = vadd.s32 %v4547_v7, %v2069_v40 }
 0x102   : > { %v2824_v44 = vadd.f32 %v2823_v35, %v2697_v30  ;;  %v3084_v45 = vadd.f32 %v3083_v34, %v2957_v36  ;;  %v965_v47 = vpop.f32.mrf.mxu0  ;;  %v2962_v22 = vmul.f32 %v2701_v6, %v2701_v6  ;;  %v2067_v30 = vadd.s32 232, %v4542_v4  ;;  %4047 = vst [vmem:[%s4564_s28 + $0x128] sm:$0xff] %v3879_v21  }
 0x103   : > { %v2699_v49 = vsel %vm2315_vm5, %v965_v47, 0.0  ;;  %v3874_v31 = vpack.c.bf16 %v4678_v27, %v4663_v5  ;;  %v4685_v36 = vpop.f32.mrf.mxu1  ;;  %vm2323_vm13 = vcmp.lt.s32.totalorder %v2195_v26, 2048  ;;  %v2199_v18 = vadd.s32 %v4547_v7, %v2070_v57 }
 0x104   : > { %v3085_v53 = vadd.f32 %v3084_v45, %v2958_v43  ;;  %v2825_v55 = vadd.f32 %v2824_v44, %v2698_v39  ;;  %v4170_v56 = vpop.f32.mrf.mxu0  ;;  %v2960_v63 = vmul.f32 %v2699_v49, %v2699_v49  ;;  %v2197_v39 = vadd.s32 %v4547_v7, %v2068_v19 }
 0x105   : > { %v3749_v59 = vpack.c.bf16 %v4170_v56, %v4169_v37  ;;  %v2702_v17 = vsel %vm2318_vm8, %v4170_v56, 0.0  ;;  %4046 = vst [vmem:[%s4564_s28 + $0x120] sm:$0xff] %v3874_v31   ;;  %v4690_v45 = vpop.f32.mrf.mxu1  ;;  %v2196_v51 = vadd.s32 %v4547_v7, %v2067_v30  ;;  %vm2326_vm0 = vcmp.lt.s32.totalorder %v2198_v60, 2048 }
 0x106   : > { %v2826_v62 = vadd.f32 %v2825_v55, %v2699_v49  ;;  %v3086_v1 = vadd.f32 %v3085_v53, %v2959_v52  ;;  %v968_v2 = vpop.f32.mrf.mxu0  ;;  %v2963_v32 = vmul.f32 %v2702_v17, %v2702_v17  ;;  %vm2325_vm14 = vcmp.lt.s32.totalorder %v2197_v39, 2048 }
 0x107   : > { %4021 = vst [vmem:[%s4564_s28 + $0x58] sm:$0xff] %v3749_v59   ;;  %v3744_v8 = vpack.c.bf16 %v968_v2, %v965_v47  ;;  %v2700_v9 = vsel %vm2316_vm7, %v968_v2, 0.0  ;;  %v4697_v59 = vpop.f32.mrf.mxu1  ;;  %vm2324_vm15 = vcmp.lt.s32.totalorder %v2196_v51, 2048  ;;  %vm2327_vm1 = vcmp.lt.s32.totalorder %v2199_v18, 2048 }
 0x108   : > { %v3087_v10 = vadd.f32 %v3086_v1, %v2960_v63  ;;  %v2827_v11 = vadd.f32 %v2826_v62, %v2700_v9  ;;  %v2961_v13 = vmul.f32 %v2700_v9, %v2700_v9  ;;  %v4173_v14 = vpop.f32.mrf.mxu0  ;;  %v2072_v62 = vadd.s32 272, %v4542_v4 }
 0x109   : > { %4020 = vst [vmem:[%s4564_s28 + $0x50] sm:$0xff] %v3744_v8   ;;  %v2705_v47 = vsel %vm2321_vm10, %v4173_v14, 0.0  ;;  %v3889_v63 = vpack.c.bf16 %v4697_v59, %v4685_v36  ;;  %v2071_v8 = vadd.s32 264, %v4542_v4  ;;  %v4706_v9 = vpop.f32.mrf.mxu1 }
 0x10a   : > { %v2828_v23 = vadd.f32 %v2827_v11, %v2701_v6  ;;  %v3088_v24 = vadd.f32 %v3087_v10, %v2961_v13  ;;  %v981_v25 = vpop.f32.mrf.mxu0  ;;  %v2966_v1 = vmul.f32 %v2705_v47, %v2705_v47  ;;  %v3884_v11 = vpack.c.bf16 %v4706_v9, %v4690_v45 }
 0x10b   : > { %v2703_v28 = vsel %vm2319_vm9, %v981_v25, 0.0  ;;  %4049 = vst [vmem:[%s4564_s28 + $0x138] sm:$0xff] %v3889_v63   ;;  %v4713_v19 = vpop.f32.mrf.mxu1  ;;  %v2200_v30 = vadd.s32 %v4547_v7, %v2071_v8 }
 0x10c   : > { %v3089_v33 = vadd.f32 %v3088_v24, %v2962_v22  ;;  %v2829_v34 = vadd.f32 %v2828_v23, %v2702_v17  ;;  %v4174_v35 = vpop.f32.mrf.mxu0  ;;  %v2964_v42 = vmul.f32 %v2703_v28, %v2703_v28  ;;  %v2201_v22 = vadd.s32 %v4547_v7, %v2072_v62  ;;  %4048 = vst [vmem:[%s4564_s28 + $0x130] sm:$0xff] %v3884_v11  }
 0x10d   : > { %v3759_v37 = vpack.c.bf16 %v4174_v35, %v4173_v14  ;;  %v2706_v61 = vsel %vm2322_vm12, %v4174_v35, 0.0  ;;  %v2073_v23 = vadd.s32 280, %v4542_v4  ;;  %v4719_v31 = vpop.f32.mrf.mxu1  ;;  %v2074_v35 = vadd.s32 288, %v4542_v4 }
 0x10e   : > { %v2830_v41 = vadd.f32 %v2829_v34, %v2703_v28  ;;  %v3090_v43 = vadd.f32 %v3089_v33, %v2963_v32  ;;  %v984_v44 = vpop.f32.mrf.mxu0  ;;  %v2967_v13 = vmul.f32 %v2706_v61, %v2706_v61  ;;  %vm2329_vm2 = vcmp.lt.s32.totalorder %v2201_v22, 2048 }
 0x10f   : > { %4023 = vst [vmem:[%s4564_s28 + $0x68] sm:$0xff] %v3759_v37   ;;  %v3754_v49 = vpack.c.bf16 %v984_v44, %v981_v25  ;;  %v2704_v50 = vsel %vm2320_vm11, %v984_v44, 0.0  ;;  %v2202_v39 = vadd.s32 %v4547_v7, %v2073_v23  ;;  %vm2328_vm3 = vcmp.lt.s32.totalorder %v2200_v30, 2048 }
 0x110   : > { %v3091_v52 = vadd.f32 %v3090_v43, %v2964_v42  ;;  %v2831_v53 = vadd.f32 %v2830_v41, %v2704_v50  ;;  %v2965_v55 = vmul.f32 %v2704_v50, %v2704_v50  ;;  %v4177_v56 = vpop.f32.mrf.mxu0  ;;  %v4725_v43 = vpop.f32.mrf.mxu1  ;;  %v2203_v57 = vadd.s32 %v4547_v7, %v2074_v35 }
 0x111   : > { %4022 = vst [vmem:[%s4564_s28 + $0x60] sm:$0xff] %v3754_v49   ;;  %v2709_v32 = vsel %vm2325_vm14, %v4177_v56, 0.0  ;;  %v3899_v49 = vpack.c.bf16 %v4725_v43, %v4713_v19  ;;  %vm2330_vm4 = vcmp.lt.s32.totalorder %v2202_v39, 2048 }
 0x112   : > { %v2832_v2 = vadd.f32 %v2831_v53, %v2705_v47  ;;  %v3092_v3 = vadd.f32 %v3091_v52, %v2965_v55  ;;  %v997_v6 = vpop.f32.mrf.mxu0  ;;  %v2076_v47 = vadd.s32 304, %v4542_v4  ;;  %v2970_v50 = vmul.f32 %v2709_v32, %v2709_v32  ;;  %v4733_v55 = vpop.f32.mrf.mxu1 }
 0x113   : > { %v2707_v10 = vsel %vm2323_vm13, %v997_v6, 0.0  ;;  %4051 = vst [vmem:[%s4564_s28 + $0x148] sm:$0xff] %v3899_v49   ;;  %vm2331_vm5 = vcmp.lt.s32.totalorder %v2203_v57, 2048  ;;  %v2081_v57 = vadd.s32 344, %v4542_v4 }
 0x114   : > { %v3093_v14 = vadd.f32 %v3092_v3, %v2966_v1  ;;  %v2833_v15 = vadd.f32 %v2832_v2, %v2706_v61  ;;  %v4178_v17 = vpop.f32.mrf.mxu0  ;;  %v2968_v25 = vmul.f32 %v2707_v10, %v2707_v10  ;;  %v3894_v61 = vpack.c.bf16 %v4733_v55, %v4719_v31  ;;  %v4740_v3 = vpop.f32.mrf.mxu1 }
 0x115   : > { %v3769_v21 = vpack.c.bf16 %v4178_v17, %v4177_v56  ;;  %v2710_v44 = vsel %vm2326_vm0, %v4178_v17, 0.0  ;;  %v2075_v2 = vadd.s32 296, %v4542_v4  ;;  %v2205_v8 = vadd.s32 %v4547_v7, %v2076_v47 }
 0x116   : > { %v2834_v24 = vadd.f32 %v2833_v15, %v2707_v10  ;;  %v3094_v26 = vadd.f32 %v3093_v14, %v2967_v13  ;;  %v1000_v28 = vpop.f32.mrf.mxu0  ;;  %v2971_v60 = vmul.f32 %v2710_v44, %v2710_v44  ;;  %v2077_v10 = vadd.s32 312, %v4542_v4  ;;  %4050 = vst [vmem:[%s4564_s28 + $0x140] sm:$0xff] %v3894_v61   ;;  %v4746_v18 = vpop.f32.mrf.mxu1 }
 0x117   : > { %4025 = vst [vmem:[%s4564_s28 + $0x78] sm:$0xff] %v3769_v21   ;;  %v3764_v33 = vpack.c.bf16 %v1000_v28, %v997_v6  ;;  %v2708_v34 = vsel %vm2324_vm15, %v1000_v28, 0.0  ;;  %v2078_v17 = vadd.s32 320, %v4542_v4  ;;  %vm2333_vm6 = vcmp.lt.s32.totalorder %v2205_v8, 2048 }
 0x118   : > { %v3095_v37 = vadd.f32 %v3094_v26, %v2968_v25  ;;  %v2835_v40 = vadd.f32 %v2834_v24, %v2708_v34  ;;  %v2969_v41 = vmul.f32 %v2708_v34, %v2708_v34  ;;  %v4181_v42 = vpop.f32.mrf.mxu0  ;;  %v4752_v34 = vpop.f32.mrf.mxu1  ;;  %v2206_v22 = vadd.s32 %v4547_v7, %v2077_v10 }
 0x119   : > { %4024 = vst [vmem:[%s4564_s28 + $0x70] sm:$0xff] %v3764_v33   ;;  %v2713_v21 = vsel %vm2329_vm2, %v4181_v42, 0.0  ;;  %v2204_v33 = vadd.s32 %v4547_v7, %v2075_v2  ;;  %v3909_v30 = vpack.c.bf16 %v4752_v34, %v4740_v3  ;;  %v2207_v47 = vadd.s32 %v4547_v7, %v2078_v17 }
 0x11a   : > { %v2836_v51 = vadd.f32 %v2835_v40, %v2709_v32  ;;  %v3096_v52 = vadd.f32 %v3095_v37, %v2969_v41  ;;  %v1013_v53 = vpop.f32.mrf.mxu0  ;;  %v2080_v37 = vadd.s32 336, %v4542_v4  ;;  %v2974_v40 = vmul.f32 %v2713_v21, %v2713_v21  ;;  %v4761_v49 = vpop.f32.mrf.mxu1 }
 0x11b   : > { %v2711_v56 = vsel %vm2327_vm1, %v1013_v53, 0.0  ;;  %4053 = vst [vmem:[%s4564_s28 + $0x158] sm:$0xff] %v3909_v30   ;;  %vm2332_vm7 = vcmp.lt.s32.totalorder %v2204_v33, 2048  ;;  %vm2334_vm8 = vcmp.lt.s32.totalorder %v2206_v22, 2048  ;;  %vm2335_vm9 = vcmp.lt.s32.totalorder %v2207_v47, 2048 }
 0x11c   : > { %v3097_v62 = vadd.f32 %v3096_v52, %v2970_v50  ;;  %v2837_v63 = vadd.f32 %v2836_v51, %v2710_v44  ;;  %v4182_v1 = vpop.f32.mrf.mxu0  ;;  %v2972_v13 = vmul.f32 %v2711_v56, %v2711_v56  ;;  %v2079_v50 = vadd.s32 328, %v4542_v4 }
 0x11d   : > { %v3779_v6 = vpack.c.bf16 %v4182_v1, %v4181_v42  ;;  %v2714_v35 = vsel %vm2330_vm4, %v4182_v1, 0.0  ;;  %v3904_v51 = vpack.c.bf16 %v4761_v49, %v4746_v18  ;;  %v2210_v8 = vadd.s32 %v4547_v7, %v2081_v57 }
 0x11e   : > { %v2838_v11 = vadd.f32 %v2837_v63, %v2711_v56  ;;  %v3098_v14 = vadd.f32 %v3097_v62, %v2971_v60  ;;  %v1016_v15 = vpop.f32.mrf.mxu0  ;;  %v2975_v52 = vmul.f32 %v2714_v35, %v2714_v35  ;;  %v4768_v60 = vpop.f32.mrf.mxu1  ;;  %v2209_v63 = vadd.s32 %v4547_v7, %v2080_v37 }
 0x11f   : > { %4027 = vst [vmem:[%s4564_s28 + $0x88] sm:$0xff] %v3779_v6   ;;  %v3774_v23 = vpack.c.bf16 %v1016_v15, %v1013_v53  ;;  %v2712_v24 = vsel %vm2328_vm3, %v1016_v15, 0.0  ;;  %4052 = vst [vmem:[%s4564_s28 + $0x150] sm:$0xff] %v3904_v51   ;;  %v2208_v17 = vadd.s32 %v4547_v7, %v2079_v50  ;;  %v2083_v22 = vadd.s32 360, %v4542_v4 }
 0x120   : > { %v3099_v25 = vadd.f32 %v3098_v14, %v2972_v13  ;;  %v2839_v26 = vadd.f32 %v2838_v11, %v2712_v24  ;;  %v2973_v28 = vmul.f32 %v2712_v24, %v2712_v24  ;;  %v4185_v32 = vpop.f32.mrf.mxu0  ;;  %v4773_v11 = vpop.f32.mrf.mxu1  ;;  %vm2337_vm10 = vcmp.lt.s32.totalorder %v2209_v63, 2048 }
 0x121   : > { %4026 = vst [vmem:[%s4564_s28 + $0x80] sm:$0xff] %v3774_v23   ;;  %v2717_v13 = vsel %vm2333_vm6, %v4185_v32, 0.0  ;;  %vm2336_vm11 = vcmp.lt.s32.totalorder %v2208_v17, 2048  ;;  %vm2338_vm12 = vcmp.lt.s32.totalorder %v2210_v8, 2048  ;;  %v2085_v57 = vadd.s32 376, %v4542_v4 }
 0x122   : > { %v2840_v41 = vadd.f32 %v2839_v26, %v2713_v21  ;;  %v3100_v42 = vadd.f32 %v3099_v25, %v2973_v28  ;;  %v1029_v44 = vpop.f32.mrf.mxu0  ;;  %v2082_v26 = vadd.s32 352, %v4542_v4  ;;  %v4780_v28 = vpop.f32.mrf.mxu1  ;;  %v2978_v37 = vmul.f32 %v2717_v13, %v2717_v13 }
 0x123   : > { %v2715_v39 = vsel %vm2331_vm5, %v1029_v44, 0.0  ;;  %5225 = vst [vmem:[#allocation2_spill] sm:$0xff] %v4780_v28  ;;  %v3919_v33 = vpack.c.bf16 %v4780_v28, %v4768_v60  ;;  %v2214_v63 = vadd.s32 %v4547_v7, %v2085_v57  ;;  %v2087_v57 = vadd.s32 392, %v4542_v4 }
 0x124   : > { %v3101_v53 = vadd.f32 %v3100_v42, %v2974_v40  ;;  %v2841_v56 = vadd.f32 %v2840_v41, %v2714_v35  ;;  %v4186_v61 = vpop.f32.mrf.mxu0  ;;  %v2976_v2 = vmul.f32 %v2715_v39, %v2715_v39  ;;  %v4788_v42 = vpop.f32.mrf.mxu1 }
 0x125   : > { %v3789_v62 = vpack.c.bf16 %v4186_v61, %v4185_v32  ;;  %v2718_v35 = vsel %vm2334_vm8, %v4186_v61, 0.0  ;;  %v2084_v32 = vadd.s32 368, %v4542_v4  ;;  %5226 = vst [vmem:[#allocation3_spill] sm:$0xff] %v4788_v42  ;;  %4055 = vst [vmem:[%s4564_s28 + $0x168] sm:$0xff] %v3919_v33   ;;  %vm2342_vm0 = vcmp.lt.s32.totalorder %v2214_v63, 2048 }
 0x126   : > { %v2842_v1 = vadd.f32 %v2841_v56, %v2715_v39  ;;  %v3102_v6 = vadd.f32 %v3101_v53, %v2975_v52  ;;  %v1032_v10 = vpop.f32.mrf.mxu0  ;;  %v3914_v39 = vpack.c.bf16 %v4788_v42, %v4773_v11  ;;  %v2979_v50 = vmul.f32 %v2718_v35, %v2718_v35  ;;  %v4796_v61 = vpop.f32.mrf.mxu1 }
 0x127   : > { %4029 = vst [vmem:[%s4564_s28 + $0x98] sm:$0xff] %v3789_v62   ;;  %v3784_v14 = vpack.c.bf16 %v1032_v10, %v1029_v44  ;;  %v2716_v15 = vsel %vm2332_vm7, %v1032_v10, 0.0  ;;  %v2211_v56 = vadd.s32 %v4547_v7, %v2082_v26  ;;  %5227 = vst [vmem:[#allocation4_spill] sm:$0xff] %v4796_v61  ;;  %v2213_v47 = vadd.s32 %v4547_v7, %v2084_v32 }
 0x128   : > { %v3103_v21 = vadd.f32 %v3102_v6, %v2976_v2  ;;  %v2843_v23 = vadd.f32 %v2842_v1, %v2716_v15  ;;  %v2977_v24 = vmul.f32 %v2716_v15, %v2716_v15  ;;  %v4189_v25 = vpop.f32.mrf.mxu0  ;;  %4054 = vst [vmem:[%s4564_s28 + $0x160] sm:$0xff] %v3914_v39  }
 0x129   : > { %4028 = vst [vmem:[%s4564_s28 + $0x90] sm:$0xff] %v3784_v14   ;;  %v4802_v14 = vpop.f32.mrf.mxu1  ;;  %v2721_v15 = vsel %vm2337_vm10, %v4189_v25, 0.0  ;;  %vm2339_vm13 = vcmp.lt.s32.totalorder %v2211_v56, 2048  ;;  %vm2341_vm14 = vcmp.lt.s32.totalorder %v2213_v47, 2048  ;;  %v2092_v47 = vadd.s32 432, %v4542_v4 }
 0x12a   : > { %v2844_v30 = vadd.f32 %v2843_v23, %v2717_v13  ;;  %v3104_v40 = vadd.f32 %v3103_v21, %v2977_v24  ;;  %v1045_v41 = vpop.f32.mrf.mxu0  ;;  %v2086_v13 = vadd.s32 384, %v4542_v4  ;;  %5228 = vst [vmem:[#allocation5_spill] sm:$0xff] %v4802_v14  ;;  %v2212_v24 = vadd.s32 %v4547_v7, %v2083_v22 }
 0x12b   : > { %v2719_v44 = vsel %vm2335_vm9, %v1045_v41, 0.0 }
 0x12c   : > { %v3105_v51 = vadd.f32 %v3104_v40, %v2978_v37  ;;  %v2845_v52 = vadd.f32 %v2844_v30, %v2718_v35  ;;  %v4190_v53 = vpop.f32.mrf.mxu0  ;;  %v2980_v2 = vmul.f32 %v2719_v44, %v2719_v44  ;;  %v4808_v37 = vpop.f32.mrf.mxu1  ;;  %v2982_v40 = vmul.f32 %v2721_v15, %v2721_v15 }
 0x12d   : > { %v3799_v62 = vpack.c.bf16 %v4190_v53, %v4189_v25  ;;  %5229 = vst [vmem:[#allocation6_spill] sm:$0xff] %v4808_v37  ;;  %v2722_v30 = vsel %vm2338_vm12, %v4190_v53, 0.0  ;;  %v2088_v25 = vadd.s32 400, %v4542_v4  ;;  %v3929_v17 = vpack.c.bf16 %v4808_v37, %v4796_v61 }
 0x12e   : > { %v2846_v1 = vadd.f32 %v2845_v52, %v2719_v44  ;;  %v3106_v6 = vadd.f32 %v3105_v51, %v2979_v50  ;;  %v1048_v10 = vpop.f32.mrf.mxu0  ;;  %v2215_v39 = vadd.s32 %v4547_v7, %v2086_v13  ;;  %v4817_v50 = vpop.f32.mrf.mxu1  ;;  %vm2340_vm15 = vcmp.lt.s32.totalorder %v2212_v24, 2048 }
 0x12f   : > { %4031 = vst [vmem:[%s4564_s28 + $0xa8] sm:$0xff] %v3799_v62   ;;  %v3794_v21 = vpack.c.bf16 %v1048_v10, %v1045_v41  ;;  %v2720_v23 = vsel %vm2336_vm11, %v1048_v10, 0.0  ;;  %5230 = vst [vmem:[#allocation7_spill] sm:$0xff] %v4817_v50  ;;  %v2089_v51 = vadd.s32 408, %v4542_v4  ;;  %v2983_v52 = vmul.f32 %v2722_v30, %v2722_v30 }
 0x130   : > { %v3107_v26 = vadd.f32 %v3106_v6, %v2980_v2  ;;  %v2847_v35 = vadd.f32 %v2846_v1, %v2720_v23  ;;  %v2981_v32 = vmul.f32 %v2720_v23, %v2720_v23  ;;  %v4193_v33 = vpop.f32.mrf.mxu0  ;;  %4057 = vst [vmem:[%s4564_s28 + $0x178] sm:$0xff] %v3929_v17   ;;  %v4822_v1 = vpop.f32.mrf.mxu1  ;;  %v2217_v6 = vadd.s32 %v4547_v7, %v2088_v25 }
 0x131   : > { %4030 = vst [vmem:[%s4564_s28 + $0xa0] sm:$0xff] %v3794_v21   ;;  %5231 = vst [vmem:[#allocation8_spill] sm:$0xff] %v4822_v1  ;;  %v2090_v10 = vadd.s32 416, %v4542_v4  ;;  %vm2343_vm1 = vcmp.lt.s32.totalorder %v2215_v39, 2048  ;;  %v2218_v17 = vadd.s32 %v4547_v7, %v2089_v51  ;;  %v3924_v24 = vpack.c.bf16 %v4817_v50, %v4802_v14 }
 0x132   : > { %v2848_v41 = vadd.f32 %v2847_v35, %v2721_v15  ;;  %v3108_v44 = vadd.f32 %v3107_v26, %v2981_v32  ;;  %v1061_v22 = vpop.f32.mrf.mxu0  ;;  %v4826_v26 = vpop.f32.mrf.mxu1  ;;  %v2725_v35 = vsel %vm2341_vm14, %v4193_v33, 0.0  ;;  %vm2345_vm2 = vcmp.lt.s32.totalorder %v2217_v6, 2048 }
 0x133   : > { %v2723_v8 = vsel %vm2339_vm13, %v1061_v22, 0.0  ;;  %5232 = vst [vmem:[#allocation9_spill] sm:$0xff] %v4826_v26  ;;  %4056 = vst [vmem:[%s4564_s28 + $0x170] sm:$0xff] %v3924_v24   ;;  %vm2346_vm4 = vcmp.lt.s32.totalorder %v2218_v17, 2048  ;;  %v2096_v6 = vadd.s32 464, %v4542_v4 }
 0x134   : > { %v3109_v53 = vadd.f32 %v3108_v44, %v2982_v40  ;;  %v2849_v56 = vadd.f32 %v2848_v41, %v2722_v30  ;;  %v4194_v62 = vpop.f32.mrf.mxu0  ;;  %v2984_v15 = vmul.f32 %v2723_v8, %v2723_v8 }
 0x135   : > { %v3809_v2 = vpack.c.bf16 %v4194_v62, %v4193_v33  ;;  %v2219_v33 = vadd.s32 %v4547_v7, %v2090_v10 }
 0x136   : > { %v2850_v13 = vadd.f32 %v2849_v56, %v2723_v8  ;;  %v3110_v21 = vadd.f32 %v3109_v53, %v2983_v52  ;;  %v1064_v23 = vpop.f32.mrf.mxu0  ;;  %v2216_v8 = vadd.s32 %v4547_v7, %v2087_v57  ;;  %v4833_v52 = vpop.f32.mrf.mxu1  ;;  %v2726_v53 = vsel %vm2342_vm0, %v4194_v62, 0.0 }
 0x137   : > { %4033 = vst [vmem:[%s4564_s28 + $0xb8] sm:$0xff] %v3809_v2   ;;  %v3804_v32 = vpack.c.bf16 %v1064_v23, %v1061_v22  ;;  %v2724_v30 = vsel %vm2340_vm15, %v1064_v23, 0.0  ;;  %5233 = vst [vmem:[#allocation10_spill] sm:$0xff] %v4833_v52  ;;  %v2986_v22 = vmul.f32 %v2725_v35, %v2725_v35  ;;  %v2091_v62 = vadd.s32 424, %v4542_v4 }
 0x138   : > { %v3111_v40 = vadd.f32 %v3110_v21, %v2984_v15  ;;  %v2851_v25 = vadd.f32 %v2850_v13, %v2724_v30  ;;  %v2985_v41 = vmul.f32 %v2724_v30, %v2724_v30  ;;  %v4197_v44 = vpop.f32.mrf.mxu0  ;;  %v2093_v13 = vadd.s32 440, %v4542_v4  ;;  %v4842_v57 = vpop.f32.mrf.mxu1 }
 0x139   : > { %4032 = vst [vmem:[%s4564_s28 + $0xb0] sm:$0xff] %v3804_v32   ;;  %5234 = vst [vmem:[#allocation11_spill] sm:$0xff] %v4842_v57  ;;  %v2987_v15 = vmul.f32 %v2726_v53, %v2726_v53  ;;  %vm2344_vm3 = vcmp.lt.s32.totalorder %v2216_v8, 2048  ;;  %v2221_v30 = vadd.s32 %v4547_v7, %v2092_v47  ;;  %vm2347_vm5 = vcmp.lt.s32.totalorder %v2219_v33, 2048 }
 0x13a   : > { %v2852_v51 = vadd.f32 %v2851_v25, %v2725_v35  ;;  %v3112_v56 = vadd.f32 %v3111_v40, %v2985_v41  ;;  %v1077_v2 = vpop.f32.mrf.mxu0  ;;  %v4847_v32 = vpop.f32.mrf.mxu1  ;;  %v2222_v24 = vadd.s32 %v4547_v7, %v2093_v13 }
 0x13b   : > { %v2727_v63 = vsel %vm2343_vm1, %v1077_v2, 0.0  ;;  %5235 = vst [vmem:[#allocation12_spill] sm:$0xff] %v4847_v32  ;;  %vm2349_vm6 = vcmp.lt.s32.totalorder %v2221_v30, 2048  ;;  %v2100_v30 = vadd.s32 496, %v4542_v4 }
 0x13c   : > { %v3113_v21 = vadd.f32 %v3112_v56, %v2986_v22  ;;  %v2853_v10 = vadd.f32 %v2852_v51, %v2726_v53  ;;  %v4198_v23 = vpop.f32.mrf.mxu0  ;;  %v2988_v25 = vmul.f32 %v2727_v63, %v2727_v63  ;;  %v4851_v37 = vpop.f32.mrf.mxu1  ;;  %v2729_v53 = vsel %vm2345_vm2, %v4197_v44, 0.0 }
 0x13d   : > { %v3819_v35 = vpack.c.bf16 %v4198_v23, %v4197_v44  ;;  %5236 = vst [vmem:[#allocation13_spill] sm:$0xff] %v4851_v37  ;;  %v2220_v51 = vadd.s32 %v4547_v7, %v2091_v62  ;;  %v2730_v13 = vsel %vm2346_vm4, %v4198_v23, 0.0  ;;  %v2095_v44 = vadd.s32 456, %v4542_v4 }
 0x13e   : > { %v2854_v40 = vadd.f32 %v2853_v10, %v2727_v63  ;;  %v3114_v39 = vadd.f32 %v3113_v21, %v2987_v15  ;;  %v1080_v41 = vpop.f32.mrf.mxu0  ;;  %v2094_v63 = vadd.s32 448, %v4542_v4  ;;  %v4857_v15 = vpop.f32.mrf.mxu1  ;;  %v2990_v62 = vmul.f32 %v2729_v53, %v2729_v53 }
 0x13f   : > { %4035 = vst [vmem:[%s4564_s28 + $0xc8] sm:$0xff] %v3819_v35   ;;  %v3814_v8 = vpack.c.bf16 %v1080_v41, %v1077_v2  ;;  %v2728_v22 = vsel %vm2344_vm3, %v1080_v41, 0.0  ;;  %5237 = vst [vmem:[#allocation14_spill] sm:$0xff] %v4857_v15  ;;  %v3939_v2 = vpack.c.bf16 %v4833_v52, %v4822_v1  ;;  %vm2350_vm7 = vcmp.lt.s32.totalorder %v2222_v24, 2048 }
 0x140   : > { %v3115_v56 = vadd.f32 %v3114_v39, %v2988_v25  ;;  %v2855_v61 = vadd.f32 %v2854_v40, %v2728_v22  ;;  %v2989_v47 = vmul.f32 %v2728_v22, %v2728_v22  ;;  %v4201_v50 = vpop.f32.mrf.mxu0  ;;  %v4865_v40 = vpop.f32.mrf.mxu1  ;;  %vm2348_vm8 = vcmp.lt.s32.totalorder %v2220_v51, 2048 }
 0x141   : > { %4034 = vst [vmem:[%s4564_s28 + $0xc0] sm:$0xff] %v3814_v8   ;;  %5238 = vst [vmem:[#allocation15_spill] sm:$0xff] %v4865_v40  ;;  %v2991_v17 = vmul.f32 %v2730_v13, %v2730_v13  ;;  %v2223_v8 = vadd.s32 %v4547_v7, %v2094_v63  ;;  %v2224_v33 = vadd.s32 %v4547_v7, %v2095_v44  ;;  %v2733_v63 = vsel %vm2349_vm6, %v4201_v50, 0.0 }
 0x142   : > { %v2856_v21 = vadd.f32 %v2855_v61, %v2729_v53  ;;  %v3116_v10 = vadd.f32 %v3115_v56, %v2989_v47  ;;  %v1093_v35 = vpop.f32.mrf.mxu0  ;;  %4059 = vst [vmem:[%s4564_s28 + $0x188] sm:$0xff] %v3939_v2   ;;  %v4870_v22 = vpop.f32.mrf.mxu1  ;;  %v2225_v53 = vadd.s32 %v4547_v7, %v2096_v6  ;;  %v2097_v56 = vadd.s32 472, %v4542_v4 }
 0x143   : > { %v2731_v25 = vsel %vm2347_vm5, %v1093_v35, 0.0  ;;  %vm2351_vm9 = vcmp.lt.s32.totalorder %v2223_v8, 2048  ;;  %v3949_v51 = vpack.c.bf16 %v4857_v15, %v4847_v32  ;;  %vm2352_vm11 = vcmp.lt.s32.totalorder %v2224_v33, 2048 }
 0x144   : > { %v3117_v23 = vadd.f32 %v3116_v10, %v2990_v62  ;;  %v2857_v39 = vadd.f32 %v2856_v21, %v2730_v13  ;;  %v4202_v41 = vpop.f32.mrf.mxu0  ;;  %v2992_v52 = vmul.f32 %v2731_v25, %v2731_v25  ;;  %v2098_v62 = vadd.s32 480, %v4542_v4  ;;  %v4876_v13 = vpop.f32.mrf.mxu1 }
 0x145   : > { %v3829_v61 = vpack.c.bf16 %v4202_v41, %v4201_v50  ;;  %v3934_v10 = vpack.c.bf16 %v4842_v57, %v4826_v26  ;;  %v2734_v14 = vsel %vm2350_vm7, %v4202_v41, 0.0  ;;  %v2226_v50 = vadd.s32 %v4547_v7, %v2097_v56  ;;  %4061 = vst [vmem:[%s4564_s28 + $0x198] sm:$0xff] %v3949_v51  }
 0x146   : > { %v2858_v47 = vadd.f32 %v2857_v39, %v2731_v25  ;;  %v3118_v1 = vadd.f32 %v3117_v23, %v2991_v17  ;;  %v1096_v2 = vpop.f32.mrf.mxu0  ;;  %v4883_v23 = vpop.f32.mrf.mxu1  ;;  %v2227_v8 = vadd.s32 %v4547_v7, %v2098_v62  ;;  %vm2353_vm10 = vcmp.lt.s32.totalorder %v2225_v53, 2048 }
 0x147   : > { %4037 = vst [vmem:[%s4564_s28 + $0xd8] sm:$0xff] %v3829_v61   ;;  %v3824_v21 = vpack.c.bf16 %v1096_v2, %v1093_v35  ;;  %v2732_v6 = vsel %vm2348_vm8, %v1096_v2, 0.0  ;;  %4058 = vst [vmem:[%s4564_s28 + $0x180] sm:$0xff] %v3934_v10   ;;  %v2994_v35 = vmul.f32 %v2733_v63, %v2733_v63  ;;  %v2995_v41 = vmul.f32 %v2734_v14, %v2734_v14 }
 0x148   : > { %v3119_v44 = vadd.f32 %v3118_v1, %v2992_v52  ;;  %v2859_v39 = vadd.f32 %v2858_v47, %v2732_v6  ;;  %v2993_v25 = vmul.f32 %v2732_v6, %v2732_v6  ;;  %v4205_v17 = vpop.f32.mrf.mxu0  ;;  %v4893_v47 = vpop.f32.mrf.mxu1  ;;  %v2099_v6 = vadd.s32 488, %v4542_v4 }
 0x149   : > { %4036 = vst [vmem:[%s4564_s28 + $0xd0] sm:$0xff] %v3824_v21   ;;  %vm2354_vm12 = vcmp.lt.s32.totalorder %v2226_v50, 2048  ;;  %v2101_v62 = vadd.s32 504, %v4542_v4  ;;  %vm2355_vm13 = vcmp.lt.s32.totalorder %v2227_v8, 2048  ;;  %v2102_v32 = vadd.s32 512, %v4542_v4 }
 0x14a   : > { %v2860_v1 = vadd.f32 %v2859_v39, %v2733_v63  ;;  %v3120_v52 = vadd.f32 %v3119_v44, %v2993_v25  ;;  %v1109_v61 = vpop.f32.mrf.mxu0  ;;  %v4897_v10 = vpop.f32.mrf.mxu1  ;;  %v2229_v44 = vadd.s32 %v4547_v7, %v2100_v30  ;;  %v2104_v53 = vadd.s32 528, %v4542_v4 }
 0x14b   : > { %v2735_v24 = vsel %vm2351_vm9, %v1109_v61, 0.0  ;;  %v3944_v33 = vpack.c.bf16 %v4865_v40, %v4851_v37 }
 0x14c   : > { %v3121_v56 = vadd.f32 %v3120_v52, %v2994_v35  ;;  %v2861_v2 = vadd.f32 %v2860_v1, %v2734_v14  ;;  %v4206_v21 = vpop.f32.mrf.mxu0  ;;  %v2996_v25 = vmul.f32 %v2735_v24, %v2735_v24  ;;  %v4901_v35 = vpop.f32.mrf.mxu1  ;;  %v2737_v14 = vsel %vm2353_vm10, %v4205_v17, 0.0 }
 0x14d   : > { %v3839_v63 = vpack.c.bf16 %v4206_v21, %v4205_v17  ;;  %v2230_v17 = vadd.s32 %v4547_v7, %v2101_v62  ;;  %vm2357_vm14 = vcmp.lt.s32.totalorder %v2229_v44, 2048  ;;  %4060 = vst [vmem:[%s4564_s28 + $0x190] sm:$0xff] %v3944_v33   ;;  %v3959_v44 = vpack.c.bf16 %v4883_v23, %v4870_v22 }
 0x14e   : > { %v2862_v39 = vadd.f32 %v2861_v2, %v2735_v24  ;;  %v3122_v15 = vadd.f32 %v3121_v56, %v2995_v41  ;;  %v1112_v51 = vpop.f32.mrf.mxu0  ;;  %v2228_v24 = vadd.s32 %v4547_v7, %v2099_v6  ;;  %v4908_v41 = vpop.f32.mrf.mxu1  ;;  %v2738_v56 = vsel %vm2354_vm12, %v4206_v21, 0.0 }
 0x14f   : > { %4039 = vst [vmem:[%s4564_s28 + $0xe8] sm:$0xff] %v3839_v63   ;;  %v3834_v1 = vpack.c.bf16 %v1112_v51, %v1109_v61  ;;  %v2736_v52 = vsel %vm2352_vm11, %v1112_v51, 0.0  ;;  %v2998_v61 = vmul.f32 %v2737_v14, %v2737_v14  ;;  %v2231_v21 = vadd.s32 %v4547_v7, %v2102_v32  ;;  %4063 = vst [vmem:[%s4564_s28 + $0x1a8] sm:$0xff] %v3959_v44  }
 0x150   : > { %v3123_v57 = vadd.f32 %v3122_v15, %v2996_v25  ;;  %v2863_v30 = vadd.f32 %v2862_v39, %v2736_v52  ;;  %v2997_v26 = vmul.f32 %v2736_v52, %v2736_v52  ;;  %v4209_v28 = vpop.f32.mrf.mxu0  ;;  %v2103_v39 = vadd.s32 520, %v4542_v4  ;;  %v4917_v6 = vpop.f32.mrf.mxu1 }
 0x151   : > { %4038 = vst [vmem:[%s4564_s28 + $0xe0] sm:$0xff] %v3834_v1   ;;  %v2999_v25 = vmul.f32 %v2738_v56, %v2738_v56  ;;  %vm2356_vm15 = vcmp.lt.s32.totalorder %v2228_v24, 2048  ;;  %vm2358_vm0 = vcmp.lt.s32.totalorder %v2230_v17, 2048  ;;  %vm2359_vm1 = vcmp.lt.s32.totalorder %v2231_v21, 2048 }
 0x152   : > { %v2864_v15 = vadd.f32 %v2863_v30, %v2737_v14  ;;  %v3124_v2 = vadd.f32 %v3123_v57, %v2997_v26  ;;  %v1125_v63 = vpop.f32.mrf.mxu0  ;;  %v4922_v52 = vpop.f32.mrf.mxu1  ;;  %v2233_v26 = vadd.s32 %v4547_v7, %v2104_v53  ;;  %v2105_v14 = vadd.s32 536, %v4542_v4 }
 0x153   : > { %v2739_v50 = vsel %vm2355_vm13, %v1125_v63, 0.0  ;;  %v2232_v33 = vadd.s32 %v4547_v7, %v2103_v39  ;;  %v2743_v17 = vsel %vm2359_vm1, %v4608_v54, 0.0  ;;  %v2109_v21 = vadd.s32 568, %v4542_v4 }
 0x154   : > { %v3125_v51 = vadd.f32 %v3124_v2, %v2998_v61  ;;  %v2865_v62 = vadd.f32 %v2864_v15, %v2738_v56  ;;  %v4210_v1 = vpop.f32.mrf.mxu0  ;;  %v3000_v8 = vmul.f32 %v2739_v50, %v2739_v50  ;;  %v4927_v61 = vpop.f32.mrf.mxu1  ;;  %v2741_v56 = vsel %vm2357_vm14, %v4209_v28, 0.0 }
 0x155   : > { %v3849_v57 = vpack.c.bf16 %v4210_v1, %v4209_v28  ;;  %v2234_v39 = vadd.s32 %v4547_v7, %v2105_v14  ;;  %v2107_v28 = vadd.s32 552, %v4542_v4  ;;  %v3002_v24 = vmul.f32 %v2741_v56, %v2741_v56 }
 0x156   : > { %v2866_v30 = vadd.f32 %v2865_v62, %v2739_v50  ;;  %v3126_v40 = vadd.f32 %v3125_v51, %v2999_v25  ;;  %v1128_v32 = vpop.f32.mrf.mxu0  ;;  %v2106_v50 = vadd.s32 544, %v4542_v4  ;;  %v4933_v62 = vpop.f32.mrf.mxu1  ;;  %v2742_v25 = vsel %vm2358_vm0, %v4210_v1, 0.0 }
 0x157   : > { %4041 = vst [vmem:[%s4564_s28 + $0xf8] sm:$0xff] %v3849_v57   ;;  %v3844_v15 = vpack.c.bf16 %v1128_v32, %v1125_v63  ;;  %v2740_v53 = vsel %vm2356_vm15, %v1128_v32, 0.0  ;;  %vm2360_vm2 = vcmp.lt.s32.totalorder %v2232_v33, 2048  ;;  %vm2361_vm3 = vcmp.lt.s32.totalorder %v2233_v26, 2048 }
 0x158   : > { %v3127_v2 = vadd.f32 %v3126_v40, %v3000_v8  ;;  %v2867_v37 = vadd.f32 %v2866_v30, %v2740_v53  ;;  %v3001_v42 = vmul.f32 %v2740_v53, %v2740_v53  ;;  %v4941_v51 = vpop.f32.mrf.mxu1  ;;  %v2108_v1 = vadd.s32 560, %v4542_v4 }
 0x159   : > { %4040 = vst [vmem:[%s4564_s28 + $0xf0] sm:$0xff] %v3844_v15   ;;  %v3954_v57 = vpack.c.bf16 %v4893_v47, %v4876_v13  ;;  %v3003_v14 = vmul.f32 %v2742_v25, %v2742_v25  ;;  %vm2362_vm4 = vcmp.lt.s32.totalorder %v2234_v39, 2048  ;;  %v2744_v32 = vsel %vm2360_vm2, %v4623_v12, 0.0 }
 0x15a   : > { %v2868_v63 = vadd.f32 %v2867_v37, %v2741_v56  ;;  %v3128_v40 = vadd.f32 %v3127_v2, %v3001_v42  ;;  %v2235_v37 = vadd.s32 %v4547_v7, %v2106_v50  ;;  %v4950_v42 = vpop.f32.mrf.mxu1  ;;  %v2236_v54 = vadd.s32 %v4547_v7, %v2107_v28 }
 0x15b   : > { %4062 = vst [vmem:[%s4564_s28 + $0x1a0] sm:$0xff] %v3954_v57   ;;  %v3004_v33 = vmul.f32 %v2743_v17, %v2743_v17  ;;  %v3969_v53 = vpack.c.bf16 %v4908_v41, %v4897_v10  ;;  %v2745_v50 = vsel %vm2361_vm3, %v4604_v46, 0.0  ;;  %v2110_v12 = vadd.s32 576, %v4542_v4 }
 0x15c   : > { %v2869_v30 = vadd.f32 %v2868_v63, %v2742_v25  ;;  %v3129_v8 = vadd.f32 %v3128_v40, %v3002_v24  ;;  %v4958_v2 = vpop.f32.mrf.mxu1  ;;  %v2237_v25 = vadd.s32 %v4547_v7, %v2108_v1  ;;  %v3005_v63 = vmul.f32 %v2744_v32, %v2744_v32 }
 0x15d   : > { %vm2363_vm5 = vcmp.lt.s32.totalorder %v2235_v37, 2048  ;;  %4065 = vst [vmem:[%s4564_s28 + $0x1b8] sm:$0xff] %v3969_v53   ;;  %v2746_v40 = vsel %vm2362_vm4, %v4614_v0, 0.0  ;;  %vm2364_vm6 = vcmp.lt.s32.totalorder %v2236_v54, 2048  ;;  %v2112_v26 = vadd.s32 592, %v4542_v4 }
 0x15e   : > { %v2870_v56 = vadd.f32 %v2869_v30, %v2743_v17  ;;  %v3130_v15 = vadd.f32 %v3129_v8, %v3003_v14  ;;  %v4965_v28 = vpop.f32.mrf.mxu1  ;;  %v2238_v17 = vadd.s32 %v4547_v7, %v2109_v21  ;;  %v3006_v46 = vmul.f32 %v2745_v50, %v2745_v50 }
 0x15f   : > { %v2111_v14 = vadd.s32 584, %v4542_v4  ;;  %v2747_v8 = vsel %vm2363_vm5, %v4636_v29, 0.0  ;;  %v2239_v37 = vadd.s32 %v4547_v7, %v2110_v12  ;;  %v2113_v39 = vadd.s32 600, %v4542_v4 }
 0x160   : > { %v3131_v44 = vadd.f32 %v3130_v15, %v3004_v33  ;;  %v2871_v24 = vadd.f32 %v2870_v56, %v2744_v32  ;;  %v4972_v30 = vpop.f32.mrf.mxu1  ;;  %v3964_v0 = vpack.c.bf16 %v4917_v6, %v4901_v35  ;;  %v3007_v32 = vmul.f32 %v2746_v40, %v2746_v40 }
 0x161   : > { %vm2365_vm7 = vcmp.lt.s32.totalorder %v2237_v25, 2048  ;;  %vm2366_vm8 = vcmp.lt.s32.totalorder %v2238_v17, 2048  ;;  %v2748_v15 = vsel %vm2364_vm6, %v4650_v48, 0.0  ;;  %v2241_v29 = vadd.s32 %v4547_v7, %v2112_v26 }
 0x162   : > { %v2872_v57 = vadd.f32 %v2871_v24, %v2745_v50  ;;  %v3132_v1 = vadd.f32 %v3131_v44, %v3005_v63  ;;  %v4979_v56 = vpop.f32.mrf.mxu1  ;;  %4064 = vst [vmem:[%s4564_s28 + $0x1b0] sm:$0xff] %v3964_v0   ;;  %v3979_v53 = vpack.c.bf16 %v4933_v62, %v4922_v52  ;;  %v3008_v12 = vmul.f32 %v2747_v8, %v2747_v8 }
 0x163   : > { %v2240_v24 = vadd.s32 %v4547_v7, %v2111_v14  ;;  %v2749_v63 = vsel %vm2365_vm7, %v4630_v20, 0.0  ;;  %vm2367_vm9 = vcmp.lt.s32.totalorder %v2239_v37, 2048  ;;  %v2242_v54 = vadd.s32 %v4547_v7, %v2113_v39 }
 0x164   : > { %v3133_v21 = vadd.f32 %v3132_v1, %v3006_v46  ;;  %v2873_v33 = vadd.f32 %v2872_v57, %v2746_v40  ;;  %v4988_v25 = vpop.f32.mrf.mxu1  ;;  %v2114_v48 = vadd.s32 608, %v4542_v4  ;;  %4067 = vst [vmem:[%s4564_s28 + $0x1c8] sm:$0xff] %v3979_v53   ;;  %v3009_v46 = vmul.f32 %v2748_v15, %v2748_v15 }
 0x165   : > { %v3974_v57 = vpack.c.bf16 %v4941_v51, %v4927_v61  ;;  %v2750_v14 = vsel %vm2366_vm8, %v4642_v38, 0.0  ;;  %v2116_v20 = vadd.s32 624, %v4542_v4  ;;  %v3010_v0 = vmul.f32 %v2749_v63, %v2749_v63 }
 0x166   : > { %v2874_v50 = vadd.f32 %v2873_v33, %v2747_v8  ;;  %v3134_v44 = vadd.f32 %v3133_v21, %v3007_v32  ;;  %v4996_v1 = vpop.f32.mrf.mxu1  ;;  %v2115_v8 = vadd.s32 616, %v4542_v4  ;;  %vm2368_vm10 = vcmp.lt.s32.totalorder %v2240_v24, 2048 }
 0x167   : > { %4066 = vst [vmem:[%s4564_s28 + $0x1c0] sm:$0xff] %v3974_v57   ;;  %vm2369_vm11 = vcmp.lt.s32.totalorder %v2241_v29, 2048  ;;  %v2751_v21 = vsel %vm2367_vm9, %v4663_v5, 0.0  ;;  %v2243_v33 = vadd.s32 %v4547_v7, %v2114_v48  ;;  %v3011_v53 = vmul.f32 %v2750_v14, %v2750_v14 }
 0x168   : > { %v3135_v40 = vadd.f32 %v3134_v44, %v3008_v12  ;;  %v2875_v26 = vadd.f32 %v2874_v50, %v2748_v15  ;;  %v2117_v15 = vadd.s32 632, %v4542_v4  ;;  %vm2370_vm12 = vcmp.lt.s32.totalorder %v2242_v54, 2048  ;;  %v5007_v50 = vpop.f32.mrf.mxu1 }
 0x169   : > { %v2752_v12 = vsel %vm2368_vm10, %v4678_v27, 0.0  ;;  %v2245_v44 = vadd.s32 %v4547_v7, %v2116_v20  ;;  %v2244_v24 = vadd.s32 %v4547_v7, %v2115_v8  ;;  %v3989_v5 = vpack.c.bf16 %v4965_v28, %v4950_v42 }
 0x16a   : > { %v2876_v39 = vadd.f32 %v2875_v26, %v2749_v63  ;;  %v3136_v32 = vadd.f32 %v3135_v40, %v3009_v46  ;;  %v3012_v63 = vmul.f32 %v2751_v21, %v2751_v21  ;;  %v3984_v40 = vpack.c.bf16 %v4972_v30, %v4958_v2 }
 0x16b   : > { %v2753_v26 = vsel %vm2369_vm11, %v4657_v58, 0.0  ;;  %vm2371_vm13 = vcmp.lt.s32.totalorder %v2243_v33, 2048  ;;  %v2246_v27 = vadd.s32 %v4547_v7, %v2117_v15  ;;  %v2118_v46 = vadd.s32 640, %v4542_v4  ;;  %4069 = vst [vmem:[%s4564_s28 + $0x1d8] sm:$0xff] %v3989_v5  }
 0x16c   : > { %v3137_v17 = vadd.f32 %v3136_v32, %v3010_v0  ;;  %v2877_v38 = vadd.f32 %v2876_v39, %v2750_v14  ;;  %v3013_v20 = vmul.f32 %v2752_v12, %v2752_v12  ;;  %v2120_v8 = vadd.s32 656, %v4542_v4  ;;  %4068 = vst [vmem:[%s4564_s28 + $0x1d0] sm:$0xff] %v3984_v40   ;;  %v5023_v0 = vpop.f32.mrf.mxu1 }
 0x16d   : > { %v2754_v39 = vsel %vm2370_vm12, %v4669_v16, 0.0  ;;  %vm2373_vm14 = vcmp.lt.s32.totalorder %v2245_v44, 2048  ;;  %v2119_v58 = vadd.s32 648, %v4542_v4  ;;  %v3014_v29 = vmul.f32 %v2753_v26, %v2753_v26 }
 0x16e   : > { %v2878_v37 = vadd.f32 %v2877_v38, %v2751_v21  ;;  %v3138_v48 = vadd.f32 %v3137_v17, %v3011_v53  ;;  %vm2372_vm15 = vcmp.lt.s32.totalorder %v2244_v24, 2048  ;;  %v2755_v15 = vsel %vm2371_vm13, %v4690_v45, 0.0  ;;  %v5033_v54 = vpop.f32.mrf.mxu1 }
 0x16f   : > { %vm2374_vm0 = vcmp.lt.s32.totalorder %v2246_v27, 2048  ;;  %v2247_v53 = vadd.s32 %v4547_v7, %v2118_v46  ;;  %v2121_v17 = vadd.s32 664, %v4542_v4  ;;  %v3015_v38 = vmul.f32 %v2754_v39, %v2754_v39 }
 0x170   : > { %v3139_v57 = vadd.f32 %v3138_v48, %v3012_v63  ;;  %v2879_v14 = vadd.f32 %v2878_v37, %v2752_v12  ;;  %v2249_v16 = vadd.s32 %v4547_v7, %v2120_v8  ;;  %v2757_v44 = vsel %vm2373_vm14, %v4685_v36, 0.0 }
 0x171   : > { %v2756_v24 = vsel %vm2372_vm15, %v4706_v9, 0.0  ;;  %v2248_v33 = vadd.s32 %v4547_v7, %v2119_v58  ;;  %v2122_v45 = vadd.s32 672, %v4542_v4  ;;  %v3016_v63 = vmul.f32 %v2755_v15, %v2755_v15 }
 0x172   : > { %v2880_v32 = vadd.f32 %v2879_v14, %v2753_v26  ;;  %v3140_v21 = vadd.f32 %v3139_v57, %v3013_v20  ;;  %v3999_v40 = vpack.c.bf16 %v4996_v1, %v4979_v56  ;;  %vm2375_vm1 = vcmp.lt.s32.totalorder %v2247_v53, 2048  ;;  %v5046_v20 = vpop.f32.mrf.mxu1 }
 0x173   : > { %v2250_v26 = vadd.s32 %v4547_v7, %v2121_v17  ;;  %v2124_v46 = vadd.s32 688, %v4542_v4  ;;  %v3994_v36 = vpack.c.bf16 %v5007_v50, %v4988_v25  ;;  %v3017_v14 = vmul.f32 %v2756_v24, %v2756_v24 }
 0x174   : > { %v3141_v12 = vadd.f32 %v3140_v21, %v3014_v29  ;;  %v2881_v5 = vadd.f32 %v2880_v32, %v2754_v39  ;;  %vm2377_vm2 = vcmp.lt.s32.totalorder %v2249_v16, 2048  ;;  %4071 = vst [vmem:[%s4564_s28 + $0x1e8] sm:$0xff] %v3999_v40   ;;  %v3018_v8 = vmul.f32 %v2757_v44, %v2757_v44 }
 0x175   : > { %v2758_v39 = vsel %vm2374_vm0, %v4697_v59, 0.0  ;;  %vm2376_vm3 = vcmp.lt.s32.totalorder %v2248_v33, 2048  ;;  %v2251_v58 = vadd.s32 %v4547_v7, %v2122_v45  ;;  %4070 = vst [vmem:[%s4564_s28 + $0x1e0] sm:$0xff] %v3994_v36   ;;  %v2759_v21 = vsel %vm2375_vm1, %v4719_v31, 0.0 }
 0x176   : > { %v2882_v37 = vadd.f32 %v2881_v5, %v2755_v15  ;;  %v3142_v48 = vadd.f32 %v3141_v12, %v3015_v38  ;;  %v2123_v15 = vadd.s32 680, %v4542_v4  ;;  %vm2378_vm4 = vcmp.lt.s32.totalorder %v2250_v26, 2048 }
 0x177   : > { %v2253_v17 = vadd.s32 %v4547_v7, %v2124_v46  ;;  %v2125_v38 = vadd.s32 696, %v4542_v4  ;;  %v3019_v12 = vmul.f32 %v2758_v39, %v2758_v39  ;;  %v2761_v59 = vsel %vm2377_vm2, %v4713_v19, 0.0 }
 0x178   : > { %v3143_v9 = vadd.f32 %v3142_v48, %v3016_v63  ;;  %v2883_v57 = vadd.f32 %v2882_v37, %v2756_v24  ;;  %v5059_v24 = vpop.f32.mrf.mxu1  ;;  %v2760_v31 = vsel %vm2376_vm3, %v4733_v55, 0.0  ;;  %vm2379_vm5 = vcmp.lt.s32.totalorder %v2251_v58, 2048 }
 0x179   : > { %v2126_v53 = vadd.s32 704, %v4542_v4  ;;  %v2252_v63 = vadd.s32 %v4547_v7, %v2123_v15  ;;  %v4009_v16 = vpack.c.bf16 %v5046_v20, %v5023_v0  ;;  %v2762_v19 = vsel %vm2378_vm4, %v4725_v43, 0.0 }
 0x17a   : > { %v2884_v29 = vadd.f32 %v2883_v57, %v2757_v44  ;;  %v3144_v32 = vadd.f32 %v3143_v9, %v3017_v14  ;;  %v3020_v44 = vmul.f32 %v2759_v21, %v2759_v21  ;;  %vm2381_vm6 = vcmp.lt.s32.totalorder %v2253_v17, 2048 }
 0x17b   : > { %v2254_v48 = vadd.s32 %v4547_v7, %v2125_v38  ;;  %v4004_v55 = vpack.c.bf16 %v5059_v24, %v5033_v54  ;;  %v3021_v46 = vmul.f32 %v2760_v31, %v2760_v31  ;;  %v2128_v36 = vadd.s32 720, %v4542_v4  ;;  %4073 = vst [vmem:[%s4564_s28 + $0x1f8] sm:$0xff] %v4009_v16  }
 0x17c   : > { %v3145_v5 = vadd.f32 %v3144_v32, %v3018_v8  ;;  %v2885_v27 = vadd.f32 %v2884_v29, %v2758_v39  ;;  %v3022_v9 = vmul.f32 %v2761_v59, %v2761_v59  ;;  %v2763_v57 = vsel %vm2379_vm5, %v4746_v18, 0.0 }
 0x17d   : > { %v2255_v14 = vadd.s32 %v4547_v7, %v2126_v53  ;;  %4072 = vst [vmem:[%s4564_s28 + $0x1f0] sm:$0xff] %v4004_v55   ;;  %vm2380_vm7 = vcmp.lt.s32.totalorder %v2252_v63, 2048  ;;  %v2127_v8 = vadd.s32 712, %v4542_v4  ;;  %v3023_v39 = vmul.f32 %v2762_v19, %v2762_v19 }
 0x17e   : > { %v2886_v45 = vadd.f32 %v2885_v27, %v2759_v21  ;;  %v3146_v37 = vadd.f32 %v3145_v5, %v3019_v12  ;;  %v2765_v29 = vsel %vm2381_vm6, %v4740_v3, 0.0  ;;  %vm2382_vm8 = vcmp.lt.s32.totalorder %v2254_v48, 2048 }
 0x17f   : > { %v2257_v15 = vadd.s32 %v4547_v7, %v2128_v36  ;;  %v3024_v38 = vmul.f32 %v2763_v57, %v2763_v57  ;;  %v2764_v18 = vsel %vm2380_vm7, %v4761_v49, 0.0  ;;  %vm2383_vm9 = vcmp.lt.s32.totalorder %v2255_v14, 2048 }
 0x180   : > { %v3147_v33 = vadd.f32 %v3146_v37, %v3020_v44  ;;  %v2887_v40 = vadd.f32 %v2886_v45, %v2760_v31  ;;  %v2129_v58 = vadd.s32 728, %v4542_v4  ;;  %v2130_v27 = vadd.s32 736, %v4542_v4 }
 0x181   : > { %v3026_v44 = vmul.f32 %v2765_v29, %v2765_v29  ;;  %v2766_v3 = vsel %vm2382_vm8, %v4752_v34, 0.0  ;;  %v3025_v53 = vmul.f32 %v2764_v18, %v2764_v18  ;;  %vm2385_vm10 = vcmp.lt.s32.totalorder %v2257_v15, 2048 }
 0x182   : > { %v2888_v43 = vadd.f32 %v2887_v40, %v2761_v59  ;;  %v3148_v26 = vadd.f32 %v3147_v33, %v3021_v46  ;;  %v2256_v59 = vadd.s32 %v4547_v7, %v2127_v8  ;;  %v2767_v45 = vsel %vm2383_vm9, %v4773_v11, 0.0  ;;  %v5239_v11 = vld [vmem:[#allocation3_spill] sm:$0xff] }
 0x183   : > { %v2258_v49 = vadd.s32 %v4547_v7, %v2129_v58  ;;  %v2132_v37 = vadd.s32 752, %v4542_v4  ;;  %v2131_v63 = vadd.s32 744, %v4542_v4  ;;  %v2259_v48 = vadd.s32 %v4547_v7, %v2130_v27  ;;  %v5241_v58 = vld [vmem:[#allocation5_spill] sm:$0xff] }
 0x184   : > { %v3149_v32 = vadd.f32 %v3148_v26, %v3022_v9  ;;  %v2889_v21 = vadd.f32 %v2888_v43, %v2762_v19  ;;  %vm2384_vm11 = vcmp.lt.s32.totalorder %v2256_v59, 2048  ;;  %v3027_v55 = vmul.f32 %v2766_v3, %v2766_v3 }
 0x185   : > { %v2133_v34 = vadd.s32 760, %v4542_v4  ;;  %v2769_v40 = vsel %vm2385_vm10, %v4768_v60, 0.0  ;;  %v3028_v36 = vmul.f32 %v2767_v45, %v2767_v45  ;;  %vm2386_vm12 = vcmp.lt.s32.totalorder %v2258_v49, 2048  ;;  %v5240_v60 = vld [vmem:[#allocation2_spill] sm:$0xff] }
 0x186   : > { %v2890_v12 = vadd.f32 %v2889_v21, %v2763_v57  ;;  %v3150_v5 = vadd.f32 %v3149_v32, %v3023_v39  ;;  %v2768_v9 = vsel %vm2384_vm11, %v5239_v11, 0.0  ;;  %v2261_v57 = vadd.s32 %v4547_v7, %v2132_v37 }
 0x187   : > { %v2260_v14 = vadd.s32 %v4547_v7, %v2131_v63  ;;  %vm2387_vm13 = vcmp.lt.s32.totalorder %v2259_v48, 2048  ;;  %v2134_v8 = vadd.s32 768, %v4542_v4  ;;  %v2262_v39 = vadd.s32 %v4547_v7, %v2133_v34  ;;  %v5243_v63 = vld [vmem:[#allocation4_spill] sm:$0xff] }
 0x188   : > { %v3151_v17 = vadd.f32 %v3150_v5, %v3024_v38  ;;  %v2891_v31 = vadd.f32 %v2890_v12, %v2764_v18  ;;  %v2770_v21 = vsel %vm2386_vm12, %v5240_v60, 0.0  ;;  %v3029_v38 = vmul.f32 %v2768_v9, %v2768_v9 }
 0x189   : > { %v3030_v18 = vmul.f32 %v2769_v40, %v2769_v40  ;;  %vm2389_vm14 = vcmp.lt.s32.totalorder %v2261_v57, 2048  ;;  %v2771_v12 = vsel %vm2387_vm13, %v5241_v58, 0.0  ;;  %vm2388_vm15 = vcmp.lt.s32.totalorder %v2260_v14, 2048 }
 0x18a   : > { %v2892_v16 = vadd.f32 %v2891_v31, %v2765_v29  ;;  %v3152_v19 = vadd.f32 %v3151_v17, %v3025_v53  ;;  %v2136_v29 = vadd.s32 784, %v4542_v4  ;;  %v2263_v27 = vadd.s32 %v4547_v7, %v2134_v8 }
 0x18b   : > { %vm2390_vm0 = vcmp.lt.s32.totalorder %v2262_v39, 2048  ;;  %v2137_v37 = vadd.s32 792, %v4542_v4  ;;  %v2138_v48 = vadd.s32 800, %v4542_v4  ;;  %v2140_v14 = vadd.s32 816, %v4542_v4 }
 0x18c   : > { %v3153_v33 = vadd.f32 %v3152_v19, %v3026_v44  ;;  %v2893_v46 = vadd.f32 %v2892_v16, %v2766_v3  ;;  %v2135_v44 = vadd.s32 776, %v4542_v4  ;;  %v3031_v3 = vmul.f32 %v2770_v21, %v2770_v21 }
 0x18d   : > { %v2265_v17 = vadd.s32 %v4547_v7, %v2136_v29  ;;  %v2773_v16 = vsel %vm2389_vm14, %v5243_v63, 0.0  ;;  %v3032_v19 = vmul.f32 %v2771_v12, %v2771_v12  ;;  %vm2391_vm1 = vcmp.lt.s32.totalorder %v2263_v27, 2048 }
 0x18e   : > { %v2894_v43 = vadd.f32 %v2893_v46, %v2767_v45  ;;  %v3154_v26 = vadd.f32 %v3153_v33, %v3027_v55  ;;  %v5242_v45 = vld [vmem:[#allocation7_spill] sm:$0xff]  ;;  %v2264_v33 = vadd.s32 %v4547_v7, %v2135_v44  ;;  %v2266_v57 = vadd.s32 %v4547_v7, %v2137_v37 }
 0x18f   : > { %v2772_v49 = vsel %vm2388_vm15, %v5242_v45, 0.0  ;;  %vm2393_vm2 = vcmp.lt.s32.totalorder %v2265_v17, 2048  ;;  %v2267_v39 = vadd.s32 %v4547_v7, %v2138_v48  ;;  %v2139_v60 = vadd.s32 808, %v4542_v4  ;;  %v5249_v48 = vld [vmem:[#allocation13_spill] sm:$0xff] }
 0x190   : > { %v3155_v32 = vadd.f32 %v3154_v26, %v3028_v36  ;;  %v2895_v15 = vadd.f32 %v2894_v43, %v2768_v9  ;;  %v3033_v36 = vmul.f32 %v2772_v49, %v2772_v49  ;;  %v3034_v43 = vmul.f32 %v2773_v16, %v2773_v16  ;;  %v5245_v26 = vld [vmem:[#allocation9_spill] sm:$0xff] }
 0x191   : > { %v2775_v8 = vsel %vm2391_vm1, %v5245_v26, 0.0  ;;  %vm2392_vm3 = vcmp.lt.s32.totalorder %v2264_v33, 2048  ;;  %vm2394_vm4 = vcmp.lt.s32.totalorder %v2266_v57, 2048  ;;  %vm2395_vm5 = vcmp.lt.s32.totalorder %v2267_v39, 2048  ;;  %v5251_v39 = vld [vmem:[#allocation15_spill] sm:$0xff] }
 0x192   : > { %v2896_v5 = vadd.f32 %v2895_v15, %v2769_v40  ;;  %v3156_v59 = vadd.f32 %v3155_v32, %v3029_v38  ;;  %v5244_v40 = vld [vmem:[#allocation6_spill] sm:$0xff]  ;;  %v5246_v15 = vld [vmem:[#allocation8_spill] sm:$0xff]  ;;  %v2141_v44 = vadd.s32 824, %v4542_v4  ;;  %v2144_v33 = vadd.s32 848, %v4542_v4 }
 0x193   : > { %v2774_v46 = vsel %vm2390_vm0, %v5244_v40, 0.0  ;;  %v2777_v38 = vsel %vm2393_vm2, %v5246_v15, 0.0  ;;  %v2143_v40 = vadd.s32 840, %v4542_v4 }
 0x194   : > { %v3157_v31 = vadd.f32 %v3156_v59, %v3030_v18  ;;  %v2897_v53 = vadd.f32 %v2896_v5, %v2770_v21  ;;  %v3035_v21 = vmul.f32 %v2774_v46, %v2774_v46  ;;  %v3036_v5 = vmul.f32 %v2775_v8, %v2775_v8  ;;  %v5247_v59 = vld [vmem:[#allocation11_spill] sm:$0xff] }
 0x195   : > { %v2776_v27 = vsel %vm2392_vm3, %v5247_v59, 0.0  ;;  %v3038_v45 = vmul.f32 %v2777_v38, %v2777_v38 }
 0x196   : > { %v2898_v55 = vadd.f32 %v2897_v53, %v2771_v12  ;;  %v3158_v34 = vadd.f32 %v3157_v31, %v3031_v3  ;;  %v2269_v12 = vadd.s32 %v4547_v7, %v2140_v14  ;;  %v2268_v31 = vadd.s32 %v4547_v7, %v2139_v60  ;;  %v5250_v14 = vld [vmem:[#allocation12_spill] sm:$0xff] }
 0x197   : > { %v2142_v53 = vadd.s32 832, %v4542_v4  ;;  %v2272_v60 = vadd.s32 %v4547_v7, %v2143_v40 }
 0x198   : > { %v3159_v11 = vadd.f32 %v3158_v34, %v3032_v19  ;;  %v2899_v9 = vadd.f32 %v2898_v55, %v2772_v49  ;;  %v5248_v49 = vld [vmem:[#allocation10_spill] sm:$0xff]  ;;  %v3037_v19 = vmul.f32 %v2776_v27, %v2776_v27  ;;  %vm2397_vm6 = vcmp.lt.s32.totalorder %v2269_v12, 2048 }
 0x199   : > { %v2778_v37 = vsel %vm2394_vm4, %v5248_v49, 0.0  ;;  %v2779_v55 = vsel %vm2395_vm5, %v5249_v48, 0.0  ;;  %v2270_v34 = vadd.s32 %v4547_v7, %v2141_v44  ;;  %vm2396_vm7 = vcmp.lt.s32.totalorder %v2268_v31, 2048 }
 0x19a   : > { %v2900_v29 = vadd.f32 %v2899_v9, %v2773_v16  ;;  %v3160_v32 = vadd.f32 %v3159_v11, %v3033_v36  ;;  %v2271_v11 = vadd.s32 %v4547_v7, %v2142_v53  ;;  %v3039_v9 = vmul.f32 %v2778_v37, %v2778_v37 }
 0x19b   : > { %vm2398_vm8 = vcmp.lt.s32.totalorder %v2270_v34, 2048  ;;  %vm2400_vm11 = vcmp.lt.s32.totalorder %v2272_v60, 2048  ;;  %v2147_v49 = vadd.s32 872, %v4542_v4 }
 0x19c   : > { %v3161_v18 = vadd.f32 %v3160_v32, %v3034_v43  ;;  %v2901_v58 = vadd.f32 %v2900_v29, %v2774_v46  ;;  %v2781_v43 = vsel %vm2397_vm6, %v5250_v14, 0.0  ;;  %v2780_v29 = vsel %vm2396_vm7, %v5251_v39, 0.0 }
 0x19d   : > { %v2273_v32 = vadd.s32 %v4547_v7, %v2144_v33  ;;  %vm2399_vm9 = vcmp.lt.s32.totalorder %v2271_v11, 2048  ;;  %v3041_v44 = vmul.f32 %v2780_v29, %v2780_v29  ;;  %v2784_v48 = vsel %vm2400_vm11, %v4893_v47, 0.0 }
 0x19e   : > { %v2902_v3 = vadd.f32 %v2901_v58, %v2775_v8  ;;  %v3162_v17 = vadd.f32 %v3161_v18, %v3035_v21  ;;  %v3040_v8 = vmul.f32 %v2779_v55, %v2779_v55  ;;  %v3042_v18 = vmul.f32 %v2781_v43, %v2781_v43 }
 0x19f   : > { %v2146_v58 = vadd.s32 864, %v4542_v4  ;;  %vm2401_vm10 = vcmp.lt.s32.totalorder %v2273_v32, 2048  ;;  %v3045_v11 = vmul.f32 %v2784_v48, %v2784_v48  ;;  %v2151_v39 = vadd.s32 904, %v4542_v4 }
 0x1a0   : > { %v3163_v63 = vadd.f32 %v3162_v17, %v3036_v5  ;;  %v2903_v16 = vadd.f32 %v2902_v3, %v2776_v27  ;;  %v5252_v5 = vld [vmem:[#allocation14_spill] sm:$0xff]  ;;  %v2783_v3 = vsel %vm2399_vm9, %v4876_v13, 0.0  ;;  %v2148_v17 = vadd.s32 880, %v4542_v4 }
 0x1a1   : > { %v2782_v59 = vsel %vm2398_vm8, %v5252_v5, 0.0  ;;  %v2785_v13 = vsel %vm2401_vm10, %v4870_v22, 0.0  ;;  %v3044_v34 = vmul.f32 %v2783_v3, %v2783_v3  ;;  %v2152_v32 = vadd.s32 912, %v4542_v4 }
 0x1a2   : > { %v2904_v46 = vadd.f32 %v2903_v16, %v2777_v38  ;;  %v3164_v36 = vadd.f32 %v3163_v63, %v3037_v19  ;;  %v2145_v38 = vadd.s32 856, %v4542_v4  ;;  %v2275_v63 = vadd.s32 %v4547_v7, %v2146_v58 }
 0x1a3   : > { %v2277_v33 = vadd.s32 %v4547_v7, %v2148_v17  ;;  %v2153_v58 = vadd.s32 920, %v4542_v4 }
 0x1a4   : > { %v3165_v57 = vadd.f32 %v3164_v36, %v3038_v45  ;;  %v2905_v26 = vadd.f32 %v2904_v46, %v2778_v37  ;;  %v2274_v45 = vadd.s32 %v4547_v7, %v2145_v38  ;;  %v3043_v37 = vmul.f32 %v2782_v59, %v2782_v59 }
 0x1a5   : > { %v2276_v36 = vadd.s32 %v4547_v7, %v2147_v49  ;;  %vm2403_vm13 = vcmp.lt.s32.totalorder %v2275_v63, 2048  ;;  %vm2405_vm14 = vcmp.lt.s32.totalorder %v2277_v33, 2048 }
 0x1a6   : > { %v2906_v21 = vadd.f32 %v2905_v26, %v2779_v55  ;;  %v3166_v15 = vadd.f32 %v3165_v57, %v3039_v9  ;;  %v2149_v55 = vadd.s32 888, %v4542_v4  ;;  %vm2402_vm12 = vcmp.lt.s32.totalorder %v2274_v45, 2048 }
 0x1a7   : > { %v2150_v9 = vadd.s32 896, %v4542_v4  ;;  %v2786_v26 = vsel %vm2402_vm12, %v4883_v23, 0.0  ;;  %vm2404_vm15 = vcmp.lt.s32.totalorder %v2276_v36, 2048 }
 0x1a8   : > { %v3167_v12 = vadd.f32 %v3166_v15, %v3040_v8  ;;  %v2907_v27 = vadd.f32 %v2906_v21, %v2780_v29  ;;  %v2278_v47 = vadd.s32 %v4547_v7, %v2149_v55  ;;  %v2787_v29 = vsel %vm2403_vm13, %v4901_v35, 0.0 }
 0x1a9   : > { %v2279_v60 = vadd.s32 %v4547_v7, %v2150_v9  ;;  %v3047_v21 = vmul.f32 %v2786_v26, %v2786_v26  ;;  %v2788_v23 = vsel %vm2404_vm15, %v4917_v6, 0.0  ;;  %v3048_v5 = vmul.f32 %v2787_v29, %v2787_v29 }
 0x1aa   : > { %v2908_v31 = vadd.f32 %v2907_v27, %v2781_v43  ;;  %v3168_v53 = vadd.f32 %v3167_v12, %v3041_v44  ;;  %v3046_v43 = vmul.f32 %v2785_v13, %v2785_v13  ;;  %vm2406_vm0 = vcmp.lt.s32.totalorder %v2278_v47, 2048 }
 0x1ab   : > { %v2280_v27 = vadd.s32 %v4547_v7, %v2151_v39  ;;  %v2790_v35 = vsel %vm2406_vm0, %v4908_v41, 0.0  ;;  %v2281_v44 = vadd.s32 %v4547_v7, %v2152_v32  ;;  %vm2407_vm1 = vcmp.lt.s32.totalorder %v2279_v60, 2048 }
 0x1ac   : > { %v3169_v16 = vadd.f32 %v3168_v53, %v3042_v18  ;;  %v2909_v19 = vadd.f32 %v2908_v31, %v2782_v59  ;;  %v2789_v18 = vsel %vm2405_vm14, %v4897_v10, 0.0  ;;  %v3049_v31 = vmul.f32 %v2788_v23, %v2788_v23 }
 0x1ad   : > { %v2154_v53 = vadd.s32 928, %v4542_v4  ;;  %v3050_v10 = vmul.f32 %v2789_v18, %v2789_v18  ;;  %v2282_v6 = vadd.s32 %v4547_v7, %v2153_v58  ;;  %vm2408_vm2 = vcmp.lt.s32.totalorder %v2280_v27, 2048 }
 0x1ae   : > { %v2910_v40 = vadd.f32 %v2909_v19, %v2783_v3  ;;  %v3170_v46 = vadd.f32 %v3169_v16, %v3043_v37  ;;  %v2155_v37 = vadd.s32 936, %v4542_v4  ;;  %v3051_v63 = vmul.f32 %v2790_v35, %v2790_v35 }
 0x1af   : > { %v2791_v16 = vsel %vm2407_vm1, %v4927_v61, 0.0  ;;  %v2156_v41 = vadd.s32 944, %v4542_v4  ;;  %v2157_v19 = vadd.s32 952, %v4542_v4  ;;  %vm2409_vm3 = vcmp.lt.s32.totalorder %v2281_v44, 2048 }
 0x1b0   : > { %v3171_v57 = vadd.f32 %v3170_v46, %v3044_v34  ;;  %v2911_v14 = vadd.f32 %v2910_v40, %v2784_v48  ;;  %vm2410_vm4 = vcmp.lt.s32.totalorder %v2282_v6, 2048  ;;  %v2792_v34 = vsel %vm2408_vm2, %v4941_v51, 0.0 }
 0x1b1   : > { %v3052_v40 = vmul.f32 %v2791_v16, %v2791_v16  ;;  %v2284_v36 = vadd.s32 %v4547_v7, %v2155_v37  ;;  %v2285_v61 = vadd.s32 %v4547_v7, %v2156_v41  ;;  %v2286_v9 = vadd.s32 %v4547_v7, %v2157_v19 }
 0x1b2   : > { %v2912_v22 = vadd.f32 %v2911_v14, %v2785_v13  ;;  %v3172_v8 = vadd.f32 %v3171_v57, %v3045_v11  ;;  %v2283_v13 = vadd.s32 %v4547_v7, %v2154_v53  ;;  %v2793_v11 = vsel %vm2409_vm3, %v4922_v52, 0.0 }
 0x1b3   : > { %v2158_v57 = vadd.s32 960, %v4542_v4  ;;  %v2160_v51 = vadd.s32 976, %v4542_v4  ;;  %vm2412_vm6 = vcmp.lt.s32.totalorder %v2284_v36, 2048  ;;  %vm2413_vm7 = vcmp.lt.s32.totalorder %v2285_v61, 2048 }
 0x1b4   : > { %v3173_v15 = vadd.f32 %v3172_v8, %v3046_v43  ;;  %v2913_v38 = vadd.f32 %v2912_v22, %v2786_v26  ;;  %v3053_v43 = vmul.f32 %v2792_v34, %v2792_v34  ;;  %vm2411_vm5 = vcmp.lt.s32.totalorder %v2283_v13, 2048 }
 0x1b5   : > { %v2794_v26 = vsel %vm2410_vm4, %v4933_v62, 0.0  ;;  %v2159_v22 = vadd.s32 968, %v4542_v4  ;;  %v3054_v8 = vmul.f32 %v2793_v11, %v2793_v11  ;;  %v2795_v52 = vsel %vm2411_vm5, %v4958_v2, 0.0 }
 0x1b6   : > { %v2914_v12 = vadd.f32 %v2913_v38, %v2787_v29  ;;  %v3174_v59 = vadd.f32 %v3173_v15, %v3047_v21  ;;  %v2287_v32 = vadd.s32 %v4547_v7, %v2158_v57  ;;  %v3055_v60 = vmul.f32 %v2794_v26, %v2794_v26 }
 0x1b7   : > { %vm2414_vm8 = vcmp.lt.s32.totalorder %v2286_v9, 2048  ;;  %v2796_v38 = vsel %vm2412_vm6, %v4972_v30, 0.0  ;;  %v2289_v62 = vadd.s32 %v4547_v7, %v2160_v51  ;;  %v2797_v58 = vsel %vm2413_vm7, %v4950_v42, 0.0 }
 0x1b8   : > { %v3175_v3 = vadd.f32 %v3174_v59, %v3048_v5  ;;  %v2915_v17 = vadd.f32 %v2914_v12, %v2788_v23  ;;  %v2288_v23 = vadd.s32 %v4547_v7, %v2159_v22  ;;  %v3056_v5 = vmul.f32 %v2795_v52, %v2795_v52 }
 0x1b9   : > { %v2798_v2 = vsel %vm2414_vm8, %v4965_v28, 0.0  ;;  %vm2415_vm9 = vcmp.lt.s32.totalorder %v2287_v32, 2048  ;;  %v3057_v44 = vmul.f32 %v2796_v38, %v2796_v38  ;;  %v3058_v30 = vmul.f32 %v2797_v58, %v2797_v58 }
 0x1ba   : > { %v2916_v45 = vadd.f32 %v2915_v17, %v2789_v18  ;;  %v3176_v49 = vadd.f32 %v3175_v3, %v3049_v31  ;;  %v2161_v18 = vadd.s32 984, %v4542_v4  ;;  %v2162_v3 = vadd.s32 992, %v4542_v4 }
 0x1bb   : > { %vm2417_vm10 = vcmp.lt.s32.totalorder %v2289_v62, 2048  ;;  %vm2416_vm11 = vcmp.lt.s32.totalorder %v2288_v23, 2048  ;;  %v2799_v42 = vsel %vm2415_vm9, %v4988_v25, 0.0  ;;  %v3059_v6 = vmul.f32 %v2798_v2, %v2798_v2 }
 0x1bc   : > { %v3177_v48 = vadd.f32 %v3176_v49, %v3050_v10  ;;  %v2917_v55 = vadd.f32 %v2916_v45, %v2790_v35  ;;  %v2290_v17 = vadd.s32 %v4547_v7, %v2161_v18  ;;  %v2163_v10 = vadd.s32 1000, %v4542_v4 }
 0x1bd   : > { %v2164_v28 = vadd.s32 1008, %v4542_v4  ;;  %v2800_v37 = vsel %vm2416_vm11, %v5007_v50, 0.0  ;;  %v3060_v41 = vmul.f32 %v2799_v42, %v2799_v42  ;;  %vm3201_vm1 = vcmask 1040384  }
 0x1be   : > { %v2918_v33 = vadd.f32 %v2917_v55, %v2791_v16  ;;  %v3178_v46 = vadd.f32 %v3177_v48, %v3051_v63  ;;  %v2291_v63 = vadd.s32 %v4547_v7, %v2162_v3  ;;  %v2801_v16 = vsel %vm2417_vm10, %v4979_v56, 0.0 }
 0x1bf   : > { %vm2418_vm12 = vcmp.lt.s32.totalorder %v2290_v17, 2048  ;;  %v2165_v55 = vadd.s32 1016, %v4542_v4  ;;  %v2292_v25 = vadd.s32 %v4547_v7, %v2163_v10  ;;  %v3061_v13 = vmul.f32 %v2800_v37, %v2800_v37 }
 0x1c0   : > { %v3179_v14 = vadd.f32 %v3178_v46, %v3052_v40  ;;  %v2919_v47 = vadd.f32 %v2918_v33, %v2792_v34  ;;  %v2293_v40 = vadd.s32 %v4547_v7, %v2164_v28  ;;  %vm2419_vm13 = vcmp.lt.s32.totalorder %v2291_v63, 2048 }
 0x1c1   : > { %v3062_v46 = vmul.f32 %v2801_v16, %v2801_v16  ;;  %v2802_v50 = vsel %vm2418_vm12, %v4996_v1, 0.0  ;;  %v2294_v56 = vadd.s32 %v4547_v7, %v2165_v55  ;;  %vm2420_vm14 = vcmp.lt.s32.totalorder %v2292_v25, 2048 }
 0x1c2   : > { %v2920_v39 = vadd.f32 %v2919_v47, %v2793_v11  ;;  %v3180_v29 = vadd.f32 %v3179_v14, %v3053_v43  ;;  %v2803_v61 = vsel %vm2419_vm13, %v5033_v54, 0.0  ;;  %v3063_v9 = vmul.f32 %v2802_v50, %v2802_v50 }
 0x1c3   : > { %vm2421_vm15 = vcmp.lt.s32.totalorder %v2293_v40, 2048  ;;  %v2804_v14 = vsel %vm2420_vm14, %v5059_v24, 0.0  ;;  %v3064_v43 = vmul.f32 %v2803_v61, %v2803_v61  ;;  %vm2422_vm0 = vcmp.lt.s32.totalorder %v2294_v56, 2048 }
 0x1c4   : > { %v3181_v21 = vadd.f32 %v3180_v29, %v3054_v8  ;;  %v2921_v15 = vadd.f32 %v2920_v39, %v2794_v26  ;;  %v2805_v1 = vsel %vm2421_vm15, %v5023_v0, 0.0  ;;  %v3065_v7 = vmul.f32 %v2804_v14, %v2804_v14 }
 0x1c5   : > { %v2806_v8 = vsel %vm2422_vm0, %v5046_v20, 0.0  ;;  %v3066_v54 = vmul.f32 %v2805_v1, %v2805_v1 }
 0x1c6   : > { %v2922_v12 = vadd.f32 %v2921_v15, %v2795_v52  ;;  %v3182_v59 = vadd.f32 %v3181_v21, %v3055_v60  ;;  %v3067_v52 = vmul.f32 %v2806_v8, %v2806_v8 }
 0x1c8   : > { %v3183_v27 = vadd.f32 %v3182_v59, %v3056_v5  ;;  %v2923_v35 = vadd.f32 %v2922_v12, %v2796_v38 }
 0x1ca   : > { %v2924_v31 = vadd.f32 %v2923_v35, %v2797_v58  ;;  %v3184_v53 = vadd.f32 %v3183_v27, %v3057_v44 }
 0x1cc   : > { %v3185_v45 = vadd.f32 %v3184_v53, %v3058_v30  ;;  %v2925_v49 = vadd.f32 %v2924_v31, %v2798_v2 }
 0x1ce   : > { %v2926_v19 = vadd.f32 %v2925_v49, %v2799_v42  ;;  %v3186_v48 = vadd.f32 %v3185_v45, %v3059_v6 }
 0x1d0   : > { %v3187_v34 = vadd.f32 %v3186_v48, %v3060_v41  ;;  %v2927_v33 = vadd.f32 %v2926_v19, %v2800_v37 }
 0x1d2   : > { %v2928_v36 = vadd.f32 %v2927_v33, %v2801_v16  ;;  %v3188_v11 = vadd.f32 %v3187_v34, %v3061_v13 }
 0x1d4   : > { %v3189_v4 = vadd.f32 %v3188_v11, %v3062_v46  ;;  %v2929_v57 = vadd.f32 %v2928_v36, %v2802_v50 }
 0x1d6   : > { %v2930_v47 = vadd.f32 %v2929_v57, %v2803_v61  ;;  %v3190_v26 = vadd.f32 %v3189_v4, %v3063_v9 }
 0x1d8   : > { %v3191_v51 = vadd.f32 %v3190_v26, %v3064_v43  ;;  %v2931_v22 = vadd.f32 %v2930_v47, %v2804_v14 }
 0x1da   : > { %v2932_v39 = vadd.f32 %v2931_v22, %v2805_v1  ;;  %v3192_v29 = vadd.f32 %v3191_v51, %v3065_v7 }
 0x1dc   : > { %v2933_v32 = vadd.f32 %v2932_v39, %v2806_v8  ;;  %v3193_v60 = vadd.f32 %v3192_v29, %v3066_v54 }
 0x1de   : > { %v2934_v24 = vrot.slane %v2933_v32, 4  ;;  %v3194_v21 = vadd.f32 %v3193_v60, %v3067_v52 }
 0x1e0   : > { %v2935_v15 = vadd.f32 %v2934_v24, %v2933_v32  ;;  %v3195_v38 = vrot.slane %v3194_v21, 4 }
 0x1e2   : > { %v2936_v62 = vrot.slane %v2935_v15, 2  ;;  %v3196_v18 = vadd.f32 %v3195_v38, %v3194_v21 }
 0x1e4   : > { %v2937_v0 = vadd.f32 %v2936_v62, %v2935_v15  ;;  %v3197_v23 = vrot.slane %v3196_v18, 2 }
 0x1e6   : > { %v2938_v58 = vrot.slane %v2937_v0, 1  ;;  %v3198_v12 = vadd.f32 %v3197_v23, %v3196_v18 }
 0x1e8   : > { %v3199_v20 = vrot.slane %v3198_v12, 1  ;;  %v2939_v5 = vadd.f32 %v2938_v58, %v2937_v0 }
 0x1ea   : > { %v3200_v59 = vadd.f32 %v3199_v20, %v3198_v12 }
 0x1ec   : > { %v3202_v2 = vsel %vm3201_vm1, %v2939_v5, %v3200_v59 }
 0x1ed   : > { %3203 = vst [vmem:[%s184_s5] sm:$0x3] %v3202_v2 }
 0x1ee PF: > { %s14_s12 = sadd.s32 1, %s4362_s12  }
 0x1ef   : > { %p11_p5 = scmp.ge.s32.totalorder %s14_s12, 4  }
 0x1f1   :  { %13 = sbr.rel (!%p11_p5) target bundleno = 1 (0x1), region = 70 }

// kernel: _lambda_.15
= control target key start
LH: loop header
LB: loop body
LE: loop exit
PB: predicated region body
PF: predicated region fallthrough
CT: control target
= control target key end

     0   :  { %vm1532_vm0 = vcmask 1040384   ;;  %s2509_s1 = inlined_call_operand.vmem [shape: bf16[128,128], index: 1, kind: input, shape index: {}]   ;;  %s2510_s0 = inlined_call_operand.vmem [shape: bf16[512,128], index: 0, kind: input, shape index: {}]   ;;  %s2511_s2 = inlined_call_operand.vmem [shape: bf16[512,128], index: 2, kind: output, shape index: {0}]   ;;  %s2512_s3 = inlined_call_operand.vmem [shape: f32[1,2,128], index: 3, kind: output, shape index: {1}]  }
   0x1   :  { %v2038_v0 = vld [vmem:[%s2509_s1 + $0x38] sm:$0xff]   ;;  %v2039_v1 = vld [vmem:[%s2509_s1 + $0x30] sm:$0xff]   ;;  %v2040_v2 = vld [vmem:[%s2509_s1 + $0x28] sm:$0xff]  }
   0x2   :  { %1942 = vmatprep.subr.bf16.mxu0 %v2038_v0  ;;  %2022 = vmatprep.subr.bf16.mxu1 %v2038_v0  ;;  %v2041_v3 = vld [vmem:[%s2509_s1 + $0x20] sm:$0xff]   ;;  %v2042_v5 = vld [vmem:[%s2509_s1 + $0x18] sm:$0xff]   ;;  %v2043_v6 = vld [vmem:[%s2509_s1 + $0x10] sm:$0xff]  }
   0x3   :  { %1943 = vmatpush3.bf16.msra.mxu0 %v2038_v0  ;;  %2030 = vmatpush3.bf16.msra.mxu1 %v2038_v0  ;;  %v2046_v4 = vld [vmem:[%s2510_s0] sm:$0xff]   ;;  %v2044_v7 = vld [vmem:[%s2509_s1 + $0x8] sm:$0xff]   ;;  %v2048_v11 = vld [vmem:[%s2510_s0 + $0x10] sm:$0xff]  }
   0x4   :  { %1944 = vmatprep.subr.bf16.mxu0 %v2039_v1  ;;  %2023 = vmatprep.subr.bf16.mxu1 %v2039_v1  ;;  %v2045_v8 = vld [vmem:[%s2509_s1] sm:$0xff]   ;;  %v2047_v10 = vld [vmem:[%s2510_s0 + $0x8] sm:$0xff]   ;;  %v2064_v13 = vld [vmem:[%s2510_s0 + $0x90] sm:$0xff]  }
   0x5   :  { %1958 = vmatprep.mubr.bf16.mxu0 %v2046_v4  ;;  %v2062_v9 = vld [vmem:[%s2510_s0 + $0x80] sm:$0xff]   ;;  %v2063_v12 = vld [vmem:[%s2510_s0 + $0x88] sm:$0xff]   ;;  %v2049_v14 = vld [vmem:[%s2510_s0 + $0x18] sm:$0xff]  }
   0x6   :  { %1990 = vmatprep.mubr.bf16.mxu1 %v2062_v9  ;;  %v2050_v15 = vld [vmem:[%s2510_s0 + $0x20] sm:$0xff]   ;;  %v2065_v16 = vld [vmem:[%s2510_s0 + $0x98] sm:$0xff]   ;;  %v2051_v18 = vld [vmem:[%s2510_s0 + $0x28] sm:$0xff]  }
   0x7   :  { %1945 = vmatpush3.bf16.msra.mxu0 %v2039_v1  ;;  %2031 = vmatpush3.bf16.msra.mxu1 %v2039_v1  ;;  %v2066_v17 = vld [vmem:[%s2510_s0 + $0xa0] sm:$0xff]   ;;  %v2067_v19 = vld [vmem:[%s2510_s0 + $0xa8] sm:$0xff]   ;;  %v2052_v20 = vld [vmem:[%s2510_s0 + $0x30] sm:$0xff]  }
   0x8   :  { %1946 = vmatprep.subr.bf16.mxu0 %v2040_v2  ;;  %2024 = vmatprep.subr.bf16.mxu1 %v2040_v2  ;;  %v2068_v21 = vld [vmem:[%s2510_s0 + $0xb0] sm:$0xff]   ;;  %v2053_v22 = vld [vmem:[%s2510_s0 + $0x38] sm:$0xff]   ;;  %v2054_v24 = vld [vmem:[%s2510_s0 + $0x40] sm:$0xff]  }
   0x9   :  { %v2069_v23 = vld [vmem:[%s2510_s0 + $0xb8] sm:$0xff]   ;;  %v2070_v25 = vld [vmem:[%s2510_s0 + $0xc0] sm:$0xff]   ;;  %v2055_v26 = vld [vmem:[%s2510_s0 + $0x48] sm:$0xff]  }
   0xa   :  { %v2071_v27 = vld [vmem:[%s2510_s0 + $0xc8] sm:$0xff]   ;;  %v2056_v28 = vld [vmem:[%s2510_s0 + $0x50] sm:$0xff]   ;;  %v2057_v30 = vld [vmem:[%s2510_s0 + $0x58] sm:$0xff]  }
   0xb   :  { %1947 = vmatpush3.bf16.msra.mxu0 %v2040_v2  ;;  %2032 = vmatpush3.bf16.msra.mxu1 %v2040_v2  ;;  %v2072_v29 = vld [vmem:[%s2510_s0 + $0xd0] sm:$0xff]   ;;  %v2073_v31 = vld [vmem:[%s2510_s0 + $0xd8] sm:$0xff]   ;;  %v2058_v32 = vld [vmem:[%s2510_s0 + $0x60] sm:$0xff]  }
   0xc   :  { %1948 = vmatprep.subr.bf16.mxu0 %v2041_v3  ;;  %2025 = vmatprep.subr.bf16.mxu1 %v2041_v3  ;;  %v2074_v33 = vld [vmem:[%s2510_s0 + $0xe0] sm:$0xff]   ;;  %v2059_v34 = vld [vmem:[%s2510_s0 + $0x68] sm:$0xff]   ;;  %v2060_v36 = vld [vmem:[%s2510_s0 + $0x70] sm:$0xff]  }
   0xd   :  { %v2075_v35 = vld [vmem:[%s2510_s0 + $0xe8] sm:$0xff]   ;;  %v2076_v37 = vld [vmem:[%s2510_s0 + $0xf0] sm:$0xff]   ;;  %v2061_v38 = vld [vmem:[%s2510_s0 + $0x78] sm:$0xff]  }
   0xe   :  { %v2077_v39 = vld [vmem:[%s2510_s0 + $0xf8] sm:$0xff]  }
   0xf   :  { %1949 = vmatpush3.bf16.msra.mxu0 %v2041_v3  ;;  %2033 = vmatpush3.bf16.msra.mxu1 %v2041_v3 }
  0x10   :  { %1950 = vmatprep.subr.bf16.mxu0 %v2042_v5  ;;  %2026 = vmatprep.subr.bf16.mxu1 %v2042_v5 }
  0x13   :  { %1951 = vmatpush3.bf16.msra.mxu0 %v2042_v5  ;;  %2034 = vmatpush3.bf16.msra.mxu1 %v2042_v5 }
  0x14   :  { %1952 = vmatprep.subr.bf16.mxu0 %v2043_v6  ;;  %2027 = vmatprep.subr.bf16.mxu1 %v2043_v6 }
  0x17   :  { %1953 = vmatpush3.bf16.msra.mxu0 %v2043_v6  ;;  %2035 = vmatpush3.bf16.msra.mxu1 %v2043_v6 }
  0x18   :  { %1954 = vmatprep.subr.bf16.mxu0 %v2044_v7  ;;  %2028 = vmatprep.subr.bf16.mxu1 %v2044_v7 }
  0x1b   :  { %1955 = vmatpush3.bf16.msra.mxu0 %v2044_v7  ;;  %2036 = vmatpush3.bf16.msra.mxu1 %v2044_v7 }
  0x1c   :  { %1956 = vmatprep.subr.bf16.mxu0 %v2045_v8  ;;  %2029 = vmatprep.subr.bf16.mxu1 %v2045_v8 }
  0x1f   :  { %1957 = vmatpush3.bf16.msra.mxu0 %v2045_v8  ;;  %2037 = vmatpush3.bf16.msra.mxu1 %v2045_v8 }
  0x22   :  { %1959 = vmatmul.mubr.bf16.vlgmr.msra.gmra.mxu0 %v2047_v10  ;;  %1991 = vmatmul.mubr.bf16.vlgmr.msra.gmra.mxu1 %v2063_v12 }
  0x23   :  { %1962 = vmatprep.mubr.bf16.mxu0 %v2048_v11  ;;  %1994 = vmatprep.mubr.bf16.mxu1 %v2064_v13 }
  0x2a   :  { %1963 = vmatmul.mubr.bf16.gmra.mxu0 %v2049_v14  ;;  %1995 = vmatmul.mubr.bf16.gmra.mxu1 %v2065_v16 }
  0x2b   :  { %1966 = vmatprep.mubr.bf16.mxu0 %v2050_v15  ;;  %1998 = vmatprep.mubr.bf16.mxu1 %v2066_v17 }
  0x32   :  { %1967 = vmatmul.mubr.bf16.gmra.mxu0 %v2051_v18  ;;  %1999 = vmatmul.mubr.bf16.gmra.mxu1 %v2067_v19 }
  0x33   :  { %1970 = vmatprep.mubr.bf16.mxu0 %v2052_v20  ;;  %2002 = vmatprep.mubr.bf16.mxu1 %v2068_v21 }
  0x3a   :  { %1971 = vmatmul.mubr.bf16.gmra.mxu0 %v2053_v22  ;;  %2003 = vmatmul.mubr.bf16.gmra.mxu1 %v2069_v23 }
  0x3b   :  { %1974 = vmatprep.mubr.bf16.mxu0 %v2054_v24  ;;  %2006 = vmatprep.mubr.bf16.mxu1 %v2070_v25 }
  0x42   :  { %1975 = vmatmul.mubr.bf16.gmra.mxu0 %v2055_v26  ;;  %2007 = vmatmul.mubr.bf16.gmra.mxu1 %v2071_v27 }
  0x43   :  { %1978 = vmatprep.mubr.bf16.mxu0 %v2056_v28  ;;  %2010 = vmatprep.mubr.bf16.mxu1 %v2072_v29 }
  0x4a   :  { %1979 = vmatmul.mubr.bf16.gmra.mxu0 %v2057_v30  ;;  %2011 = vmatmul.mubr.bf16.gmra.mxu1 %v2073_v31 }
  0x4b   :  { %1982 = vmatprep.mubr.bf16.mxu0 %v2058_v32  ;;  %2014 = vmatprep.mubr.bf16.mxu1 %v2074_v33 }
  0x52   :  { %1983 = vmatmul.mubr.bf16.gmra.mxu0 %v2059_v34  ;;  %2015 = vmatmul.mubr.bf16.gmra.mxu1 %v2075_v35 }
  0x53   :  { %1986 = vmatprep.mubr.bf16.mxu0 %v2060_v36  ;;  %2018 = vmatprep.mubr.bf16.mxu1 %v2076_v37 }
  0x5a   :  { %1987 = vmatmul.mubr.bf16.gmra.mxu0 %v2061_v38  ;;  %2019 = vmatmul.mubr.bf16.gmra.mxu1 %v2077_v39 }
  0xe2   :  { %v1960_v40 = vpop.f32.mrf.mxu0  ;;  %v2218_v41 = vpop.f32.mrf.mxu1 }
  0xe3   :  { %v1401_v57 = vmul.f32 %v1960_v40, %v1960_v40 }
  0xe4   :  { %v368_v42 = vpop.f32.mrf.mxu0  ;;  %v2220_v43 = vpop.f32.mrf.mxu1 }
  0xe5   :  { %v1399_v48 = vmul.f32 %v368_v42, %v368_v42 }
  0xe6   :  { %v1961_v44 = vpop.f32.mrf.mxu0  ;;  %v2222_v45 = vpop.f32.mrf.mxu1 }
  0xe7   :  { %v1719_v46 = vpack.c.bf16 %v1961_v44, %v1960_v40  ;;  %v1799_v47 = vpack.c.bf16 %v2222_v45, %v2218_v41  ;;  %v1402_v62 = vmul.f32 %v1961_v44, %v1961_v44 }
  0xe8   :  { %v371_v49 = vpop.f32.mrf.mxu0  ;;  %v2226_v50 = vpop.f32.mrf.mxu1 }
  0xe9   :  { %1871 = vst [vmem:[%s2511_s2 + $0x8] sm:$0xff] %v1719_v46   ;;  %v1714_v51 = vpack.c.bf16 %v371_v49, %v368_v42  ;;  %v1330_v52 = vadd.f32 %v371_v49, %v368_v42  ;;  %v1400_v53 = vmul.f32 %v371_v49, %v371_v49  ;;  %1887 = vst [vmem:[%s2511_s2 + $0x88] sm:$0xff] %v1799_v47  }
  0xea   :  { %v1794_v54 = vpack.c.bf16 %v2226_v50, %v2220_v43  ;;  %v1964_v55 = vpop.f32.mrf.mxu0  ;;  %v2236_v56 = vpop.f32.mrf.mxu1 }
  0xeb   :  { %1715 = vst [vmem:[%s2511_s2] sm:$0xff] %v1714_v51   ;;  %v1331_v58 = vadd.f32 %v1960_v40, %v1330_v52  ;;  %v1463_v59 = vadd.f32 %v1400_v53, %v1399_v48  ;;  %v1405_v17 = vmul.f32 %v1964_v55, %v1964_v55 }
  0xec   :  { %1886 = vst [vmem:[%s2511_s2 + $0x80] sm:$0xff] %v1794_v54   ;;  %v384_v60 = vpop.f32.mrf.mxu0  ;;  %v2244_v61 = vpop.f32.mrf.mxu1 }
  0xed   :  { %v1464_v63 = vadd.f32 %v1463_v59, %v1401_v57  ;;  %v1332_v0 = vadd.f32 %v1961_v44, %v1331_v58  ;;  %v1403_v4 = vmul.f32 %v384_v60, %v384_v60 }
  0xee   :  { %v1965_v1 = vpop.f32.mrf.mxu0  ;;  %v2246_v2 = vpop.f32.mrf.mxu1 }
  0xef   :  { %v1333_v3 = vadd.f32 %v1332_v0, %v384_v60  ;;  %v1465_v5 = vadd.f32 %v1464_v63, %v1402_v62  ;;  %v1729_v6 = vpack.c.bf16 %v1965_v1, %v1964_v55  ;;  %v1809_v8 = vpack.c.bf16 %v2246_v2, %v2236_v56 }
  0xf0   :  { %v387_v7 = vpop.f32.mrf.mxu0  ;;  %v2250_v9 = vpop.f32.mrf.mxu1  ;;  %v1406_v22 = vmul.f32 %v1965_v1, %v1965_v1 }
  0xf1   :  { %v1466_v10 = vadd.f32 %v1465_v5, %v1403_v4  ;;  %1873 = vst [vmem:[%s2511_s2 + $0x18] sm:$0xff] %v1729_v6   ;;  %v1724_v11 = vpack.c.bf16 %v387_v7, %v384_v60  ;;  %v1334_v12 = vadd.f32 %v1333_v3, %v387_v7  ;;  %v1404_v13 = vmul.f32 %v387_v7, %v387_v7 }
  0xf2   :  { %v1968_v14 = vpop.f32.mrf.mxu0  ;;  %1889 = vst [vmem:[%s2511_s2 + $0x98] sm:$0xff] %v1809_v8   ;;  %v1804_v15 = vpack.c.bf16 %v2250_v9, %v2244_v61  ;;  %v2260_v16 = vpop.f32.mrf.mxu1 }
  0xf3   :  { %1872 = vst [vmem:[%s2511_s2 + $0x10] sm:$0xff] %v1724_v11   ;;  %v1335_v18 = vadd.f32 %v1964_v55, %v1334_v12  ;;  %v1467_v19 = vadd.f32 %v1466_v10, %v1404_v13  ;;  %v1409_v42 = vmul.f32 %v1968_v14, %v1968_v14 }
  0xf4   :  { %v400_v20 = vpop.f32.mrf.mxu0  ;;  %1888 = vst [vmem:[%s2511_s2 + $0x90] sm:$0xff] %v1804_v15   ;;  %v2268_v21 = vpop.f32.mrf.mxu1 }
  0xf5   :  { %v1468_v23 = vadd.f32 %v1467_v19, %v1405_v17  ;;  %v1336_v24 = vadd.f32 %v1965_v1, %v1335_v18  ;;  %v1407_v28 = vmul.f32 %v400_v20, %v400_v20 }
  0xf6   :  { %v1969_v25 = vpop.f32.mrf.mxu0  ;;  %v2270_v26 = vpop.f32.mrf.mxu1 }
  0xf7   :  { %v1337_v27 = vadd.f32 %v1336_v24, %v400_v20  ;;  %v1469_v29 = vadd.f32 %v1468_v23, %v1406_v22  ;;  %v1739_v30 = vpack.c.bf16 %v1969_v25, %v1968_v14  ;;  %v1819_v32 = vpack.c.bf16 %v2270_v26, %v2260_v16 }
  0xf8   :  { %v403_v31 = vpop.f32.mrf.mxu0  ;;  %v2274_v33 = vpop.f32.mrf.mxu1  ;;  %v1410_v49 = vmul.f32 %v1969_v25, %v1969_v25 }
  0xf9   :  { %v1470_v34 = vadd.f32 %v1469_v29, %v1407_v28  ;;  %1875 = vst [vmem:[%s2511_s2 + $0x28] sm:$0xff] %v1739_v30   ;;  %v1734_v35 = vpack.c.bf16 %v403_v31, %v400_v20  ;;  %v1338_v36 = vadd.f32 %v1337_v27, %v403_v31  ;;  %v1408_v37 = vmul.f32 %v403_v31, %v403_v31 }
  0xfa   :  { %v1972_v38 = vpop.f32.mrf.mxu0  ;;  %1891 = vst [vmem:[%s2511_s2 + $0xa8] sm:$0xff] %v1819_v32   ;;  %v1814_v39 = vpack.c.bf16 %v2274_v33, %v2268_v21  ;;  %v2284_v40 = vpop.f32.mrf.mxu1 }
  0xfb   :  { %1874 = vst [vmem:[%s2511_s2 + $0x20] sm:$0xff] %v1734_v35   ;;  %v1339_v44 = vadd.f32 %v1968_v14, %v1338_v36  ;;  %v1471_v46 = vadd.f32 %v1470_v34, %v1408_v37  ;;  %v1413_v8 = vmul.f32 %v1972_v38, %v1972_v38 }
  0xfc   :  { %v416_v47 = vpop.f32.mrf.mxu0  ;;  %1890 = vst [vmem:[%s2511_s2 + $0xa0] sm:$0xff] %v1814_v39   ;;  %v2292_v48 = vpop.f32.mrf.mxu1 }
  0xfd   :  { %v1472_v51 = vadd.f32 %v1471_v46, %v1409_v42  ;;  %v1340_v52 = vadd.f32 %v1969_v25, %v1339_v44  ;;  %v1411_v57 = vmul.f32 %v416_v47, %v416_v47 }
  0xfe   :  { %v1973_v53 = vpop.f32.mrf.mxu0  ;;  %v2294_v54 = vpop.f32.mrf.mxu1 }
  0xff   :  { %v1341_v55 = vadd.f32 %v1340_v52, %v416_v47  ;;  %v1473_v58 = vadd.f32 %v1472_v51, %v1410_v49  ;;  %v1749_v59 = vpack.c.bf16 %v1973_v53, %v1972_v38  ;;  %v1829_v62 = vpack.c.bf16 %v2294_v54, %v2284_v40 }
 0x100   :  { %v419_v60 = vpop.f32.mrf.mxu0  ;;  %v2298_v63 = vpop.f32.mrf.mxu1  ;;  %v1414_v14 = vmul.f32 %v1973_v53, %v1973_v53 }
 0x101   :  { %v1474_v0 = vadd.f32 %v1473_v58, %v1411_v57  ;;  %1877 = vst [vmem:[%s2511_s2 + $0x38] sm:$0xff] %v1749_v59   ;;  %v1744_v1 = vpack.c.bf16 %v419_v60, %v416_v47  ;;  %v1342_v3 = vadd.f32 %v1341_v55, %v419_v60  ;;  %v1412_v4 = vmul.f32 %v419_v60, %v419_v60 }
 0x102   :  { %v1976_v5 = vpop.f32.mrf.mxu0  ;;  %1893 = vst [vmem:[%s2511_s2 + $0xb8] sm:$0xff] %v1829_v62   ;;  %v1824_v6 = vpack.c.bf16 %v2298_v63, %v2292_v48  ;;  %v2308_v7 = vpop.f32.mrf.mxu1 }
 0x103   :  { %1876 = vst [vmem:[%s2511_s2 + $0x30] sm:$0xff] %v1744_v1   ;;  %v1343_v10 = vadd.f32 %v1972_v38, %v1342_v3  ;;  %v1475_v11 = vadd.f32 %v1474_v0, %v1412_v4  ;;  %v1417_v37 = vmul.f32 %v1976_v5, %v1976_v5 }
 0x104   :  { %v432_v12 = vpop.f32.mrf.mxu0  ;;  %1892 = vst [vmem:[%s2511_s2 + $0xb0] sm:$0xff] %v1824_v6   ;;  %v2316_v13 = vpop.f32.mrf.mxu1 }
 0x105   :  { %v1476_v15 = vadd.f32 %v1475_v11, %v1413_v8  ;;  %v1344_v17 = vadd.f32 %v1973_v53, %v1343_v10  ;;  %v1415_v22 = vmul.f32 %v432_v12, %v432_v12 }
 0x106   :  { %v1977_v18 = vpop.f32.mrf.mxu0  ;;  %v2318_v19 = vpop.f32.mrf.mxu1 }
 0x107   :  { %v1345_v20 = vadd.f32 %v1344_v17, %v432_v12  ;;  %v1477_v23 = vadd.f32 %v1476_v15, %v1414_v14  ;;  %v1759_v24 = vpack.c.bf16 %v1977_v18, %v1976_v5  ;;  %v1839_v27 = vpack.c.bf16 %v2318_v19, %v2308_v7 }
 0x108   :  { %v435_v25 = vpop.f32.mrf.mxu0  ;;  %v2322_v28 = vpop.f32.mrf.mxu1  ;;  %v1418_v46 = vmul.f32 %v1977_v18, %v1977_v18 }
 0x109   :  { %v1478_v29 = vadd.f32 %v1477_v23, %v1415_v22  ;;  %1879 = vst [vmem:[%s2511_s2 + $0x48] sm:$0xff] %v1759_v24   ;;  %v1754_v30 = vpack.c.bf16 %v435_v25, %v432_v12  ;;  %v1346_v31 = vadd.f32 %v1345_v20, %v435_v25  ;;  %v1416_v32 = vmul.f32 %v435_v25, %v435_v25 }
 0x10a   :  { %v1980_v34 = vpop.f32.mrf.mxu0  ;;  %1895 = vst [vmem:[%s2511_s2 + $0xc8] sm:$0xff] %v1839_v27   ;;  %v1834_v35 = vpack.c.bf16 %v2322_v28, %v2316_v13  ;;  %v2332_v36 = vpop.f32.mrf.mxu1 }
 0x10b   :  { %1878 = vst [vmem:[%s2511_s2 + $0x40] sm:$0xff] %v1754_v30   ;;  %v1347_v38 = vadd.f32 %v1976_v5, %v1346_v31  ;;  %v1479_v39 = vadd.f32 %v1478_v29, %v1416_v32  ;;  %v1421_v10 = vmul.f32 %v1980_v34, %v1980_v34 }
 0x10c   :  { %v448_v42 = vpop.f32.mrf.mxu0  ;;  %1894 = vst [vmem:[%s2511_s2 + $0xc0] sm:$0xff] %v1834_v35   ;;  %v2340_v44 = vpop.f32.mrf.mxu1 }
 0x10d   :  { %v1480_v47 = vadd.f32 %v1479_v39, %v1417_v37  ;;  %v1348_v49 = vadd.f32 %v1977_v18, %v1347_v38  ;;  %v1419_v55 = vmul.f32 %v448_v42, %v448_v42 }
 0x10e   :  { %v1981_v51 = vpop.f32.mrf.mxu0  ;;  %v2342_v52 = vpop.f32.mrf.mxu1 }
 0x10f   :  { %v1349_v53 = vadd.f32 %v1348_v49, %v448_v42  ;;  %v1481_v57 = vadd.f32 %v1480_v47, %v1418_v46  ;;  %v1769_v58 = vpack.c.bf16 %v1981_v51, %v1980_v34  ;;  %v1849_v60 = vpack.c.bf16 %v2342_v52, %v2332_v36 }
 0x110   :  { %v451_v59 = vpop.f32.mrf.mxu0  ;;  %v2346_v62 = vpop.f32.mrf.mxu1  ;;  %v1422_v17 = vmul.f32 %v1981_v51, %v1981_v51 }
 0x111   :  { %v1482_v0 = vadd.f32 %v1481_v57, %v1419_v55  ;;  %1881 = vst [vmem:[%s2511_s2 + $0x58] sm:$0xff] %v1769_v58   ;;  %v1764_v1 = vpack.c.bf16 %v451_v59, %v448_v42  ;;  %v1350_v3 = vadd.f32 %v1349_v53, %v451_v59  ;;  %v1420_v4 = vmul.f32 %v451_v59, %v451_v59 }
 0x112   :  { %v1984_v5 = vpop.f32.mrf.mxu0  ;;  %1897 = vst [vmem:[%s2511_s2 + $0xd8] sm:$0xff] %v1849_v60   ;;  %v1844_v6 = vpack.c.bf16 %v2346_v62, %v2340_v44  ;;  %v2356_v8 = vpop.f32.mrf.mxu1 }
 0x113   :  { %1880 = vst [vmem:[%s2511_s2 + $0x50] sm:$0xff] %v1764_v1   ;;  %v1351_v11 = vadd.f32 %v1980_v34, %v1350_v3  ;;  %v1483_v12 = vadd.f32 %v1482_v0, %v1420_v4  ;;  %v1425_v47 = vmul.f32 %v1984_v5, %v1984_v5 }
 0x114   :  { %v464_v14 = vpop.f32.mrf.mxu0  ;;  %1896 = vst [vmem:[%s2511_s2 + $0xd0] sm:$0xff] %v1844_v6   ;;  %v2364_v15 = vpop.f32.mrf.mxu1 }
 0x115   :  { %v1484_v18 = vadd.f32 %v1483_v12, %v1421_v10  ;;  %v1352_v20 = vadd.f32 %v1981_v51, %v1351_v11  ;;  %v1423_v25 = vmul.f32 %v464_v14, %v464_v14 }
 0x116   :  { %v1985_v22 = vpop.f32.mrf.mxu0  ;;  %v2366_v23 = vpop.f32.mrf.mxu1 }
 0x117   :  { %v1353_v24 = vadd.f32 %v1352_v20, %v464_v14  ;;  %v1485_v27 = vadd.f32 %v1484_v18, %v1422_v17  ;;  %v1779_v29 = vpack.c.bf16 %v1985_v22, %v1984_v5  ;;  %v1859_v31 = vpack.c.bf16 %v2366_v23, %v2356_v8 }
 0x118   :  { %v467_v30 = vpop.f32.mrf.mxu0  ;;  %v2370_v32 = vpop.f32.mrf.mxu1  ;;  %v1426_v57 = vmul.f32 %v1985_v22, %v1985_v22 }
 0x119   :  { %v1486_v34 = vadd.f32 %v1485_v27, %v1423_v25  ;;  %1883 = vst [vmem:[%s2511_s2 + $0x68] sm:$0xff] %v1779_v29   ;;  %v1774_v35 = vpack.c.bf16 %v467_v30, %v464_v14  ;;  %v1354_v37 = vadd.f32 %v1353_v24, %v467_v30  ;;  %v1424_v38 = vmul.f32 %v467_v30, %v467_v30 }
 0x11a   :  { %v1988_v39 = vpop.f32.mrf.mxu0  ;;  %1899 = vst [vmem:[%s2511_s2 + $0xe8] sm:$0xff] %v1859_v31   ;;  %v1854_v42 = vpack.c.bf16 %v2370_v32, %v2364_v15  ;;  %v2380_v46 = vpop.f32.mrf.mxu1  ;;  %v1431_v31 = vmul.f32 %v2220_v43, %v2220_v43 }
 0x11b   :  { %1882 = vst [vmem:[%s2511_s2 + $0x60] sm:$0xff] %v1774_v35   ;;  %v1355_v49 = vadd.f32 %v1984_v5, %v1354_v37  ;;  %v1487_v51 = vadd.f32 %v1486_v34, %v1424_v38  ;;  %v1432_v38 = vmul.f32 %v2226_v50, %v2226_v50 }
 0x11c   :  { %v480_v53 = vpop.f32.mrf.mxu0  ;;  %1898 = vst [vmem:[%s2511_s2 + $0xe0] sm:$0xff] %v1854_v42   ;;  %v2388_v55 = vpop.f32.mrf.mxu1  ;;  %v1433_v42 = vmul.f32 %v2218_v41, %v2218_v41 }
 0x11d   :  { %v1488_v58 = vadd.f32 %v1487_v51, %v1425_v47  ;;  %v1356_v59 = vadd.f32 %v1985_v22, %v1355_v49  ;;  %v1427_v3 = vmul.f32 %v480_v53, %v480_v53  ;;  %v1429_v22 = vmul.f32 %v1988_v39, %v1988_v39 }
 0x11e   :  { %v1989_v60 = vpop.f32.mrf.mxu0  ;;  %v2390_v0 = vpop.f32.mrf.mxu1  ;;  %v1434_v51 = vmul.f32 %v2222_v45, %v2222_v45 }
 0x11f   :  { %v1357_v1 = vadd.f32 %v1356_v59, %v480_v53  ;;  %v1489_v4 = vadd.f32 %v1488_v58, %v1426_v57  ;;  %v1789_v6 = vpack.c.bf16 %v1989_v60, %v1988_v39  ;;  %v1869_v5 = vpack.c.bf16 %v2390_v0, %v2380_v46 }
 0x120   :  { %v483_v10 = vpop.f32.mrf.mxu0  ;;  %v2394_v11 = vpop.f32.mrf.mxu1  ;;  %v1430_v27 = vmul.f32 %v1989_v60, %v1989_v60  ;;  %v1435_v58 = vmul.f32 %v2244_v61, %v2244_v61 }
 0x121   :  { %v1490_v12 = vadd.f32 %v1489_v4, %v1427_v3  ;;  %1885 = vst [vmem:[%s2511_s2 + $0x78] sm:$0xff] %v1789_v6   ;;  %v1784_v14 = vpack.c.bf16 %v483_v10, %v480_v53  ;;  %v1358_v17 = vadd.f32 %v1357_v1, %v483_v10  ;;  %v1428_v18 = vmul.f32 %v483_v10, %v483_v10 }
 0x122   :  { %1901 = vst [vmem:[%s2511_s2 + $0xf8] sm:$0xff] %v1869_v5   ;;  %v1864_v20 = vpack.c.bf16 %v2394_v11, %v2388_v55  ;;  %v1436_v1 = vmul.f32 %v2250_v9, %v2250_v9  ;;  %v1439_v5 = vmul.f32 %v2268_v21, %v2268_v21 }
 0x123   :  { %1884 = vst [vmem:[%s2511_s2 + $0x70] sm:$0xff] %v1784_v14   ;;  %v1359_v24 = vadd.f32 %v1988_v39, %v1358_v17  ;;  %v1491_v25 = vadd.f32 %v1490_v12, %v1428_v18  ;;  %v1440_v17 = vmul.f32 %v2274_v33, %v2274_v33 }
 0x124   :  { %1900 = vst [vmem:[%s2511_s2 + $0xf0] sm:$0xff] %v1864_v20  }
 0x125   :  { %v1360_v29 = vadd.f32 %v1989_v60, %v1359_v24  ;;  %v1492_v30 = vadd.f32 %v1491_v25, %v1429_v22  ;;  %v1443_v25 = vmul.f32 %v2292_v48, %v2292_v48 }
 0x127   :  { %v1493_v34 = vadd.f32 %v1492_v30, %v1430_v27  ;;  %v1361_v35 = vadd.f32 %v1360_v29, %v2220_v43  ;;  %v1444_v30 = vmul.f32 %v2298_v63, %v2298_v63 }
 0x129   :  { %v1362_v37 = vadd.f32 %v1361_v35, %v2226_v50  ;;  %v1494_v39 = vadd.f32 %v1493_v34, %v1431_v31 }
 0x12b   :  { %v1363_v47 = vadd.f32 %v2218_v41, %v1362_v37  ;;  %v1495_v49 = vadd.f32 %v1494_v39, %v1432_v38  ;;  %v1437_v41 = vmul.f32 %v2236_v56, %v2236_v56  ;;  %v1447_v38 = vmul.f32 %v2316_v13, %v2316_v13 }
 0x12d   :  { %v1496_v53 = vadd.f32 %v1495_v49, %v1433_v42  ;;  %v1364_v57 = vadd.f32 %v2222_v45, %v1363_v47  ;;  %v1438_v45 = vmul.f32 %v2246_v2, %v2246_v2  ;;  %v1448_v47 = vmul.f32 %v2322_v28, %v2322_v28 }
 0x12f   :  { %v1365_v43 = vadd.f32 %v1364_v57, %v2244_v61  ;;  %v1497_v59 = vadd.f32 %v1496_v53, %v1434_v51 }
 0x131   :  { %v1498_v50 = vadd.f32 %v1497_v59, %v1435_v58  ;;  %v1366_v60 = vadd.f32 %v1365_v43, %v2250_v9  ;;  %v1451_v43 = vmul.f32 %v2340_v44, %v2340_v44 }
 0x133   :  { %v1367_v3 = vadd.f32 %v2236_v56, %v1366_v60  ;;  %v1499_v4 = vadd.f32 %v1498_v50, %v1436_v1  ;;  %v1441_v56 = vmul.f32 %v2260_v16, %v2260_v16  ;;  %v1452_v50 = vmul.f32 %v2346_v62, %v2346_v62 }
 0x135   :  { %v1500_v6 = vadd.f32 %v1499_v4, %v1437_v41  ;;  %v1368_v10 = vadd.f32 %v2246_v2, %v1367_v3  ;;  %v1442_v2 = vmul.f32 %v2270_v26, %v2270_v26  ;;  %v1455_v4 = vmul.f32 %v2364_v15, %v2364_v15 }
 0x137   :  { %v1369_v61 = vadd.f32 %v1368_v10, %v2268_v21  ;;  %v1501_v12 = vadd.f32 %v1500_v6, %v1438_v45  ;;  %v1456_v10 = vmul.f32 %v2370_v32, %v2370_v32 }
 0x139   :  { %v1502_v14 = vadd.f32 %v1501_v12, %v1439_v5  ;;  %v1370_v9 = vadd.f32 %v1369_v61, %v2274_v33 }
 0x13b   :  { %v1371_v18 = vadd.f32 %v2260_v16, %v1370_v9  ;;  %v1503_v20 = vadd.f32 %v1502_v14, %v1440_v17  ;;  %v1445_v16 = vmul.f32 %v2284_v40, %v2284_v40  ;;  %v1459_v9 = vmul.f32 %v2388_v55, %v2388_v55 }
 0x13d   :  { %v1504_v22 = vadd.f32 %v1503_v20, %v1441_v56  ;;  %v1372_v24 = vadd.f32 %v2270_v26, %v1371_v18  ;;  %v1446_v26 = vmul.f32 %v2294_v54, %v2294_v54  ;;  %v1460_v18 = vmul.f32 %v2394_v11, %v2394_v11 }
 0x13f   :  { %v1373_v21 = vadd.f32 %v1372_v24, %v2292_v48  ;;  %v1505_v27 = vadd.f32 %v1504_v22, %v1442_v2 }
 0x141   :  { %v1506_v29 = vadd.f32 %v1505_v27, %v1443_v25  ;;  %v1374_v33 = vadd.f32 %v1373_v21, %v2298_v63 }
 0x143   :  { %v1375_v31 = vadd.f32 %v2284_v40, %v1374_v33  ;;  %v1507_v34 = vadd.f32 %v1506_v29, %v1444_v30  ;;  %v1449_v40 = vmul.f32 %v2308_v7, %v2308_v7 }
 0x145   :  { %v1508_v35 = vadd.f32 %v1507_v34, %v1445_v16  ;;  %v1376_v37 = vadd.f32 %v2294_v54, %v1375_v31  ;;  %v1450_v54 = vmul.f32 %v2318_v19, %v2318_v19 }
 0x147   :  { %v1377_v48 = vadd.f32 %v1376_v37, %v2316_v13  ;;  %v1509_v39 = vadd.f32 %v1508_v35, %v1446_v26 }
 0x149   :  { %v1510_v42 = vadd.f32 %v1509_v39, %v1447_v38  ;;  %v1378_v63 = vadd.f32 %v1377_v48, %v2322_v28 }
 0x14b   :  { %v1379_v49 = vadd.f32 %v2308_v7, %v1378_v63  ;;  %v1511_v51 = vadd.f32 %v1510_v42, %v1448_v47  ;;  %v1453_v7 = vmul.f32 %v2332_v36, %v2332_v36 }
 0x14d   :  { %v1512_v53 = vadd.f32 %v1511_v51, %v1449_v40  ;;  %v1380_v57 = vadd.f32 %v2318_v19, %v1379_v49  ;;  %v1454_v19 = vmul.f32 %v2342_v52, %v2342_v52 }
 0x14f   :  { %v1381_v13 = vadd.f32 %v1380_v57, %v2340_v44  ;;  %v1513_v58 = vadd.f32 %v1512_v53, %v1450_v54 }
 0x151   :  { %v1514_v59 = vadd.f32 %v1513_v58, %v1451_v43  ;;  %v1382_v28 = vadd.f32 %v1381_v13, %v2346_v62 }
 0x153   :  { %v1383_v60 = vadd.f32 %v2332_v36, %v1382_v28  ;;  %v1515_v1 = vadd.f32 %v1514_v59, %v1452_v50  ;;  %v1457_v36 = vmul.f32 %v2356_v8, %v2356_v8 }
 0x155   :  { %v1516_v41 = vadd.f32 %v1515_v1, %v1453_v7  ;;  %v1384_v3 = vadd.f32 %v2342_v52, %v1383_v60  ;;  %v1458_v52 = vmul.f32 %v2366_v23, %v2366_v23 }
 0x157   :  { %v1385_v44 = vadd.f32 %v1384_v3, %v2364_v15  ;;  %v1517_v45 = vadd.f32 %v1516_v41, %v1454_v19 }
 0x159   :  { %v1518_v6 = vadd.f32 %v1517_v45, %v1455_v4  ;;  %v1386_v62 = vadd.f32 %v1385_v44, %v2370_v32 }
 0x15b   :  { %v1387_v61 = vadd.f32 %v2356_v8, %v1386_v62  ;;  %v1519_v5 = vadd.f32 %v1518_v6, %v1456_v10  ;;  %v1461_v8 = vmul.f32 %v2380_v46, %v2380_v46 }
 0x15d   :  { %v1520_v12 = vadd.f32 %v1519_v5, %v1457_v36  ;;  %v1388_v14 = vadd.f32 %v2366_v23, %v1387_v61  ;;  %v1462_v23 = vmul.f32 %v2390_v0, %v2390_v0 }
 0x15f   :  { %v1389_v15 = vadd.f32 %v1388_v14, %v2388_v55  ;;  %v1521_v17 = vadd.f32 %v1520_v12, %v1458_v52 }
 0x161   :  { %v1522_v56 = vadd.f32 %v1521_v17, %v1459_v9  ;;  %v1390_v32 = vadd.f32 %v1389_v15, %v2394_v11 }
 0x163   :  { %v1391_v20 = vadd.f32 %v2380_v46, %v1390_v32  ;;  %v1523_v2 = vadd.f32 %v1522_v56, %v1460_v18 }
 0x165   :  { %v1392_v22 = vadd.f32 %v2390_v0, %v1391_v20  ;;  %v1524_v24 = vadd.f32 %v1523_v2, %v1461_v8 }
 0x167   :  { %v1393_v55 = vrot.slane %v1392_v22, 4  ;;  %v1525_v21 = vadd.f32 %v1524_v24, %v1462_v23 }
 0x169   :  { %v1394_v25 = vadd.f32 %v1393_v55, %v1392_v22  ;;  %v1526_v27 = vrot.slane %v1525_v21, 4 }
 0x16b   :  { %v1395_v29 = vrot.slane %v1394_v25, 2  ;;  %v1527_v33 = vadd.f32 %v1526_v27, %v1525_v21 }
 0x16d   :  { %v1396_v30 = vadd.f32 %v1395_v29, %v1394_v25  ;;  %v1528_v11 = vrot.slane %v1527_v33, 2 }
 0x16f   :  { %v1397_v16 = vrot.slane %v1396_v30, 1  ;;  %v1529_v31 = vadd.f32 %v1528_v11, %v1527_v33 }
 0x171   :  { %v1530_v34 = vrot.slane %v1529_v31, 1  ;;  %v1398_v46 = vadd.f32 %v1397_v16, %v1396_v30 }
 0x173   :  { %v1531_v26 = vadd.f32 %v1530_v34, %v1529_v31 }
 0x175   :  { %v1533_v35 = vsel %vm1532_vm0, %v1398_v46, %v1531_v26 }
 0x176   :  { %1534 = vst [vmem:[%s2512_s3] sm:$0x3] %v1533_v35 }

// kernel: _lambda_.16
= control target key start
LH: loop header
LB: loop body
LE: loop exit
PB: predicated region body
PF: predicated region fallthrough
CT: control target
= control target key end

     0   :  { %s1631_s0 = inlined_call_operand.vmem [shape: bf16[512,128], index: 0, kind: input, shape index: {}]   ;;  %s1632_s1 = inlined_call_operand.vmem [shape: f32[1,128], index: 1, kind: input, shape index: {}]   ;;  %s1633_s2 = inlined_call_operand.vmem [shape: f32[1,128], index: 2, kind: input, shape index: {}]   ;;  %s1634_s3 = inlined_call_operand.vmem [shape: bf16[512,128], index: 3, kind: output, shape index: {}]  }
   0x1   :  { %v931_v0 = vld [vmem:[%s1631_s0] sm:$0xff]   ;;  %v1218_v4 = vld [vmem:[%s1631_s0 + $0x8] sm:$0xff]   ;;  %v1219_v5 = vld [vmem:[%s1631_s0 + $0x10] sm:$0xff]  }
   0x2   :  { %v1306_v1 = vld [vmem:[%s1632_s1] ss:$0 sm:$0xff]  ;;  %v932_v2 = vunpack.c.l.bf16 %v931_v0  ;;  %v933_v3 = vunpack.c.h.bf16 %v931_v0  ;;  %v1220_v6 = vld [vmem:[%s1631_s0 + $0x18] sm:$0xff]   ;;  %v936_v8 = vunpack.c.l.bf16 %v1218_v4  ;;  %v937_v9 = vunpack.c.h.bf16 %v1218_v4  ;;  %v1222_v35 = vld [vmem:[%s1631_s0 + $0x28] sm:$0xff]  }
   0x3   :  { %v1320_v7 = vld [vmem:[%s1633_s2] ss:$0 sm:$0xff]  ;;  %v940_v10 = vunpack.c.l.bf16 %v1219_v5  ;;  %v941_v11 = vunpack.c.h.bf16 %v1219_v5  ;;  %v944_v14 = vunpack.c.l.bf16 %v1220_v6  ;;  %v945_v15 = vunpack.c.h.bf16 %v1220_v6  ;;  %v1223_v48 = vld [vmem:[%s1631_s0 + $0x30] sm:$0xff]   ;;  %v1224_v4 = vld [vmem:[%s1631_s0 + $0x38] sm:$0xff]  }
   0x4   :  { %v149_v12 = vmul.f32 %v932_v2, %v1306_v1  ;;  %v150_v13 = vmul.f32 %v933_v3, %v1306_v1  ;;  %v151_v16 = vmul.f32 %v936_v8, %v1306_v1  ;;  %v152_v17 = vmul.f32 %v937_v9, %v1306_v1  ;;  %v1221_v34 = vld [vmem:[%s1631_s0 + $0x20] sm:$0xff]  }
   0x5   :  { %v153_v18 = vmul.f32 %v940_v10, %v1306_v1  ;;  %v154_v19 = vmul.f32 %v941_v11, %v1306_v1  ;;  %v155_v22 = vmul.f32 %v944_v14, %v1306_v1  ;;  %v156_v23 = vmul.f32 %v945_v15, %v1306_v1  ;;  %v1225_v15 = vld [vmem:[%s1631_s0 + $0x40] sm:$0xff]  }
   0x6   :  { %v220_v20 = vadd.f32 %v1320_v7, %v149_v12  ;;  %v221_v21 = vadd.f32 %v1320_v7, %v150_v13  ;;  %v222_v24 = vadd.f32 %v1320_v7, %v151_v16  ;;  %v223_v25 = vadd.f32 %v1320_v7, %v152_v17 }
   0x7   :  { %v224_v26 = vadd.f32 %v1320_v7, %v153_v18  ;;  %v225_v27 = vadd.f32 %v1320_v7, %v154_v19  ;;  %v226_v42 = vadd.f32 %v1320_v7, %v155_v22  ;;  %v227_v43 = vadd.f32 %v1320_v7, %v156_v23 }
   0x8   :  { %vm284_vm0 = vcmp.ge.f32.partialorder %v220_v20, 0.0  ;;  %vm285_vm1 = vcmp.ge.f32.partialorder %v221_v21, 0.0  ;;  %v348_v28 = vmul.f32 0.2, %v220_v20  ;;  %v349_v29 = vmul.f32 0.2, %v221_v21 }
   0x9   :  { %vm286_vm2 = vcmp.ge.f32.partialorder %v222_v24, 0.0  ;;  %vm287_vm3 = vcmp.ge.f32.partialorder %v223_v25, 0.0  ;;  %v350_v30 = vmul.f32 0.2, %v222_v24  ;;  %v351_v31 = vmul.f32 0.2, %v223_v25 }
   0xa   :  { %v412_v32 = vsel %vm284_vm0, %v220_v20, %v348_v28  ;;  %v413_v33 = vsel %vm285_vm1, %v221_v21, %v349_v29  ;;  %vm288_vm4 = vcmp.ge.f32.partialorder %v224_v26, 0.0  ;;  %vm289_vm5 = vcmp.ge.f32.partialorder %v225_v27, 0.0 }
   0xb   :  { %v1061_v36 = vpack.c.bf16 %v413_v33, %v412_v32  ;;  %v414_v37 = vsel %vm286_vm2, %v222_v24, %v350_v30  ;;  %v415_v38 = vsel %vm287_vm3, %v223_v25, %v351_v31  ;;  %v352_v39 = vmul.f32 0.2, %v224_v26 }
   0xc   :  { %v1066_v40 = vpack.c.bf16 %v415_v38, %v414_v37  ;;  %v353_v41 = vmul.f32 0.2, %v225_v27  ;;  %v948_v45 = vunpack.c.l.bf16 %v1221_v34  ;;  %v949_v46 = vunpack.c.h.bf16 %v1221_v34 }
   0xd   :  { %1062 = vst [vmem:[%s1634_s3] sm:$0xff] %v1061_v36   ;;  %v416_v44 = vsel %vm288_vm4, %v224_v26, %v352_v39  ;;  %v952_v47 = vunpack.c.l.bf16 %v1222_v35  ;;  %vm290_vm6 = vcmp.ge.f32.partialorder %v226_v42, 0.0  ;;  %vm291_vm7 = vcmp.ge.f32.partialorder %v227_v43, 0.0  ;;  %v1226_v26 = vld [vmem:[%s1631_s0 + $0x48] sm:$0xff]  }
   0xe   :  { %1249 = vst [vmem:[%s1634_s3 + $0x8] sm:$0xff] %v1066_v40   ;;  %v417_v49 = vsel %vm289_vm5, %v225_v27, %v353_v41  ;;  %v354_v50 = vmul.f32 0.2, %v226_v42  ;;  %v355_v52 = vmul.f32 0.2, %v227_v43  ;;  %v157_v53 = vmul.f32 %v948_v45, %v1306_v1  ;;  %v1227_v27 = vld [vmem:[%s1631_s0 + $0x50] sm:$0xff]  }
   0xf   :  { %v1071_v51 = vpack.c.bf16 %v417_v49, %v416_v44  ;;  %v158_v54 = vmul.f32 %v949_v46, %v1306_v1  ;;  %v953_v56 = vunpack.c.h.bf16 %v1222_v35  ;;  %v159_v57 = vmul.f32 %v952_v47, %v1306_v1 }
  0x10   :  { %v418_v55 = vsel %vm290_vm6, %v226_v42, %v354_v50  ;;  %v956_v58 = vunpack.c.l.bf16 %v1223_v48  ;;  %v419_v59 = vsel %vm291_vm7, %v227_v43, %v355_v52  ;;  %v228_v60 = vadd.f32 %v1320_v7, %v157_v53 }
  0x11   :  { %1250 = vst [vmem:[%s1634_s3 + $0x10] sm:$0xff] %v1071_v51   ;;  %v229_v61 = vadd.f32 %v1320_v7, %v158_v54  ;;  %v957_v62 = vunpack.c.h.bf16 %v1223_v48  ;;  %v1076_v63 = vpack.c.bf16 %v419_v59, %v418_v55  ;;  %v160_v0 = vmul.f32 %v953_v56, %v1306_v1  ;;  %v1228_v55 = vld [vmem:[%s1631_s0 + $0x58] sm:$0xff]  }
  0x12   :  { %v230_v2 = vadd.f32 %v1320_v7, %v159_v57  ;;  %v161_v3 = vmul.f32 %v956_v58, %v1306_v1  ;;  %vm292_vm8 = vcmp.ge.f32.partialorder %v228_v60, 0.0  ;;  %v356_v5 = vmul.f32 0.2, %v228_v60 }
  0x13   :  { %vm293_vm9 = vcmp.ge.f32.partialorder %v229_v61, 0.0  ;;  %v357_v6 = vmul.f32 0.2, %v229_v61  ;;  %1251 = vst [vmem:[%s1634_s3 + $0x18] sm:$0xff] %v1076_v63   ;;  %v231_v8 = vadd.f32 %v1320_v7, %v160_v0  ;;  %v162_v10 = vmul.f32 %v957_v62, %v1306_v1 }
  0x14   :  { %vm294_vm10 = vcmp.ge.f32.partialorder %v230_v2, 0.0  ;;  %v358_v9 = vmul.f32 0.2, %v230_v2  ;;  %v420_v11 = vsel %vm292_vm8, %v228_v60, %v356_v5  ;;  %v232_v13 = vadd.f32 %v1320_v7, %v161_v3  ;;  %v1229_v60 = vld [vmem:[%s1631_s0 + $0x60] sm:$0xff]  }
  0x15   :  { %v421_v12 = vsel %vm293_vm9, %v229_v61, %v357_v6  ;;  %v960_v14 = vunpack.c.l.bf16 %v1224_v4  ;;  %vm295_vm11 = vcmp.ge.f32.partialorder %v231_v8, 0.0  ;;  %v359_v17 = vmul.f32 0.2, %v231_v8 }
  0x16   :  { %v1081_v16 = vpack.c.bf16 %v421_v12, %v420_v11  ;;  %v422_v18 = vsel %vm294_vm10, %v230_v2, %v358_v9  ;;  %v233_v19 = vadd.f32 %v1320_v7, %v162_v10  ;;  %vm296_vm12 = vcmp.ge.f32.partialorder %v232_v13, 0.0  ;;  %v1230_v9 = vld [vmem:[%s1631_s0 + $0x68] sm:$0xff]  }
  0x17   :  { %v360_v20 = vmul.f32 0.2, %v232_v13  ;;  %v961_v21 = vunpack.c.h.bf16 %v1224_v4  ;;  %v423_v22 = vsel %vm295_vm11, %v231_v8, %v359_v17  ;;  %v163_v23 = vmul.f32 %v960_v14, %v1306_v1 }
  0x18   :  { %1252 = vst [vmem:[%s1634_s3 + $0x20] sm:$0xff] %v1081_v16   ;;  %v964_v24 = vunpack.c.l.bf16 %v1225_v15  ;;  %v965_v25 = vunpack.c.h.bf16 %v1225_v15  ;;  %v1086_v28 = vpack.c.bf16 %v423_v22, %v422_v18  ;;  %vm297_vm13 = vcmp.ge.f32.partialorder %v233_v19, 0.0 }
  0x19   :  { %v361_v29 = vmul.f32 0.2, %v233_v19  ;;  %v424_v30 = vsel %vm296_vm12, %v232_v13, %v360_v20  ;;  %v164_v31 = vmul.f32 %v961_v21, %v1306_v1  ;;  %v234_v32 = vadd.f32 %v1320_v7, %v163_v23 }
  0x1a   :  { %v165_v33 = vmul.f32 %v964_v24, %v1306_v1  ;;  %v166_v34 = vmul.f32 %v965_v25, %v1306_v1  ;;  %1253 = vst [vmem:[%s1634_s3 + $0x28] sm:$0xff] %v1086_v28   ;;  %v968_v36 = vunpack.c.l.bf16 %v1226_v26  ;;  %v969_v37 = vunpack.c.h.bf16 %v1226_v26  ;;  %v1231_v28 = vld [vmem:[%s1631_s0 + $0x70] sm:$0xff]  }
  0x1b   :  { %v425_v35 = vsel %vm297_vm13, %v233_v19, %v361_v29  ;;  %v972_v38 = vunpack.c.l.bf16 %v1227_v27  ;;  %v235_v40 = vadd.f32 %v1320_v7, %v164_v31  ;;  %vm298_vm14 = vcmp.ge.f32.partialorder %v234_v32, 0.0 }
  0x1c   :  { %v1091_v39 = vpack.c.bf16 %v425_v35, %v424_v30  ;;  %v362_v41 = vmul.f32 0.2, %v234_v32  ;;  %v236_v42 = vadd.f32 %v1320_v7, %v165_v33  ;;  %v237_v43 = vadd.f32 %v1320_v7, %v166_v34 }
  0x1d   :  { %v167_v44 = vmul.f32 %v968_v36, %v1306_v1  ;;  %v168_v45 = vmul.f32 %v969_v37, %v1306_v1  ;;  %vm299_vm15 = vcmp.ge.f32.partialorder %v235_v40, 0.0  ;;  %v363_v46 = vmul.f32 0.2, %v235_v40  ;;  %v1232_v37 = vld [vmem:[%s1631_s0 + $0x78] sm:$0xff]  }
  0x1e   :  { %1254 = vst [vmem:[%s1634_s3 + $0x30] sm:$0xff] %v1091_v39   ;;  %v426_v47 = vsel %vm298_vm14, %v234_v32, %v362_v41  ;;  %v973_v48 = vunpack.c.h.bf16 %v1227_v27  ;;  %vm300_vm0 = vcmp.ge.f32.partialorder %v236_v42, 0.0  ;;  %vm301_vm1 = vcmp.ge.f32.partialorder %v237_v43, 0.0 }
  0x1f   :  { %v364_v49 = vmul.f32 0.2, %v236_v42  ;;  %v365_v50 = vmul.f32 0.2, %v237_v43  ;;  %v427_v51 = vsel %vm299_vm15, %v235_v40, %v363_v46  ;;  %v238_v52 = vadd.f32 %v1320_v7, %v167_v44 }
  0x20   :  { %v239_v53 = vadd.f32 %v1320_v7, %v168_v45  ;;  %v169_v54 = vmul.f32 %v972_v38, %v1306_v1  ;;  %v1096_v56 = vpack.c.bf16 %v427_v51, %v426_v47  ;;  %v170_v59 = vmul.f32 %v973_v48, %v1306_v1 }
  0x21   :  { %v428_v57 = vsel %vm300_vm0, %v236_v42, %v364_v49  ;;  %v429_v58 = vsel %vm301_vm1, %v237_v43, %v365_v50  ;;  %vm302_vm2 = vcmp.ge.f32.partialorder %v238_v52, 0.0  ;;  %v366_v62 = vmul.f32 0.2, %v238_v52  ;;  %v1233_v42 = vld [vmem:[%s1631_s0 + $0x80] sm:$0xff]   ;;  %v1234_v50 = vld [vmem:[%s1631_s0 + $0x88] sm:$0xff]  }
  0x22   :  { %v1101_v61 = vpack.c.bf16 %v429_v58, %v428_v57  ;;  %vm303_vm3 = vcmp.ge.f32.partialorder %v239_v53, 0.0  ;;  %1255 = vst [vmem:[%s1634_s3 + $0x38] sm:$0xff] %v1096_v56   ;;  %v367_v63 = vmul.f32 0.2, %v239_v53  ;;  %v240_v0 = vadd.f32 %v1320_v7, %v169_v54 }
  0x23   :  { %v241_v2 = vadd.f32 %v1320_v7, %v170_v59  ;;  %v976_v3 = vunpack.c.l.bf16 %v1228_v55  ;;  %v430_v4 = vsel %vm302_vm2, %v238_v52, %v366_v62  ;;  %v977_v5 = vunpack.c.h.bf16 %v1228_v55 }
  0x24   :  { %1256 = vst [vmem:[%s1634_s3 + $0x40] sm:$0xff] %v1101_v61   ;;  %v980_v6 = vunpack.c.l.bf16 %v1229_v60  ;;  %v981_v8 = vunpack.c.h.bf16 %v1229_v60  ;;  %v431_v10 = vsel %vm303_vm3, %v239_v53, %v367_v63  ;;  %vm304_vm4 = vcmp.ge.f32.partialorder %v240_v0, 0.0 }
  0x25   :  { %vm305_vm5 = vcmp.ge.f32.partialorder %v241_v2, 0.0  ;;  %v368_v11 = vmul.f32 0.2, %v240_v0  ;;  %v1106_v12 = vpack.c.bf16 %v431_v10, %v430_v4  ;;  %v369_v13 = vmul.f32 0.2, %v241_v2 }
  0x26   :  { %v171_v14 = vmul.f32 %v976_v3, %v1306_v1  ;;  %v172_v15 = vmul.f32 %v977_v5, %v1306_v1  ;;  %v173_v17 = vmul.f32 %v980_v6, %v1306_v1  ;;  %v174_v18 = vmul.f32 %v981_v8, %v1306_v1 }
  0x27   :  { %v432_v16 = vsel %vm304_vm4, %v240_v0, %v368_v11  ;;  %v984_v19 = vunpack.c.l.bf16 %v1230_v9  ;;  %1257 = vst [vmem:[%s1634_s3 + $0x48] sm:$0xff] %v1106_v12   ;;  %v433_v20 = vsel %vm305_vm5, %v241_v2, %v369_v13  ;;  %v985_v23 = vunpack.c.h.bf16 %v1230_v9 }
  0x28   :  { %v242_v21 = vadd.f32 %v1320_v7, %v171_v14  ;;  %v243_v22 = vadd.f32 %v1320_v7, %v172_v15  ;;  %v1111_v24 = vpack.c.bf16 %v433_v20, %v432_v16  ;;  %v244_v25 = vadd.f32 %v1320_v7, %v173_v17  ;;  %v1235_v15 = vld [vmem:[%s1631_s0 + $0x90] sm:$0xff]   ;;  %v1236_v20 = vld [vmem:[%s1631_s0 + $0x98] sm:$0xff]  }
  0x29   :  { %v245_v26 = vadd.f32 %v1320_v7, %v174_v18  ;;  %v175_v27 = vmul.f32 %v984_v19, %v1306_v1  ;;  %v176_v35 = vmul.f32 %v985_v23, %v1306_v1  ;;  %v988_v41 = vunpack.c.l.bf16 %v1231_v28 }
  0x2a   :  { %vm306_vm6 = vcmp.ge.f32.partialorder %v242_v21, 0.0  ;;  %vm307_vm7 = vcmp.ge.f32.partialorder %v243_v22, 0.0  ;;  %v370_v29 = vmul.f32 0.2, %v242_v21  ;;  %v371_v30 = vmul.f32 0.2, %v243_v22 }
  0x2b   :  { %1258 = vst [vmem:[%s1634_s3 + $0x50] sm:$0xff] %v1111_v24   ;;  %vm308_vm8 = vcmp.ge.f32.partialorder %v244_v25, 0.0  ;;  %vm309_vm9 = vcmp.ge.f32.partialorder %v245_v26, 0.0  ;;  %v372_v31 = vmul.f32 0.2, %v244_v25  ;;  %v246_v36 = vadd.f32 %v1320_v7, %v175_v27 }
  0x2c   :  { %v373_v32 = vmul.f32 0.2, %v245_v26  ;;  %v434_v33 = vsel %vm306_vm6, %v242_v21, %v370_v29  ;;  %v435_v34 = vsel %vm307_vm7, %v243_v22, %v371_v30  ;;  %v247_v44 = vadd.f32 %v1320_v7, %v176_v35  ;;  %v1237_v21 = vld [vmem:[%s1631_s0 + $0xa0] sm:$0xff]  }
  0x2d   :  { %v1116_v38 = vpack.c.bf16 %v435_v34, %v434_v33  ;;  %v436_v39 = vsel %vm308_vm8, %v244_v25, %v372_v31  ;;  %vm310_vm10 = vcmp.ge.f32.partialorder %v246_v36, 0.0  ;;  %v374_v45 = vmul.f32 0.2, %v246_v36 }
  0x2e   :  { %v437_v40 = vsel %vm309_vm9, %v245_v26, %v373_v32  ;;  %v989_v46 = vunpack.c.h.bf16 %v1231_v28  ;;  %v177_v47 = vmul.f32 %v988_v41, %v1306_v1  ;;  %v992_v48 = vunpack.c.l.bf16 %v1232_v37 }
  0x2f   :  { %v1121_v43 = vpack.c.bf16 %v437_v40, %v436_v39  ;;  %1259 = vst [vmem:[%s1634_s3 + $0x58] sm:$0xff] %v1116_v38   ;;  %v993_v49 = vunpack.c.h.bf16 %v1232_v37  ;;  %vm311_vm11 = vcmp.ge.f32.partialorder %v247_v44, 0.0  ;;  %v375_v51 = vmul.f32 0.2, %v247_v44  ;;  %v1238_v40 = vld [vmem:[%s1631_s0 + $0xa8] sm:$0xff]  }
  0x30   :  { %v438_v52 = vsel %vm310_vm10, %v246_v36, %v374_v45  ;;  %v996_v53 = vunpack.c.l.bf16 %v1233_v42  ;;  %v178_v54 = vmul.f32 %v989_v46, %v1306_v1  ;;  %v248_v55 = vadd.f32 %v1320_v7, %v177_v47 }
  0x31   :  { %1260 = vst [vmem:[%s1634_s3 + $0x60] sm:$0xff] %v1121_v43   ;;  %v179_v56 = vmul.f32 %v992_v48, %v1306_v1  ;;  %v180_v57 = vmul.f32 %v993_v49, %v1306_v1  ;;  %v439_v58 = vsel %vm311_vm11, %v247_v44, %v375_v51  ;;  %v997_v59 = vunpack.c.h.bf16 %v1233_v42 }
  0x32   :  { %v181_v60 = vmul.f32 %v996_v53, %v1306_v1  ;;  %v1000_v61 = vunpack.c.l.bf16 %v1234_v50  ;;  %v1126_v62 = vpack.c.bf16 %v439_v58, %v438_v52  ;;  %v249_v63 = vadd.f32 %v1320_v7, %v178_v54 }
  0x33   :  { %vm312_vm12 = vcmp.ge.f32.partialorder %v248_v55, 0.0  ;;  %v376_v0 = vmul.f32 0.2, %v248_v55  ;;  %v250_v2 = vadd.f32 %v1320_v7, %v179_v56  ;;  %v251_v3 = vadd.f32 %v1320_v7, %v180_v57 }
  0x34   :  { %v182_v4 = vmul.f32 %v997_v59, %v1306_v1  ;;  %v252_v5 = vadd.f32 %v1320_v7, %v181_v60  ;;  %1261 = vst [vmem:[%s1634_s3 + $0x68] sm:$0xff] %v1126_v62   ;;  %vm313_vm13 = vcmp.ge.f32.partialorder %v249_v63, 0.0  ;;  %v377_v6 = vmul.f32 0.2, %v249_v63 }
  0x35   :  { %v440_v8 = vsel %vm312_vm12, %v248_v55, %v376_v0  ;;  %v1001_v9 = vunpack.c.h.bf16 %v1234_v50  ;;  %vm314_vm14 = vcmp.ge.f32.partialorder %v250_v2, 0.0  ;;  %vm315_vm15 = vcmp.ge.f32.partialorder %v251_v3, 0.0  ;;  %v1239_v0 = vld [vmem:[%s1631_s0 + $0xb0] sm:$0xff]  }
  0x36   :  { %v378_v10 = vmul.f32 0.2, %v250_v2  ;;  %v379_v11 = vmul.f32 0.2, %v251_v3  ;;  %v441_v12 = vsel %vm313_vm13, %v249_v63, %v377_v6  ;;  %v253_v13 = vadd.f32 %v1320_v7, %v182_v4 }
  0x37   :  { %vm316_vm0 = vcmp.ge.f32.partialorder %v252_v5, 0.0  ;;  %v380_v14 = vmul.f32 0.2, %v252_v5  ;;  %v1131_v16 = vpack.c.bf16 %v441_v12, %v440_v8  ;;  %v183_v19 = vmul.f32 %v1000_v61, %v1306_v1 }
  0x38   :  { %v442_v17 = vsel %vm314_vm14, %v250_v2, %v378_v10  ;;  %v443_v18 = vsel %vm315_vm15, %v251_v3, %v379_v11  ;;  %vm317_vm1 = vcmp.ge.f32.partialorder %v253_v13, 0.0  ;;  %v381_v23 = vmul.f32 0.2, %v253_v13  ;;  %v1240_v2 = vld [vmem:[%s1631_s0 + $0xb8] sm:$0xff]  }
  0x39   :  { %v1136_v22 = vpack.c.bf16 %v443_v18, %v442_v17  ;;  %v444_v24 = vsel %vm316_vm0, %v252_v5, %v380_v14  ;;  %1262 = vst [vmem:[%s1634_s3 + $0x70] sm:$0xff] %v1131_v16   ;;  %v184_v25 = vmul.f32 %v1001_v9, %v1306_v1  ;;  %v254_v26 = vadd.f32 %v1320_v7, %v183_v19  ;;  %v1241_v18 = vld [vmem:[%s1631_s0 + $0xc0] sm:$0xff]  }
  0x3a   :  { %v1004_v27 = vunpack.c.l.bf16 %v1235_v15  ;;  %v1005_v28 = vunpack.c.h.bf16 %v1235_v15  ;;  %v445_v29 = vsel %vm317_vm1, %v253_v13, %v381_v23  ;;  %v1008_v30 = vunpack.c.l.bf16 %v1236_v20 }
  0x3b   :  { %1263 = vst [vmem:[%s1634_s3 + $0x78] sm:$0xff] %v1136_v22   ;;  %v1009_v31 = vunpack.c.h.bf16 %v1236_v20  ;;  %v1012_v32 = vunpack.c.l.bf16 %v1237_v21  ;;  %v1141_v33 = vpack.c.bf16 %v445_v29, %v444_v24  ;;  %v255_v34 = vadd.f32 %v1320_v7, %v184_v25 }
  0x3c   :  { %vm318_vm2 = vcmp.ge.f32.partialorder %v254_v26, 0.0  ;;  %v382_v35 = vmul.f32 0.2, %v254_v26  ;;  %v185_v36 = vmul.f32 %v1004_v27, %v1306_v1  ;;  %v186_v37 = vmul.f32 %v1005_v28, %v1306_v1 }
  0x3d   :  { %v187_v38 = vmul.f32 %v1008_v30, %v1306_v1  ;;  %v188_v39 = vmul.f32 %v1009_v31, %v1306_v1  ;;  %1264 = vst [vmem:[%s1634_s3 + $0x80] sm:$0xff] %v1141_v33   ;;  %vm319_vm3 = vcmp.ge.f32.partialorder %v255_v34, 0.0  ;;  %v383_v41 = vmul.f32 0.2, %v255_v34 }
  0x3e   :  { %v446_v42 = vsel %vm318_vm2, %v254_v26, %v382_v35  ;;  %v1013_v43 = vunpack.c.h.bf16 %v1237_v21  ;;  %v256_v44 = vadd.f32 %v1320_v7, %v185_v36  ;;  %v257_v45 = vadd.f32 %v1320_v7, %v186_v37  ;;  %v1242_v36 = vld [vmem:[%s1631_s0 + $0xc8] sm:$0xff]  }
  0x3f   :  { %v258_v46 = vadd.f32 %v1320_v7, %v187_v38  ;;  %v259_v47 = vadd.f32 %v1320_v7, %v188_v39  ;;  %v447_v48 = vsel %vm319_vm3, %v255_v34, %v383_v41  ;;  %v189_v49 = vmul.f32 %v1012_v32, %v1306_v1 }
  0x40   :  { %v190_v50 = vmul.f32 %v1013_v43, %v1306_v1  ;;  %v1016_v51 = vunpack.c.l.bf16 %v1238_v40  ;;  %v1146_v52 = vpack.c.bf16 %v447_v48, %v446_v42  ;;  %vm320_vm4 = vcmp.ge.f32.partialorder %v256_v44, 0.0  ;;  %v1243_v42 = vld [vmem:[%s1631_s0 + $0xd0] sm:$0xff]  }
  0x41   :  { %vm321_vm5 = vcmp.ge.f32.partialorder %v257_v45, 0.0  ;;  %v384_v53 = vmul.f32 0.2, %v256_v44  ;;  %v385_v54 = vmul.f32 0.2, %v257_v45  ;;  %vm322_vm6 = vcmp.ge.f32.partialorder %v258_v46, 0.0 }
  0x42   :  { %vm323_vm7 = vcmp.ge.f32.partialorder %v259_v47, 0.0  ;;  %v386_v55 = vmul.f32 0.2, %v258_v46  ;;  %1265 = vst [vmem:[%s1634_s3 + $0x88] sm:$0xff] %v1146_v52   ;;  %v387_v57 = vmul.f32 0.2, %v259_v47  ;;  %v260_v58 = vadd.f32 %v1320_v7, %v189_v49 }
  0x43   :  { %v448_v56 = vsel %vm320_vm4, %v256_v44, %v384_v53  ;;  %v261_v59 = vadd.f32 %v1320_v7, %v190_v50  ;;  %v449_v60 = vsel %vm321_vm5, %v257_v45, %v385_v54  ;;  %v1017_v62 = vunpack.c.h.bf16 %v1238_v40 }
  0x44   :  { %v450_v61 = vsel %vm322_vm6, %v258_v46, %v386_v55  ;;  %v191_v63 = vmul.f32 %v1016_v51, %v1306_v1  ;;  %v1151_v3 = vpack.c.bf16 %v449_v60, %v448_v56  ;;  %v451_v4 = vsel %vm323_vm7, %v259_v47, %v387_v57  ;;  %v1244_v55 = vld [vmem:[%s1631_s0 + $0xd8] sm:$0xff]  }
  0x45   :  { %vm324_vm8 = vcmp.ge.f32.partialorder %v260_v58, 0.0  ;;  %vm325_vm9 = vcmp.ge.f32.partialorder %v261_v59, 0.0  ;;  %v1156_v5 = vpack.c.bf16 %v451_v4, %v450_v61  ;;  %v388_v6 = vmul.f32 0.2, %v260_v58 }
  0x46   :  { %v389_v8 = vmul.f32 0.2, %v261_v59  ;;  %v192_v9 = vmul.f32 %v1017_v62, %v1306_v1  ;;  %1266 = vst [vmem:[%s1634_s3 + $0x90] sm:$0xff] %v1151_v3   ;;  %v262_v10 = vadd.f32 %v1320_v7, %v191_v63  ;;  %v1020_v11 = vunpack.c.l.bf16 %v1239_v0 }
  0x47   :  { %v1021_v12 = vunpack.c.h.bf16 %v1239_v0  ;;  %v1024_v13 = vunpack.c.l.bf16 %v1240_v2  ;;  %1267 = vst [vmem:[%s1634_s3 + $0x98] sm:$0xff] %v1156_v5   ;;  %v452_v14 = vsel %vm324_vm8, %v260_v58, %v388_v6  ;;  %v1025_v17 = vunpack.c.h.bf16 %v1240_v2 }
  0x48   :  { %v453_v15 = vsel %vm325_vm9, %v261_v59, %v389_v8  ;;  %v263_v16 = vadd.f32 %v1320_v7, %v192_v9  ;;  %vm326_vm10 = vcmp.ge.f32.partialorder %v262_v10, 0.0  ;;  %v390_v20 = vmul.f32 0.2, %v262_v10 }
  0x49   :  { %v1161_v19 = vpack.c.bf16 %v453_v15, %v452_v14  ;;  %v193_v21 = vmul.f32 %v1020_v11, %v1306_v1  ;;  %v194_v23 = vmul.f32 %v1021_v12, %v1306_v1  ;;  %v195_v24 = vmul.f32 %v1024_v13, %v1306_v1  ;;  %v1246_v14 = vld [vmem:[%s1631_s0 + $0xe8] sm:$0xff]  }
  0x4a   :  { %vm327_vm11 = vcmp.ge.f32.partialorder %v263_v16, 0.0  ;;  %v391_v22 = vmul.f32 0.2, %v263_v16  ;;  %v454_v25 = vsel %vm326_vm10, %v262_v10, %v390_v20  ;;  %v196_v27 = vmul.f32 %v1025_v17, %v1306_v1  ;;  %v1245_v10 = vld [vmem:[%s1631_s0 + $0xe0] sm:$0xff]  }
  0x4b   :  { %1268 = vst [vmem:[%s1634_s3 + $0xa0] sm:$0xff] %v1161_v19   ;;  %v264_v26 = vadd.f32 %v1320_v7, %v193_v21  ;;  %v1028_v28 = vunpack.c.l.bf16 %v1241_v18  ;;  %v265_v30 = vadd.f32 %v1320_v7, %v194_v23  ;;  %v266_v31 = vadd.f32 %v1320_v7, %v195_v24 }
  0x4c   :  { %v455_v29 = vsel %vm327_vm11, %v263_v16, %v391_v22  ;;  %v1029_v32 = vunpack.c.h.bf16 %v1241_v18  ;;  %v267_v35 = vadd.f32 %v1320_v7, %v196_v27  ;;  %v1032_v46 = vunpack.c.l.bf16 %v1242_v36 }
  0x4d   :  { %v1166_v33 = vpack.c.bf16 %v455_v29, %v454_v25  ;;  %vm328_vm12 = vcmp.ge.f32.partialorder %v264_v26, 0.0  ;;  %v392_v34 = vmul.f32 0.2, %v264_v26  ;;  %vm329_vm13 = vcmp.ge.f32.partialorder %v265_v30, 0.0 }
  0x4e   :  { %v393_v37 = vmul.f32 0.2, %v265_v30  ;;  %vm330_vm14 = vcmp.ge.f32.partialorder %v266_v31, 0.0  ;;  %v394_v38 = vmul.f32 0.2, %v266_v31  ;;  %vm331_vm15 = vcmp.ge.f32.partialorder %v267_v35, 0.0 }
  0x4f   :  { %1269 = vst [vmem:[%s1634_s3 + $0xa8] sm:$0xff] %v1166_v33   ;;  %v456_v39 = vsel %vm328_vm12, %v264_v26, %v392_v34  ;;  %v395_v40 = vmul.f32 0.2, %v267_v35  ;;  %v197_v41 = vmul.f32 %v1028_v28, %v1306_v1  ;;  %v198_v45 = vmul.f32 %v1029_v32, %v1306_v1 }
  0x50   :  { %v457_v43 = vsel %vm329_vm13, %v265_v30, %v393_v37  ;;  %v458_v44 = vsel %vm330_vm14, %v266_v31, %v394_v38  ;;  %v1033_v50 = vunpack.c.h.bf16 %v1242_v36  ;;  %v199_v53 = vmul.f32 %v1032_v46, %v1306_v1  ;;  %v1247_v30 = vld [vmem:[%s1631_s0 + $0xf0] sm:$0xff]  }
  0x51   :  { %v1171_v47 = vpack.c.bf16 %v457_v43, %v456_v39  ;;  %v459_v48 = vsel %vm331_vm15, %v267_v35, %v395_v40  ;;  %v268_v49 = vadd.f32 %v1320_v7, %v197_v41  ;;  %v269_v52 = vadd.f32 %v1320_v7, %v198_v45 }
  0x52   :  { %v1176_v51 = vpack.c.bf16 %v459_v48, %v458_v44  ;;  %v1036_v54 = vunpack.c.l.bf16 %v1243_v42  ;;  %v200_v57 = vmul.f32 %v1033_v50, %v1306_v1  ;;  %v1037_v58 = vunpack.c.h.bf16 %v1243_v42  ;;  %v1248_v44 = vld [vmem:[%s1631_s0 + $0xf8] sm:$0xff]  }
  0x53   :  { %1270 = vst [vmem:[%s1634_s3 + $0xb0] sm:$0xff] %v1171_v47   ;;  %vm332_vm0 = vcmp.ge.f32.partialorder %v268_v49, 0.0  ;;  %v396_v56 = vmul.f32 0.2, %v268_v49  ;;  %vm333_vm1 = vcmp.ge.f32.partialorder %v269_v52, 0.0  ;;  %v270_v60 = vadd.f32 %v1320_v7, %v199_v53 }
  0x54   :  { %1271 = vst [vmem:[%s1634_s3 + $0xb8] sm:$0xff] %v1176_v51   ;;  %v397_v59 = vmul.f32 0.2, %v269_v52  ;;  %v201_v61 = vmul.f32 %v1036_v54, %v1306_v1  ;;  %v271_v63 = vadd.f32 %v1320_v7, %v200_v57  ;;  %v202_v0 = vmul.f32 %v1037_v58, %v1306_v1 }
  0x55   :  { %v460_v62 = vsel %vm332_vm0, %v268_v49, %v396_v56  ;;  %v1040_v2 = vunpack.c.l.bf16 %v1244_v55  ;;  %vm334_vm2 = vcmp.ge.f32.partialorder %v270_v60, 0.0  ;;  %v398_v4 = vmul.f32 0.2, %v270_v60 }
  0x56   :  { %v461_v3 = vsel %vm333_vm1, %v269_v52, %v397_v59  ;;  %v272_v5 = vadd.f32 %v1320_v7, %v201_v61  ;;  %vm335_vm3 = vcmp.ge.f32.partialorder %v271_v63, 0.0  ;;  %v399_v8 = vmul.f32 0.2, %v271_v63 }
  0x57   :  { %v1181_v6 = vpack.c.bf16 %v461_v3, %v460_v62  ;;  %v273_v9 = vadd.f32 %v1320_v7, %v202_v0  ;;  %v462_v11 = vsel %vm334_vm2, %v270_v60, %v398_v4  ;;  %v1041_v13 = vunpack.c.h.bf16 %v1244_v55 }
  0x58   :  { %vm336_vm4 = vcmp.ge.f32.partialorder %v272_v5, 0.0  ;;  %v400_v12 = vmul.f32 0.2, %v272_v5  ;;  %v463_v15 = vsel %vm335_vm3, %v271_v63, %v399_v8  ;;  %v203_v17 = vmul.f32 %v1040_v2, %v1306_v1 }
  0x59   :  { %1272 = vst [vmem:[%s1634_s3 + $0xc0] sm:$0xff] %v1181_v6   ;;  %vm337_vm5 = vcmp.ge.f32.partialorder %v273_v9, 0.0  ;;  %v401_v16 = vmul.f32 0.2, %v273_v9  ;;  %v1186_v18 = vpack.c.bf16 %v463_v15, %v462_v11  ;;  %v204_v20 = vmul.f32 %v1041_v13, %v1306_v1 }
  0x5a   :  { %v464_v19 = vsel %vm336_vm4, %v272_v5, %v400_v12  ;;  %v1044_v21 = vunpack.c.l.bf16 %v1245_v10  ;;  %v274_v23 = vadd.f32 %v1320_v7, %v203_v17  ;;  %v1045_v24 = vunpack.c.h.bf16 %v1245_v10 }
  0x5b   :  { %v465_v22 = vsel %vm337_vm5, %v273_v9, %v401_v16  ;;  %v1048_v25 = vunpack.c.l.bf16 %v1246_v14  ;;  %1273 = vst [vmem:[%s1634_s3 + $0xc8] sm:$0xff] %v1186_v18   ;;  %v275_v27 = vadd.f32 %v1320_v7, %v204_v20  ;;  %v1049_v29 = vunpack.c.h.bf16 %v1246_v14 }
  0x5c   :  { %v1191_v26 = vpack.c.bf16 %v465_v22, %v464_v19  ;;  %v205_v28 = vmul.f32 %v1044_v21, %v1306_v1  ;;  %vm338_vm6 = vcmp.ge.f32.partialorder %v274_v23, 0.0  ;;  %v402_v31 = vmul.f32 0.2, %v274_v23 }
  0x5d   :  { %v206_v32 = vmul.f32 %v1045_v24, %v1306_v1  ;;  %v207_v33 = vmul.f32 %v1048_v25, %v1306_v1  ;;  %vm339_vm7 = vcmp.ge.f32.partialorder %v275_v27, 0.0  ;;  %v403_v34 = vmul.f32 0.2, %v275_v27 }
  0x5e   :  { %1274 = vst [vmem:[%s1634_s3 + $0xd0] sm:$0xff] %v1191_v26   ;;  %v276_v35 = vadd.f32 %v1320_v7, %v205_v28  ;;  %v208_v36 = vmul.f32 %v1049_v29, %v1306_v1  ;;  %v466_v37 = vsel %vm338_vm6, %v274_v23, %v402_v31  ;;  %v1052_v40 = vunpack.c.l.bf16 %v1247_v30 }
  0x5f   :  { %v277_v38 = vadd.f32 %v1320_v7, %v206_v32  ;;  %v278_v39 = vadd.f32 %v1320_v7, %v207_v33  ;;  %v467_v41 = vsel %vm339_vm7, %v275_v27, %v403_v34  ;;  %v1053_v51 = vunpack.c.h.bf16 %v1247_v30 }
  0x60   :  { %vm340_vm8 = vcmp.ge.f32.partialorder %v276_v35, 0.0  ;;  %v404_v42 = vmul.f32 0.2, %v276_v35  ;;  %v279_v43 = vadd.f32 %v1320_v7, %v208_v36  ;;  %v1196_v45 = vpack.c.bf16 %v467_v41, %v466_v37 }
  0x61   :  { %vm341_vm9 = vcmp.ge.f32.partialorder %v277_v38, 0.0  ;;  %v405_v46 = vmul.f32 0.2, %v277_v38  ;;  %vm342_vm10 = vcmp.ge.f32.partialorder %v278_v39, 0.0  ;;  %v406_v48 = vmul.f32 0.2, %v278_v39 }
  0x62   :  { %v468_v47 = vsel %vm340_vm8, %v276_v35, %v404_v42  ;;  %vm343_vm11 = vcmp.ge.f32.partialorder %v279_v43, 0.0  ;;  %v407_v49 = vmul.f32 0.2, %v279_v43  ;;  %1275 = vst [vmem:[%s1634_s3 + $0xd8] sm:$0xff] %v1196_v45   ;;  %v209_v52 = vmul.f32 %v1052_v40, %v1306_v1 }
  0x63   :  { %v469_v50 = vsel %vm341_vm9, %v277_v38, %v405_v46  ;;  %v1056_v53 = vunpack.c.l.bf16 %v1248_v44  ;;  %v470_v55 = vsel %vm342_vm10, %v278_v39, %v406_v48  ;;  %v1057_v57 = vunpack.c.h.bf16 %v1248_v44 }
  0x64   :  { %v1201_v54 = vpack.c.bf16 %v469_v50, %v468_v47  ;;  %v471_v56 = vsel %vm343_vm11, %v279_v43, %v407_v49  ;;  %v210_v59 = vmul.f32 %v1053_v51, %v1306_v1  ;;  %v280_v60 = vadd.f32 %v1320_v7, %v209_v52 }
  0x65   :  { %v1206_v58 = vpack.c.bf16 %v471_v56, %v470_v55  ;;  %v211_v61 = vmul.f32 %v1056_v53, %v1306_v1  ;;  %v212_v62 = vmul.f32 %v1057_v57, %v1306_v1 }
  0x66   :  { %1276 = vst [vmem:[%s1634_s3 + $0xe0] sm:$0xff] %v1201_v54   ;;  %v281_v63 = vadd.f32 %v1320_v7, %v210_v59  ;;  %vm344_vm12 = vcmp.ge.f32.partialorder %v280_v60, 0.0  ;;  %v408_v0 = vmul.f32 0.2, %v280_v60 }
  0x67   :  { %1277 = vst [vmem:[%s1634_s3 + $0xe8] sm:$0xff] %v1206_v58   ;;  %v282_v2 = vadd.f32 %v1320_v7, %v211_v61  ;;  %v283_v3 = vadd.f32 %v1320_v7, %v212_v62 }
  0x68   :  { %vm345_vm13 = vcmp.ge.f32.partialorder %v281_v63, 0.0  ;;  %v409_v4 = vmul.f32 0.2, %v281_v63  ;;  %v472_v5 = vsel %vm344_vm12, %v280_v60, %v408_v0 }
  0x69   :  { %vm346_vm14 = vcmp.ge.f32.partialorder %v282_v2, 0.0  ;;  %vm347_vm15 = vcmp.ge.f32.partialorder %v283_v3, 0.0  ;;  %v410_v6 = vmul.f32 0.2, %v282_v2  ;;  %v411_v8 = vmul.f32 0.2, %v283_v3 }
  0x6a   :  { %v473_v1 = vsel %vm345_vm13, %v281_v63, %v409_v4 }
  0x6b   :  { %v1211_v9 = vpack.c.bf16 %v473_v1, %v472_v5  ;;  %v474_v10 = vsel %vm346_vm14, %v282_v2, %v410_v6  ;;  %v475_v11 = vsel %vm347_vm15, %v283_v3, %v411_v8 }
  0x6c   :  { %v1216_v12 = vpack.c.bf16 %v475_v11, %v474_v10 }
  0x6d   :  { %1278 = vst [vmem:[%s1634_s3 + $0xf0] sm:$0xff] %v1211_v9  }
  0x6e   :  { %1279 = vst [vmem:[%s1634_s3 + $0xf8] sm:$0xff] %v1216_v12  }

// kernel: _lambda_.18
= control target key start
LH: loop header
LB: loop body
LE: loop exit
PB: predicated region body
PF: predicated region fallthrough
CT: control target
= control target key end

     0   :  { %s455_s0 = inlined_call_operand.vmem [shape: bf16[128,128], index: 0, kind: input, shape index: {}]   ;;  %s456_s1 = inlined_call_operand.vmem [shape: f32[1,128], index: 1, kind: input, shape index: {}]   ;;  %s457_s2 = inlined_call_operand.vmem [shape: f32[1,128], index: 2, kind: input, shape index: {}]   ;;  %s458_s3 = inlined_call_operand.vmem [shape: bf16[128,128], index: 3, kind: output, shape index: {}]  }
   0x1   :  { %v259_v0 = vld [vmem:[%s455_s0] sm:$0xff]   ;;  %v330_v4 = vld [vmem:[%s455_s0 + $0x8] sm:$0xff]   ;;  %v331_v5 = vld [vmem:[%s455_s0 + $0x10] sm:$0xff]  }
   0x2   :  { %v370_v1 = vld [vmem:[%s456_s1] ss:$0 sm:$0xff]  ;;  %v260_v2 = vunpack.c.l.bf16 %v259_v0  ;;  %v261_v3 = vunpack.c.h.bf16 %v259_v0  ;;  %v332_v6 = vld [vmem:[%s455_s0 + $0x18] sm:$0xff]   ;;  %v264_v8 = vunpack.c.l.bf16 %v330_v4  ;;  %v265_v9 = vunpack.c.h.bf16 %v330_v4  ;;  %v334_v35 = vld [vmem:[%s455_s0 + $0x28] sm:$0xff]  }
   0x3   :  { %v384_v7 = vld [vmem:[%s457_s2] ss:$0 sm:$0xff]  ;;  %v268_v10 = vunpack.c.l.bf16 %v331_v5  ;;  %v269_v11 = vunpack.c.h.bf16 %v331_v5  ;;  %v272_v14 = vunpack.c.l.bf16 %v332_v6  ;;  %v273_v15 = vunpack.c.h.bf16 %v332_v6  ;;  %v335_v48 = vld [vmem:[%s455_s0 + $0x30] sm:$0xff]   ;;  %v336_v4 = vld [vmem:[%s455_s0 + $0x38] sm:$0xff]  }
   0x4   :  { %v53_v12 = vmul.f32 %v260_v2, %v370_v1  ;;  %v54_v13 = vmul.f32 %v261_v3, %v370_v1  ;;  %v55_v16 = vmul.f32 %v264_v8, %v370_v1  ;;  %v56_v17 = vmul.f32 %v265_v9, %v370_v1  ;;  %v333_v34 = vld [vmem:[%s455_s0 + $0x20] sm:$0xff]  }
   0x5   :  { %v57_v18 = vmul.f32 %v268_v10, %v370_v1  ;;  %v58_v19 = vmul.f32 %v269_v11, %v370_v1  ;;  %v59_v22 = vmul.f32 %v272_v14, %v370_v1  ;;  %v60_v23 = vmul.f32 %v273_v15, %v370_v1 }
   0x6   :  { %v76_v20 = vadd.f32 %v384_v7, %v53_v12  ;;  %v77_v21 = vadd.f32 %v384_v7, %v54_v13  ;;  %v78_v24 = vadd.f32 %v384_v7, %v55_v16  ;;  %v79_v25 = vadd.f32 %v384_v7, %v56_v17 }
   0x7   :  { %v80_v26 = vadd.f32 %v384_v7, %v57_v18  ;;  %v81_v27 = vadd.f32 %v384_v7, %v58_v19  ;;  %v82_v42 = vadd.f32 %v384_v7, %v59_v22  ;;  %v83_v43 = vadd.f32 %v384_v7, %v60_v23 }
   0x8   :  { %vm92_vm0 = vcmp.ge.f32.partialorder %v76_v20, 0.0  ;;  %vm93_vm1 = vcmp.ge.f32.partialorder %v77_v21, 0.0  ;;  %v108_v28 = vmul.f32 0.2, %v76_v20  ;;  %v109_v29 = vmul.f32 0.2, %v77_v21 }
   0x9   :  { %vm94_vm2 = vcmp.ge.f32.partialorder %v78_v24, 0.0  ;;  %vm95_vm3 = vcmp.ge.f32.partialorder %v79_v25, 0.0  ;;  %v110_v30 = vmul.f32 0.2, %v78_v24  ;;  %v111_v31 = vmul.f32 0.2, %v79_v25 }
   0xa   :  { %v124_v32 = vsel %vm92_vm0, %v76_v20, %v108_v28  ;;  %v125_v33 = vsel %vm93_vm1, %v77_v21, %v109_v29  ;;  %vm96_vm4 = vcmp.ge.f32.partialorder %v80_v26, 0.0  ;;  %vm97_vm5 = vcmp.ge.f32.partialorder %v81_v27, 0.0 }
   0xb   :  { %v293_v36 = vpack.c.bf16 %v125_v33, %v124_v32  ;;  %v126_v37 = vsel %vm94_vm2, %v78_v24, %v110_v30  ;;  %v127_v38 = vsel %vm95_vm3, %v79_v25, %v111_v31  ;;  %v112_v39 = vmul.f32 0.2, %v80_v26 }
   0xc   :  { %v298_v40 = vpack.c.bf16 %v127_v38, %v126_v37  ;;  %v113_v41 = vmul.f32 0.2, %v81_v27  ;;  %v276_v45 = vunpack.c.l.bf16 %v333_v34  ;;  %v277_v46 = vunpack.c.h.bf16 %v333_v34 }
   0xd   :  { %294 = vst [vmem:[%s458_s3] sm:$0xff] %v293_v36   ;;  %v128_v44 = vsel %vm96_vm4, %v80_v26, %v112_v39  ;;  %v280_v47 = vunpack.c.l.bf16 %v334_v35  ;;  %vm98_vm6 = vcmp.ge.f32.partialorder %v82_v42, 0.0  ;;  %vm99_vm7 = vcmp.ge.f32.partialorder %v83_v43, 0.0 }
   0xe   :  { %337 = vst [vmem:[%s458_s3 + $0x8] sm:$0xff] %v298_v40   ;;  %v129_v49 = vsel %vm97_vm5, %v81_v27, %v113_v41  ;;  %v114_v50 = vmul.f32 0.2, %v82_v42  ;;  %v115_v52 = vmul.f32 0.2, %v83_v43  ;;  %v61_v53 = vmul.f32 %v276_v45, %v370_v1 }
   0xf   :  { %v303_v51 = vpack.c.bf16 %v129_v49, %v128_v44  ;;  %v62_v54 = vmul.f32 %v277_v46, %v370_v1  ;;  %v281_v56 = vunpack.c.h.bf16 %v334_v35  ;;  %v63_v57 = vmul.f32 %v280_v47, %v370_v1 }
  0x10   :  { %v130_v55 = vsel %vm98_vm6, %v82_v42, %v114_v50  ;;  %v284_v58 = vunpack.c.l.bf16 %v335_v48  ;;  %v131_v59 = vsel %vm99_vm7, %v83_v43, %v115_v52  ;;  %v84_v60 = vadd.f32 %v384_v7, %v61_v53 }
  0x11   :  { %338 = vst [vmem:[%s458_s3 + $0x10] sm:$0xff] %v303_v51   ;;  %v85_v61 = vadd.f32 %v384_v7, %v62_v54  ;;  %v285_v62 = vunpack.c.h.bf16 %v335_v48  ;;  %v308_v63 = vpack.c.bf16 %v131_v59, %v130_v55  ;;  %v64_v0 = vmul.f32 %v281_v56, %v370_v1 }
  0x12   :  { %v86_v2 = vadd.f32 %v384_v7, %v63_v57  ;;  %v65_v3 = vmul.f32 %v284_v58, %v370_v1  ;;  %vm100_vm8 = vcmp.ge.f32.partialorder %v84_v60, 0.0  ;;  %v116_v5 = vmul.f32 0.2, %v84_v60 }
  0x13   :  { %vm101_vm9 = vcmp.ge.f32.partialorder %v85_v61, 0.0  ;;  %v117_v6 = vmul.f32 0.2, %v85_v61  ;;  %339 = vst [vmem:[%s458_s3 + $0x18] sm:$0xff] %v308_v63   ;;  %v87_v8 = vadd.f32 %v384_v7, %v64_v0  ;;  %v66_v10 = vmul.f32 %v285_v62, %v370_v1 }
  0x14   :  { %vm102_vm10 = vcmp.ge.f32.partialorder %v86_v2, 0.0  ;;  %v118_v9 = vmul.f32 0.2, %v86_v2  ;;  %v132_v11 = vsel %vm100_vm8, %v84_v60, %v116_v5  ;;  %v88_v13 = vadd.f32 %v384_v7, %v65_v3 }
  0x15   :  { %v133_v12 = vsel %vm101_vm9, %v85_v61, %v117_v6  ;;  %v288_v14 = vunpack.c.l.bf16 %v336_v4  ;;  %vm103_vm11 = vcmp.ge.f32.partialorder %v87_v8, 0.0  ;;  %v119_v16 = vmul.f32 0.2, %v87_v8 }
  0x16   :  { %v313_v15 = vpack.c.bf16 %v133_v12, %v132_v11  ;;  %v134_v17 = vsel %vm102_vm10, %v86_v2, %v118_v9  ;;  %v89_v18 = vadd.f32 %v384_v7, %v66_v10  ;;  %vm104_vm12 = vcmp.ge.f32.partialorder %v88_v13, 0.0 }
  0x17   :  { %v120_v19 = vmul.f32 0.2, %v88_v13  ;;  %v289_v20 = vunpack.c.h.bf16 %v336_v4  ;;  %v135_v21 = vsel %vm103_vm11, %v87_v8, %v119_v16  ;;  %v67_v22 = vmul.f32 %v288_v14, %v370_v1 }
  0x18   :  { %340 = vst [vmem:[%s458_s3 + $0x20] sm:$0xff] %v313_v15   ;;  %v318_v23 = vpack.c.bf16 %v135_v21, %v134_v17  ;;  %vm105_vm13 = vcmp.ge.f32.partialorder %v89_v18, 0.0  ;;  %v121_v24 = vmul.f32 0.2, %v89_v18 }
  0x19   :  { %v136_v25 = vsel %vm104_vm12, %v88_v13, %v120_v19  ;;  %v68_v26 = vmul.f32 %v289_v20, %v370_v1  ;;  %v90_v27 = vadd.f32 %v384_v7, %v67_v22 }
  0x1a   :  { %341 = vst [vmem:[%s458_s3 + $0x28] sm:$0xff] %v318_v23   ;;  %v137_v28 = vsel %vm105_vm13, %v89_v18, %v121_v24 }
  0x1b   :  { %v323_v29 = vpack.c.bf16 %v137_v28, %v136_v25  ;;  %v91_v30 = vadd.f32 %v384_v7, %v68_v26  ;;  %vm106_vm14 = vcmp.ge.f32.partialorder %v90_v27, 0.0  ;;  %v122_v31 = vmul.f32 0.2, %v90_v27 }
  0x1d   :  { %342 = vst [vmem:[%s458_s3 + $0x30] sm:$0xff] %v323_v29   ;;  %vm107_vm15 = vcmp.ge.f32.partialorder %v91_v30, 0.0  ;;  %v123_v32 = vmul.f32 0.2, %v91_v30  ;;  %v138_v33 = vsel %vm106_vm14, %v90_v27, %v122_v31 }
  0x1f   :  { %v139_v1 = vsel %vm107_vm15, %v91_v30, %v123_v32 }
  0x20   :  { %v328_v34 = vpack.c.bf16 %v139_v1, %v138_v33 }
  0x22   :  { %343 = vst [vmem:[%s458_s3 + $0x38] sm:$0xff] %v328_v34  }

// kernel: _lambda_.17
= control target key start
LH: loop header
LB: loop body
LE: loop exit
PB: predicated region body
PF: predicated region fallthrough
CT: control target
= control target key end

     0   :  { %vm572_vm0 = vcmask 1040384   ;;  %s981_s1 = inlined_call_operand.vmem [shape: bf16[256,128], index: 1, kind: input, shape index: {}]   ;;  %s982_s0 = inlined_call_operand.vmem [shape: bf16[128,256], index: 0, kind: input, shape index: {}]   ;;  %s983_s2 = inlined_call_operand.vmem [shape: bf16[128,128], index: 2, kind: output, shape index: {0}]   ;;  %s984_s3 = inlined_call_operand.vmem [shape: f32[1,2,128], index: 3, kind: output, shape index: {1}]  }
   0x1   :  { %v774_v0 = vld [vmem:[%s981_s1 + $0x78] sm:$0xff]   ;;  %v776_v2 = vld [vmem:[%s981_s1 + $0x70] sm:$0xff]   ;;  %v778_v4 = vld [vmem:[%s981_s1 + $0x68] sm:$0xff]  }
   0x2   :  { %v775_v1 = vld [vmem:[%s981_s1 + $0x38] sm:$0xff]   ;;  %694 = vmatprep.subr.bf16.mxu0 %v774_v0  ;;  %758 = vmatprep.subr.bf16.mxu1 %v774_v0  ;;  %v777_v3 = vld [vmem:[%s981_s1 + $0x30] sm:$0xff]   ;;  %v779_v5 = vld [vmem:[%s981_s1 + $0x28] sm:$0xff]  }
   0x3   :  { %695 = vmatpush3.bf16.msra.mxu0 %v775_v1  ;;  %766 = vmatpush3.bf16.msra.mxu1 %v775_v1  ;;  %v780_v6 = vld [vmem:[%s981_s1 + $0x60] sm:$0xff]   ;;  %v782_v8 = vld [vmem:[%s981_s1 + $0x58] sm:$0xff]   ;;  %v784_v10 = vld [vmem:[%s981_s1 + $0x50] sm:$0xff]  }
   0x4   :  { %696 = vmatprep.subr.bf16.mxu0 %v776_v2  ;;  %759 = vmatprep.subr.bf16.mxu1 %v776_v2  ;;  %v781_v7 = vld [vmem:[%s981_s1 + $0x20] sm:$0xff]   ;;  %v783_v9 = vld [vmem:[%s981_s1 + $0x18] sm:$0xff]   ;;  %v785_v12 = vld [vmem:[%s981_s1 + $0x10] sm:$0xff]  }
   0x5   :  { %v792_v11 = vld [vmem:[%s982_s0 + $0x4] ss:$8 sps:$4 sm:$0xff]   ;;  %v790_v18 = vld [vmem:[%s982_s0] ss:$8 sps:$4 sm:$0xff]   ;;  %v793_v20 = vld [vmem:[%s982_s0 + $0x14] ss:$8 sps:$4 sm:$0xff]  }
   0x6   :  { %v798_v13 = vld [vmem:[%s982_s0 + $0x44] ss:$8 sps:$4 sm:$0xff]   ;;  %270 = vmatprep.mubr.bf16.mxu0 %v792_v11  ;;  %v796_v19 = vld [vmem:[%s982_s0 + $0x40] ss:$8 sps:$4 sm:$0xff]   ;;  %v802_v21 = vld [vmem:[%s982_s0 + $0x54] ss:$8 sps:$4 sm:$0xff]  }
   0x7   :  { %697 = vmatpush3.bf16.msra.mxu0 %v777_v3  ;;  %767 = vmatpush3.bf16.msra.mxu1 %v777_v3  ;;  %v786_v14 = vld [vmem:[%s981_s1 + $0x48] sm:$0xff]   ;;  %v788_v16 = vld [vmem:[%s981_s1 + $0x40] sm:$0xff]   ;;  %v795_v22 = vld [vmem:[%s982_s0 + $0x10] ss:$8 sps:$4 sm:$0xff]  }
   0x8   :  { %698 = vmatprep.subr.bf16.mxu0 %v778_v4  ;;  %760 = vmatprep.subr.bf16.mxu1 %v778_v4  ;;  %v787_v15 = vld [vmem:[%s981_s1 + $0x8] sm:$0xff]   ;;  %v789_v17 = vld [vmem:[%s981_s1] sm:$0xff]   ;;  %v804_v23 = vld [vmem:[%s982_s0 + $0x50] ss:$8 sps:$4 sm:$0xff]  }
   0x9   :  { %302 = vmatprep.mubr.bf16.mxu1 %v798_v13  ;;  %v799_v24 = vld [vmem:[%s982_s0 + $0x24] ss:$8 sps:$4 sm:$0xff]   ;;  %v801_v26 = vld [vmem:[%s982_s0 + $0x20] ss:$8 sps:$4 sm:$0xff]   ;;  %v805_v28 = vld [vmem:[%s982_s0 + $0x34] ss:$8 sps:$4 sm:$0xff]  }
   0xa   :  { %v808_v25 = vld [vmem:[%s982_s0 + $0x64] ss:$8 sps:$4 sm:$0xff]   ;;  %v810_v27 = vld [vmem:[%s982_s0 + $0x60] ss:$8 sps:$4 sm:$0xff]   ;;  %v811_v29 = vld [vmem:[%s982_s0 + $0x74] ss:$8 sps:$4 sm:$0xff]  }
   0xb   :  { %699 = vmatpush3.bf16.msra.mxu0 %v779_v5  ;;  %768 = vmatpush3.bf16.msra.mxu1 %v779_v5  ;;  %v807_v30 = vld [vmem:[%s982_s0 + $0x30] ss:$8 sps:$4 sm:$0xff]  }
   0xc   :  { %700 = vmatprep.subr.bf16.mxu0 %v780_v6  ;;  %761 = vmatprep.subr.bf16.mxu1 %v780_v6  ;;  %v813_v31 = vld [vmem:[%s982_s0 + $0x70] ss:$8 sps:$4 sm:$0xff]  }
   0xf   :  { %701 = vmatpush3.bf16.msra.mxu0 %v781_v7  ;;  %769 = vmatpush3.bf16.msra.mxu1 %v781_v7 }
  0x10   :  { %702 = vmatprep.subr.bf16.mxu0 %v782_v8  ;;  %762 = vmatprep.subr.bf16.mxu1 %v782_v8 }
  0x13   :  { %703 = vmatpush3.bf16.msra.mxu0 %v783_v9  ;;  %770 = vmatpush3.bf16.msra.mxu1 %v783_v9 }
  0x14   :  { %704 = vmatprep.subr.bf16.mxu0 %v784_v10  ;;  %763 = vmatprep.subr.bf16.mxu1 %v784_v10 }
  0x17   :  { %705 = vmatpush3.bf16.msra.mxu0 %v785_v12  ;;  %771 = vmatpush3.bf16.msra.mxu1 %v785_v12 }
  0x18   :  { %706 = vmatprep.subr.bf16.mxu0 %v786_v14  ;;  %764 = vmatprep.subr.bf16.mxu1 %v786_v14 }
  0x1b   :  { %707 = vmatpush3.bf16.msra.mxu0 %v787_v15  ;;  %772 = vmatpush3.bf16.msra.mxu1 %v787_v15 }
  0x1c   :  { %708 = vmatprep.subr.bf16.mxu0 %v788_v16  ;;  %765 = vmatprep.subr.bf16.mxu1 %v788_v16 }
  0x1f   :  { %709 = vmatpush3.bf16.msra.mxu0 %v789_v17  ;;  %773 = vmatpush3.bf16.msra.mxu1 %v789_v17 }
  0x22   :  { %271 = vmatmul.mubr.bf16.vlgmr.msra.gmra.mxu0 %v790_v18  ;;  %303 = vmatmul.mubr.bf16.vlgmr.msra.gmra.mxu1 %v796_v19 }
  0x23   :  { %278 = vmatprep.mubr.bf16.mxu0 %v793_v20  ;;  %310 = vmatprep.mubr.bf16.mxu1 %v802_v21 }
  0x2a   :  { %279 = vmatmul.mubr.bf16.gmra.mxu0 %v795_v22  ;;  %311 = vmatmul.mubr.bf16.gmra.mxu1 %v804_v23 }
  0x2b   :  { %286 = vmatprep.mubr.bf16.mxu0 %v799_v24  ;;  %318 = vmatprep.mubr.bf16.mxu1 %v808_v25 }
  0x32   :  { %287 = vmatmul.mubr.bf16.gmra.mxu0 %v801_v26  ;;  %319 = vmatmul.mubr.bf16.gmra.mxu1 %v810_v27 }
  0x33   :  { %294 = vmatprep.mubr.bf16.mxu0 %v805_v28  ;;  %326 = vmatprep.mubr.bf16.mxu1 %v811_v29 }
  0x3a   :  { %295 = vmatmul.mubr.bf16.gmra.mxu0 %v807_v30  ;;  %327 = vmatmul.mubr.bf16.gmra.mxu1 %v813_v31 }
  0xe2   :  { %v710_v32 = vpop.f32.mrf.mxu0  ;;  %v734_v33 = vpop.f32.mrf.mxu1 }
  0xe4   :  { %v711_v34 = vpop.f32.mrf.mxu0  ;;  %v735_v35 = vpop.f32.mrf.mxu1 }
  0xe5   :  { %v930_v38 = vadd.f32 %v735_v35, %v734_v33  ;;  %v712_v41 = vadd.f32 %v711_v34, %v710_v32 }
  0xe6   :  { %v713_v36 = vpop.f32.mrf.mxu0  ;;  %v737_v37 = vpop.f32.mrf.mxu1 }
  0xe7   :  { %v535_v1 = vmul.f32 %v712_v41, %v712_v41 }
  0xe8   :  { %v714_v39 = vpop.f32.mrf.mxu0  ;;  %v738_v40 = vpop.f32.mrf.mxu1 }
  0xe9   :  { %v715_v42 = vadd.f32 %v714_v39, %v713_v36  ;;  %v932_v43 = vadd.f32 %v738_v40, %v737_v37 }
  0xea   :  { %v716_v44 = vpop.f32.mrf.mxu0  ;;  %v740_v45 = vpop.f32.mrf.mxu1 }
  0xeb   :  { %v650_v46 = vpack.c.bf16 %v715_v42, %v712_v41  ;;  %v670_v47 = vpack.c.bf16 %v932_v43, %v930_v38  ;;  %v536_v62 = vmul.f32 %v715_v42, %v715_v42  ;;  %v514_v6 = vadd.f32 %v715_v42, %v712_v41 }
  0xec   :  { %v717_v48 = vpop.f32.mrf.mxu0  ;;  %v741_v49 = vpop.f32.mrf.mxu1 }
  0xed   :  { %651 = vst [vmem:[%s983_s2] sm:$0xff] %v650_v46   ;;  %690 = vst [vmem:[%s983_s2 + $0x20] sm:$0xff] %v670_v47   ;;  %v942_v52 = vadd.f32 %v741_v49, %v740_v45  ;;  %v718_v55 = vadd.f32 %v717_v48, %v716_v44  ;;  %v551_v8 = vadd.f32 %v536_v62, %v535_v1 }
  0xee   :  { %v719_v50 = vpop.f32.mrf.mxu0  ;;  %v743_v51 = vpop.f32.mrf.mxu1  ;;  %v543_v47 = vmul.f32 %v930_v38, %v930_v38 }
  0xef   :  { %v537_v2 = vmul.f32 %v718_v55, %v718_v55  ;;  %v515_v12 = vadd.f32 %v718_v55, %v514_v6 }
  0xf0   :  { %v720_v53 = vpop.f32.mrf.mxu0  ;;  %v744_v54 = vpop.f32.mrf.mxu1 }
  0xf1   :  { %v721_v56 = vadd.f32 %v720_v53, %v719_v50  ;;  %v944_v57 = vadd.f32 %v744_v54, %v743_v51  ;;  %v552_v15 = vadd.f32 %v551_v8, %v537_v2  ;;  %v544_v50 = vmul.f32 %v932_v43, %v932_v43 }
  0xf2   :  { %v722_v58 = vpop.f32.mrf.mxu0  ;;  %v746_v59 = vpop.f32.mrf.mxu1  ;;  %v545_v54 = vmul.f32 %v942_v52, %v942_v52 }
  0xf3   :  { %v655_v60 = vpack.c.bf16 %v721_v56, %v718_v55  ;;  %v675_v61 = vpack.c.bf16 %v944_v57, %v942_v52  ;;  %v538_v9 = vmul.f32 %v721_v56, %v721_v56  ;;  %v516_v19 = vadd.f32 %v721_v56, %v515_v12 }
  0xf4   :  { %v723_v63 = vpop.f32.mrf.mxu0  ;;  %v747_v0 = vpop.f32.mrf.mxu1 }
  0xf5   :  { %687 = vst [vmem:[%s983_s2 + $0x8] sm:$0xff] %v655_v60   ;;  %691 = vst [vmem:[%s983_s2 + $0x28] sm:$0xff] %v675_v61   ;;  %v724_v3 = vadd.f32 %v723_v63, %v722_v58  ;;  %v748_v7 = vadd.f32 %v747_v0, %v746_v59  ;;  %v553_v22 = vadd.f32 %v552_v15, %v538_v9 }
  0xf6   :  { %v725_v4 = vpop.f32.mrf.mxu0  ;;  %v749_v5 = vpop.f32.mrf.mxu1 }
  0xf7   :  { %v539_v16 = vmul.f32 %v724_v3, %v724_v3  ;;  %v517_v26 = vadd.f32 %v724_v3, %v516_v19  ;;  %v547_v60 = vmul.f32 %v748_v7, %v748_v7 }
  0xf8   :  { %v726_v10 = vpop.f32.mrf.mxu0  ;;  %v750_v11 = vpop.f32.mrf.mxu1 }
  0xf9   :  { %v727_v13 = vadd.f32 %v726_v10, %v725_v4  ;;  %v751_v14 = vadd.f32 %v750_v11, %v749_v5  ;;  %v554_v28 = vadd.f32 %v553_v22, %v539_v16 }
  0xfa   :  { %v728_v17 = vpop.f32.mrf.mxu0  ;;  %v752_v18 = vpop.f32.mrf.mxu1 }
  0xfb   :  { %v660_v20 = vpack.c.bf16 %v727_v13, %v724_v3  ;;  %v680_v21 = vpack.c.bf16 %v751_v14, %v748_v7  ;;  %v540_v23 = vmul.f32 %v727_v13, %v727_v13  ;;  %v518_v31 = vadd.f32 %v727_v13, %v517_v26 }
  0xfc   :  { %v729_v24 = vpop.f32.mrf.mxu0  ;;  %v753_v25 = vpop.f32.mrf.mxu1  ;;  %v548_v0 = vmul.f32 %v751_v14, %v751_v14 }
  0xfd   :  { %688 = vst [vmem:[%s983_s2 + $0x10] sm:$0xff] %v660_v20   ;;  %v730_v27 = vadd.f32 %v729_v24, %v728_v17  ;;  %692 = vst [vmem:[%s983_s2 + $0x30] sm:$0xff] %v680_v21   ;;  %v754_v33 = vadd.f32 %v753_v25, %v752_v18  ;;  %v555_v34 = vadd.f32 %v554_v28, %v540_v23 }
  0xfe   :  { %v731_v29 = vpop.f32.mrf.mxu0  ;;  %v755_v30 = vpop.f32.mrf.mxu1 }
  0xff   :  { %v541_v32 = vmul.f32 %v730_v27, %v730_v27  ;;  %v519_v37 = vadd.f32 %v730_v27, %v518_v31  ;;  %v549_v3 = vmul.f32 %v754_v33, %v754_v33 }
 0x100   :  { %v732_v35 = vpop.f32.mrf.mxu0  ;;  %v756_v36 = vpop.f32.mrf.mxu1 }
 0x101   :  { %v733_v39 = vadd.f32 %v732_v35, %v731_v29  ;;  %v757_v40 = vadd.f32 %v756_v36, %v755_v30  ;;  %v556_v41 = vadd.f32 %v555_v34, %v541_v32 }
 0x103   :  { %v665_v42 = vpack.c.bf16 %v733_v39, %v730_v27  ;;  %v520_v44 = vadd.f32 %v733_v39, %v519_v37  ;;  %v542_v45 = vmul.f32 %v733_v39, %v733_v39  ;;  %v685_v46 = vpack.c.bf16 %v757_v40, %v754_v33 }
 0x104   :  { %v550_v6 = vmul.f32 %v757_v40, %v757_v40 }
 0x105   :  { %689 = vst [vmem:[%s983_s2 + $0x18] sm:$0xff] %v665_v42   ;;  %v521_v48 = vadd.f32 %v930_v38, %v520_v44  ;;  %v557_v49 = vadd.f32 %v556_v41, %v542_v45  ;;  %693 = vst [vmem:[%s983_s2 + $0x38] sm:$0xff] %v685_v46   ;;  %v546_v38 = vmul.f32 %v944_v57, %v944_v57 }
 0x107   :  { %v522_v51 = vadd.f32 %v932_v43, %v521_v48  ;;  %v558_v53 = vadd.f32 %v557_v49, %v543_v47 }
 0x109   :  { %v559_v55 = vadd.f32 %v558_v53, %v544_v50  ;;  %v523_v56 = vadd.f32 %v942_v52, %v522_v51 }
 0x10b   :  { %v524_v58 = vadd.f32 %v944_v57, %v523_v56  ;;  %v560_v59 = vadd.f32 %v559_v55, %v545_v54 }
 0x10d   :  { %v525_v61 = vadd.f32 %v748_v7, %v524_v58  ;;  %v561_v62 = vadd.f32 %v560_v59, %v546_v38 }
 0x10f   :  { %v526_v63 = vadd.f32 %v751_v14, %v525_v61  ;;  %v562_v1 = vadd.f32 %v561_v62, %v547_v60 }
 0x111   :  { %v563_v43 = vadd.f32 %v562_v1, %v548_v0  ;;  %v527_v2 = vadd.f32 %v754_v33, %v526_v63 }
 0x113   :  { %v564_v4 = vadd.f32 %v563_v43, %v549_v3  ;;  %v528_v5 = vadd.f32 %v757_v40, %v527_v2 }
 0x115   :  { %v529_v8 = vrot.slane %v528_v5, 4  ;;  %v565_v52 = vadd.f32 %v564_v4, %v550_v6 }
 0x117   :  { %v530_v9 = vadd.f32 %v529_v8, %v528_v5  ;;  %v566_v10 = vrot.slane %v565_v52, 4 }
 0x119   :  { %v531_v11 = vrot.slane %v530_v9, 2  ;;  %v567_v12 = vadd.f32 %v566_v10, %v565_v52 }
 0x11b   :  { %v532_v57 = vadd.f32 %v531_v11, %v530_v9  ;;  %v568_v13 = vrot.slane %v567_v12, 2 }
 0x11d   :  { %v533_v15 = vrot.slane %v532_v57, 1  ;;  %v569_v7 = vadd.f32 %v568_v13, %v567_v12 }
 0x11f   :  { %v570_v16 = vrot.slane %v569_v7, 1  ;;  %v534_v14 = vadd.f32 %v533_v15, %v532_v57 }
 0x121   :  { %v571_v17 = vadd.f32 %v570_v16, %v569_v7 }
 0x123   :  { %v573_v18 = vsel %vm572_vm0, %v534_v14, %v571_v17 }
 0x124   :  { %574 = vst [vmem:[%s984_s3] sm:$0x3] %v573_v18 }

// kernel: _lambda_.20
= control target key start
LH: loop header
LB: loop body
LE: loop exit
PB: predicated region body
PF: predicated region fallthrough
CT: control target
= control target key end

     0   :  { %s148_s0 = inlined_call_operand.vmem [shape: bf16[32,128], index: 0, kind: input, shape index: {}]   ;;  %s149_s1 = inlined_call_operand.vmem [shape: f32[1,128], index: 1, kind: input, shape index: {}]   ;;  %s150_s2 = inlined_call_operand.vmem [shape: f32[1,128], index: 2, kind: input, shape index: {}]   ;;  %s151_s3 = inlined_call_operand.vmem [shape: bf16[32,128], index: 3, kind: output, shape index: {}]  }
   0x1   :  { %v91_v0 = vld [vmem:[%s148_s0] sm:$0xff]   ;;  %v108_v4 = vld [vmem:[%s148_s0 + $0x8] sm:$0xff]  }
   0x2   :  { %v80_v1 = vld [vmem:[%s149_s1] ss:$0 sm:$0xff]  ;;  %v92_v2 = vunpack.c.l.bf16 %v91_v0  ;;  %v93_v3 = vunpack.c.h.bf16 %v91_v0  ;;  %v96_v6 = vunpack.c.l.bf16 %v108_v4  ;;  %v97_v7 = vunpack.c.h.bf16 %v108_v4 }
   0x3   :  { %v81_v5 = vld [vmem:[%s150_s2] ss:$0 sm:$0xff] }
   0x4   :  { %v29_v8 = vmul.f32 %v92_v2, %v80_v1  ;;  %v30_v9 = vmul.f32 %v93_v3, %v80_v1  ;;  %v31_v10 = vmul.f32 %v96_v6, %v80_v1  ;;  %v32_v11 = vmul.f32 %v97_v7, %v80_v1 }
   0x6   :  { %v40_v12 = vadd.f32 %v81_v5, %v29_v8  ;;  %v41_v13 = vadd.f32 %v81_v5, %v30_v9  ;;  %v42_v14 = vadd.f32 %v81_v5, %v31_v10  ;;  %v43_v15 = vadd.f32 %v81_v5, %v32_v11 }
   0x8   :  { %vm44_vm0 = vcmp.ge.f32.partialorder %v40_v12, 0.0  ;;  %vm45_vm1 = vcmp.ge.f32.partialorder %v41_v13, 0.0  ;;  %v48_v16 = vmul.f32 0.2, %v40_v12  ;;  %v49_v17 = vmul.f32 0.2, %v41_v13 }
   0x9   :  { %vm46_vm2 = vcmp.ge.f32.partialorder %v42_v14, 0.0  ;;  %vm47_vm3 = vcmp.ge.f32.partialorder %v43_v15, 0.0  ;;  %v50_v18 = vmul.f32 0.2, %v42_v14  ;;  %v51_v19 = vmul.f32 0.2, %v43_v15 }
   0xa   :  { %v52_v20 = vsel %vm44_vm0, %v40_v12, %v48_v16  ;;  %v53_v21 = vsel %vm45_vm1, %v41_v13, %v49_v17 }
   0xb   :  { %v101_v22 = vpack.c.bf16 %v53_v21, %v52_v20  ;;  %v54_v23 = vsel %vm46_vm2, %v42_v14, %v50_v18  ;;  %v55_v24 = vsel %vm47_vm3, %v43_v15, %v51_v19 }
   0xc   :  { %v106_v25 = vpack.c.bf16 %v55_v24, %v54_v23 }
   0xd   :  { %102 = vst [vmem:[%s151_s3] sm:$0xff] %v101_v22  }
   0xe   :  { %109 = vst [vmem:[%s151_s3 + $0x8] sm:$0xff] %v106_v25  }

// kernel: _lambda_.19
= control target key start
LH: loop header
LB: loop body
LE: loop exit
PB: predicated region body
PF: predicated region fallthrough
CT: control target
= control target key end

     0   :  { %vm485_vm0 = vcmask 1040384   ;;  %s804_s1 = inlined_call_operand.vmem [shape: bf16[512,128], index: 1, kind: input, shape index: {}]   ;;  %s805_s0 = inlined_call_operand.vmem [shape: bf16[32,512], index: 0, kind: input, shape index: {}]   ;;  %s806_s2 = inlined_call_operand.vmem [shape: bf16[32,128], index: 2, kind: output, shape index: {0}]   ;;  %s807_s3 = inlined_call_operand.vmem [shape: f32[1,2,128], index: 3, kind: output, shape index: {1}]  }
   0x1   :  { %v611_v0 = vld [vmem:[%s804_s1 + $0x78] sm:$0xff]   ;;  %v615_v4 = vld [vmem:[%s804_s1 + $0x70] sm:$0xff]   ;;  %v619_v8 = vld [vmem:[%s804_s1 + $0x68] sm:$0xff]  }
   0x2   :  { %v612_v1 = vld [vmem:[%s804_s1 + $0xf8] sm:$0xff]   ;;  %555 = vmatprep.subr.bf16.mxu0 %v611_v0  ;;  %v616_v5 = vld [vmem:[%s804_s1 + $0xf0] sm:$0xff]   ;;  %v620_v9 = vld [vmem:[%s804_s1 + $0xe8] sm:$0xff]  }
   0x3   :  { %v613_v2 = vld [vmem:[%s804_s1 + $0x38] sm:$0xff]   ;;  %583 = vmatprep.subr.bf16.mxu1 %v612_v1  ;;  %v617_v6 = vld [vmem:[%s804_s1 + $0x30] sm:$0xff]   ;;  %v621_v10 = vld [vmem:[%s804_s1 + $0x28] sm:$0xff]  }
   0x4   :  { %v614_v3 = vld [vmem:[%s804_s1 + $0xb8] sm:$0xff]   ;;  %556 = vmatpush3.bf16.msra.mxu0 %v613_v2  ;;  %v618_v7 = vld [vmem:[%s804_s1 + $0xb0] sm:$0xff]   ;;  %v622_v11 = vld [vmem:[%s804_s1 + $0xa8] sm:$0xff]  }
   0x5   :  { %584 = vmatpush3.bf16.msra.mxu1 %v614_v3  ;;  %557 = vmatprep.subr.bf16.mxu0 %v615_v4  ;;  %v623_v12 = vld [vmem:[%s804_s1 + $0x60] sm:$0xff]   ;;  %v627_v16 = vld [vmem:[%s804_s1 + $0x58] sm:$0xff]   ;;  %v631_v20 = vld [vmem:[%s804_s1 + $0x50] sm:$0xff]  }
   0x6   :  { %585 = vmatprep.subr.bf16.mxu1 %v616_v5  ;;  %v624_v13 = vld [vmem:[%s804_s1 + $0xe0] sm:$0xff]   ;;  %v628_v17 = vld [vmem:[%s804_s1 + $0xd8] sm:$0xff]   ;;  %v632_v21 = vld [vmem:[%s804_s1 + $0xd0] sm:$0xff]  }
   0x7   :  { %v625_v14 = vld [vmem:[%s804_s1 + $0x20] sm:$0xff]   ;;  %v629_v18 = vld [vmem:[%s804_s1 + $0x18] sm:$0xff]   ;;  %v633_v22 = vld [vmem:[%s804_s1 + $0x10] sm:$0xff]  }
   0x8   :  { %558 = vmatpush3.bf16.msra.mxu0 %v617_v6  ;;  %v626_v15 = vld [vmem:[%s804_s1 + $0xa0] sm:$0xff]   ;;  %v630_v19 = vld [vmem:[%s804_s1 + $0x98] sm:$0xff]   ;;  %v634_v23 = vld [vmem:[%s804_s1 + $0x90] sm:$0xff]  }
   0x9   :  { %586 = vmatpush3.bf16.msra.mxu1 %v618_v7  ;;  %559 = vmatprep.subr.bf16.mxu0 %v619_v8  ;;  %v635_v24 = vld [vmem:[%s804_s1 + $0x48] sm:$0xff]   ;;  %v639_v28 = vld [vmem:[%s804_s1 + $0x40] sm:$0xff]  }
   0xa   :  { %587 = vmatprep.subr.bf16.mxu1 %v620_v9  ;;  %v636_v25 = vld [vmem:[%s804_s1 + $0xc8] sm:$0xff]   ;;  %v640_v29 = vld [vmem:[%s804_s1 + $0xc0] sm:$0xff]  }
   0xb   :  { %v637_v26 = vld [vmem:[%s804_s1 + $0x8] sm:$0xff]   ;;  %v641_v30 = vld [vmem:[%s804_s1] sm:$0xff]  }
   0xc   :  { %560 = vmatpush3.bf16.msra.mxu0 %v621_v10  ;;  %v638_v27 = vld [vmem:[%s804_s1 + $0x88] sm:$0xff]   ;;  %v642_v31 = vld [vmem:[%s804_s1 + $0x80] sm:$0xff]  }
   0xd   :  { %588 = vmatpush3.bf16.msra.mxu1 %v622_v11  ;;  %561 = vmatprep.subr.bf16.mxu0 %v623_v12  ;;  %v643_v32 = vld [vmem:[%s805_s0] ss:$16 sps:$4 sm:$0xff]   ;;  %v645_v33 = vld [vmem:[%s805_s0 + $0x4] ss:$16 sps:$4 sm:$0xff]   ;;  %v646_v34 = vld [vmem:[%s805_s0 + $0x8] ss:$16 sps:$4 sm:$0xff]  }
   0xe   :  { %589 = vmatprep.subr.bf16.mxu1 %v624_v13  ;;  %v648_v35 = vld [vmem:[%s805_s0 + $0xc] ss:$16 sps:$4 sm:$0xff]   ;;  %350 = vmatprep.mubr.bf16.mxu0 %v645_v33  ;;  %v649_v36 = vld [vmem:[%s805_s0 + $0x24] ss:$16 sps:$4 sm:$0xff]   ;;  %v653_v38 = vld [vmem:[%s805_s0 + $0x20] ss:$16 sps:$4 sm:$0xff]  }
   0xf   :  { %399 = vmatprep.mubr.bf16.mxu1 %v648_v35  ;;  %v651_v37 = vld [vmem:[%s805_s0 + $0x2c] ss:$16 sps:$4 sm:$0xff]   ;;  %v654_v39 = vld [vmem:[%s805_s0 + $0x28] ss:$16 sps:$4 sm:$0xff]  }
  0x10   :  { %562 = vmatpush3.bf16.msra.mxu0 %v625_v14 }
  0x11   :  { %590 = vmatpush3.bf16.msra.mxu1 %v626_v15  ;;  %563 = vmatprep.subr.bf16.mxu0 %v627_v16 }
  0x12   :  { %591 = vmatprep.subr.bf16.mxu1 %v628_v17 }
  0x14   :  { %564 = vmatpush3.bf16.msra.mxu0 %v629_v18 }
  0x15   :  { %592 = vmatpush3.bf16.msra.mxu1 %v630_v19  ;;  %565 = vmatprep.subr.bf16.mxu0 %v631_v20 }
  0x16   :  { %593 = vmatprep.subr.bf16.mxu1 %v632_v21 }
  0x18   :  { %566 = vmatpush3.bf16.msra.mxu0 %v633_v22 }
  0x19   :  { %594 = vmatpush3.bf16.msra.mxu1 %v634_v23  ;;  %567 = vmatprep.subr.bf16.mxu0 %v635_v24 }
  0x1a   :  { %595 = vmatprep.subr.bf16.mxu1 %v636_v25 }
  0x1c   :  { %568 = vmatpush3.bf16.msra.mxu0 %v637_v26 }
  0x1d   :  { %596 = vmatpush3.bf16.msra.mxu1 %v638_v27  ;;  %569 = vmatprep.subr.bf16.mxu0 %v639_v28 }
  0x1e   :  { %597 = vmatprep.subr.bf16.mxu1 %v640_v29 }
  0x20   :  { %570 = vmatpush3.bf16.msra.mxu0 %v641_v30 }
  0x21   :  { %598 = vmatpush3.bf16.msra.mxu1 %v642_v31 }
  0x23   :  { %351 = vmatmul.mubr.bf16.vlgmr.msra.gmra.mxu0 %v643_v32 }
  0x24   :  { %400 = vmatmul.mubr.bf16.vlgmr.msra.gmra.mxu1 %v646_v34  ;;  %358 = vmatprep.mubr.bf16.mxu0 %v649_v36 }
  0x25   :  { %407 = vmatprep.mubr.bf16.mxu1 %v651_v37 }
  0x2b   :  { %359 = vmatmul.mubr.bf16.gmra.mxu0 %v653_v38 }
  0x2c   :  { %408 = vmatmul.mubr.bf16.gmra.mxu1 %v654_v39 }
  0xe3   :  { %v571_v40 = vpop.f32.mrf.mxu0 }
  0xe4   :  { %v599_v41 = vpop.f32.mrf.mxu1 }
  0xe5   :  { %v572_v42 = vpop.f32.mrf.mxu0 }
  0xe6   :  { %v600_v43 = vpop.f32.mrf.mxu1  ;;  %v573_v46 = vadd.f32 %v572_v42, %v571_v40 }
  0xe7   :  { %v574_v44 = vpop.f32.mrf.mxu0  ;;  %v601_v47 = vadd.f32 %v600_v43, %v599_v41 }
  0xe8   :  { %v602_v45 = vpop.f32.mrf.mxu1 }
  0xe9   :  { %v575_v48 = vpop.f32.mrf.mxu0  ;;  %v402_v54 = vadd.f32 %v601_v47, %v573_v46 }
  0xea   :  { %v576_v49 = vadd.f32 %v575_v48, %v574_v44  ;;  %v603_v50 = vpop.f32.mrf.mxu1 }
  0xeb   :  { %v604_v51 = vadd.f32 %v603_v50, %v602_v45  ;;  %v577_v52 = vpop.f32.mrf.mxu0  ;;  %v472_v4 = vmul.f32 %v402_v54, %v402_v54 }
  0xec   :  { %v605_v53 = vpop.f32.mrf.mxu1 }
  0xed   :  { %v405_v55 = vadd.f32 %v604_v51, %v576_v49  ;;  %v578_v56 = vpop.f32.mrf.mxu0 }
  0xee   :  { %v579_v57 = vadd.f32 %v578_v56, %v577_v52  ;;  %v606_v58 = vpop.f32.mrf.mxu1 }
  0xef   :  { %v547_v59 = vpack.c.bf16 %v405_v55, %v402_v54  ;;  %v607_v60 = vadd.f32 %v606_v58, %v605_v53  ;;  %v580_v61 = vpop.f32.mrf.mxu0  ;;  %v473_v63 = vmul.f32 %v405_v55, %v405_v55  ;;  %v463_v5 = vadd.f32 %v405_v55, %v402_v54 }
  0xf0   :  { %v608_v62 = vpop.f32.mrf.mxu1 }
  0xf1   :  { %548 = vst [vmem:[%s806_s2] sm:$0xff] %v547_v59   ;;  %v410_v0 = vadd.f32 %v607_v60, %v579_v57  ;;  %v581_v1 = vpop.f32.mrf.mxu0  ;;  %v476_v8 = vadd.f32 %v473_v63, %v472_v4 }
  0xf2   :  { %v582_v2 = vadd.f32 %v581_v1, %v580_v61  ;;  %v609_v3 = vpop.f32.mrf.mxu1 }
  0xf3   :  { %v474_v6 = vmul.f32 %v410_v0, %v410_v0  ;;  %v610_v7 = vadd.f32 %v609_v3, %v608_v62  ;;  %v464_v9 = vadd.f32 %v463_v5, %v410_v0 }
  0xf5   :  { %v413_v10 = vadd.f32 %v610_v7, %v582_v2  ;;  %v477_v11 = vadd.f32 %v476_v8, %v474_v6 }
  0xf7   :  { %v552_v12 = vpack.c.bf16 %v413_v10, %v410_v0  ;;  %v465_v13 = vadd.f32 %v464_v9, %v413_v10  ;;  %v475_v14 = vmul.f32 %v413_v10, %v413_v10 }
  0xf9   :  { %554 = vst [vmem:[%s806_s2 + $0x8] sm:$0xff] %v552_v12   ;;  %v466_v15 = vrot.slane %v465_v13, 4  ;;  %v478_v16 = vadd.f32 %v477_v11, %v475_v14 }
  0xfb   :  { %v467_v17 = vadd.f32 %v466_v15, %v465_v13  ;;  %v479_v18 = vrot.slane %v478_v16, 4 }
  0xfd   :  { %v468_v19 = vrot.slane %v467_v17, 2  ;;  %v480_v20 = vadd.f32 %v479_v18, %v478_v16 }
  0xff   :  { %v469_v21 = vadd.f32 %v468_v19, %v467_v17  ;;  %v481_v22 = vrot.slane %v480_v20, 2 }
 0x101   :  { %v470_v23 = vrot.slane %v469_v21, 1  ;;  %v482_v24 = vadd.f32 %v481_v22, %v480_v20 }
 0x103   :  { %v483_v25 = vrot.slane %v482_v24, 1  ;;  %v471_v26 = vadd.f32 %v470_v23, %v469_v21 }
 0x105   :  { %v484_v27 = vadd.f32 %v483_v25, %v482_v24 }
 0x107   :  { %v486_v28 = vsel %vm485_vm0, %v471_v26, %v484_v27 }
 0x108   :  { %487 = vst [vmem:[%s807_s3] sm:$0x3] %v486_v28 }

// kernel: _lambda_.22
= control target key start
LH: loop header
LB: loop body
LE: loop exit
PB: predicated region body
PF: predicated region fallthrough
CT: control target
= control target key end

     0   :  { %s75_s0 = inlined_call_operand.vmem [shape: bf16[8,128], index: 0, kind: input, shape index: {}]   ;;  %s76_s1 = inlined_call_operand.vmem [shape: f32[1,128], index: 1, kind: input, shape index: {}]   ;;  %s77_s2 = inlined_call_operand.vmem [shape: f32[1,128], index: 2, kind: input, shape index: {}]   ;;  %s78_s3 = inlined_call_operand.vmem [shape: bf16[8,128], index: 3, kind: output, shape index: {}]  }
   0x1   :  { %v14_v0 = vld [vmem:[%s75_s0] sm:$0xf] }
   0x2   :  { %v41_v1 = vld [vmem:[%s76_s1] ss:$0 sm:$0xff]  ;;  %v15_v2 = vunpack.c.l.bf16 %v14_v0 }
   0x3   :  { %v42_v3 = vld [vmem:[%s77_s2] ss:$0 sm:$0xff] }
   0x4   :  { %v23_v4 = vmul.f32 %v41_v1, %v15_v2 }
   0x6   :  { %v31_v5 = vadd.f32 %v42_v3, %v23_v4 }
   0x8   :  { %vm32_vm0 = vcmp.ge.f32.partialorder %v31_v5, 0.0  ;;  %v33_v6 = vmul.f32 0.2, %v31_v5 }
   0xa   :  { %v34_v7 = vsel %vm32_vm0, %v31_v5, %v33_v6 }
   0xb   :  { %v35_v8 = vpack.c.bf16 %v34_v7, %v34_v7 }
   0xd   :  { %36 = vst [vmem:[%s78_s3] sm:$0xf] %v35_v8 }

// kernel: _lambda_.23
= control target key start
LH: loop header
LB: loop body
LE: loop exit
PB: predicated region body
PF: predicated region fallthrough
CT: control target
= control target key end

     0   :  { %v264_v1 = vmov 0   ;;  %vm197_vm0 = vcmask 1040384   ;;  %s342_s1 = inlined_call_operand.vmem [shape: bf16[128,256], index: 1, kind: input, shape index: {}]   ;;  %s343_s0 = inlined_call_operand.vmem [shape: bf16[8,128], index: 0, kind: input, shape index: {}]   ;;  %s344_s2 = inlined_call_operand.vmem [shape: bf16[8,256], index: 2, kind: output, shape index: {0}]   ;;  %s345_s3 = inlined_call_operand.vmem [shape: f32[1,2,256], index: 3, kind: output, shape index: {1}]  }
   0x1   :  { %v240_v0 = vld [vmem:[%s342_s1 + $0x74] ss:$8 sps:$4 sm:$0xff]   ;;  %143 = vmatprep.mubr.bf16.mxu0 %v264_v1  ;;  %v242_v2 = vld [vmem:[%s342_s1 + $0x70] ss:$8 sps:$4 sm:$0xff]   ;;  %v243_v3 = vld [vmem:[%s342_s1 + $0x64] ss:$8 sps:$4 sm:$0xff]  }
   0x2   :  { %111 = vmatprep.subr.bf16.mxu0 %v240_v0  ;;  %v245_v4 = vld [vmem:[%s342_s1 + $0x60] ss:$8 sps:$4 sm:$0xff]   ;;  %v246_v5 = vld [vmem:[%s342_s1 + $0x54] ss:$8 sps:$4 sm:$0xff]   ;;  %v248_v6 = vld [vmem:[%s342_s1 + $0x50] ss:$8 sps:$4 sm:$0xff]  }
   0x3   :  { %112 = vmatpush1.bf16.msra.mxu0 %v242_v2  ;;  %v249_v7 = vld [vmem:[%s342_s1 + $0x44] ss:$8 sps:$4 sm:$0xff]   ;;  %v251_v8 = vld [vmem:[%s342_s1 + $0x40] ss:$8 sps:$4 sm:$0xff]   ;;  %v252_v9 = vld [vmem:[%s342_s1 + $0x34] ss:$8 sps:$4 sm:$0xff]  }
   0x4   :  { %113 = vmatprep.subr.bf16.mxu0 %v243_v3  ;;  %v254_v10 = vld [vmem:[%s342_s1 + $0x30] ss:$8 sps:$4 sm:$0xff]   ;;  %v255_v11 = vld [vmem:[%s342_s1 + $0x24] ss:$8 sps:$4 sm:$0xff]   ;;  %v257_v12 = vld [vmem:[%s342_s1 + $0x20] ss:$8 sps:$4 sm:$0xff]  }
   0x5   :  { %v258_v13 = vld [vmem:[%s342_s1 + $0x14] ss:$8 sps:$4 sm:$0xff]   ;;  %v260_v14 = vld [vmem:[%s342_s1 + $0x10] ss:$8 sps:$4 sm:$0xff]   ;;  %v261_v15 = vld [vmem:[%s342_s1 + $0x4] ss:$8 sps:$4 sm:$0xff]  }
   0x6   :  { %v263_v16 = vld [vmem:[%s342_s1] ss:$8 sps:$4 sm:$0xff]  }
   0x7   :  { %114 = vmatpush1.bf16.msra.mxu0 %v245_v4  ;;  %v14_v17 = vld [vmem:[%s343_s0] sm:$0xf] }
   0x8   :  { %115 = vmatprep.subr.bf16.mxu0 %v246_v5 }
   0xb   :  { %116 = vmatpush1.bf16.msra.mxu0 %v248_v6 }
   0xc   :  { %117 = vmatprep.subr.bf16.mxu0 %v249_v7 }
   0xf   :  { %118 = vmatpush1.bf16.msra.mxu0 %v251_v8 }
  0x10   :  { %119 = vmatprep.subr.bf16.mxu0 %v252_v9 }
  0x13   :  { %120 = vmatpush1.bf16.msra.mxu0 %v254_v10 }
  0x14   :  { %121 = vmatprep.subr.bf16.mxu0 %v255_v11 }
  0x17   :  { %122 = vmatpush1.bf16.msra.mxu0 %v257_v12 }
  0x18   :  { %123 = vmatprep.subr.bf16.mxu0 %v258_v13 }
  0x1b   :  { %124 = vmatpush1.bf16.msra.mxu0 %v260_v14 }
  0x1c   :  { %125 = vmatprep.subr.bf16.mxu0 %v261_v15 }
  0x1f   :  { %126 = vmatpush1.bf16.msra.mxu0 %v263_v16 }
  0x22   :  { %144 = vmatmul.mubr.bf16.vlgmr.msra.gmra.mxu0 %v14_v17 }
  0xe2   :  { %v145_v18 = vpop.f32.mrf.mxu0 }
  0xe3   :  { %v171_v19 = vrot.slane %v145_v18, 4  ;;  %v183_v20 = vmul.f32 %v145_v18, %v145_v18 }
  0xe4   :  { %v147_v21 = vpop.f32.mrf.mxu0 }
  0xe5   :  { %v172_v22 = vadd.f32 %v171_v19, %v145_v18  ;;  %v185_v23 = vrot.slane %v183_v20, 4  ;;  %v238_v24 = vpack.c.bf16 %v147_v21, %v145_v18  ;;  %v177_v25 = vrot.slane %v147_v21, 4 }
  0xe6   :  { %v184_v26 = vmul.f32 %v147_v21, %v147_v21  ;;  %v149_v27 = vpop.f32.mrf.mxu0 }
  0xe7   :  { %v173_v28 = vrot.slane %v172_v22, 2  ;;  %v186_v29 = vadd.f32 %v185_v23, %v183_v20  ;;  %160 = vst [vmem:[%s344_s2] sm:$0xff] %v238_v24  ;;  %v178_v30 = vadd.f32 %v177_v25, %v147_v21 }
  0xe8   :  { %v191_v31 = vrot.slane %v184_v26, 4  ;;  %v150_v32 = vpop.f32.mrf.mxu0 }
  0xe9   :  { %v187_v33 = vrot.slane %v186_v29, 2  ;;  %v179_v34 = vrot.slane %v178_v30, 2  ;;  %v174_v35 = vadd.f32 %v173_v28, %v172_v22 }
  0xea   :  { %v192_v36 = vadd.f32 %v191_v31, %v184_v26 }
  0xeb   :  { %v188_v37 = vadd.f32 %v187_v33, %v186_v29  ;;  %v180_v38 = vadd.f32 %v179_v34, %v178_v30  ;;  %v175_v41 = vrot.slane %v174_v35, 1 }
  0xec   :  { %v193_v39 = vrot.slane %v192_v36, 2 }
  0xed   :  { %v189_v40 = vrot.slane %v188_v37, 1  ;;  %v181_v42 = vrot.slane %v180_v38, 1  ;;  %v176_v46 = vadd.f32 %v175_v41, %v174_v35 }
  0xee   :  { %v194_v43 = vadd.f32 %v193_v39, %v192_v36 }
  0xef   :  { %v190_v44 = vadd.f32 %v189_v40, %v188_v37  ;;  %v182_v47 = vadd.f32 %v181_v42, %v180_v38 }
  0xf0   :  { %v195_v45 = vrot.slane %v194_v43, 1 }
  0xf1   :  { %v198_v49 = vsel %vm197_vm0, %v176_v46, %v190_v44 }
  0xf2   :  { %v196_v48 = vadd.f32 %v195_v45, %v194_v43 }
  0xf4   :  { %v199_v50 = vsel %vm197_vm0, %v182_v47, %v196_v48 }
  0xf5   :  { %v202_v51 = vcombine.low %v198_v49, %v199_v50 }
  0xf7   :  { %237 = vst.sshfl [vmem:[%s345_s3] sm:$0x33 pattern:$0x76325410] %v202_v51 }

// kernel: _lambda_.21
= control target key start
LH: loop header
LB: loop body
LE: loop exit
PB: predicated region body
PF: predicated region fallthrough
CT: control target
= control target key end

     0   :  { %vm742_vm0 = vcmask 1040384   ;;  %s1215_s1 = inlined_call_operand.vmem [shape: bf16[1024,128], index: 1, kind: input, shape index: {}]   ;;  %s1216_s0 = inlined_call_operand.vmem [shape: bf16[8,1024], index: 0, kind: input, shape index: {}]   ;;  %s1217_s2 = inlined_call_operand.vmem [shape: bf16[8,128], index: 2, kind: output, shape index: {0}]   ;;  %s1218_s3 = inlined_call_operand.vmem [shape: f32[1,2,128], index: 3, kind: output, shape index: {1}]  }
   0x1   :  { %v913_v0 = vld [vmem:[%s1215_s1 + $0x78] sm:$0xff]   ;;  %v917_v4 = vld [vmem:[%s1215_s1 + $0x70] sm:$0xff]   ;;  %v921_v8 = vld [vmem:[%s1215_s1 + $0x68] sm:$0xff]  }
   0x2   :  { %v914_v1 = vld [vmem:[%s1215_s1 + $0xf8] sm:$0xff]   ;;  %825 = vmatprep.subr.bf16.mxu0 %v913_v0  ;;  %v918_v5 = vld [vmem:[%s1215_s1 + $0xf0] sm:$0xff]   ;;  %v922_v9 = vld [vmem:[%s1215_s1 + $0xe8] sm:$0xff]  }
   0x3   :  { %v915_v2 = vld [vmem:[%s1215_s1 + $0x38] sm:$0xff]   ;;  %847 = vmatprep.subr.bf16.mxu1 %v914_v1  ;;  %v919_v6 = vld [vmem:[%s1215_s1 + $0x30] sm:$0xff]   ;;  %v923_v10 = vld [vmem:[%s1215_s1 + $0x28] sm:$0xff]  }
   0x4   :  { %v916_v3 = vld [vmem:[%s1215_s1 + $0xb8] sm:$0xff]   ;;  %826 = vmatpush3.bf16.msra.mxu0 %v915_v2  ;;  %v920_v7 = vld [vmem:[%s1215_s1 + $0xb0] sm:$0xff]   ;;  %v924_v11 = vld [vmem:[%s1215_s1 + $0xa8] sm:$0xff]  }
   0x5   :  { %848 = vmatpush3.bf16.msra.mxu1 %v916_v3  ;;  %827 = vmatprep.subr.bf16.mxu0 %v917_v4  ;;  %v925_v12 = vld [vmem:[%s1215_s1 + $0x60] sm:$0xff]   ;;  %v929_v16 = vld [vmem:[%s1215_s1 + $0x58] sm:$0xff]   ;;  %v933_v20 = vld [vmem:[%s1215_s1 + $0x50] sm:$0xff]  }
   0x6   :  { %849 = vmatprep.subr.bf16.mxu1 %v918_v5  ;;  %v926_v13 = vld [vmem:[%s1215_s1 + $0xe0] sm:$0xff]   ;;  %v930_v17 = vld [vmem:[%s1215_s1 + $0xd8] sm:$0xff]   ;;  %v934_v21 = vld [vmem:[%s1215_s1 + $0xd0] sm:$0xff]  }
   0x7   :  { %v927_v14 = vld [vmem:[%s1215_s1 + $0x20] sm:$0xff]   ;;  %v931_v18 = vld [vmem:[%s1215_s1 + $0x18] sm:$0xff]   ;;  %v935_v22 = vld [vmem:[%s1215_s1 + $0x10] sm:$0xff]  }
   0x8   :  { %828 = vmatpush3.bf16.msra.mxu0 %v919_v6  ;;  %v928_v15 = vld [vmem:[%s1215_s1 + $0xa0] sm:$0xff]   ;;  %v932_v19 = vld [vmem:[%s1215_s1 + $0x98] sm:$0xff]   ;;  %v936_v23 = vld [vmem:[%s1215_s1 + $0x90] sm:$0xff]  }
   0x9   :  { %850 = vmatpush3.bf16.msra.mxu1 %v920_v7  ;;  %829 = vmatprep.subr.bf16.mxu0 %v921_v8  ;;  %v937_v24 = vld [vmem:[%s1215_s1 + $0x48] sm:$0xff]   ;;  %v941_v28 = vld [vmem:[%s1215_s1 + $0x40] sm:$0xff]   ;;  %v949_v38 = vld [vmem:[%s1215_s1 + $0x178] sm:$0xff]  }
   0xa   :  { %851 = vmatprep.subr.bf16.mxu1 %v922_v9  ;;  %v938_v25 = vld [vmem:[%s1215_s1 + $0xc8] sm:$0xff]   ;;  %v942_v29 = vld [vmem:[%s1215_s1 + $0xc0] sm:$0xff]   ;;  %v950_v39 = vld [vmem:[%s1215_s1 + $0x1f8] sm:$0xff]  }
   0xb   :  { %v939_v26 = vld [vmem:[%s1215_s1 + $0x8] sm:$0xff]   ;;  %v943_v30 = vld [vmem:[%s1215_s1] sm:$0xff]   ;;  %v951_v40 = vld [vmem:[%s1215_s1 + $0x138] sm:$0xff]  }
   0xc   :  { %830 = vmatpush3.bf16.msra.mxu0 %v923_v10  ;;  %v940_v27 = vld [vmem:[%s1215_s1 + $0x88] sm:$0xff]   ;;  %v944_v31 = vld [vmem:[%s1215_s1 + $0x80] sm:$0xff]   ;;  %v952_v41 = vld [vmem:[%s1215_s1 + $0x1b8] sm:$0xff]  }
   0xd   :  { %852 = vmatpush3.bf16.msra.mxu1 %v924_v11  ;;  %831 = vmatprep.subr.bf16.mxu0 %v925_v12  ;;  %v14_v32 = vld [vmem:[%s1216_s0] sm:$0xff]  ;;  %v15_v33 = vld [vmem:[%s1216_s0 + $0x8] sm:$0xff]  ;;  %v953_v42 = vld [vmem:[%s1215_s1 + $0x170] sm:$0xff]  }
   0xe   :  { %853 = vmatprep.subr.bf16.mxu1 %v926_v13  ;;  %v753_v34 = vcombine.low %v14_v32, %v14_v32  ;;  %v754_v35 = vcombine.high %v14_v32, %v14_v32  ;;  %v755_v36 = vcombine.low %v15_v33, %v15_v33  ;;  %v756_v37 = vcombine.high %v15_v33, %v15_v33  ;;  %v954_v43 = vld [vmem:[%s1215_s1 + $0x1f0] sm:$0xff]   ;;  %v957_v46 = vld [vmem:[%s1215_s1 + $0x168] sm:$0xff]   ;;  %v961_v50 = vld [vmem:[%s1215_s1 + $0x160] sm:$0xff]  }
   0xf   :  { %v955_v44 = vld [vmem:[%s1215_s1 + $0x130] sm:$0xff]   ;;  %v958_v47 = vld [vmem:[%s1215_s1 + $0x1e8] sm:$0xff]   ;;  %v962_v51 = vld [vmem:[%s1215_s1 + $0x1e0] sm:$0xff]  }
  0x10   :  { %832 = vmatpush3.bf16.msra.mxu0 %v927_v14  ;;  %590 = vmatprep.mubr.bf16.mxu0 %v754_v35  ;;  %v956_v45 = vld [vmem:[%s1215_s1 + $0x1b0] sm:$0xff]   ;;  %v959_v48 = vld [vmem:[%s1215_s1 + $0x128] sm:$0xff]   ;;  %v963_v52 = vld [vmem:[%s1215_s1 + $0x120] sm:$0xff]  }
  0x11   :  { %854 = vmatpush3.bf16.msra.mxu1 %v928_v15  ;;  %833 = vmatprep.subr.bf16.mxu0 %v929_v16  ;;  %v960_v49 = vld [vmem:[%s1215_s1 + $0x1a8] sm:$0xff]   ;;  %v964_v53 = vld [vmem:[%s1215_s1 + $0x1a0] sm:$0xff]   ;;  %v965_v54 = vld [vmem:[%s1215_s1 + $0x158] sm:$0xff]  }
  0x12   :  { %855 = vmatprep.subr.bf16.mxu1 %v930_v17  ;;  %630 = vmatprep.mubr.bf16.mxu1 %v756_v37  ;;  %v966_v55 = vld [vmem:[%s1215_s1 + $0x1d8] sm:$0xff]   ;;  %v969_v58 = vld [vmem:[%s1215_s1 + $0x150] sm:$0xff]   ;;  %v973_v62 = vld [vmem:[%s1215_s1 + $0x148] sm:$0xff]  }
  0x13   :  { %v967_v56 = vld [vmem:[%s1215_s1 + $0x118] sm:$0xff]   ;;  %v970_v59 = vld [vmem:[%s1215_s1 + $0x1d0] sm:$0xff]   ;;  %v974_v63 = vld [vmem:[%s1215_s1 + $0x1c8] sm:$0xff]  }
  0x14   :  { %834 = vmatpush3.bf16.msra.mxu0 %v931_v18  ;;  %v968_v57 = vld [vmem:[%s1215_s1 + $0x198] sm:$0xff]   ;;  %v971_v60 = vld [vmem:[%s1215_s1 + $0x110] sm:$0xff]   ;;  %v975_v0 = vld [vmem:[%s1215_s1 + $0x108] sm:$0xff]  }
  0x15   :  { %856 = vmatpush3.bf16.msra.mxu1 %v932_v19  ;;  %835 = vmatprep.subr.bf16.mxu0 %v933_v20  ;;  %v972_v61 = vld [vmem:[%s1215_s1 + $0x190] sm:$0xff]   ;;  %v976_v1 = vld [vmem:[%s1215_s1 + $0x188] sm:$0xff]   ;;  %v977_v2 = vld [vmem:[%s1215_s1 + $0x140] sm:$0xff]  }
  0x16   :  { %857 = vmatprep.subr.bf16.mxu1 %v934_v21  ;;  %v978_v3 = vld [vmem:[%s1215_s1 + $0x1c0] sm:$0xff]   ;;  %v16_v6 = vld [vmem:[%s1216_s0 + $0x10] sm:$0xff]  ;;  %v17_v9 = vld [vmem:[%s1216_s0 + $0x18] sm:$0xff] }
  0x17   :  { %v979_v4 = vld [vmem:[%s1215_s1 + $0x100] sm:$0xff]   ;;  %v757_v7 = vcombine.low %v16_v6, %v16_v6  ;;  %v758_v8 = vcombine.high %v16_v6, %v16_v6  ;;  %v759_v10 = vcombine.low %v17_v9, %v17_v9  ;;  %v760_v11 = vcombine.high %v17_v9, %v17_v9 }
  0x18   :  { %836 = vmatpush3.bf16.msra.mxu0 %v935_v22  ;;  %v980_v5 = vld [vmem:[%s1215_s1 + $0x180] sm:$0xff]  }
  0x19   :  { %858 = vmatpush3.bf16.msra.mxu1 %v936_v23  ;;  %837 = vmatprep.subr.bf16.mxu0 %v937_v24 }
  0x1a   :  { %859 = vmatprep.subr.bf16.mxu1 %v938_v25 }
  0x1c   :  { %838 = vmatpush3.bf16.msra.mxu0 %v939_v26 }
  0x1d   :  { %860 = vmatpush3.bf16.msra.mxu1 %v940_v27  ;;  %839 = vmatprep.subr.bf16.mxu0 %v941_v28 }
  0x1e   :  { %861 = vmatprep.subr.bf16.mxu1 %v942_v29 }
  0x20   :  { %840 = vmatpush3.bf16.msra.mxu0 %v943_v30 }
  0x21   :  { %862 = vmatpush3.bf16.msra.mxu1 %v944_v31  ;;  %869 = vmatprep.subr.bf16.mxu0 %v949_v38 }
  0x22   :  { %891 = vmatprep.subr.bf16.mxu1 %v950_v39 }
  0x23   :  { %591 = vmatmul.mubr.bf16.vlgmr.msra.gmra.mxu0 %v753_v34 }
  0x24   :  { %631 = vmatmul.mubr.bf16.vlgmr.msra.gmra.mxu1 %v755_v36  ;;  %870 = vmatpush3.bf16.msra.mxu0 %v951_v40 }
  0x25   :  { %892 = vmatpush3.bf16.msra.mxu1 %v952_v41  ;;  %871 = vmatprep.subr.bf16.mxu0 %v953_v42 }
  0x26   :  { %893 = vmatprep.subr.bf16.mxu1 %v954_v43  ;;  %670 = vmatprep.mubr.bf16.mxu0 %v758_v8 }
  0x27   :  { %710 = vmatprep.mubr.bf16.mxu1 %v760_v11 }
  0x28   :  { %872 = vmatpush3.bf16.msra.mxu0 %v955_v44 }
  0x29   :  { %894 = vmatpush3.bf16.msra.mxu1 %v956_v45  ;;  %873 = vmatprep.subr.bf16.mxu0 %v957_v46 }
  0x2a   :  { %895 = vmatprep.subr.bf16.mxu1 %v958_v47 }
  0x2c   :  { %874 = vmatpush3.bf16.msra.mxu0 %v959_v48 }
  0x2d   :  { %896 = vmatpush3.bf16.msra.mxu1 %v960_v49  ;;  %875 = vmatprep.subr.bf16.mxu0 %v961_v50 }
  0x2e   :  { %897 = vmatprep.subr.bf16.mxu1 %v962_v51 }
  0x30   :  { %876 = vmatpush3.bf16.msra.mxu0 %v963_v52 }
  0x31   :  { %898 = vmatpush3.bf16.msra.mxu1 %v964_v53  ;;  %877 = vmatprep.subr.bf16.mxu0 %v965_v54 }
  0x32   :  { %899 = vmatprep.subr.bf16.mxu1 %v966_v55 }
  0x34   :  { %878 = vmatpush3.bf16.msra.mxu0 %v967_v56 }
  0x35   :  { %900 = vmatpush3.bf16.msra.mxu1 %v968_v57  ;;  %879 = vmatprep.subr.bf16.mxu0 %v969_v58 }
  0x36   :  { %901 = vmatprep.subr.bf16.mxu1 %v970_v59 }
  0x38   :  { %880 = vmatpush3.bf16.msra.mxu0 %v971_v60 }
  0x39   :  { %902 = vmatpush3.bf16.msra.mxu1 %v972_v61  ;;  %881 = vmatprep.subr.bf16.mxu0 %v973_v62 }
  0x3a   :  { %903 = vmatprep.subr.bf16.mxu1 %v974_v63 }
  0x3c   :  { %882 = vmatpush3.bf16.msra.mxu0 %v975_v0 }
  0x3d   :  { %904 = vmatpush3.bf16.msra.mxu1 %v976_v1  ;;  %883 = vmatprep.subr.bf16.mxu0 %v977_v2 }
  0x3e   :  { %905 = vmatprep.subr.bf16.mxu1 %v978_v3 }
  0x40   :  { %884 = vmatpush3.bf16.msra.mxu0 %v979_v4 }
  0x41   :  { %906 = vmatpush3.bf16.msra.mxu1 %v980_v5 }
  0x43   :  { %671 = vmatmul.mubr.bf16.vlgmr.msra.gmra.mxu0 %v757_v7 }
  0x44   :  { %711 = vmatmul.mubr.bf16.vlgmr.msra.gmra.mxu1 %v759_v10 }
  0xe3   :  { %v841_v12 = vpop.f32.mrf.mxu0 }
  0xe4   :  { %v863_v13 = vpop.f32.mrf.mxu1 }
  0xe5   :  { %v842_v14 = vpop.f32.mrf.mxu0 }
  0xe6   :  { %v864_v15 = vpop.f32.mrf.mxu1  ;;  %v843_v20 = vadd.f32 %v842_v14, %v841_v12 }
  0xe7   :  { %v844_v16 = vpop.f32.mrf.mxu0  ;;  %v865_v21 = vadd.f32 %v864_v15, %v863_v13 }
  0xe8   :  { %v866_v17 = vpop.f32.mrf.mxu1 }
  0xe9   :  { %v845_v18 = vpop.f32.mrf.mxu0  ;;  %v633_v26 = vadd.f32 %v865_v21, %v843_v20 }
  0xea   :  { %v867_v19 = vpop.f32.mrf.mxu1 }
 0x103   :  { %v885_v22 = vpop.f32.mrf.mxu0 }
 0x104   :  { %v907_v23 = vpop.f32.mrf.mxu1 }
 0x105   :  { %v886_v24 = vpop.f32.mrf.mxu0 }
 0x106   :  { %v908_v25 = vpop.f32.mrf.mxu1  ;;  %v887_v27 = vadd.f32 %v886_v24, %v885_v22 }
 0x107   :  { %v888_v28 = vpop.f32.mrf.mxu0  ;;  %v909_v31 = vadd.f32 %v908_v25, %v907_v23 }
 0x108   :  { %v910_v29 = vpop.f32.mrf.mxu1  ;;  %v673_v30 = vadd.f32 %v887_v27, %v633_v26 }
 0x109   :  { %v889_v32 = vpop.f32.mrf.mxu0 }
 0x10a   :  { %v911_v33 = vpop.f32.mrf.mxu1  ;;  %v713_v34 = vadd.f32 %v909_v31, %v673_v30 }
 0x10c   :  { %v718_v35 = vpack.c.bf16 %v713_v34, %v713_v34  ;;  %v729_v36 = vrot.slane %v713_v34, 4  ;;  %v735_v37 = vmul.f32 %v713_v34, %v713_v34 }
 0x10e   :  { %719 = vst [vmem:[%s1217_s2] sm:$0xf] %v718_v35  ;;  %v730_v38 = vadd.f32 %v729_v36, %v713_v34  ;;  %v736_v39 = vrot.slane %v735_v37, 4 }
 0x110   :  { %v731_v40 = vrot.slane %v730_v38, 2  ;;  %v737_v41 = vadd.f32 %v736_v39, %v735_v37 }
 0x112   :  { %v732_v42 = vadd.f32 %v731_v40, %v730_v38  ;;  %v738_v43 = vrot.slane %v737_v41, 2 }
 0x114   :  { %v733_v44 = vrot.slane %v732_v42, 1  ;;  %v739_v45 = vadd.f32 %v738_v43, %v737_v41 }
 0x116   :  { %v740_v46 = vrot.slane %v739_v45, 1  ;;  %v734_v47 = vadd.f32 %v733_v44, %v732_v42 }
 0x118   :  { %v741_v48 = vadd.f32 %v740_v46, %v739_v45 }
 0x11a   :  { %v743_v49 = vsel %vm742_vm0, %v734_v47, %v741_v48 }
 0x11b   :  { %744 = vst [vmem:[%s1218_s3] sm:$0x3] %v743_v49 }

// kernel: _lambda_.24
= control target key start
LH: loop header
LB: loop body
LE: loop exit
PB: predicated region body
PF: predicated region fallthrough
CT: control target
= control target key end

     0   :  { %v19_v0 = vlaneseq  ;;  %s98_s0 = inlined_call_operand.vmem [shape: bf16[8,256], index: 0, kind: input, shape index: {}]   ;;  %s99_s1 = inlined_call_operand.vmem [shape: f32[1,256], index: 1, kind: input, shape index: {}]   ;;  %s100_s2 = inlined_call_operand.vmem [shape: f32[1,256], index: 2, kind: input, shape index: {}]   ;;  %s101_s3 = inlined_call_operand.vmem [shape: bf16[8,256], index: 3, kind: output, shape index: {}]  }
   0x1   :  { %v14_v1 = vld [vmem:[%s98_s0] sm:$0xff] }
   0x2   :  { %v20_v2 = vshrl.u32 %v19_v0, 7  ;;  %v17_v3 = vld [vmem:[%s99_s1] sm:$0x3]  ;;  %v15_v5 = vunpack.c.l.bf16 %v14_v1  ;;  %v16_v6 = vunpack.c.h.bf16 %v14_v1 }
   0x3   :  { %v31_v4 = vld [vmem:[%s100_s2] sm:$0x3] }
   0x4   :  { %v21_v7 = vsub.s32 0, %v20_v2  ;;  %v25_v8 = vsub.s32 1, %v20_v2 }
   0x6   :  { %v22_v9 = vrot.slane %v17_v3, %v21_v7  ;;  %v26_v10 = vrot.slane %v17_v3, %v25_v8  ;;  %v36_v11 = vrot.slane %v31_v4, %v21_v7  ;;  %v40_v12 = vrot.slane %v31_v4, %v25_v8 }
   0x8   :  { %v29_v13 = vmul.f32 %v22_v9, %v15_v5  ;;  %v30_v14 = vmul.f32 %v26_v10, %v16_v6 }
   0xa   :  { %v43_v15 = vadd.f32 %v36_v11, %v29_v13  ;;  %v44_v16 = vadd.f32 %v40_v12, %v30_v14 }
   0xc   :  { %vm45_vm0 = vcmp.ge.f32.partialorder %v43_v15, 0.0  ;;  %vm46_vm1 = vcmp.ge.f32.partialorder %v44_v16, 0.0  ;;  %v47_v17 = vmul.f32 0.2, %v43_v15  ;;  %v48_v18 = vmul.f32 0.2, %v44_v16 }
   0xe   :  { %v49_v19 = vsel %vm45_vm0, %v43_v15, %v47_v17  ;;  %v50_v20 = vsel %vm46_vm1, %v44_v16, %v48_v18 }
   0xf   :  { %v65_v21 = vpack.c.bf16 %v50_v20, %v49_v19 }
  0x11   :  { %59 = vst [vmem:[%s101_s3] sm:$0xff] %v65_v21 }

// kernel: _lambda_.25
= control target key start
LH: loop header
LB: loop body
LE: loop exit
PB: predicated region body
PF: predicated region fallthrough
CT: control target
= control target key end

     0   :  { %v3821_v22 = vmov 1966171168   ;;  %v546_v24 = vlaneseq  ;;  %s4674_s1 = inlined_call_operand.vmem [shape: bf16[4096,128], index: 1, kind: input, shape index: {}]   ;;  %s4675_s0 = inlined_call_operand.vmem [shape: bf16[2,4096], index: 0, kind: input, shape index: {}]   ;;  %s4676_s2 = inlined_call_operand.vmem [shape: f32[1,128], index: 2, kind: input, shape index: {}]   ;;  %s4677_s3 = inlined_call_operand.vmem [shape: f32[2,128], index: 3, kind: output, shape index: {}]  }
   0x1   :  { %v3561_v0 = vld [vmem:[%s4674_s1 + $0x78] sm:$0xff]   ;;  %v3565_v4 = vld [vmem:[%s4674_s1 + $0x70] sm:$0xff]   ;;  %v3569_v8 = vld [vmem:[%s4674_s1 + $0x68] sm:$0xff]   ;;  %v544_v23 = vunpack.c.l.s4 %v3821_v22 }
   0x2   :  { %v3562_v1 = vld [vmem:[%s4674_s1 + $0xf8] sm:$0xff]   ;;  %3208 = vmatprep.subr.bf16.mxu0 %v3561_v0  ;;  %v3566_v5 = vld [vmem:[%s4674_s1 + $0xf0] sm:$0xff]   ;;  %v3570_v9 = vld [vmem:[%s4674_s1 + $0xe8] sm:$0xff]   ;;  %v547_v30 = vshrl.u32 %v546_v24, 7 }
   0x3   :  { %v3563_v2 = vld [vmem:[%s4674_s1 + $0x38] sm:$0xff]   ;;  %3230 = vmatprep.subr.bf16.mxu1 %v3562_v1  ;;  %v3567_v6 = vld [vmem:[%s4674_s1 + $0x30] sm:$0xff]   ;;  %v3571_v10 = vld [vmem:[%s4674_s1 + $0x28] sm:$0xff]   ;;  %v545_v29 = vunpack.c.0.s8 %v544_v23 }
   0x4   :  { %v3564_v3 = vld [vmem:[%s4674_s1 + $0xb8] sm:$0xff]   ;;  %3209 = vmatpush3.bf16.msra.mxu0 %v3563_v2  ;;  %v3568_v7 = vld [vmem:[%s4674_s1 + $0xb0] sm:$0xff]   ;;  %v3572_v11 = vld [vmem:[%s4674_s1 + $0xa8] sm:$0xff]  }
   0x5   :  { %3231 = vmatpush3.bf16.msra.mxu1 %v3564_v3  ;;  %3210 = vmatprep.subr.bf16.mxu0 %v3565_v4  ;;  %v3573_v12 = vld [vmem:[%s4674_s1 + $0x60] sm:$0xff]   ;;  %v3577_v16 = vld [vmem:[%s4674_s1 + $0x58] sm:$0xff]   ;;  %v3581_v20 = vld [vmem:[%s4674_s1 + $0x50] sm:$0xff]   ;;  %v3932_v35 = vsub.s32 %v545_v29, %v547_v30 }
   0x6   :  { %3232 = vmatprep.subr.bf16.mxu1 %v3566_v5  ;;  %v3574_v13 = vld [vmem:[%s4674_s1 + $0xe0] sm:$0xff]   ;;  %v3578_v17 = vld [vmem:[%s4674_s1 + $0xd8] sm:$0xff]   ;;  %v3582_v21 = vld [vmem:[%s4674_s1 + $0xd0] sm:$0xff]  }
   0x7   :  { %v3575_v14 = vld [vmem:[%s4674_s1 + $0x20] sm:$0xff]   ;;  %v3579_v18 = vld [vmem:[%s4674_s1 + $0x18] sm:$0xff]   ;;  %v3583_v25 = vld [vmem:[%s4674_s1 + $0x10] sm:$0xff]  }
   0x8   :  { %3211 = vmatpush3.bf16.msra.mxu0 %v3567_v6  ;;  %v3576_v15 = vld [vmem:[%s4674_s1 + $0xa0] sm:$0xff]   ;;  %v3580_v19 = vld [vmem:[%s4674_s1 + $0x98] sm:$0xff]   ;;  %v3584_v26 = vld [vmem:[%s4674_s1 + $0x90] sm:$0xff]  }
   0x9   :  { %3233 = vmatpush3.bf16.msra.mxu1 %v3568_v7  ;;  %3212 = vmatprep.subr.bf16.mxu0 %v3569_v8  ;;  %v3585_v27 = vld [vmem:[%s4674_s1 + $0x48] sm:$0xff]   ;;  %v3589_v33 = vld [vmem:[%s4674_s1 + $0x40] sm:$0xff]   ;;  %v3594_v41 = vld [vmem:[%s4674_s1 + $0x178] sm:$0xff]  }
   0xa   :  { %3234 = vmatprep.subr.bf16.mxu1 %v3570_v9  ;;  %v3586_v28 = vld [vmem:[%s4674_s1 + $0xc8] sm:$0xff]   ;;  %v3590_v34 = vld [vmem:[%s4674_s1 + $0xc0] sm:$0xff]   ;;  %v3595_v42 = vld [vmem:[%s4674_s1 + $0x1f8] sm:$0xff]  }
   0xb   :  { %v3587_v31 = vld [vmem:[%s4674_s1 + $0x8] sm:$0xff]   ;;  %v3591_v36 = vld [vmem:[%s4674_s1] sm:$0xff]   ;;  %v3596_v46 = vld [vmem:[%s4674_s1 + $0x138] sm:$0xff]  }
   0xc   :  { %3213 = vmatpush3.bf16.msra.mxu0 %v3571_v10  ;;  %v3588_v32 = vld [vmem:[%s4674_s1 + $0x88] sm:$0xff]   ;;  %v3592_v37 = vld [vmem:[%s4674_s1 + $0x80] sm:$0xff]   ;;  %v3597_v48 = vld [vmem:[%s4674_s1 + $0x1b8] sm:$0xff]  }
   0xd   :  { %3235 = vmatpush3.bf16.msra.mxu1 %v3572_v11  ;;  %3214 = vmatprep.subr.bf16.mxu0 %v3573_v12  ;;  %v15_v38 = vld [vmem:[%s4675_s0] sm:$0xff]  ;;  %v3598_v51 = vld [vmem:[%s4674_s1 + $0x170] sm:$0xff]   ;;  %v3602_v58 = vld [vmem:[%s4674_s1 + $0x168] sm:$0xff]  }
   0xe   :  { %3236 = vmatprep.subr.bf16.mxu1 %v3574_v13  ;;  %v542_v39 = vcombine.high %v15_v38, %v15_v38  ;;  %v549_v40 = vrot.slane %v15_v38, %v3932_v35  ;;  %v3599_v53 = vld [vmem:[%s4674_s1 + $0x1f0] sm:$0xff]   ;;  %v3603_v59 = vld [vmem:[%s4674_s1 + $0x1e8] sm:$0xff]   ;;  %v3606_v62 = vld [vmem:[%s4674_s1 + $0x160] sm:$0xff]  }
   0xf   :  { %v3600_v55 = vld [vmem:[%s4674_s1 + $0x130] sm:$0xff]   ;;  %v3604_v60 = vld [vmem:[%s4674_s1 + $0x128] sm:$0xff]   ;;  %v3607_v63 = vld [vmem:[%s4674_s1 + $0x1e0] sm:$0xff]  }
  0x10   :  { %3215 = vmatpush3.bf16.msra.mxu0 %v3575_v14  ;;  %v557_v43 = vcombine.high %v549_v40, %v549_v40  ;;  %v565_v44 = vrot.slane %v549_v40, %v3932_v35  ;;  %v3952_v45 = vrot.slane %v542_v39, %v3932_v35  ;;  %v3601_v56 = vld [vmem:[%s4674_s1 + $0x1b0] sm:$0xff]   ;;  %v3605_v61 = vld [vmem:[%s4674_s1 + $0x1a8] sm:$0xff]   ;;  %v3608_v0 = vld [vmem:[%s4674_s1 + $0x120] sm:$0xff]  }
  0x11   :  { %3237 = vmatpush3.bf16.msra.mxu1 %v3576_v15  ;;  %3216 = vmatprep.subr.bf16.mxu0 %v3577_v16  ;;  %v3609_v1 = vld [vmem:[%s4674_s1 + $0x1a0] sm:$0xff]   ;;  %v3610_v2 = vld [vmem:[%s4674_s1 + $0x158] sm:$0xff]   ;;  %v3614_v6 = vld [vmem:[%s4674_s1 + $0x150] sm:$0xff]  }
  0x12   :  { %3238 = vmatprep.subr.bf16.mxu1 %v3578_v17  ;;  %v579_v47 = vrot.slane %v557_v43, %v3932_v35  ;;  %v558_v49 = vcombine.high %v3952_v45, %v3952_v45  ;;  %v587_v50 = vcombine.high %v565_v44, %v565_v44  ;;  %v3611_v3 = vld [vmem:[%s4674_s1 + $0x1d8] sm:$0xff]   ;;  %v3615_v7 = vld [vmem:[%s4674_s1 + $0x1d0] sm:$0xff]   ;;  %v3618_v10 = vld [vmem:[%s4674_s1 + $0x148] sm:$0xff]  }
  0x13   :  { %v3612_v4 = vld [vmem:[%s4674_s1 + $0x118] sm:$0xff]   ;;  %v3616_v8 = vld [vmem:[%s4674_s1 + $0x110] sm:$0xff]   ;;  %v3619_v11 = vld [vmem:[%s4674_s1 + $0x1c8] sm:$0xff]  }
  0x14   :  { %3217 = vmatpush3.bf16.msra.mxu0 %v3579_v18  ;;  %2338 = vmatprep.mubr.bf16.mxu0 %v579_v47  ;;  %v589_v52 = vcombine.high %v579_v47, %v579_v47  ;;  %v586_v54 = vrot.slane %v558_v49, %v3932_v35  ;;  %v3613_v5 = vld [vmem:[%s4674_s1 + $0x198] sm:$0xff]   ;;  %v3617_v9 = vld [vmem:[%s4674_s1 + $0x190] sm:$0xff]   ;;  %v3620_v12 = vld [vmem:[%s4674_s1 + $0x108] sm:$0xff]   ;;  %v572_v18 = vrot.slane %v3952_v45, %v3932_v35 }
  0x15   :  { %3239 = vmatpush3.bf16.msra.mxu1 %v3580_v19  ;;  %3218 = vmatprep.subr.bf16.mxu0 %v3581_v20  ;;  %v3621_v13 = vld [vmem:[%s4674_s1 + $0x188] sm:$0xff]   ;;  %v3622_v14 = vld [vmem:[%s4674_s1 + $0x140] sm:$0xff]   ;;  %v3626_v19 = vld [vmem:[%s4674_s1 + $0x278] sm:$0xff]  }
  0x16   :  { %3240 = vmatprep.subr.bf16.mxu1 %v3582_v21  ;;  %2378 = vmatprep.mubr.bf16.mxu1 %v589_v52  ;;  %v590_v57 = vcombine.high %v586_v54, %v586_v54  ;;  %v3623_v15 = vld [vmem:[%s4674_s1 + $0x1c0] sm:$0xff]   ;;  %v3627_v20 = vld [vmem:[%s4674_s1 + $0x2f8] sm:$0xff]   ;;  %v588_v23 = vcombine.high %v572_v18, %v572_v18  ;;  %v3630_v24 = vld [vmem:[%s4674_s1 + $0x270] sm:$0xff]  }
  0x17   :  { %v3624_v16 = vld [vmem:[%s4674_s1 + $0x100] sm:$0xff]   ;;  %v3628_v21 = vld [vmem:[%s4674_s1 + $0x238] sm:$0xff]   ;;  %v3635_v29 = vld [vmem:[%s4674_s1 + $0x2e8] sm:$0xff]  }
  0x18   :  { %3219 = vmatpush3.bf16.msra.mxu0 %v3583_v25  ;;  %v3625_v17 = vld [vmem:[%s4674_s1 + $0x180] sm:$0xff]   ;;  %v3629_v22 = vld [vmem:[%s4674_s1 + $0x2b8] sm:$0xff]   ;;  %v3631_v25 = vld [vmem:[%s4674_s1 + $0x2f0] sm:$0xff]  }
  0x19   :  { %3241 = vmatpush3.bf16.msra.mxu1 %v3584_v26  ;;  %3220 = vmatprep.subr.bf16.mxu0 %v3585_v27  ;;  %v3632_v26 = vld [vmem:[%s4674_s1 + $0x230] sm:$0xff]   ;;  %v3636_v30 = vld [vmem:[%s4674_s1 + $0x228] sm:$0xff]   ;;  %v3643_v38 = vld [vmem:[%s4674_s1 + $0x2d8] sm:$0xff]  }
  0x1a   :  { %3242 = vmatprep.subr.bf16.mxu1 %v3586_v28  ;;  %v3633_v27 = vld [vmem:[%s4674_s1 + $0x2b0] sm:$0xff]   ;;  %v3634_v28 = vld [vmem:[%s4674_s1 + $0x268] sm:$0xff]   ;;  %v3644_v39 = vld [vmem:[%s4674_s1 + $0x218] sm:$0xff]  }
  0x1b   :  { %v3645_v40 = vld [vmem:[%s4674_s1 + $0x298] sm:$0xff]   ;;  %v3648_v43 = vld [vmem:[%s4674_s1 + $0x210] sm:$0xff]   ;;  %v3650_v45 = vld [vmem:[%s4674_s1 + $0x248] sm:$0xff]  }
  0x1c   :  { %3221 = vmatpush3.bf16.msra.mxu0 %v3587_v31  ;;  %v3637_v31 = vld [vmem:[%s4674_s1 + $0x2a8] sm:$0xff]   ;;  %v3654_v49 = vld [vmem:[%s4674_s1 + $0x240] sm:$0xff]  }
  0x1d   :  { %3243 = vmatpush3.bf16.msra.mxu1 %v3588_v32  ;;  %3222 = vmatprep.subr.bf16.mxu0 %v3589_v33  ;;  %v3638_v32 = vld [vmem:[%s4674_s1 + $0x260] sm:$0xff]   ;;  %v3652_v47 = vld [vmem:[%s4674_s1 + $0x208] sm:$0xff]  }
  0x1e   :  { %3244 = vmatprep.subr.bf16.mxu1 %v3590_v34  ;;  %v3639_v33 = vld [vmem:[%s4674_s1 + $0x2e0] sm:$0xff]   ;;  %v16_v52 = vld [vmem:[%s4675_s0 + $0x8] sm:$0xff] }
  0x1f   :  { %v3640_v34 = vld [vmem:[%s4674_s1 + $0x220] sm:$0xff]  }
  0x20   :  { %3223 = vmatpush3.bf16.msra.mxu0 %v3591_v36  ;;  %v3641_v36 = vld [vmem:[%s4674_s1 + $0x2a0] sm:$0xff]  }
  0x21   :  { %3245 = vmatpush3.bf16.msra.mxu1 %v3592_v37  ;;  %3252 = vmatprep.subr.bf16.mxu0 %v3594_v41  ;;  %v3642_v37 = vld [vmem:[%s4674_s1 + $0x258] sm:$0xff]   ;;  %v3646_v41 = vld [vmem:[%s4674_s1 + $0x250] sm:$0xff]  }
  0x22   :  { %3274 = vmatprep.subr.bf16.mxu1 %v3595_v42  ;;  %v3647_v42 = vld [vmem:[%s4674_s1 + $0x2d0] sm:$0xff]  }
  0x23   :  { %2339 = vmatmul.mubr.bf16.vlgmr.msra.gmra.mxu0 %v565_v44  ;;  %v3649_v44 = vld [vmem:[%s4674_s1 + $0x290] sm:$0xff]  }
  0x24   :  { %3253 = vmatpush3.bf16.msra.mxu0 %v3596_v46  ;;  %2379 = vmatmul.mubr.bf16.vlgmr.msra.gmra.mxu1 %v587_v50  ;;  %v3651_v46 = vld [vmem:[%s4674_s1 + $0x2c8] sm:$0xff]   ;;  %v3655_v50 = vld [vmem:[%s4674_s1 + $0x2c0] sm:$0xff]  }
  0x25   :  { %3254 = vmatprep.subr.bf16.mxu0 %v3598_v51  ;;  %3275 = vmatpush3.bf16.msra.mxu1 %v3597_v48  ;;  %v3653_v48 = vld [vmem:[%s4674_s1 + $0x288] sm:$0xff]   ;;  %v3656_v51 = vld [vmem:[%s4674_s1 + $0x200] sm:$0xff]  }
  0x26   :  { %2418 = vmatprep.mubr.bf16.mxu0 %v586_v54  ;;  %3276 = vmatprep.subr.bf16.mxu1 %v3599_v53  ;;  %v3657_v53 = vld [vmem:[%s4674_s1 + $0x280] sm:$0xff]   ;;  %v598_v54 = vrot.slane %v16_v52, %v3932_v35 }
  0x27   :  { %2458 = vmatprep.mubr.bf16.mxu1 %v590_v57 }
  0x28   :  { %3255 = vmatpush3.bf16.msra.mxu0 %v3600_v55  ;;  %v591_v55 = vcombine.high %v16_v52, %v16_v52  ;;  %v606_v57 = vcombine.high %v598_v54, %v598_v54  ;;  %v3707_v52 = vld [vmem:[%s4674_s1 + $0x458] sm:$0xff]  }
  0x29   :  { %3256 = vmatprep.subr.bf16.mxu0 %v3602_v58  ;;  %3277 = vmatpush3.bf16.msra.mxu1 %v3601_v56  ;;  %v3658_v56 = vld [vmem:[%s4674_s1 + $0x378] sm:$0xff]   ;;  %v614_v58 = vrot.slane %v598_v54, %v3932_v35 }
  0x2a   :  { %3278 = vmatprep.subr.bf16.mxu1 %v3603_v59  ;;  %v3659_v59 = vld [vmem:[%s4674_s1 + $0x3f8] sm:$0xff]  }
  0x2b   :  { %v3709_v54 = vld [vmem:[%s4674_s1 + $0x418] sm:$0xff]  }
  0x2c   :  { %3257 = vmatpush3.bf16.msra.mxu0 %v3604_v60  ;;  %v4158_v60 = vrot.slane %v591_v55, %v3932_v35  ;;  %v3710_v55 = vld [vmem:[%s4674_s1 + $0x498] sm:$0xff]  }
  0x2d   :  { %3258 = vmatprep.subr.bf16.mxu0 %v3606_v62  ;;  %3279 = vmatpush3.bf16.msra.mxu1 %v3605_v61  ;;  %v3660_v61 = vld [vmem:[%s4674_s1 + $0x338] sm:$0xff]   ;;  %v628_v62 = vrot.slane %v606_v57, %v3932_v35  ;;  %v3712_v57 = vld [vmem:[%s4674_s1 + $0x4d0] sm:$0xff]  }
  0x2e   :  { %3280 = vmatprep.subr.bf16.mxu1 %v3607_v63  ;;  %v3661_v63 = vld [vmem:[%s4674_s1 + $0x3b8] sm:$0xff]  }
  0x30   :  { %3259 = vmatpush3.bf16.msra.mxu0 %v3608_v0  ;;  %v607_v0 = vcombine.high %v4158_v60, %v4158_v60 }
  0x31   :  { %3260 = vmatprep.subr.bf16.mxu0 %v3610_v2  ;;  %3281 = vmatpush3.bf16.msra.mxu1 %v3609_v1  ;;  %v636_v1 = vcombine.high %v614_v58, %v614_v58  ;;  %v3662_v2 = vld [vmem:[%s4674_s1 + $0x370] sm:$0xff]  }
  0x32   :  { %3282 = vmatprep.subr.bf16.mxu1 %v3611_v3  ;;  %v638_v3 = vcombine.high %v628_v62, %v628_v62 }
  0x34   :  { %3261 = vmatpush3.bf16.msra.mxu0 %v3612_v4  ;;  %v3663_v4 = vld [vmem:[%s4674_s1 + $0x3f0] sm:$0xff]  }
  0x35   :  { %3262 = vmatprep.subr.bf16.mxu0 %v3614_v6  ;;  %3283 = vmatpush3.bf16.msra.mxu1 %v3613_v5  ;;  %v635_v5 = vrot.slane %v607_v0, %v3932_v35  ;;  %v3664_v6 = vld [vmem:[%s4674_s1 + $0x330] sm:$0xff]   ;;  %v3719_v0 = vld [vmem:[%s4674_s1 + $0x440] sm:$0xff]  }
  0x36   :  { %3284 = vmatprep.subr.bf16.mxu1 %v3615_v7  ;;  %v3665_v7 = vld [vmem:[%s4674_s1 + $0x3b0] sm:$0xff]  }
  0x38   :  { %3263 = vmatpush3.bf16.msra.mxu0 %v3616_v8  ;;  %v639_v8 = vcombine.high %v635_v5, %v635_v5 }
  0x39   :  { %3264 = vmatprep.subr.bf16.mxu0 %v3618_v10  ;;  %3285 = vmatpush3.bf16.msra.mxu1 %v3617_v9  ;;  %v3666_v9 = vld [vmem:[%s4674_s1 + $0x368] sm:$0xff]  }
  0x3a   :  { %3286 = vmatprep.subr.bf16.mxu1 %v3619_v11  ;;  %v3667_v10 = vld [vmem:[%s4674_s1 + $0x3e8] sm:$0xff]  }
  0x3b   :  { %v3668_v11 = vld [vmem:[%s4674_s1 + $0x328] sm:$0xff]  }
  0x3c   :  { %3265 = vmatpush3.bf16.msra.mxu0 %v3620_v12  ;;  %v3669_v12 = vld [vmem:[%s4674_s1 + $0x3a8] sm:$0xff]  }
  0x3d   :  { %3266 = vmatprep.subr.bf16.mxu0 %v3622_v14  ;;  %3287 = vmatpush3.bf16.msra.mxu1 %v3621_v13  ;;  %v3670_v13 = vld [vmem:[%s4674_s1 + $0x360] sm:$0xff]  }
  0x3e   :  { %3288 = vmatprep.subr.bf16.mxu1 %v3623_v15  ;;  %v3671_v14 = vld [vmem:[%s4674_s1 + $0x3e0] sm:$0xff]  }
  0x3f   :  { %v3672_v15 = vld [vmem:[%s4674_s1 + $0x320] sm:$0xff]  }
  0x40   :  { %3267 = vmatpush3.bf16.msra.mxu0 %v3624_v16  ;;  %v3673_v16 = vld [vmem:[%s4674_s1 + $0x3a0] sm:$0xff]  }
  0x41   :  { %3296 = vmatprep.subr.bf16.mxu0 %v3626_v19  ;;  %3289 = vmatpush3.bf16.msra.mxu1 %v3625_v17  ;;  %v3674_v17 = vld [vmem:[%s4674_s1 + $0x358] sm:$0xff]  }
  0x42   :  { %3318 = vmatprep.subr.bf16.mxu1 %v3627_v20  ;;  %v3676_v19 = vld [vmem:[%s4674_s1 + $0x318] sm:$0xff]  }
  0x43   :  { %2419 = vmatmul.mubr.bf16.vlgmr.msra.gmra.mxu0 %v572_v18  ;;  %v3675_v18 = vld [vmem:[%s4674_s1 + $0x3d8] sm:$0xff]  }
  0x44   :  { %3297 = vmatpush3.bf16.msra.mxu0 %v3628_v21  ;;  %2459 = vmatmul.mubr.bf16.vlgmr.msra.gmra.mxu1 %v588_v23  ;;  %v3677_v20 = vld [vmem:[%s4674_s1 + $0x398] sm:$0xff]   ;;  %v3678_v21 = vld [vmem:[%s4674_s1 + $0x350] sm:$0xff]  }
  0x45   :  { %3298 = vmatprep.subr.bf16.mxu0 %v3630_v24  ;;  %3319 = vmatpush3.bf16.msra.mxu1 %v3629_v22  ;;  %v3679_v22 = vld [vmem:[%s4674_s1 + $0x3d0] sm:$0xff]  }
  0x46   :  { %3320 = vmatprep.subr.bf16.mxu1 %v3631_v25  ;;  %2498 = vmatprep.mubr.bf16.mxu0 %v628_v62  ;;  %v3680_v23 = vld [vmem:[%s4674_s1 + $0x310] sm:$0xff]   ;;  %v3682_v25 = vld [vmem:[%s4674_s1 + $0x348] sm:$0xff]  }
  0x47   :  { %2538 = vmatprep.mubr.bf16.mxu1 %v638_v3  ;;  %v3681_v24 = vld [vmem:[%s4674_s1 + $0x390] sm:$0xff]   ;;  %v3717_v62 = vld [vmem:[%s4674_s1 + $0x408] sm:$0xff]  }
  0x48   :  { %3299 = vmatpush3.bf16.msra.mxu0 %v3632_v26  ;;  %v3683_v26 = vld [vmem:[%s4674_s1 + $0x3c8] sm:$0xff]   ;;  %v17_v3 = vld [vmem:[%s4675_s0 + $0x10] sm:$0xff] }
  0x49   :  { %3300 = vmatprep.subr.bf16.mxu0 %v3634_v28  ;;  %3321 = vmatpush3.bf16.msra.mxu1 %v3633_v27  ;;  %v3684_v27 = vld [vmem:[%s4674_s1 + $0x308] sm:$0xff]  }
  0x4a   :  { %3322 = vmatprep.subr.bf16.mxu1 %v3635_v29  ;;  %v3685_v28 = vld [vmem:[%s4674_s1 + $0x388] sm:$0xff]   ;;  %v3686_v29 = vld [vmem:[%s4674_s1 + $0x340] sm:$0xff]  }
  0x4c   :  { %3301 = vmatpush3.bf16.msra.mxu0 %v3636_v30  ;;  %v3687_v30 = vld [vmem:[%s4674_s1 + $0x3c0] sm:$0xff]  }
  0x4d   :  { %3302 = vmatprep.subr.bf16.mxu0 %v3638_v32  ;;  %3323 = vmatpush3.bf16.msra.mxu1 %v3637_v31  ;;  %v3688_v31 = vld [vmem:[%s4674_s1 + $0x300] sm:$0xff]  }
  0x4e   :  { %3324 = vmatprep.subr.bf16.mxu1 %v3639_v33  ;;  %v3689_v32 = vld [vmem:[%s4674_s1 + $0x380] sm:$0xff]   ;;  %v621_v33 = vrot.slane %v4158_v60, %v3932_v35  ;;  %v3715_v60 = vld [vmem:[%s4674_s1 + $0x448] sm:$0xff]  }
  0x50   :  { %3303 = vmatpush3.bf16.msra.mxu0 %v3640_v34  ;;  %v3691_v34 = vld [vmem:[%s4674_s1 + $0x478] sm:$0xff]  }
  0x51   :  { %3304 = vmatprep.subr.bf16.mxu0 %v3642_v37  ;;  %3325 = vmatpush3.bf16.msra.mxu1 %v3641_v36  ;;  %v3692_v36 = vld [vmem:[%s4674_s1 + $0x4f8] sm:$0xff]  }
  0x52   :  { %3326 = vmatprep.subr.bf16.mxu1 %v3643_v38  ;;  %v3693_v37 = vld [vmem:[%s4674_s1 + $0x438] sm:$0xff]  }
  0x53   :  { %v3694_v38 = vld [vmem:[%s4674_s1 + $0x4b8] sm:$0xff]  }
  0x54   :  { %3305 = vmatpush3.bf16.msra.mxu0 %v3644_v39  ;;  %v637_v39 = vcombine.high %v621_v33, %v621_v33 }
  0x55   :  { %3306 = vmatprep.subr.bf16.mxu0 %v3646_v41  ;;  %3327 = vmatpush3.bf16.msra.mxu1 %v3645_v40  ;;  %v3695_v40 = vld [vmem:[%s4674_s1 + $0x470] sm:$0xff]  }
  0x56   :  { %3328 = vmatprep.subr.bf16.mxu1 %v3647_v42  ;;  %v3696_v41 = vld [vmem:[%s4674_s1 + $0x4f0] sm:$0xff]  }
  0x57   :  { %v3697_v42 = vld [vmem:[%s4674_s1 + $0x430] sm:$0xff]  }
  0x58   :  { %3307 = vmatpush3.bf16.msra.mxu0 %v3648_v43  ;;  %v3698_v43 = vld [vmem:[%s4674_s1 + $0x4b0] sm:$0xff]  }
  0x59   :  { %3308 = vmatprep.subr.bf16.mxu0 %v3650_v45  ;;  %3329 = vmatpush3.bf16.msra.mxu1 %v3649_v44  ;;  %v3699_v44 = vld [vmem:[%s4674_s1 + $0x468] sm:$0xff]  }
  0x5a   :  { %3330 = vmatprep.subr.bf16.mxu1 %v3651_v46  ;;  %v3700_v45 = vld [vmem:[%s4674_s1 + $0x4e8] sm:$0xff]  }
  0x5b   :  { %v3701_v46 = vld [vmem:[%s4674_s1 + $0x428] sm:$0xff]  }
  0x5c   :  { %3309 = vmatpush3.bf16.msra.mxu0 %v3652_v47  ;;  %v3702_v47 = vld [vmem:[%s4674_s1 + $0x4a8] sm:$0xff]  }
  0x5d   :  { %3310 = vmatprep.subr.bf16.mxu0 %v3654_v49  ;;  %3331 = vmatpush3.bf16.msra.mxu1 %v3653_v48  ;;  %v3703_v48 = vld [vmem:[%s4674_s1 + $0x460] sm:$0xff]  }
  0x5e   :  { %3332 = vmatprep.subr.bf16.mxu1 %v3655_v50  ;;  %v3704_v49 = vld [vmem:[%s4674_s1 + $0x4e0] sm:$0xff]  }
  0x5f   :  { %v3705_v50 = vld [vmem:[%s4674_s1 + $0x420] sm:$0xff]  }
  0x60   :  { %3311 = vmatpush3.bf16.msra.mxu0 %v3656_v51  ;;  %v3706_v51 = vld [vmem:[%s4674_s1 + $0x4a0] sm:$0xff]  }
  0x61   :  { %3340 = vmatprep.subr.bf16.mxu0 %v3658_v56  ;;  %3333 = vmatpush3.bf16.msra.mxu1 %v3657_v53  ;;  %v3708_v53 = vld [vmem:[%s4674_s1 + $0x4d8] sm:$0xff]   ;;  %v3711_v56 = vld [vmem:[%s4674_s1 + $0x450] sm:$0xff]  }
  0x62   :  { %3362 = vmatprep.subr.bf16.mxu1 %v3659_v59  ;;  %v3714_v59 = vld [vmem:[%s4674_s1 + $0x490] sm:$0xff]  }
  0x63   :  { %2499 = vmatmul.mubr.bf16.vlgmr.msra.gmra.mxu0 %v614_v58  ;;  %v3713_v58 = vld [vmem:[%s4674_s1 + $0x410] sm:$0xff]  }
  0x64   :  { %3341 = vmatpush3.bf16.msra.mxu0 %v3660_v61  ;;  %2539 = vmatmul.mubr.bf16.vlgmr.msra.gmra.mxu1 %v636_v1  ;;  %v3716_v61 = vld [vmem:[%s4674_s1 + $0x4c8] sm:$0xff]   ;;  %v3720_v1 = vld [vmem:[%s4674_s1 + $0x4c0] sm:$0xff]  }
  0x65   :  { %3342 = vmatprep.subr.bf16.mxu0 %v3662_v2  ;;  %3363 = vmatpush3.bf16.msra.mxu1 %v3661_v63  ;;  %v3718_v63 = vld [vmem:[%s4674_s1 + $0x488] sm:$0xff]   ;;  %v3721_v2 = vld [vmem:[%s4674_s1 + $0x400] sm:$0xff]  }
  0x66   :  { %2578 = vmatprep.mubr.bf16.mxu0 %v635_v5  ;;  %3364 = vmatprep.subr.bf16.mxu1 %v3663_v4  ;;  %v3722_v4 = vld [vmem:[%s4674_s1 + $0x480] sm:$0xff]   ;;  %v647_v5 = vrot.slane %v17_v3, %v3932_v35 }
  0x67   :  { %2618 = vmatprep.mubr.bf16.mxu1 %v639_v8 }
  0x68   :  { %3343 = vmatpush3.bf16.msra.mxu0 %v3664_v6  ;;  %v640_v6 = vcombine.high %v17_v3, %v17_v3  ;;  %v655_v8 = vcombine.high %v647_v5, %v647_v5  ;;  %v3772_v3 = vld [vmem:[%s4674_s1 + $0x658] sm:$0xff]  }
  0x69   :  { %3344 = vmatprep.subr.bf16.mxu0 %v3666_v9  ;;  %3365 = vmatpush3.bf16.msra.mxu1 %v3665_v7  ;;  %v3723_v7 = vld [vmem:[%s4674_s1 + $0x578] sm:$0xff]   ;;  %v663_v9 = vrot.slane %v647_v5, %v3932_v35 }
  0x6a   :  { %3366 = vmatprep.subr.bf16.mxu1 %v3667_v10  ;;  %v3724_v10 = vld [vmem:[%s4674_s1 + $0x5f8] sm:$0xff]  }
  0x6b   :  { %v3774_v5 = vld [vmem:[%s4674_s1 + $0x618] sm:$0xff]  }
  0x6c   :  { %3345 = vmatpush3.bf16.msra.mxu0 %v3668_v11  ;;  %v4364_v11 = vrot.slane %v640_v6, %v3932_v35  ;;  %v3775_v6 = vld [vmem:[%s4674_s1 + $0x698] sm:$0xff]  }
  0x6d   :  { %3346 = vmatprep.subr.bf16.mxu0 %v3670_v13  ;;  %3367 = vmatpush3.bf16.msra.mxu1 %v3669_v12  ;;  %v3725_v12 = vld [vmem:[%s4674_s1 + $0x538] sm:$0xff]   ;;  %v677_v13 = vrot.slane %v655_v8, %v3932_v35  ;;  %v3777_v8 = vld [vmem:[%s4674_s1 + $0x6d0] sm:$0xff]  }
  0x6e   :  { %3368 = vmatprep.subr.bf16.mxu1 %v3671_v14  ;;  %v3726_v14 = vld [vmem:[%s4674_s1 + $0x5b8] sm:$0xff]  }
  0x70   :  { %3347 = vmatpush3.bf16.msra.mxu0 %v3672_v15  ;;  %v656_v15 = vcombine.high %v4364_v11, %v4364_v11 }
  0x71   :  { %3348 = vmatprep.subr.bf16.mxu0 %v3674_v17  ;;  %3369 = vmatpush3.bf16.msra.mxu1 %v3673_v16  ;;  %v685_v16 = vcombine.high %v663_v9, %v663_v9  ;;  %v3727_v17 = vld [vmem:[%s4674_s1 + $0x570] sm:$0xff]  }
  0x72   :  { %3370 = vmatprep.subr.bf16.mxu1 %v3675_v18  ;;  %v687_v18 = vcombine.high %v677_v13, %v677_v13 }
  0x74   :  { %3349 = vmatpush3.bf16.msra.mxu0 %v3676_v19  ;;  %v3728_v19 = vld [vmem:[%s4674_s1 + $0x5f0] sm:$0xff]  }
  0x75   :  { %3350 = vmatprep.subr.bf16.mxu0 %v3678_v21  ;;  %3371 = vmatpush3.bf16.msra.mxu1 %v3677_v20  ;;  %v684_v20 = vrot.slane %v656_v15, %v3932_v35  ;;  %v3729_v21 = vld [vmem:[%s4674_s1 + $0x530] sm:$0xff]   ;;  %v3784_v15 = vld [vmem:[%s4674_s1 + $0x640] sm:$0xff]  }
  0x76   :  { %3372 = vmatprep.subr.bf16.mxu1 %v3679_v22  ;;  %v3730_v22 = vld [vmem:[%s4674_s1 + $0x5b0] sm:$0xff]  }
  0x78   :  { %3351 = vmatpush3.bf16.msra.mxu0 %v3680_v23  ;;  %v688_v23 = vcombine.high %v684_v20, %v684_v20 }
  0x79   :  { %3352 = vmatprep.subr.bf16.mxu0 %v3682_v25  ;;  %3373 = vmatpush3.bf16.msra.mxu1 %v3681_v24  ;;  %v3731_v24 = vld [vmem:[%s4674_s1 + $0x568] sm:$0xff]  }
  0x7a   :  { %3374 = vmatprep.subr.bf16.mxu1 %v3683_v26  ;;  %v3732_v25 = vld [vmem:[%s4674_s1 + $0x5e8] sm:$0xff]  }
  0x7b   :  { %v3733_v26 = vld [vmem:[%s4674_s1 + $0x528] sm:$0xff]  }
  0x7c   :  { %3353 = vmatpush3.bf16.msra.mxu0 %v3684_v27  ;;  %v3734_v27 = vld [vmem:[%s4674_s1 + $0x5a8] sm:$0xff]  }
  0x7d   :  { %3354 = vmatprep.subr.bf16.mxu0 %v3686_v29  ;;  %3375 = vmatpush3.bf16.msra.mxu1 %v3685_v28  ;;  %v3735_v28 = vld [vmem:[%s4674_s1 + $0x560] sm:$0xff]  }
  0x7e   :  { %3376 = vmatprep.subr.bf16.mxu1 %v3687_v30  ;;  %v3736_v29 = vld [vmem:[%s4674_s1 + $0x5e0] sm:$0xff]  }
  0x7f   :  { %v3737_v30 = vld [vmem:[%s4674_s1 + $0x520] sm:$0xff]  }
  0x80   :  { %3355 = vmatpush3.bf16.msra.mxu0 %v3688_v31  ;;  %v3738_v31 = vld [vmem:[%s4674_s1 + $0x5a0] sm:$0xff]  }
  0x81   :  { %3384 = vmatprep.subr.bf16.mxu0 %v3691_v34  ;;  %3377 = vmatpush3.bf16.msra.mxu1 %v3689_v32  ;;  %v3739_v32 = vld [vmem:[%s4674_s1 + $0x558] sm:$0xff]  }
  0x82   :  { %3406 = vmatprep.subr.bf16.mxu1 %v3692_v36  ;;  %v3741_v34 = vld [vmem:[%s4674_s1 + $0x518] sm:$0xff]  }
  0x83   :  { %2579 = vmatmul.mubr.bf16.vlgmr.msra.gmra.mxu0 %v621_v33  ;;  %v3740_v33 = vld [vmem:[%s4674_s1 + $0x5d8] sm:$0xff]  }
  0x84   :  { %3385 = vmatpush3.bf16.msra.mxu0 %v3693_v37  ;;  %2619 = vmatmul.mubr.bf16.vlgmr.msra.gmra.mxu1 %v637_v39  ;;  %v3742_v36 = vld [vmem:[%s4674_s1 + $0x598] sm:$0xff]   ;;  %v3743_v37 = vld [vmem:[%s4674_s1 + $0x550] sm:$0xff]  }
  0x85   :  { %3386 = vmatprep.subr.bf16.mxu0 %v3695_v40  ;;  %3407 = vmatpush3.bf16.msra.mxu1 %v3694_v38  ;;  %v3744_v38 = vld [vmem:[%s4674_s1 + $0x5d0] sm:$0xff]  }
  0x86   :  { %3408 = vmatprep.subr.bf16.mxu1 %v3696_v41  ;;  %2658 = vmatprep.mubr.bf16.mxu0 %v677_v13  ;;  %v3745_v39 = vld [vmem:[%s4674_s1 + $0x510] sm:$0xff]   ;;  %v3747_v41 = vld [vmem:[%s4674_s1 + $0x548] sm:$0xff]  }
  0x87   :  { %2698 = vmatprep.mubr.bf16.mxu1 %v687_v18  ;;  %v3746_v40 = vld [vmem:[%s4674_s1 + $0x590] sm:$0xff]   ;;  %v3782_v13 = vld [vmem:[%s4674_s1 + $0x608] sm:$0xff]   ;;  %v18_v18 = vld [vmem:[%s4675_s0 + $0x18] sm:$0xff] }
  0x88   :  { %3387 = vmatpush3.bf16.msra.mxu0 %v3697_v42  ;;  %v3748_v42 = vld [vmem:[%s4674_s1 + $0x5c8] sm:$0xff]  }
  0x89   :  { %3388 = vmatprep.subr.bf16.mxu0 %v3699_v44  ;;  %3409 = vmatpush3.bf16.msra.mxu1 %v3698_v43  ;;  %v3749_v43 = vld [vmem:[%s4674_s1 + $0x508] sm:$0xff]  }
  0x8a   :  { %3410 = vmatprep.subr.bf16.mxu1 %v3700_v45  ;;  %v3750_v44 = vld [vmem:[%s4674_s1 + $0x588] sm:$0xff]   ;;  %v3751_v45 = vld [vmem:[%s4674_s1 + $0x540] sm:$0xff]  }
  0x8c   :  { %3389 = vmatpush3.bf16.msra.mxu0 %v3701_v46  ;;  %v3752_v46 = vld [vmem:[%s4674_s1 + $0x5c0] sm:$0xff]  }
  0x8d   :  { %3390 = vmatprep.subr.bf16.mxu0 %v3703_v48  ;;  %3411 = vmatpush3.bf16.msra.mxu1 %v3702_v47  ;;  %v3753_v47 = vld [vmem:[%s4674_s1 + $0x500] sm:$0xff]  }
  0x8e   :  { %3412 = vmatprep.subr.bf16.mxu1 %v3704_v49  ;;  %v3754_v48 = vld [vmem:[%s4674_s1 + $0x580] sm:$0xff]   ;;  %v670_v49 = vrot.slane %v4364_v11, %v3932_v35  ;;  %v3780_v11 = vld [vmem:[%s4674_s1 + $0x648] sm:$0xff]  }
  0x90   :  { %3391 = vmatpush3.bf16.msra.mxu0 %v3705_v50  ;;  %v3756_v50 = vld [vmem:[%s4674_s1 + $0x678] sm:$0xff]  }
  0x91   :  { %3392 = vmatprep.subr.bf16.mxu0 %v3707_v52  ;;  %3413 = vmatpush3.bf16.msra.mxu1 %v3706_v51  ;;  %v3757_v51 = vld [vmem:[%s4674_s1 + $0x6f8] sm:$0xff]  }
  0x92   :  { %3414 = vmatprep.subr.bf16.mxu1 %v3708_v53  ;;  %v3758_v52 = vld [vmem:[%s4674_s1 + $0x638] sm:$0xff]  }
  0x93   :  { %v3759_v53 = vld [vmem:[%s4674_s1 + $0x6b8] sm:$0xff]  }
  0x94   :  { %3393 = vmatpush3.bf16.msra.mxu0 %v3709_v54  ;;  %v686_v54 = vcombine.high %v670_v49, %v670_v49 }
  0x95   :  { %3394 = vmatprep.subr.bf16.mxu0 %v3711_v56  ;;  %3415 = vmatpush3.bf16.msra.mxu1 %v3710_v55  ;;  %v3760_v55 = vld [vmem:[%s4674_s1 + $0x670] sm:$0xff]  }
  0x96   :  { %3416 = vmatprep.subr.bf16.mxu1 %v3712_v57  ;;  %v3761_v56 = vld [vmem:[%s4674_s1 + $0x6f0] sm:$0xff]  }
  0x97   :  { %v3762_v57 = vld [vmem:[%s4674_s1 + $0x630] sm:$0xff]  }
  0x98   :  { %3395 = vmatpush3.bf16.msra.mxu0 %v3713_v58  ;;  %v3763_v58 = vld [vmem:[%s4674_s1 + $0x6b0] sm:$0xff]  }
  0x99   :  { %3396 = vmatprep.subr.bf16.mxu0 %v3715_v60  ;;  %3417 = vmatpush3.bf16.msra.mxu1 %v3714_v59  ;;  %v3764_v59 = vld [vmem:[%s4674_s1 + $0x668] sm:$0xff]  }
  0x9a   :  { %3418 = vmatprep.subr.bf16.mxu1 %v3716_v61  ;;  %v3765_v60 = vld [vmem:[%s4674_s1 + $0x6e8] sm:$0xff]  }
  0x9b   :  { %v3766_v61 = vld [vmem:[%s4674_s1 + $0x628] sm:$0xff]  }
  0x9c   :  { %3397 = vmatpush3.bf16.msra.mxu0 %v3717_v62  ;;  %v3767_v62 = vld [vmem:[%s4674_s1 + $0x6a8] sm:$0xff]  }
  0x9d   :  { %3398 = vmatprep.subr.bf16.mxu0 %v3719_v0  ;;  %3419 = vmatpush3.bf16.msra.mxu1 %v3718_v63  ;;  %v3768_v63 = vld [vmem:[%s4674_s1 + $0x660] sm:$0xff]  }
  0x9e   :  { %3420 = vmatprep.subr.bf16.mxu1 %v3720_v1  ;;  %v3769_v0 = vld [vmem:[%s4674_s1 + $0x6e0] sm:$0xff]  }
  0x9f   :  { %v3770_v1 = vld [vmem:[%s4674_s1 + $0x620] sm:$0xff]  }
  0xa0   :  { %3399 = vmatpush3.bf16.msra.mxu0 %v3721_v2  ;;  %v3771_v2 = vld [vmem:[%s4674_s1 + $0x6a0] sm:$0xff]  }
  0xa1   :  { %3428 = vmatprep.subr.bf16.mxu0 %v3723_v7  ;;  %3421 = vmatpush3.bf16.msra.mxu1 %v3722_v4  ;;  %v3773_v4 = vld [vmem:[%s4674_s1 + $0x6d8] sm:$0xff]   ;;  %v3776_v7 = vld [vmem:[%s4674_s1 + $0x650] sm:$0xff]  }
  0xa2   :  { %3450 = vmatprep.subr.bf16.mxu1 %v3724_v10  ;;  %v3779_v10 = vld [vmem:[%s4674_s1 + $0x690] sm:$0xff]  }
  0xa3   :  { %2659 = vmatmul.mubr.bf16.vlgmr.msra.gmra.mxu0 %v663_v9  ;;  %v3778_v9 = vld [vmem:[%s4674_s1 + $0x610] sm:$0xff]  }
  0xa4   :  { %3429 = vmatpush3.bf16.msra.mxu0 %v3725_v12  ;;  %2699 = vmatmul.mubr.bf16.vlgmr.msra.gmra.mxu1 %v685_v16  ;;  %v3781_v12 = vld [vmem:[%s4674_s1 + $0x6c8] sm:$0xff]   ;;  %v3785_v16 = vld [vmem:[%s4674_s1 + $0x6c0] sm:$0xff]  }
  0xa5   :  { %3430 = vmatprep.subr.bf16.mxu0 %v3727_v17  ;;  %3451 = vmatpush3.bf16.msra.mxu1 %v3726_v14  ;;  %v3783_v14 = vld [vmem:[%s4674_s1 + $0x688] sm:$0xff]   ;;  %v3786_v17 = vld [vmem:[%s4674_s1 + $0x600] sm:$0xff]  }
  0xa6   :  { %2738 = vmatprep.mubr.bf16.mxu0 %v684_v20  ;;  %3452 = vmatprep.subr.bf16.mxu1 %v3728_v19  ;;  %v696_v19 = vrot.slane %v18_v18, %v3932_v35  ;;  %v3788_v20 = vld [vmem:[%s4674_s1 + $0x778] sm:$0xff]  }
  0xa7   :  { %2778 = vmatprep.mubr.bf16.mxu1 %v688_v23 }
  0xa8   :  { %3431 = vmatpush3.bf16.msra.mxu0 %v3729_v21  ;;  %v689_v21 = vcombine.high %v18_v18, %v18_v18  ;;  %v704_v23 = vcombine.high %v696_v19, %v696_v19 }
  0xa9   :  { %3432 = vmatprep.subr.bf16.mxu0 %v3731_v24  ;;  %3453 = vmatpush3.bf16.msra.mxu1 %v3730_v22  ;;  %v3787_v22 = vld [vmem:[%s4674_s1 + $0x680] sm:$0xff]   ;;  %v712_v24 = vrot.slane %v696_v19, %v3932_v35 }
  0xaa   :  { %3454 = vmatprep.subr.bf16.mxu1 %v3732_v25  ;;  %v3789_v25 = vld [vmem:[%s4674_s1 + $0x7f8] sm:$0xff]  }
  0xac   :  { %3433 = vmatpush3.bf16.msra.mxu0 %v3733_v26  ;;  %v4570_v26 = vrot.slane %v689_v21, %v3932_v35 }
  0xad   :  { %3434 = vmatprep.subr.bf16.mxu0 %v3735_v28  ;;  %3455 = vmatpush3.bf16.msra.mxu1 %v3734_v27  ;;  %v3790_v27 = vld [vmem:[%s4674_s1 + $0x738] sm:$0xff]   ;;  %v726_v28 = vrot.slane %v704_v23, %v3932_v35 }
  0xae   :  { %3456 = vmatprep.subr.bf16.mxu1 %v3736_v29  ;;  %v3791_v29 = vld [vmem:[%s4674_s1 + $0x7b8] sm:$0xff]  }
  0xb0   :  { %3435 = vmatpush3.bf16.msra.mxu0 %v3737_v30  ;;  %v705_v30 = vcombine.high %v4570_v26, %v4570_v26 }
  0xb1   :  { %3436 = vmatprep.subr.bf16.mxu0 %v3739_v32  ;;  %3457 = vmatpush3.bf16.msra.mxu1 %v3738_v31  ;;  %v734_v31 = vcombine.high %v712_v24, %v712_v24  ;;  %v3792_v32 = vld [vmem:[%s4674_s1 + $0x770] sm:$0xff]  }
  0xb2   :  { %3458 = vmatprep.subr.bf16.mxu1 %v3740_v33  ;;  %v736_v33 = vcombine.high %v726_v28, %v726_v28 }
  0xb4   :  { %3437 = vmatpush3.bf16.msra.mxu0 %v3741_v34 }
  0xb5   :  { %3438 = vmatprep.subr.bf16.mxu0 %v3743_v37  ;;  %3459 = vmatpush3.bf16.msra.mxu1 %v3742_v36  ;;  %v2951_v36 = vld [vmem:[%s4676_s2] ss:$0 sm:$0xff]  ;;  %v733_v37 = vrot.slane %v705_v30, %v3932_v35 }
  0xb6   :  { %3460 = vmatprep.subr.bf16.mxu1 %v3744_v38  ;;  %v3793_v38 = vld [vmem:[%s4674_s1 + $0x7f0] sm:$0xff]  }
  0xb8   :  { %3439 = vmatpush3.bf16.msra.mxu0 %v3745_v39 }
  0xb9   :  { %3440 = vmatprep.subr.bf16.mxu0 %v3747_v41  ;;  %3461 = vmatpush3.bf16.msra.mxu1 %v3746_v40  ;;  %v3794_v41 = vld [vmem:[%s4674_s1 + $0x730] sm:$0xff]  }
  0xba   :  { %3462 = vmatprep.subr.bf16.mxu1 %v3748_v42  ;;  %v737_v42 = vcombine.high %v733_v37, %v733_v37 }
  0xbc   :  { %3441 = vmatpush3.bf16.msra.mxu0 %v3749_v43 }
  0xbd   :  { %3442 = vmatprep.subr.bf16.mxu0 %v3751_v45  ;;  %3463 = vmatpush3.bf16.msra.mxu1 %v3750_v44  ;;  %v3796_v44 = vld [vmem:[%s4674_s1 + $0x768] sm:$0xff]  }
  0xbe   :  { %3464 = vmatprep.subr.bf16.mxu1 %v3752_v46 }
  0xc0   :  { %3443 = vmatpush3.bf16.msra.mxu0 %v3753_v47  ;;  %v3795_v47 = vld [vmem:[%s4674_s1 + $0x7b0] sm:$0xff]  }
  0xc1   :  { %3472 = vmatprep.subr.bf16.mxu0 %v3756_v50  ;;  %3465 = vmatpush3.bf16.msra.mxu1 %v3754_v48  ;;  %v3797_v50 = vld [vmem:[%s4674_s1 + $0x7e8] sm:$0xff]  }
  0xc2   :  { %3494 = vmatprep.subr.bf16.mxu1 %v3757_v51 }
  0xc3   :  { %2739 = vmatmul.mubr.bf16.vlgmr.msra.gmra.mxu0 %v670_v49 }
  0xc4   :  { %3473 = vmatpush3.bf16.msra.mxu0 %v3758_v52  ;;  %2779 = vmatmul.mubr.bf16.vlgmr.msra.gmra.mxu1 %v686_v54 }
  0xc5   :  { %3474 = vmatprep.subr.bf16.mxu0 %v3760_v55  ;;  %3495 = vmatpush3.bf16.msra.mxu1 %v3759_v53  ;;  %v3798_v53 = vld [vmem:[%s4674_s1 + $0x728] sm:$0xff]   ;;  %v3800_v55 = vld [vmem:[%s4674_s1 + $0x760] sm:$0xff]  }
  0xc6   :  { %3496 = vmatprep.subr.bf16.mxu1 %v3761_v56  ;;  %2818 = vmatprep.mubr.bf16.mxu0 %v726_v28 }
  0xc7   :  { %2858 = vmatprep.mubr.bf16.mxu1 %v736_v33 }
  0xc8   :  { %3475 = vmatpush3.bf16.msra.mxu0 %v3762_v57  ;;  %v3799_v57 = vld [vmem:[%s4674_s1 + $0x7a8] sm:$0xff]  }
  0xc9   :  { %3476 = vmatprep.subr.bf16.mxu0 %v3764_v59  ;;  %3497 = vmatpush3.bf16.msra.mxu1 %v3763_v58  ;;  %v3801_v58 = vld [vmem:[%s4674_s1 + $0x7e0] sm:$0xff]  }
  0xca   :  { %3498 = vmatprep.subr.bf16.mxu1 %v3765_v60  ;;  %v3802_v59 = vld [vmem:[%s4674_s1 + $0x720] sm:$0xff]   ;;  %v3804_v60 = vld [vmem:[%s4674_s1 + $0x758] sm:$0xff]  }
  0xcc   :  { %3477 = vmatpush3.bf16.msra.mxu0 %v3766_v61  ;;  %v3803_v61 = vld [vmem:[%s4674_s1 + $0x7a0] sm:$0xff]  }
  0xcd   :  { %3478 = vmatprep.subr.bf16.mxu0 %v3768_v63  ;;  %3499 = vmatpush3.bf16.msra.mxu1 %v3767_v62  ;;  %v3805_v62 = vld [vmem:[%s4674_s1 + $0x7d8] sm:$0xff]  }
  0xce   :  { %3500 = vmatprep.subr.bf16.mxu1 %v3769_v0  ;;  %v3806_v63 = vld [vmem:[%s4674_s1 + $0x718] sm:$0xff]   ;;  %v3808_v0 = vld [vmem:[%s4674_s1 + $0x750] sm:$0xff]  }
  0xd0   :  { %3479 = vmatpush3.bf16.msra.mxu0 %v3770_v1  ;;  %v3807_v1 = vld [vmem:[%s4674_s1 + $0x798] sm:$0xff]  }
  0xd1   :  { %3480 = vmatprep.subr.bf16.mxu0 %v3772_v3  ;;  %3501 = vmatpush3.bf16.msra.mxu1 %v3771_v2  ;;  %v3809_v2 = vld [vmem:[%s4674_s1 + $0x7d0] sm:$0xff]  }
  0xd2   :  { %3502 = vmatprep.subr.bf16.mxu1 %v3773_v4  ;;  %v3810_v3 = vld [vmem:[%s4674_s1 + $0x710] sm:$0xff]   ;;  %v3812_v4 = vld [vmem:[%s4674_s1 + $0x748] sm:$0xff]  }
  0xd4   :  { %3481 = vmatpush3.bf16.msra.mxu0 %v3774_v5  ;;  %v3811_v5 = vld [vmem:[%s4674_s1 + $0x790] sm:$0xff]  }
  0xd5   :  { %3482 = vmatprep.subr.bf16.mxu0 %v3776_v7  ;;  %3503 = vmatpush3.bf16.msra.mxu1 %v3775_v6  ;;  %v3813_v6 = vld [vmem:[%s4674_s1 + $0x7c8] sm:$0xff]  }
  0xd6   :  { %3504 = vmatprep.subr.bf16.mxu1 %v3777_v8  ;;  %v3814_v7 = vld [vmem:[%s4674_s1 + $0x708] sm:$0xff]   ;;  %v3816_v8 = vld [vmem:[%s4674_s1 + $0x740] sm:$0xff]  }
  0xd8   :  { %3483 = vmatpush3.bf16.msra.mxu0 %v3778_v9  ;;  %v3815_v9 = vld [vmem:[%s4674_s1 + $0x788] sm:$0xff]  }
  0xd9   :  { %3484 = vmatprep.subr.bf16.mxu0 %v3780_v11  ;;  %3505 = vmatpush3.bf16.msra.mxu1 %v3779_v10  ;;  %v3817_v10 = vld [vmem:[%s4674_s1 + $0x7c0] sm:$0xff]  }
  0xda   :  { %3506 = vmatprep.subr.bf16.mxu1 %v3781_v12  ;;  %v3818_v11 = vld [vmem:[%s4674_s1 + $0x700] sm:$0xff]   ;;  %v719_v12 = vrot.slane %v4570_v26, %v3932_v35 }
  0xdc   :  { %3485 = vmatpush3.bf16.msra.mxu0 %v3782_v13  ;;  %v3819_v13 = vld [vmem:[%s4674_s1 + $0x780] sm:$0xff]  }
  0xdd   :  { %3486 = vmatprep.subr.bf16.mxu0 %v3784_v15  ;;  %3507 = vmatpush3.bf16.msra.mxu1 %v3783_v14  ;;  %v735_v14 = vcombine.high %v719_v12, %v719_v12 }
  0xde   :  { %3508 = vmatprep.subr.bf16.mxu1 %v3785_v16 }
  0xe0   :  { %3487 = vmatpush3.bf16.msra.mxu0 %v3786_v17 }
  0xe1   :  { %3516 = vmatprep.subr.bf16.mxu0 %v3788_v20  ;;  %3509 = vmatpush3.bf16.msra.mxu1 %v3787_v22 }
  0xe2   :  { %3538 = vmatprep.subr.bf16.mxu1 %v3789_v25 }
  0xe3   :  { %v3224_v34 = vpop.f32.mrf.mxu0  ;;  %2819 = vmatmul.mubr.bf16.vlgmr.msra.gmra.mxu0 %v712_v24 }
  0xe4   :  { %v3246_v39 = vpop.f32.mrf.mxu1  ;;  %3517 = vmatpush3.bf16.msra.mxu0 %v3790_v27  ;;  %2859 = vmatmul.mubr.bf16.vlgmr.msra.gmra.mxu1 %v734_v31 }
  0xe5   :  { %v3225_v40 = vpop.f32.mrf.mxu0  ;;  %3518 = vmatprep.subr.bf16.mxu0 %v3792_v32  ;;  %3539 = vmatpush3.bf16.msra.mxu1 %v3791_v29 }
  0xe6   :  { %v3226_v43 = vadd.f32 %v3225_v40, %v3224_v34  ;;  %v3247_v45 = vpop.f32.mrf.mxu1  ;;  %2898 = vmatprep.mubr.bf16.mxu0 %v733_v37  ;;  %3540 = vmatprep.subr.bf16.mxu1 %v3793_v38 }
  0xe7   :  { %v3227_v46 = vpop.f32.mrf.mxu0  ;;  %v3248_v49 = vadd.f32 %v3247_v45, %v3246_v39  ;;  %2938 = vmatprep.mubr.bf16.mxu1 %v737_v42 }
  0xe8   :  { %v2341_v48 = vadd.f32 %v3226_v43, %v2951_v36  ;;  %v3249_v51 = vpop.f32.mrf.mxu1  ;;  %3519 = vmatpush3.bf16.msra.mxu0 %v3794_v41 }
  0xe9   :  { %v3228_v52 = vpop.f32.mrf.mxu0  ;;  %3520 = vmatprep.subr.bf16.mxu0 %v3796_v44  ;;  %3541 = vmatpush3.bf16.msra.mxu1 %v3795_v47 }
  0xea   :  { %v2381_v54 = vadd.f32 %v3248_v49, %v2341_v48  ;;  %v3250_v56 = vpop.f32.mrf.mxu1  ;;  %3542 = vmatprep.subr.bf16.mxu1 %v3797_v50 }
  0xec   :  { %3521 = vmatpush3.bf16.msra.mxu0 %v3798_v53 }
  0xed   :  { %3522 = vmatprep.subr.bf16.mxu0 %v3800_v55  ;;  %3543 = vmatpush3.bf16.msra.mxu1 %v3799_v57 }
  0xee   :  { %3544 = vmatprep.subr.bf16.mxu1 %v3801_v58 }
  0xf0   :  { %3523 = vmatpush3.bf16.msra.mxu0 %v3802_v59 }
  0xf1   :  { %3524 = vmatprep.subr.bf16.mxu0 %v3804_v60  ;;  %3545 = vmatpush3.bf16.msra.mxu1 %v3803_v61 }
  0xf2   :  { %3546 = vmatprep.subr.bf16.mxu1 %v3805_v62 }
  0xf4   :  { %3525 = vmatpush3.bf16.msra.mxu0 %v3806_v63 }
  0xf5   :  { %3526 = vmatprep.subr.bf16.mxu0 %v3808_v0  ;;  %3547 = vmatpush3.bf16.msra.mxu1 %v3807_v1 }
  0xf6   :  { %3548 = vmatprep.subr.bf16.mxu1 %v3809_v2 }
  0xf8   :  { %3527 = vmatpush3.bf16.msra.mxu0 %v3810_v3 }
  0xf9   :  { %3528 = vmatprep.subr.bf16.mxu0 %v3812_v4  ;;  %3549 = vmatpush3.bf16.msra.mxu1 %v3811_v5 }
  0xfa   :  { %3550 = vmatprep.subr.bf16.mxu1 %v3813_v6 }
  0xfc   :  { %3529 = vmatpush3.bf16.msra.mxu0 %v3814_v7 }
  0xfd   :  { %3530 = vmatprep.subr.bf16.mxu0 %v3816_v8  ;;  %3551 = vmatpush3.bf16.msra.mxu1 %v3815_v9 }
  0xfe   :  { %3552 = vmatprep.subr.bf16.mxu1 %v3817_v10 }
 0x100   :  { %3531 = vmatpush3.bf16.msra.mxu0 %v3818_v11 }
 0x101   :  { %3553 = vmatpush3.bf16.msra.mxu1 %v3819_v13 }
 0x103   :  { %v3268_v15 = vpop.f32.mrf.mxu0  ;;  %2899 = vmatmul.mubr.bf16.vlgmr.msra.gmra.mxu0 %v719_v12 }
 0x104   :  { %v3290_v16 = vpop.f32.mrf.mxu1  ;;  %2939 = vmatmul.mubr.bf16.vlgmr.msra.gmra.mxu1 %v735_v14 }
 0x105   :  { %v3269_v17 = vpop.f32.mrf.mxu0 }
 0x106   :  { %v3270_v18 = vadd.f32 %v3269_v17, %v3268_v15  ;;  %v3291_v19 = vpop.f32.mrf.mxu1 }
 0x107   :  { %v3271_v20 = vpop.f32.mrf.mxu0  ;;  %v3292_v22 = vadd.f32 %v3291_v19, %v3290_v16 }
 0x108   :  { %v2421_v21 = vadd.f32 %v3270_v18, %v2381_v54  ;;  %v3293_v35 = vpop.f32.mrf.mxu1 }
 0x109   :  { %v3272_v23 = vpop.f32.mrf.mxu0 }
 0x10a   :  { %v2461_v24 = vadd.f32 %v3292_v22, %v2421_v21  ;;  %v3294_v25 = vpop.f32.mrf.mxu1 }
 0x123   :  { %v3312_v26 = vpop.f32.mrf.mxu0 }
 0x124   :  { %v3334_v27 = vpop.f32.mrf.mxu1 }
 0x125   :  { %v3313_v28 = vpop.f32.mrf.mxu0 }
 0x126   :  { %v3314_v29 = vadd.f32 %v3313_v28, %v3312_v26  ;;  %v3335_v30 = vpop.f32.mrf.mxu1 }
 0x127   :  { %v3315_v31 = vpop.f32.mrf.mxu0  ;;  %v3336_v33 = vadd.f32 %v3335_v30, %v3334_v27 }
 0x128   :  { %v2501_v32 = vadd.f32 %v3314_v29, %v2461_v24  ;;  %v3337_v34 = vpop.f32.mrf.mxu1 }
 0x129   :  { %v3316_v36 = vpop.f32.mrf.mxu0 }
 0x12a   :  { %v2541_v37 = vadd.f32 %v3336_v33, %v2501_v32  ;;  %v3338_v38 = vpop.f32.mrf.mxu1 }
 0x143   :  { %v3356_v39 = vpop.f32.mrf.mxu0 }
 0x144   :  { %v3378_v40 = vpop.f32.mrf.mxu1 }
 0x145   :  { %v3357_v41 = vpop.f32.mrf.mxu0 }
 0x146   :  { %v3358_v42 = vadd.f32 %v3357_v41, %v3356_v39  ;;  %v3379_v43 = vpop.f32.mrf.mxu1 }
 0x147   :  { %v3359_v44 = vpop.f32.mrf.mxu0  ;;  %v3380_v46 = vadd.f32 %v3379_v43, %v3378_v40 }
 0x148   :  { %v2581_v45 = vadd.f32 %v3358_v42, %v2541_v37  ;;  %v3381_v47 = vpop.f32.mrf.mxu1 }
 0x149   :  { %v3360_v48 = vpop.f32.mrf.mxu0 }
 0x14a   :  { %v2621_v49 = vadd.f32 %v3380_v46, %v2581_v45  ;;  %v3382_v50 = vpop.f32.mrf.mxu1 }
 0x163   :  { %v3400_v51 = vpop.f32.mrf.mxu0 }
 0x164   :  { %v3422_v52 = vpop.f32.mrf.mxu1 }
 0x165   :  { %v3401_v53 = vpop.f32.mrf.mxu0 }
 0x166   :  { %v3402_v54 = vadd.f32 %v3401_v53, %v3400_v51  ;;  %v3423_v55 = vpop.f32.mrf.mxu1 }
 0x167   :  { %v3403_v56 = vpop.f32.mrf.mxu0  ;;  %v3424_v58 = vadd.f32 %v3423_v55, %v3422_v52 }
 0x168   :  { %v2661_v57 = vadd.f32 %v3402_v54, %v2621_v49  ;;  %v3425_v59 = vpop.f32.mrf.mxu1 }
 0x169   :  { %v3404_v60 = vpop.f32.mrf.mxu0 }
 0x16a   :  { %v2701_v61 = vadd.f32 %v3424_v58, %v2661_v57  ;;  %v3426_v62 = vpop.f32.mrf.mxu1 }
 0x183   :  { %v3444_v63 = vpop.f32.mrf.mxu0 }
 0x184   :  { %v3466_v0 = vpop.f32.mrf.mxu1 }
 0x185   :  { %v3445_v1 = vpop.f32.mrf.mxu0 }
 0x186   :  { %v3467_v2 = vpop.f32.mrf.mxu1  ;;  %v3446_v15 = vadd.f32 %v3445_v1, %v3444_v63 }
 0x187   :  { %v3447_v3 = vpop.f32.mrf.mxu0  ;;  %v3468_v17 = vadd.f32 %v3467_v2, %v3466_v0 }
 0x188   :  { %v3469_v4 = vpop.f32.mrf.mxu1  ;;  %v2741_v16 = vadd.f32 %v3446_v15, %v2701_v61 }
 0x189   :  { %v3448_v5 = vpop.f32.mrf.mxu0 }
 0x18a   :  { %v3470_v6 = vpop.f32.mrf.mxu1  ;;  %v2781_v19 = vadd.f32 %v3468_v17, %v2741_v16 }
 0x1a3   :  { %v3488_v7 = vpop.f32.mrf.mxu0 }
 0x1a4   :  { %v3510_v8 = vpop.f32.mrf.mxu1 }
 0x1a5   :  { %v3489_v9 = vpop.f32.mrf.mxu0 }
 0x1a6   :  { %v3511_v10 = vpop.f32.mrf.mxu1  ;;  %v3490_v18 = vadd.f32 %v3489_v9, %v3488_v7 }
 0x1a7   :  { %v3491_v11 = vpop.f32.mrf.mxu0  ;;  %v3512_v21 = vadd.f32 %v3511_v10, %v3510_v8 }
 0x1a8   :  { %v3513_v12 = vpop.f32.mrf.mxu1  ;;  %v2821_v20 = vadd.f32 %v3490_v18, %v2781_v19 }
 0x1a9   :  { %v3492_v13 = vpop.f32.mrf.mxu0 }
 0x1aa   :  { %v3514_v14 = vpop.f32.mrf.mxu1  ;;  %v2861_v24 = vadd.f32 %v3512_v21, %v2821_v20 }
 0x1c3   :  { %v3532_v22 = vpop.f32.mrf.mxu0 }
 0x1c4   :  { %v3554_v35 = vpop.f32.mrf.mxu1 }
 0x1c5   :  { %v3533_v23 = vpop.f32.mrf.mxu0 }
 0x1c6   :  { %v3534_v25 = vadd.f32 %v3533_v23, %v3532_v22  ;;  %v3555_v26 = vpop.f32.mrf.mxu1 }
 0x1c7   :  { %v3535_v27 = vpop.f32.mrf.mxu0  ;;  %v3556_v29 = vadd.f32 %v3555_v26, %v3554_v35 }
 0x1c8   :  { %v2901_v28 = vadd.f32 %v3534_v25, %v2861_v24  ;;  %v3557_v30 = vpop.f32.mrf.mxu1 }
 0x1c9   :  { %v3536_v31 = vpop.f32.mrf.mxu0 }
 0x1ca   :  { %v2941_v32 = vadd.f32 %v3556_v29, %v2901_v28  ;;  %v3558_v33 = vpop.f32.mrf.mxu1 }
 0x1cc   :  { %2946 = vst [vmem:[%s4677_s3] sm:$0x3] %v2941_v32 }

</bundles_post_ra>
